<compile_context>
chip_gen: v5e
topology: v5e:2x2
jax: 0.10.0
libtpu: 0.0.40
codegen_flags: <defaults>
</compile_context>

<pallas_src>
import jax
import jax.numpy as jnp
from jax import lax
from jax.experimental import pallas as pl
from jax.experimental.pallas import tpu as pltpu

POOL_KS = (5, 9, 13)   # kernel implements the SPP default; SPPF chaining relies on it.


def _round_up(v, m):
    return (v + m - 1) // m * m


def _vmem_capacity_bytes():
    try:
        return int(pltpu.get_tpu_info().vmem_capacity_bytes)
    except Exception:
        return 128 * 2 ** 20   # v5e / v6e default; v7x reports 64 MiB when queryable.


def _silu(x, approx):
    # sigmoid = 1 / (1 + exp(-x)); exp goes to the EUP, reciprocal too in fast mode.
    t = 1.0 + jnp.exp(-x)
    inv = pl.reciprocal(t, approx=True) if approx else 1.0 / t
    return x * inv


def _pool5_valid(p):
    """'Valid' 5x5 sliding max over the first two dims of [h, w, c].

    out[i, j] = max(p[i:i+5, j:j+5]); output shape [h-4, w-4, c].
    """
    h, w, _ = p.shape
    a = p[0:h - 4]
    for d in range(1, 5):
        a = jnp.maximum(a, p[d:d + h - 4])
    b = a[:, 0:w - 4]
    for d in range(1, 5):
        b = jnp.maximum(b, a[:, d:d + w - 4])
    return b


def _vmem_estimate(tile_h, nb, W, C1p, Cmp, C2p, mm_bytes, pool_bytes):
    """Per-grid-step VMEM working set (bytes), per actual buffers."""
    halo_rows = 8 if nb > 1 else tile_h
    Hp = tile_h + 12
    Wp = _round_up(W + 14, 8)
    est = 2 * tile_h * W * C1p * mm_bytes                       # x centre block (double buffered)
    if nb > 1:
        est += 2 * 2 * halo_rows * W * C1p * mm_bytes           # prev/next halo blocks
    est += 2 * tile_h * W * C2p * 4                             # f32 output block (double buffered)
    est += 2 * ((C1p * Cmp + 4 * Cmp * C2p) * mm_bytes + (Cmp + C2p) * 4)   # weights/biases
    est += Hp * Wp * Cmp * pool_bytes                           # pooling scratch
    est += 3 * Hp * Wp * Cmp * pool_bytes                       # p1/p2/p3 + per-level temporaries
    est += 4 * tile_h * W * Cmp * pool_bytes                    # sliced pools feeding cv2
    est += tile_h * W * (Cmp + C2p) * 4                         # cv1 pre-SiLU f32 + cv2 accumulator
    return est


def spp_pallas_nhwc(x_nhwc, w1, b1, w2, b2, *, tile_h=None,
                    mm_dtype=jnp.bfloat16, approx_silu=True):
    """SPP forward on an NHWC activation; returns NHWC [N, H, W, C2] float32.

    x_nhwc : [N, H, W, C1] float32
    w1     : [C1, Cm]      cv1 1x1 conv (BN folded)
    b1     : [1, Cm] or [Cm]
    w2     : [4*Cm, C2]    cv2 1x1 conv (rows ordered [identity, pool5, pool9, pool13])
    b2     : [1, C2] or [C2]

    mm_dtype=bfloat16 (default) keeps f32 accumulation but rounds matmul operands and the
    pooling scratch to bf16 — fine for inference, ~0.25 abs error at O(1) activations.
    """
    N, H, W, C1 = x_nhwc.shape
    Cm = w1.shape[1]
    C2 = w2.shape[1]
    assert w1.shape[0] == C1 and w2.shape[0] == 4 * Cm

    f32 = jnp.float32
    mm_bytes = jnp.dtype(mm_dtype).itemsize
    pool_dtype = mm_dtype                    # pool chain runs in the matmul operand dtype
    pool_bytes = jnp.dtype(pool_dtype).itemsize

    # ---- pad channel dims to lane-dense multiples of 128 ---------------------
    C1p = _round_up(C1, 128)
    Cmp = _round_up(Cm, 128)
    C2p = _round_up(C2, 128)

    vmem_budget = int(0.72 * _vmem_capacity_bytes())

    # ---- choose H tiling: largest tile whose working set fits the budget -----
    if tile_h is None:
        tile_h = H
        if H % 8 == 0:
            for cand in (128, 64, 32, 16, 8):
                if cand <= H and H % cand == 0:
                    nb_c = H // cand
                    est_c = _vmem_estimate(cand, nb_c, W, C1p, Cmp, C2p, mm_bytes, pool_bytes)
                    if int(1.5 * est_c) <= vmem_budget:
                        tile_h = cand
                        break
    assert H % tile_h == 0, "tile_h must divide H"
    nb = H // tile_h
    if nb > 1:
        assert tile_h % 8 == 0 and tile_h >= 8, "tiled path needs tile_h % 8 == 0"
    halo_rows = 8 if nb > 1 else tile_h     # neighbour block height feeding the 6-row halo
    n_hblk = H // halo_rows
    r = tile_h // halo_rows

    x_in = x_nhwc
    if C1p != C1:
        x_in = jnp.pad(x_in, ((0, 0), (0, 0), (0, 0), (0, C1p - C1)))
    x_in = x_in.astype(mm_dtype)

    w1p = jnp.zeros((C1p, Cmp), f32).at[:C1, :Cm].set(w1).astype(mm_dtype)
    b1p = jnp.zeros((1, Cmp), f32).at[0, :Cm].set(jnp.reshape(b1, (-1,)))
    w2b = jnp.zeros((4, Cmp, C2p), f32)
    for i in range(4):
        w2b = w2b.at[i, :Cm, :C2].set(w2[i * Cm:(i + 1) * Cm, :])
    w2b = w2b.astype(mm_dtype)
    b2p = jnp.zeros((1, C2p), f32).at[0, :C2].set(jnp.reshape(b2, (-1,)))

    # Pooling scratch: 6 halo rows top/bottom, 8 (sublane-aligned) cols left and >=6
    # -inf cols right.
    Wp = _round_up(W + 14, 8)
    Hp = tile_h + 12
    Wr = Wp - (8 + W)          # right -inf border width
    assert Wr >= 6

    # ---- kernel ---------------------------------------------------------------
    def kernel(*args):
        if nb > 1:
            (xc_ref, xprev_ref, xnext_ref,
             w1_ref, b1_ref, w2_ref, b2_ref, o_ref, pad_ref) = args
        else:
            xc_ref, w1_ref, b1_ref, w2_ref, b2_ref, o_ref, pad_ref = args
            xprev_ref = xnext_ref = None

        h = pl.program_id(1)
        w1v = w1_ref[...]
        b1v = b1_ref[...]
        neg_inf = -jnp.inf

        def cv1(xt):                              # [rows, W, C1p] -> [rows, W, Cmp]
            rows = xt.shape[0]
            z = jnp.dot(xt.reshape(rows * W, C1p), w1v,
                        preferred_element_type=jnp.float32)
            return _silu(z + b1v, approx_silu).reshape(rows, W, Cmp).astype(pool_dtype)

        # Only the border bands of the pooling scratch need -inf; the interior is fully
        # overwritten every step (no full-scratch dead store, and the band writes are
        # per-step, so a per-core scratch under core sharding stays correct).
        pad_ref[:, 0:8, :] = jnp.full((Hp, 8, Cmp), neg_inf, pool_dtype)
        pad_ref[:, 8 + W:Wp, :] = jnp.full((Hp, Wr, Cmp), neg_inf, pool_dtype)

        y_c = cv1(xc_ref[0])                      # [tile_h, W, Cmp]
        pad_ref[6:6 + tile_h, 8:8 + W, :] = y_c

        if nb > 1:
            @pl.when(h == 0)
            def _():
                pad_ref[0:6, 8:8 + W, :] = jnp.full((6, W, Cmp), neg_inf, pool_dtype)

            @pl.when(h > 0)
            def _():
                # Only the 6 rows actually needed from the previous 8-row block.
                pad_ref[0:6, 8:8 + W, :] = cv1(xprev_ref[0, halo_rows - 6:halo_rows])

            @pl.when(h == nb - 1)
            def _():
                pad_ref[6 + tile_h:Hp, 8:8 + W, :] = jnp.full((6, W, Cmp), neg_inf, pool_dtype)

            @pl.when(h < nb - 1)
            def _():
                pad_ref[6 + tile_h:Hp, 8:8 + W, :] = cv1(xnext_ref[0, 0:6])
        else:
            pad_ref[0:6, 8:8 + W, :] = jnp.full((6, W, Cmp), neg_inf, pool_dtype)
            pad_ref[6 + tile_h:Hp, 8:8 + W, :] = jnp.full((6, W, Cmp), neg_inf, pool_dtype)

        p0 = pad_ref[...]
        # SPPF chaining: pool9 = pool5∘pool5, pool13 = pool5∘pool5∘pool5.
        p1 = _pool5_valid(p0)                     # [tile_h+8,  Wp-4,  Cmp]
        p2 = _pool5_valid(p1)                     # [tile_h+4,  Wp-8,  Cmp]
        p3 = _pool5_valid(p2)                     # [tile_h,    Wp-12, Cmp]

        pool5 = p1[4:4 + tile_h, 6:6 + W]
        pool9 = p2[2:2 + tile_h, 4:4 + W]
        pool13 = p3[0:tile_h, 2:2 + W]

        def flat(t):                              # already in mm_dtype (== pool_dtype)
            return t.reshape(tile_h * W, Cmp)

        # cv2 as four accumulated [tile_h*W, Cmp] @ [Cmp, C2p] matmuls (no concat).
        acc = jnp.dot(flat(y_c), w2_ref[0], preferred_element_type=jnp.float32)
        acc += jnp.dot(flat(pool5), w2_ref[1], preferred_element_type=jnp.float32)
        acc += jnp.dot(flat(pool9), w2_ref[2], preferred_element_type=jnp.float32)
        acc += jnp.dot(flat(pool13), w2_ref[3], preferred_element_type=jnp.float32)

        out = _silu(acc + b2_ref[...], approx_silu)
        o_ref[0] = out.reshape(tile_h, W, C2p).astype(o_ref.dtype)

    # ---- specs ----------------------------------------------------------------
    center_map = lambda n, hh: (n, hh, 0, 0)
    # prev/next clamp at image edges; the clamped fetch is discarded under pl.when,
    # so it is only a small wasted DMA, never a correctness issue — do not "fix" it.
    prev_map = lambda n, hh: (n, jnp.maximum(hh * r - 1, 0), 0, 0)
    next_map = lambda n, hh: (n, jnp.minimum((hh + 1) * r, n_hblk - 1), 0, 0)
    const2 = lambda n, hh: (0, 0)
    const3 = lambda n, hh: (0, 0, 0)

    x_specs = [pl.BlockSpec((1, tile_h, W, C1p), center_map)]
    x_args = [x_in]
    if nb > 1:
        x_specs += [pl.BlockSpec((1, halo_rows, W, C1p), prev_map),
                    pl.BlockSpec((1, halo_rows, W, C1p), next_map)]
        x_args += [x_in, x_in]

    # TODO(synk): the four weight/bias inputs are grid-constant; pipeline_mode=pl.Buffered(1)
    # would halve their VMEM footprint (matters on v7x) — left off pending validation.
    in_specs = x_specs + [
        pl.BlockSpec((C1p, Cmp), const2),
        pl.BlockSpec((1, Cmp), const2),
        pl.BlockSpec((4, Cmp, C2p), const3),
        pl.BlockSpec((1, C2p), const2),
    ]

    est = _vmem_estimate(tile_h, nb, W, C1p, Cmp, C2p, mm_bytes, pool_bytes)
    vmem_limit = int(min(vmem_budget, max(32 * 2 ** 20, int(1.5 * est))))

    out_nhwc = pl.pallas_call(
        kernel,
        out_shape=jax.ShapeDtypeStruct((N, H, W, C2p), jnp.float32),
        grid_spec=pltpu.PrefetchScalarGridSpec(
            num_scalar_prefetch=0,
            grid=(N, nb),
            in_specs=in_specs,
            out_specs=pl.BlockSpec((1, tile_h, W, C2p), center_map),
            scratch_shapes=[pltpu.VMEM((Hp, Wp, Cmp), pool_dtype)],
        ),
        # TODO(synk): on v7x use CORE_PARALLEL on the batch axis (2 TCs/chip); plain
        # "parallel" is kept here since it is safe on every generation.
        compiler_params=pltpu.CompilerParams(
            dimension_semantics=("parallel", "parallel"),
            vmem_limit_bytes=vmem_limit),
    )(*x_args, w1p, b1p, w2b, b2p)

    return out_nhwc[..., :C2]


def spp_pallas(x_nchw, w1, b1, w2, b2, **kwargs):
    """NCHW wrapper matching the PyTorch module's convention."""
    # TODO(synk): in a full model keep activations NHWC end-to-end and fold the :C2 unpad
    # into the consumer; these boundary transposes are extra HBM round trips the kernel avoids.
    x_nhwc = jnp.transpose(x_nchw, (0, 2, 3, 1))
    out_nhwc = spp_pallas_nhwc(x_nhwc, w1, b1, w2, b2, **kwargs)
    return jnp.transpose(out_nhwc, (0, 3, 1, 2))


def spp_reference(x_nchw, w1, b1, w2, b2):
    """Pure-JAX reference (mirrors the PyTorch forward); HIGHEST-precision matmuls."""
    x = jnp.transpose(x_nchw, (0, 2, 3, 1))
    y = jax.nn.silu(jnp.einsum("nhwc,cd->nhwd", x, w1,
                               precision=lax.Precision.HIGHEST) + jnp.reshape(b1, (-1,)))
    pools = [y]
    for k in POOL_KS:
        p = lax.reduce_window(
            y, -jnp.inf, lax.max,
            window_dimensions=(1, k, k, 1),
            window_strides=(1, 1, 1, 1),
            padding=[(0, 0), (k // 2, k // 2), (k // 2, k // 2), (0, 0)])
        pools.append(p)
    cat = jnp.concatenate(pools, axis=-1)
    out = jax.nn.silu(jnp.einsum("nhwc,cd->nhwd", cat, w2,
                                 precision=lax.Precision.HIGHEST) + jnp.reshape(b2, (-1,)))
    return jnp.transpose(out, (0, 3, 1, 2))


if __name__ == "__main__":
    # Small shapes consistent with SPP(c1=4, c2=8, k=(5, 9, 13)).
    N, C1, H, W = 2, 4, 16, 16
    C2 = 8
    Cm = C1 // 2                       # c_ = c1 // 2
    Ccat = Cm * (len(POOL_KS) + 1)     # c_ * (len(k) + 1)

    key = jax.random.PRNGKey(0)
    kx, k1, kb1, k2, kb2 = jax.random.split(key, 5)

    x = jax.random.normal(kx, (N, C1, H, W), dtype=jnp.float32)
    # Deterministic synthetic params: conv weights with BN already folded in.
    w1 = jax.random.normal(k1, (C1, Cm), dtype=jnp.float32) * 0.5
    b1 = jax.random.normal(kb1, (1, Cm), dtype=jnp.float32) * 0.1
    w2 = jax.random.normal(k2, (Ccat, C2), dtype=jnp.float32) * 0.5
    b2 = jax.random.normal(kb2, (1, C2), dtype=jnp.float32) * 0.1

    ref = jax.block_until_ready(spp_reference(x, w1, b1, w2, b2))

    # f32-operand path, H tiled into 2 row blocks (exercises the halo/-inf-band logic).
    # Tolerance covers MXU default-precision (bf16-pass) f32 matmuls; structural bugs
    # (halo / pooling indexing) would produce O(1) errors.
    out_f32 = jax.block_until_ready(
        spp_pallas(x, w1, b1, w2, b2, tile_h=8,
                   mm_dtype=jnp.float32, approx_silu=False))
    assert out_f32.shape == (N, C2, H, W)
    err = float(jnp.max(jnp.abs(out_f32 - ref)))
    assert err < 5e-2, err

    # f32-operand path, single H block (untiled fallback, auto tile pick).
    out_single = jax.block_until_ready(
        spp_pallas(x, w1, b1, w2, b2, mm_dtype=jnp.float32, approx_silu=False))
    err = float(jnp.max(jnp.abs(out_single - ref)))
    assert err < 5e-2, err

    # Default fast path: bf16 MXU operands + bf16 pooling scratch (f32 accumulation)
    # and approx SiLU reciprocal; loose tolerance reflects bf16 operand rounding.
    out_fast = jax.block_until_ready(spp_pallas(x, w1, b1, w2, b2, tile_h=8))
    err = float(jnp.max(jnp.abs(out_fast - ref)))
    assert err < 0.25, err

    print("KERNEL_OK")
</pallas_src>

<mosaic_0001>
module attributes {stable_mosaic.version = 11 : i64} {
  func.func @kernel(%arg0: i32, %arg1: i32, %arg2: memref<1x8x16x128xf32, #tpu.memory_space<vmem>>, %arg3: memref<1x8x16x128xf32, #tpu.memory_space<vmem>>, %arg4: memref<1x8x16x128xf32, #tpu.memory_space<vmem>>, %arg5: memref<128x128xf32, #tpu.memory_space<vmem>>, %arg6: memref<1x128xf32, #tpu.memory_space<vmem>>, %arg7: memref<4x128x128xf32, #tpu.memory_space<vmem>>, %arg8: memref<1x128xf32, #tpu.memory_space<vmem>>, %arg9: memref<1x8x16x128xf32, #tpu.memory_space<vmem>>, %arg10: memref<20x32x128xf32, #tpu.memory_space<vmem>>) attributes {dimension_semantics = [#tpu.dimension_semantics<parallel>, #tpu.dimension_semantics<parallel>], iteration_bounds = array<i64: 2, 2>, scalar_prefetch = 0 : i64, scratch_operands = 1 : i64, tpu.core_type = #tpu.core_type<tc>, window_params = [{transform_indices = @transform_0, window_bounds = array<i64: 1, 8, 16, 128>}, {transform_indices = @transform_1, window_bounds = array<i64: 1, 8, 16, 128>}, {transform_indices = @transform_2, window_bounds = array<i64: 1, 8, 16, 128>}, {pipeline_mode = #tpu.pipeline_mode<synchronous>, transform_indices = @transform_3, window_bounds = array<i64: 128, 128>}, {pipeline_mode = #tpu.pipeline_mode<synchronous>, transform_indices = @transform_4, window_bounds = array<i64: 1, 128>}, {pipeline_mode = #tpu.pipeline_mode<synchronous>, transform_indices = @transform_5, window_bounds = array<i64: 4, 128, 128>}, {pipeline_mode = #tpu.pipeline_mode<synchronous>, transform_indices = @transform_6, window_bounds = array<i64: 1, 128>}, {transform_indices = @transform_7, window_bounds = array<i64: 1, 8, 16, 128>}]} {
    %c0 = arith.constant 0 : index
    %c0_0 = arith.constant 0 : index
    %0 = vector.load %arg5[%c0, %c0_0] : memref<128x128xf32, #tpu.memory_space<vmem>>, vector<128x128xf32>
    %c0_1 = arith.constant 0 : index
    %c0_2 = arith.constant 0 : index
    %1 = vector.load %arg6[%c0_1, %c0_2] : memref<1x128xf32, #tpu.memory_space<vmem>>, vector<1x128xf32>
    %cst = arith.constant 0xFF800000 : f32
    %2 = vector.broadcast %cst : f32 to vector<20x8x128xf32>
    %c0_3 = arith.constant 0 : index
    %c0_4 = arith.constant 0 : index
    %c0_5 = arith.constant 0 : index
    %3 = vector.load %arg10[%c0_3, %c0_4, %c0_5] : memref<20x32x128xf32, #tpu.memory_space<vmem>>, vector<20x8x128xf32>
    tpu.vector_store %arg10[%c0_3, %c0_4, %c0_5], %2 {strides = array<i32>} : memref<20x32x128xf32, #tpu.memory_space<vmem>>, vector<20x8x128xf32>,
    %cst_6 = arith.constant 0xFF800000 : f32
    %4 = vector.broadcast %cst_6 : f32 to vector<20x8x128xf32>
    %c0_7 = arith.constant 0 : index
    %c24 = arith.constant 24 : index
    %c0_8 = arith.constant 0 : index
    %5 = vector.load %arg10[%c0_7, %c24, %c0_8] : memref<20x32x128xf32, #tpu.memory_space<vmem>>, vector<20x8x128xf32>
    tpu.vector_store %arg10[%c0_7, %c24, %c0_8], %4 {strides = array<i32>} : memref<20x32x128xf32, #tpu.memory_space<vmem>>, vector<20x8x128xf32>,
    %c0_9 = arith.constant 0 : index
    %c0_10 = arith.constant 0 : index
    %c0_11 = arith.constant 0 : index
    %c0_12 = arith.constant 0 : index
    %6 = vector.load %arg2[%c0_9, %c0_10, %c0_11, %c0_12] : memref<1x8x16x128xf32, #tpu.memory_space<vmem>>, vector<1x8x16x128xf32>
    %7 = vector.shape_cast %6 : vector<1x8x16x128xf32> to vector<8x16x128xf32>
    %8 = vector.shape_cast %7 : vector<8x16x128xf32> to vector<128x128xf32>
    %cst_13 = arith.constant dense<0.000000e+00> : vector<128x128xf32>
    %9 = tpu.matmul %8, %0, %cst_13 {dimension_numbers = #tpu.dot_dimension_numbers<[1], [0], [0], [1], [0, 0, 1, 1], [], []>} : vector<128x128xf32>, vector<128x128xf32>, vector<128x128xf32> -> vector<128x128xf32>
    %10 = vector.broadcast %1 : vector<1x128xf32> to vector<128x128xf32>
    %11 = arith.addf %9, %10 : vector<128x128xf32>
    %cst_14 = arith.constant 0.000000e+00 : f32
    %12 = vector.broadcast %cst_14 : f32 to vector<128x128xf32>
    %13 = arith.subf %12, %11 : vector<128x128xf32>
    %14 = math.exp %13 : vector<128x128xf32>
    %cst_15 = arith.constant 1.000000e+00 : f32
    %15 = vector.broadcast %cst_15 : f32 to vector<128x128xf32>
    %16 = arith.addf %15, %14 : vector<128x128xf32>
    %cst_16 = arith.constant 1.000000e+00 : f32
    %17 = vector.broadcast %cst_16 : f32 to vector<128x128xf32>
    %18 = arith.divf %17, %16 : vector<128x128xf32>
    %19 = arith.mulf %11, %18 : vector<128x128xf32>
    %20 = vector.shape_cast %19 : vector<128x128xf32> to vector<8x16x128xf32>
    %c6 = arith.constant 6 : index
    %c8 = arith.constant 8 : index
    %c0_17 = arith.constant 0 : index
    %21 = vector.load %arg10[%c6, %c8, %c0_17] : memref<20x32x128xf32, #tpu.memory_space<vmem>>, vector<8x16x128xf32>
    tpu.vector_store %arg10[%c6, %c8, %c0_17], %20 {strides = array<i32>} : memref<20x32x128xf32, #tpu.memory_space<vmem>>, vector<8x16x128xf32>,
    %c0_i32 = arith.constant 0 : i32
    %22 = arith.cmpi eq, %arg1, %c0_i32 : i32
    %23 = arith.extui %22 : i1 to i32
    %c0_i32_18 = arith.constant 0 : i32
    %24 = arith.cmpi ne, %23, %c0_i32_18 : i32
    scf.if %24 {
      %cst_49 = arith.constant 0xFF800000 : f32
      %126 = vector.broadcast %cst_49 : f32 to vector<6x16x128xf32>
      %c0_50 = arith.constant 0 : index
      %c8_51 = arith.constant 8 : index
      %c0_52 = arith.constant 0 : index
      %127 = vector.load %arg10[%c0_50, %c8_51, %c0_52] : memref<20x32x128xf32, #tpu.memory_space<vmem>>, vector<6x16x128xf32>
      tpu.vector_store %arg10[%c0_50, %c8_51, %c0_52], %126 {strides = array<i32>} : memref<20x32x128xf32, #tpu.memory_space<vmem>>, vector<6x16x128xf32>,
    } else {
    }
    %c0_i32_19 = arith.constant 0 : i32
    %25 = arith.cmpi sgt, %arg1, %c0_i32_19 : i32
    %26 = arith.extui %25 : i1 to i32
    %c0_i32_20 = arith.constant 0 : i32
    %27 = arith.cmpi ne, %26, %c0_i32_20 : i32
    scf.if %27 {
      %c0_49 = arith.constant 0 : index
      %c2_50 = arith.constant 2 : index
      %c0_51 = arith.constant 0 : index
      %c0_52 = arith.constant 0 : index
      %126 = vector.load %arg3[%c0_49, %c2_50, %c0_51, %c0_52] : memref<1x8x16x128xf32, #tpu.memory_space<vmem>>, vector<1x6x16x128xf32>
      %127 = vector.shape_cast %126 : vector<1x6x16x128xf32> to vector<6x16x128xf32>
      %128 = vector.shape_cast %127 : vector<6x16x128xf32> to vector<96x128xf32>
      %cst_53 = arith.constant dense<0.000000e+00> : vector<96x128xf32>
      %129 = tpu.matmul %128, %0, %cst_53 {dimension_numbers = #tpu.dot_dimension_numbers<[1], [0], [0], [1], [0, 0, 1, 1], [], []>} : vector<96x128xf32>, vector<128x128xf32>, vector<96x128xf32> -> vector<96x128xf32>
      %130 = vector.broadcast %1 : vector<1x128xf32> to vector<96x128xf32>
      %131 = arith.addf %129, %130 : vector<96x128xf32>
      %cst_54 = arith.constant 0.000000e+00 : f32
      %132 = vector.broadcast %cst_54 : f32 to vector<96x128xf32>
      %133 = arith.subf %132, %131 : vector<96x128xf32>
      %134 = math.exp %133 : vector<96x128xf32>
      %cst_55 = arith.constant 1.000000e+00 : f32
      %135 = vector.broadcast %cst_55 : f32 to vector<96x128xf32>
      %136 = arith.addf %135, %134 : vector<96x128xf32>
      %cst_56 = arith.constant 1.000000e+00 : f32
      %137 = vector.broadcast %cst_56 : f32 to vector<96x128xf32>
      %138 = arith.divf %137, %136 : vector<96x128xf32>
      %139 = arith.mulf %131, %138 : vector<96x128xf32>
      %140 = vector.shape_cast %139 : vector<96x128xf32> to vector<6x16x128xf32>
      %c0_57 = arith.constant 0 : index
      %c8_58 = arith.constant 8 : index
      %c0_59 = arith.constant 0 : index
      %141 = vector.load %arg10[%c0_57, %c8_58, %c0_59] : memref<20x32x128xf32, #tpu.memory_space<vmem>>, vector<6x16x128xf32>
      tpu.vector_store %arg10[%c0_57, %c8_58, %c0_59], %140 {strides = array<i32>} : memref<20x32x128xf32, #tpu.memory_space<vmem>>, vector<6x16x128xf32>,
    } else {
    }
    %c1_i32 = arith.constant 1 : i32
    %28 = arith.cmpi eq, %arg1, %c1_i32 : i32
    %29 = arith.extui %28 : i1 to i32
    %c0_i32_21 = arith.constant 0 : i32
    %30 = arith.cmpi ne, %29, %c0_i32_21 : i32
    scf.if %30 {
      %cst_49 = arith.constant 0xFF800000 : f32
      %126 = vector.broadcast %cst_49 : f32 to vector<6x16x128xf32>
      %c14 = arith.constant 14 : index
      %c8_50 = arith.constant 8 : index
      %c0_51 = arith.constant 0 : index
      %127 = vector.load %arg10[%c14, %c8_50, %c0_51] : memref<20x32x128xf32, #tpu.memory_space<vmem>>, vector<6x16x128xf32>
      tpu.vector_store %arg10[%c14, %c8_50, %c0_51], %126 {strides = array<i32>} : memref<20x32x128xf32, #tpu.memory_space<vmem>>, vector<6x16x128xf32>,
    } else {
    }
    %c1_i32_22 = arith.constant 1 : i32
    %31 = arith.cmpi slt, %arg1, %c1_i32_22 : i32
    %32 = arith.extui %31 : i1 to i32
    %c0_i32_23 = arith.constant 0 : i32
    %33 = arith.cmpi ne, %32, %c0_i32_23 : i32
    scf.if %33 {
      %c0_49 = arith.constant 0 : index
      %c0_50 = arith.constant 0 : index
      %c0_51 = arith.constant 0 : index
      %c0_52 = arith.constant 0 : index
      %126 = vector.load %arg4[%c0_49, %c0_50, %c0_51, %c0_52] : memref<1x8x16x128xf32, #tpu.memory_space<vmem>>, vector<1x6x16x128xf32>
      %127 = vector.shape_cast %126 : vector<1x6x16x128xf32> to vector<6x16x128xf32>
      %128 = vector.shape_cast %127 : vector<6x16x128xf32> to vector<96x128xf32>
      %cst_53 = arith.constant dense<0.000000e+00> : vector<96x128xf32>
      %129 = tpu.matmul %128, %0, %cst_53 {dimension_numbers = #tpu.dot_dimension_numbers<[1], [0], [0], [1], [0, 0, 1, 1], [], []>} : vector<96x128xf32>, vector<128x128xf32>, vector<96x128xf32> -> vector<96x128xf32>
      %130 = vector.broadcast %1 : vector<1x128xf32> to vector<96x128xf32>
      %131 = arith.addf %129, %130 : vector<96x128xf32>
      %cst_54 = arith.constant 0.000000e+00 : f32
      %132 = vector.broadcast %cst_54 : f32 to vector<96x128xf32>
      %133 = arith.subf %132, %131 : vector<96x128xf32>
      %134 = math.exp %133 : vector<96x128xf32>
      %cst_55 = arith.constant 1.000000e+00 : f32
      %135 = vector.broadcast %cst_55 : f32 to vector<96x128xf32>
      %136 = arith.addf %135, %134 : vector<96x128xf32>
      %cst_56 = arith.constant 1.000000e+00 : f32
      %137 = vector.broadcast %cst_56 : f32 to vector<96x128xf32>
      %138 = arith.divf %137, %136 : vector<96x128xf32>
      %139 = arith.mulf %131, %138 : vector<96x128xf32>
      %140 = vector.shape_cast %139 : vector<96x128xf32> to vector<6x16x128xf32>
      %c14 = arith.constant 14 : index
      %c8_57 = arith.constant 8 : index
      %c0_58 = arith.constant 0 : index
      %141 = vector.load %arg10[%c14, %c8_57, %c0_58] : memref<20x32x128xf32, #tpu.memory_space<vmem>>, vector<6x16x128xf32>
      tpu.vector_store %arg10[%c14, %c8_57, %c0_58], %140 {strides = array<i32>} : memref<20x32x128xf32, #tpu.memory_space<vmem>>, vector<6x16x128xf32>,
    } else {
    }
    %c0_24 = arith.constant 0 : index
    %c0_25 = arith.constant 0 : index
    %c0_26 = arith.constant 0 : index
    %34 = vector.load %arg10[%c0_24, %c0_25, %c0_26] : memref<20x32x128xf32, #tpu.memory_space<vmem>>, vector<20x32x128xf32>
    %35 = vector.extract_strided_slice %34 {offsets = [0, 0, 0], sizes = [16, 32, 128], strides = [1, 1, 1]} : vector<20x32x128xf32> to vector<16x32x128xf32>
    %36 = vector.extract_strided_slice %34 {offsets = [1, 0, 0], sizes = [16, 32, 128], strides = [1, 1, 1]} : vector<20x32x128xf32> to vector<16x32x128xf32>
    %37 = arith.maximumf %35, %36 : vector<16x32x128xf32>
    %38 = vector.extract_strided_slice %34 {offsets = [2, 0, 0], sizes = [16, 32, 128], strides = [1, 1, 1]} : vector<20x32x128xf32> to vector<16x32x128xf32>
    %39 = arith.maximumf %37, %38 : vector<16x32x128xf32>
    %40 = vector.extract_strided_slice %34 {offsets = [3, 0, 0], sizes = [16, 32, 128], strides = [1, 1, 1]} : vector<20x32x128xf32> to vector<16x32x128xf32>
    %41 = arith.maximumf %39, %40 : vector<16x32x128xf32>
    %42 = vector.extract_strided_slice %34 {offsets = [4, 0, 0], sizes = [16, 32, 128], strides = [1, 1, 1]} : vector<20x32x128xf32> to vector<16x32x128xf32>
    %43 = arith.maximumf %41, %42 : vector<16x32x128xf32>
    %44 = vector.extract_strided_slice %43 {offsets = [0, 0, 0], sizes = [16, 28, 128], strides = [1, 1, 1]} : vector<16x32x128xf32> to vector<16x28x128xf32>
    %45 = vector.extract_strided_slice %43 {offsets = [0, 1, 0], sizes = [16, 28, 128], strides = [1, 1, 1]} : vector<16x32x128xf32> to vector<16x28x128xf32>
    %46 = arith.maximumf %44, %45 : vector<16x28x128xf32>
    %47 = vector.extract_strided_slice %43 {offsets = [0, 2, 0], sizes = [16, 28, 128], strides = [1, 1, 1]} : vector<16x32x128xf32> to vector<16x28x128xf32>
    %48 = arith.maximumf %46, %47 : vector<16x28x128xf32>
    %49 = vector.extract_strided_slice %43 {offsets = [0, 3, 0], sizes = [16, 28, 128], strides = [1, 1, 1]} : vector<16x32x128xf32> to vector<16x28x128xf32>
    %50 = arith.maximumf %48, %49 : vector<16x28x128xf32>
    %51 = vector.extract_strided_slice %43 {offsets = [0, 4, 0], sizes = [16, 28, 128], strides = [1, 1, 1]} : vector<16x32x128xf32> to vector<16x28x128xf32>
    %52 = arith.maximumf %50, %51 : vector<16x28x128xf32>
    %53 = vector.extract_strided_slice %52 {offsets = [0, 0, 0], sizes = [12, 28, 128], strides = [1, 1, 1]} : vector<16x28x128xf32> to vector<12x28x128xf32>
    %54 = vector.extract_strided_slice %52 {offsets = [1, 0, 0], sizes = [12, 28, 128], strides = [1, 1, 1]} : vector<16x28x128xf32> to vector<12x28x128xf32>
    %55 = arith.maximumf %53, %54 : vector<12x28x128xf32>
    %56 = vector.extract_strided_slice %52 {offsets = [2, 0, 0], sizes = [12, 28, 128], strides = [1, 1, 1]} : vector<16x28x128xf32> to vector<12x28x128xf32>
    %57 = arith.maximumf %55, %56 : vector<12x28x128xf32>
    %58 = vector.extract_strided_slice %52 {offsets = [3, 0, 0], sizes = [12, 28, 128], strides = [1, 1, 1]} : vector<16x28x128xf32> to vector<12x28x128xf32>
    %59 = arith.maximumf %57, %58 : vector<12x28x128xf32>
    %60 = vector.extract_strided_slice %52 {offsets = [4, 0, 0], sizes = [12, 28, 128], strides = [1, 1, 1]} : vector<16x28x128xf32> to vector<12x28x128xf32>
    %61 = arith.maximumf %59, %60 : vector<12x28x128xf32>
    %62 = vector.extract_strided_slice %61 {offsets = [0, 0, 0], sizes = [12, 24, 128], strides = [1, 1, 1]} : vector<12x28x128xf32> to vector<12x24x128xf32>
    %63 = vector.extract_strided_slice %61 {offsets = [0, 1, 0], sizes = [12, 24, 128], strides = [1, 1, 1]} : vector<12x28x128xf32> to vector<12x24x128xf32>
    %64 = arith.maximumf %62, %63 : vector<12x24x128xf32>
    %65 = vector.extract_strided_slice %61 {offsets = [0, 2, 0], sizes = [12, 24, 128], strides = [1, 1, 1]} : vector<12x28x128xf32> to vector<12x24x128xf32>
    %66 = arith.maximumf %64, %65 : vector<12x24x128xf32>
    %67 = vector.extract_strided_slice %61 {offsets = [0, 3, 0], sizes = [12, 24, 128], strides = [1, 1, 1]} : vector<12x28x128xf32> to vector<12x24x128xf32>
    %68 = arith.maximumf %66, %67 : vector<12x24x128xf32>
    %69 = vector.extract_strided_slice %61 {offsets = [0, 4, 0], sizes = [12, 24, 128], strides = [1, 1, 1]} : vector<12x28x128xf32> to vector<12x24x128xf32>
    %70 = arith.maximumf %68, %69 : vector<12x24x128xf32>
    %71 = vector.extract_strided_slice %70 {offsets = [0, 0, 0], sizes = [8, 24, 128], strides = [1, 1, 1]} : vector<12x24x128xf32> to vector<8x24x128xf32>
    %72 = vector.extract_strided_slice %70 {offsets = [1, 0, 0], sizes = [8, 24, 128], strides = [1, 1, 1]} : vector<12x24x128xf32> to vector<8x24x128xf32>
    %73 = arith.maximumf %71, %72 : vector<8x24x128xf32>
    %74 = vector.extract_strided_slice %70 {offsets = [2, 0, 0], sizes = [8, 24, 128], strides = [1, 1, 1]} : vector<12x24x128xf32> to vector<8x24x128xf32>
    %75 = arith.maximumf %73, %74 : vector<8x24x128xf32>
    %76 = vector.extract_strided_slice %70 {offsets = [3, 0, 0], sizes = [8, 24, 128], strides = [1, 1, 1]} : vector<12x24x128xf32> to vector<8x24x128xf32>
    %77 = arith.maximumf %75, %76 : vector<8x24x128xf32>
    %78 = vector.extract_strided_slice %70 {offsets = [4, 0, 0], sizes = [8, 24, 128], strides = [1, 1, 1]} : vector<12x24x128xf32> to vector<8x24x128xf32>
    %79 = arith.maximumf %77, %78 : vector<8x24x128xf32>
    %80 = vector.extract_strided_slice %79 {offsets = [0, 0, 0], sizes = [8, 20, 128], strides = [1, 1, 1]} : vector<8x24x128xf32> to vector<8x20x128xf32>
    %81 = vector.extract_strided_slice %79 {offsets = [0, 1, 0], sizes = [8, 20, 128], strides = [1, 1, 1]} : vector<8x24x128xf32> to vector<8x20x128xf32>
    %82 = arith.maximumf %80, %81 : vector<8x20x128xf32>
    %83 = vector.extract_strided_slice %79 {offsets = [0, 2, 0], sizes = [8, 20, 128], strides = [1, 1, 1]} : vector<8x24x128xf32> to vector<8x20x128xf32>
    %84 = arith.maximumf %82, %83 : vector<8x20x128xf32>
    %85 = vector.extract_strided_slice %79 {offsets = [0, 3, 0], sizes = [8, 20, 128], strides = [1, 1, 1]} : vector<8x24x128xf32> to vector<8x20x128xf32>
    %86 = arith.maximumf %84, %85 : vector<8x20x128xf32>
    %87 = vector.extract_strided_slice %79 {offsets = [0, 4, 0], sizes = [8, 20, 128], strides = [1, 1, 1]} : vector<8x24x128xf32> to vector<8x20x128xf32>
    %88 = arith.maximumf %86, %87 : vector<8x20x128xf32>
    %89 = vector.extract_strided_slice %52 {offsets = [4, 6, 0], sizes = [8, 16, 128], strides = [1, 1, 1]} : vector<16x28x128xf32> to vector<8x16x128xf32>
    %90 = vector.extract_strided_slice %70 {offsets = [2, 4, 0], sizes = [8, 16, 128], strides = [1, 1, 1]} : vector<12x24x128xf32> to vector<8x16x128xf32>
    %91 = vector.extract_strided_slice %88 {offsets = [0, 2, 0], sizes = [8, 16, 128], strides = [1, 1, 1]} : vector<8x20x128xf32> to vector<8x16x128xf32>
    %92 = vector.shape_cast %20 : vector<8x16x128xf32> to vector<128x128xf32>
    %c0_27 = arith.constant 0 : index
    %c0_28 = arith.constant 0 : index
    %c0_29 = arith.constant 0 : index
    %93 = vector.load %arg7[%c0_27, %c0_28, %c0_29] : memref<4x128x128xf32, #tpu.memory_space<vmem>>, vector<1x128x128xf32>
    %94 = vector.shape_cast %93 : vector<1x128x128xf32> to vector<128x128xf32>
    %cst_30 = arith.constant dense<0.000000e+00> : vector<128x128xf32>
    %95 = tpu.matmul %92, %94, %cst_30 {dimension_numbers = #tpu.dot_dimension_numbers<[1], [0], [0], [1], [0, 0, 1, 1], [], []>} : vector<128x128xf32>, vector<128x128xf32>, vector<128x128xf32> -> vector<128x128xf32>
    %96 = vector.shape_cast %89 : vector<8x16x128xf32> to vector<128x128xf32>
    %c1 = arith.constant 1 : index
    %c0_31 = arith.constant 0 : index
    %c0_32 = arith.constant 0 : index
    %97 = vector.load %arg7[%c1, %c0_31, %c0_32] : memref<4x128x128xf32, #tpu.memory_space<vmem>>, vector<1x128x128xf32>
    %98 = vector.shape_cast %97 : vector<1x128x128xf32> to vector<128x128xf32>
    %cst_33 = arith.constant dense<0.000000e+00> : vector<128x128xf32>
    %99 = tpu.matmul %96, %98, %cst_33 {dimension_numbers = #tpu.dot_dimension_numbers<[1], [0], [0], [1], [0, 0, 1, 1], [], []>} : vector<128x128xf32>, vector<128x128xf32>, vector<128x128xf32> -> vector<128x128xf32>
    %100 = arith.addf %95, %99 : vector<128x128xf32>
    %101 = vector.shape_cast %90 : vector<8x16x128xf32> to vector<128x128xf32>
    %c2 = arith.constant 2 : index
    %c0_34 = arith.constant 0 : index
    %c0_35 = arith.constant 0 : index
    %102 = vector.load %arg7[%c2, %c0_34, %c0_35] : memref<4x128x128xf32, #tpu.memory_space<vmem>>, vector<1x128x128xf32>
    %103 = vector.shape_cast %102 : vector<1x128x128xf32> to vector<128x128xf32>
    %cst_36 = arith.constant dense<0.000000e+00> : vector<128x128xf32>
    %104 = tpu.matmul %101, %103, %cst_36 {dimension_numbers = #tpu.dot_dimension_numbers<[1], [0], [0], [1], [0, 0, 1, 1], [], []>} : vector<128x128xf32>, vector<128x128xf32>, vector<128x128xf32> -> vector<128x128xf32>
    %105 = arith.addf %100, %104 : vector<128x128xf32>
    %106 = vector.shape_cast %91 : vector<8x16x128xf32> to vector<128x128xf32>
    %c3 = arith.constant 3 : index
    %c0_37 = arith.constant 0 : index
    %c0_38 = arith.constant 0 : index
    %107 = vector.load %arg7[%c3, %c0_37, %c0_38] : memref<4x128x128xf32, #tpu.memory_space<vmem>>, vector<1x128x128xf32>
    %108 = vector.shape_cast %107 : vector<1x128x128xf32> to vector<128x128xf32>
    %cst_39 = arith.constant dense<0.000000e+00> : vector<128x128xf32>
    %109 = tpu.matmul %106, %108, %cst_39 {dimension_numbers = #tpu.dot_dimension_numbers<[1], [0], [0], [1], [0, 0, 1, 1], [], []>} : vector<128x128xf32>, vector<128x128xf32>, vector<128x128xf32> -> vector<128x128xf32>
    %110 = arith.addf %105, %109 : vector<128x128xf32>
    %c0_40 = arith.constant 0 : index
    %c0_41 = arith.constant 0 : index
    %111 = vector.load %arg8[%c0_40, %c0_41] : memref<1x128xf32, #tpu.memory_space<vmem>>, vector<1x128xf32>
    %112 = vector.broadcast %111 : vector<1x128xf32> to vector<128x128xf32>
    %113 = arith.addf %110, %112 : vector<128x128xf32>
    %cst_42 = arith.constant 0.000000e+00 : f32
    %114 = vector.broadcast %cst_42 : f32 to vector<128x128xf32>
    %115 = arith.subf %114, %113 : vector<128x128xf32>
    %116 = math.exp %115 : vector<128x128xf32>
    %cst_43 = arith.constant 1.000000e+00 : f32
    %117 = vector.broadcast %cst_43 : f32 to vector<128x128xf32>
    %118 = arith.addf %117, %116 : vector<128x128xf32>
    %cst_44 = arith.constant 1.000000e+00 : f32
    %119 = vector.broadcast %cst_44 : f32 to vector<128x128xf32>
    %120 = arith.divf %119, %118 : vector<128x128xf32>
    %121 = arith.mulf %113, %120 : vector<128x128xf32>
    %122 = vector.shape_cast %121 : vector<128x128xf32> to vector<8x16x128xf32>
    %c0_45 = arith.constant 0 : index
    %c0_46 = arith.constant 0 : index
    %c0_47 = arith.constant 0 : index
    %c0_48 = arith.constant 0 : index
    %123 = vector.load %arg9[%c0_45, %c0_46, %c0_47, %c0_48] : memref<1x8x16x128xf32, #tpu.memory_space<vmem>>, vector<1x8x16x128xf32>
    %124 = vector.shape_cast %123 : vector<1x8x16x128xf32> to vector<8x16x128xf32>
    %125 = vector.shape_cast %122 : vector<8x16x128xf32> to vector<1x8x16x128xf32>
    tpu.vector_store %arg9[%c0_45, %c0_46, %c0_47, %c0_48], %125 {strides = array<i32>} : memref<1x8x16x128xf32, #tpu.memory_space<vmem>>, vector<1x8x16x128xf32>,
    return
  }
  func.func @transform_0(%arg0: i32, %arg1: i32) -> (i32, i32, i32, i32) {
    %c0_i32 = arith.constant 0 : i32
    %c0_i32_0 = arith.constant 0 : i32
    %c0_i32_1 = arith.constant 0 : i32
    return %arg0, %arg1, %c0_i32, %c0_i32_0 : i32, i32, i32, i32
  }
  func.func @transform_1(%arg0: i32, %arg1: i32) -> (i32, i32, i32, i32) {
    %c1_i32 = arith.constant 1 : i32
    %0 = arith.muli %arg1, %c1_i32 : i32
    %c1_i32_0 = arith.constant 1 : i32
    %1 = arith.subi %0, %c1_i32_0 : i32
    %c0_i32 = arith.constant 0 : i32
    %2 = arith.maxsi %1, %c0_i32 : i32
    %c0_i32_1 = arith.constant 0 : i32
    %c0_i32_2 = arith.constant 0 : i32
    %c0_i32_3 = arith.constant 0 : i32
    return %arg0, %2, %c0_i32_1, %c0_i32_2 : i32, i32, i32, i32
  }
  func.func @transform_2(%arg0: i32, %arg1: i32) -> (i32, i32, i32, i32) {
    %c1_i32 = arith.constant 1 : i32
    %0 = arith.addi %arg1, %c1_i32 : i32
    %c1_i32_0 = arith.constant 1 : i32
    %1 = arith.muli %0, %c1_i32_0 : i32
    %c1_i32_1 = arith.constant 1 : i32
    %2 = arith.minsi %1, %c1_i32_1 : i32
    %c0_i32 = arith.constant 0 : i32
    %c0_i32_2 = arith.constant 0 : i32
    %c0_i32_3 = arith.constant 0 : i32
    return %arg0, %2, %c0_i32, %c0_i32_2 : i32, i32, i32, i32
  }
  func.func @transform_3(%arg0: i32, %arg1: i32) -> (i32, i32) {
    %c0_i32 = arith.constant 0 : i32
    %c0_i32_0 = arith.constant 0 : i32
    %c0_i32_1 = arith.constant 0 : i32
    return %c0_i32, %c0_i32_0 : i32, i32
  }
  func.func @transform_4(%arg0: i32, %arg1: i32) -> (i32, i32) {
    %c0_i32 = arith.constant 0 : i32
    %c0_i32_0 = arith.constant 0 : i32
    %c0_i32_1 = arith.constant 0 : i32
    return %c0_i32, %c0_i32_0 : i32, i32
  }
  func.func @transform_5(%arg0: i32, %arg1: i32) -> (i32, i32, i32) {
    %c0_i32 = arith.constant 0 : i32
    %c0_i32_0 = arith.constant 0 : i32
    %c0_i32_1 = arith.constant 0 : i32
    %c0_i32_2 = arith.constant 0 : i32
    return %c0_i32, %c0_i32_0, %c0_i32_1 : i32, i32, i32
  }
  func.func @transform_6(%arg0: i32, %arg1: i32) -> (i32, i32) {
    %c0_i32 = arith.constant 0 : i32
    %c0_i32_0 = arith.constant 0 : i32
    %c0_i32_1 = arith.constant 0 : i32
    return %c0_i32, %c0_i32_0 : i32, i32
  }
  func.func @transform_7(%arg0: i32, %arg1: i32) -> (i32, i32, i32, i32) {
    %c0_i32 = arith.constant 0 : i32
    %c0_i32_0 = arith.constant 0 : i32
    %c0_i32_1 = arith.constant 0 : i32
    return %arg0, %arg1, %c0_i32, %c0_i32_0 : i32, i32, i32, i32
  }
}

</mosaic_0001>

<bundles_post_ra>
// kernel: tpu_custom_call.1
= control target key start
LH: loop header
LB: loop body
LE: loop exit
PB: predicated region body
PF: predicated region fallthrough
CT: control target
= control target key end

     0   :  { %s10947_s0 = inlined_call_operand.hbm [shape: f32[2,16,16,128], index: 0, kind: input, shape index: {}]   ;;  %s10948_s1 = inlined_call_operand.hbm [shape: f32[2,16,16,128], index: 1, kind: input, shape index: {}]   ;;  %s10949_s2 = inlined_call_operand.hbm [shape: f32[2,16,16,128], index: 2, kind: input, shape index: {}]   ;;  %s10950_s3 = inlined_call_operand.hbm [shape: f32[128,128], index: 3, kind: input, shape index: {}]   ;;  %s10951_s4 = inlined_call_operand.vmem [shape: f32[1,128], index: 4, kind: input, shape index: {}]   ;;  %s10952_s5 = inlined_call_operand.hbm [shape: f32[4,128,128], index: 5, kind: input, shape index: {}]   ;;  %s10953_s6 = inlined_call_operand.vmem [shape: f32[1,128], index: 6, kind: input, shape index: {}]   ;;  %s10954_s7 = inlined_call_operand.hbm [shape: f32[2,16,16,128], index: 7, kind: output, shape index: {}]  }
   0x1   :  { %11362 = sst [smem:[#allocation149_spill]] %s10947_s0 }
   0x2   :  { %11363 = sst [smem:[#allocation150_spill]] %s10948_s1 }
   0x3   :  { %11364 = sst [smem:[#allocation151_spill]] %s10949_s2 }
   0x4   :  { %11365 = sst [smem:[#allocation152_spill]] %s10950_s3 }
   0x5   :  { %11366 = sst [smem:[#allocation153_spill]] %s10951_s4 }
   0x6   :  { %11367 = sst [smem:[#allocation154_spill]] %s10952_s5 }
   0x7   :  { %11368 = sst [smem:[#allocation155_spill]] %s10953_s6 }
   0x8   :  { %11369 = sst [smem:[#allocation156_spill]] %s10954_s7 }
   0x9   :  { %12 = vsyncpa [#allocation4], 0 }
   0xa   :  { %14 = vsyncpa [#allocation4 + $0x1], 0 }
   0xb   :  { %15 = vsyncpa [#allocation7], 0 }
   0xc   :  { %17 = vsyncpa [#allocation7 + $0x1], 0 }
   0xd   :  { %18 = vsyncpa [#allocation10], 0 }
   0xe   :  { %19 = vsyncpa [#allocation5], 0 }
   0xf   :  { %21 = vsyncpa [#allocation5 + $0x1], 0  ;;  %s6435_s24 = smov 0   ;;  %s6437_s25 = smov 0  }
  0x10   :  { %s6439_s26 = smov 0   ;;  %s6441_s27 = smov 0  }
  0x11   :  { %s6443_s28 = smov 0   ;;  %s6445_s29 = smov 0  }
  0x12   :  { %s6447_s30 = smov 0   ;;  %s6449_s8 = smov 0  }
  0x13   :  { %s6451_s9 = smov 0   ;;  %s6453_s10 = smov 0  }
  0x14   :  { %s6455_s11 = smov 0   ;;  %s6457_s12 = smov 0  }
  0x15   :  { %s6459_s13 = smov 0   ;;  %s6461_s14 = smov 0  }
  0x16 LB: > { %11370 = sst [smem:[#allocation18_spill]] %s6348_s28  ;;  %s6506_s15 = sadd.s32 4294967295, %s6384_s14   ;;  %s6384_s14 = sphi %s6461_s14, %s27_s14   ;;  %s6380_s13 = sphi %s6459_s13, %s12241_s13   ;;  %s6376_s12 = sphi %s6457_s12, %s12232_s12   ;;  %s6372_s11 = sphi %s6455_s11, %s12240_s11   ;;  %s6368_s10 = sphi %s6453_s10, %s12239_s10   ;;  %s6364_s9 = sphi %s6451_s9, %s12230_s9   ;;  %s6360_s8 = sphi %s6449_s8, %s12238_s8   ;;  %s6356_s30 = sphi %s6447_s30, %s12237_s30   ;;  %s6352_s29 = sphi %s6445_s29, %s12228_s29   ;;  %s6348_s28 = sphi %s6443_s28, %s12227_s28   ;;  %s6344_s27 = sphi %s6441_s27, %s12226_s27   ;;  %s6340_s26 = sphi %s6439_s26, %s12236_s26   ;;  %s6336_s25 = sphi %s6437_s25, %s12235_s25   ;;  %s6332_s24 = sphi %s6435_s24, %s12234_s24  }
  0x17   : > { %11371 = sst [smem:[#allocation19_spill]] %s6352_s29  ;;  %p5462_p0 = scmp.ge.s32.totalorder %s6384_s14, 1 }
  0x18   : > { %11372 = sst [smem:[#allocation20_spill]] %s6364_s9  ;;  %p10969_p1 = scmp.eq.s32.totalorder %s6506_s15, 0 }
  0x19   : > { %11373 = sst [smem:[#allocation21_spill]] %s6368_s10  ;;  %p252_p2 = scmp.lt.s32.totalorder %s6384_s14, 5 }
  0x1a   : > { %11374 = sst [smem:[#allocation22_spill]] %s6372_s11  ;;  %s6386_s20 = smov [#allocation9]  }
  0x1b   : > { %11375 = sst [smem:[#allocation23_spill]] %s6376_s12  ;;  %p6514_p3 = pnand %p5462_p0, %p252_p2 }
  0x1c   : > { %s11376_s3 = sld [smem:[#allocation152_spill]]  ;;  %s265_s21 = sshll.u32 %s6386_s20, 4  ;;  %s266_s21 = int_to_ptr.vmem [resolvable:$true] %s265_s21 }
  0x1d   : > { %s11377_s19 = scalar_select %p6514_p3, 1, 0 }
  0x1e   : > { %p5676_p4 = pneg %p6514_p3  ;;  %s10955_s23 = smov 128  }
  0x1f   : > { %11378 = sst [smem:[#allocation24_spill]] %s11377_s19  ;;  %s10957_s16 = smov 8  }
  0x20   : > { %p6522_p5 = pnand %p5676_p4, %p10969_p1  ;;  %s36_s17 = sadd.s32 1, %s6376_s12 }
  0x21   : > { %p37_p6 = scmp.ge.s32.totalorder %s36_s17, 2  ;;  %s39_s20 = sadd.s32 1, %s6380_s13 }
  0x22   : > { %s263_s18 = sshll.u32 %s11376_s3, 4  ;;  %p56_p7 = scmp.eq.s32.totalorder %s6384_s14, 0  ;;  %s264_s18 = int_to_ptr.hbm [resolvable:$true] %s263_s18 }
  0x23   : > { %5679 = dma.hbm_to_vmem [thread:$0]  (!%p6522_p5), %s264_s18, 2048, %s266_s21, [#allocation10], %s10955_s23, %s10955_s23, %s10957_s16  }
  0x24   : > { %s12243_s17 = smov (%p37_p6, %s36_s17), 0  ;;  %s12245_s20 = smov (!%p37_p6, %s39_s20), %s6380_s13 }
  0x25   : > { %11380 = sst [smem:[#allocation25_spill]] %s12243_s17  ;;  %s44_s3 = ssub.s32 %s6376_s12, %s12243_s17 }
  0x26   : > { %p41_p8 = scmp.ge.s32.totalorder %s12245_s20, 2  ;;  %s82_s18 = sadd.s32 1, %s6352_s29 }
  0x27   : > { %p89_p9 = scmp.ne.s32.totalorder %s6352_s29, %s6348_s28  ;;  %p95_p10 = scmp.ne.s32.totalorder %s6348_s28, %s6344_s27 }
  0x28   : > { %s12247_s20 = smov (%p41_p8, %s12245_s20), 0  ;;  %p10968_p0 = scmp.lt.s32.totalorder %s6384_s14, 4 }
  0x29   : > { %11381 = sst [smem:[#allocation26_spill]] %s12247_s20  ;;  %s6544_s21 = ssub.s32 %s6380_s13, %s12247_s20 }
  0x2a   : > { %s6549_s23 = sor.u32 %s44_s3, %s6544_s21  ;;  %p6556_p12 = por %p89_p9, %p56_p7 }
  0x2b   : > { %p46_p11 = scmp.eq.s32.totalorder %s6549_s23, 0  ;;  %p6562_p13 = por %p95_p10, %p10969_p1 }
  0x2c   : > { %s324_s7 = sand.u32 1, %s6384_s14   ;;  %p10967_p2 = scmp.eq.s32.totalorder %s6544_s21, 0 }
  0x2d   : > { %s326_s3 = sand.u32 1, %s6352_s29   ;;  %s10966_s6 = sshll.u32 %s6380_s13, 8 }
  0x2e   : > { %s6574_s27 = scalar_select %p10967_p2, %s6352_s29, %s82_s18  }
  0x2f   : > { %s5471_s11 = sshll.u32 %s326_s3, 7  ;;  %s11385_s1 = sld [smem:[#allocation150_spill]] }
  0x30   : > { %11384 = sst [smem:[#allocation27_spill]] %s6574_s27  ;;  %s328_s19 = scalar_lea.vmem [#allocation6], %s5471_s11 }
  0x31   : > { %s342_s2 = sshll.u32 %s328_s19, 4  ;;  %p6586_p4 = pnand %p10968_p0, %p6556_p12  ;;  %s343_s2 = int_to_ptr.vmem [resolvable:$true] %s342_s2 }
  0x32   : > { %s11387_s5 = sld [smem:[#allocation154_spill]]  ;;  %s6593_s29 = scalar_lea.sflag [#allocation7], %s324_s7 }
  0x33   : > { %p6106_p8 = pneg %p6586_p4 }
  0x35   : > { %s339_s28 = scalar_lea.hbm %s11385_s1, %s10966_s6  ;;  %s6109_s19 = scalar_lea.hbm %s11385_s1, 512 }
  0x36   : > { %s340_s0 = sshll.u32 %s339_s28, 4  ;;  %s341_s0 = int_to_ptr.hbm [resolvable:$true] %s340_s0 }
  0x37   : > { %s6102_s4 = sshra.s32 %s341_s0, 4  ;;  %s6103_s4 = int_to_ptr.hbm [resolvable:$true] %s6102_s4 }
  0x38   : > { %s280_s3 = sshll.u32 %s11387_s5, 4  ;;  %s6104_s10 = scalar_lea.hbm %s6103_s4, 128  ;;  %s281_s3 = int_to_ptr.hbm [resolvable:$true] %s280_s3 }
  0x39   : > { %p6105_p6 = scmp.ne.s32.totalorder %s6103_s4, %s6104_s10  ;;  %p6110_p12 = scmp.lt.s32.totalorder %s6103_s4, %s11385_s1 }
  0x3a   : > { %p6111_p2 = scmp.lt.s32.totalorder %s6109_s19, %s6104_s10 }
  0x3b   : > { %p6107_p9 = pnand %p6106_p8, %p6105_p6 }
  0x3c   : > { %p6112_p0 = por %p6111_p2, %p6110_p12 }
  0x3d   : > { %p6108_p10 = pneg %p6107_p9 }
  0x3f   : > { %p6113_p1 = pnand %p6112_p0, %p6108_p10 }
  0x41   : > { %6116 = shalt.err (!%p6113_p1)
}
  0x42   : > { %s11388_s7 = smov 8   ;;  %s11389_s27 = smov 128  }
  0x43   : > { %5689 = dma.hbm_to_vmem [thread:$0]  (!%p6586_p4), %s341_s0, 2048, %s343_s2, %s6593_s29, %s11389_s27, %s11389_s27, %s11388_s7  }
  0x44   : > { %s6389_s6 = smov [#allocation11]   ;;  %s5459_s18 = sadd.s32 4294967294, %s6384_s14  }
  0x45   : > { %s282_s17 = sshll.u32 %s6389_s6, 4  ;;  %s48_s4 = sadd.s32 1, %s6364_s9  ;;  %s283_s17 = int_to_ptr.vmem [resolvable:$true] %s282_s17 }
  0x46   : > { %5682 = dma.hbm_to_vmem [thread:$0]  (!%p6522_p5), %s281_s3, 8192, %s283_s17, [#allocation10], %s11389_s27, %s11389_s27, %s11388_s7  }
  0x47   : > { %s6619_s10 = scalar_select %p46_p11, %s6364_s9, %s48_s4  }
  0x48   : > { %p55_p1 = scmp.ne.s32.totalorder %s6364_s9, %s6360_s8  ;;  %p61_p0 = scmp.ne.s32.totalorder %s6360_s8, %s6356_s30 }
  0x49   : > { %11390 = sst [smem:[#allocation28_spill]] %s6619_s10  ;;  %p239_p2 = scmp.eq.s32.totalorder %s6506_s15, 3 }
  0x4a   : > { %p245_p4 = scmp.eq.s32.totalorder %s5459_s18, 3  ;;  %p6628_p6 = por %p56_p7, %p55_p1 }
  0x4b   : > { %p11392_p8 = scmp.eq.s32.totalorder %s6506_s15, 0  ;;  %p6638_p5 = por %p239_p2, %p55_p1 }
  0x4c   : > { %p6642_p11 = por %p245_p4, %p61_p0  ;;  %s299_s3 = sand.u32 1, %s6364_s9  }
  0x4d   : > { %p6634_p9 = por %p11392_p8, %p61_p0  ;;  %s5512_s28 = sshll.u32 %s6376_s12, 4 }
  0x4e   : > { %s11395_s23 = scalar_select %p6642_p11, 1, 0 }
  0x4f   : > { %s5466_s11 = sshll.u32 %s299_s3, 7  ;;  %s11396_s19 = sshll.u32 %s6380_s13, 5 }
  0x50   : > { %s309_s16 = sadd.s32 %s5512_s28, %s11396_s19  ;;  %s303_s17 = scalar_lea.vmem [#allocation3], %s5466_s11 }
  0x51   : > { %s5470_s6 = sshll.u32 %s309_s16, 3  ;;  %s314_s18 = sshll.u32 %s303_s17, 4  ;;  %s315_s18 = int_to_ptr.vmem [resolvable:$true] %s314_s18 }
  0x52   : > { %s11397_s5 = sld [smem:[#allocation149_spill]]  ;;  %p11398_p10 = scmp.lt.s32.totalorder %s6384_s14, 4 }
  0x53   : > { %s300_s12 = scalar_lea.sflag [#allocation4], %s299_s3  ;;  %s116_s28 = sadd.s32 1, %s6340_s26 }
  0x54   : > { %p5684_p12 = pnand %p11398_p10, %p6628_p6  ;;  %p123_p1 = scmp.ne.s32.totalorder %s6340_s26, %s6336_s25 }
  0x55   : > { %p129_p0 = scmp.ne.s32.totalorder %s6336_s25, %s6332_s24  ;;  %s354_s11 = sand.u32 1, %s6340_s26  }
  0x56   : > { %p125_p2 = por %p123_p1, %p56_p7  ;;  %p11399_p4 = pmov %p11392_p8 }
  0x57   : > { %p11401_p6 = scmp.eq.s32.totalorder %s6544_s21, 0  ;;  %s11402_s0 = sshll.u32 %s6380_s13, 8 }
  0x58   : > { %s311_s10 = scalar_lea.hbm %s11397_s5, %s5470_s6  ;;  %p6670_p8 = por %p129_p0, %p11399_p4 }
  0x59   : > { %s312_s9 = sshll.u32 %s311_s10, 4  ;;  %s5477_s5 = sshll.u32 %s354_s11, 7  ;;  %s313_s9 = int_to_ptr.hbm [resolvable:$true] %s312_s9 }
  0x5a   : > { %5686 = dma.hbm_to_vmem [thread:$0]  (!%p5684_p12), %s313_s9, 2048, %s315_s18, %s300_s12, %s11389_s27, %s11389_s27, %s11388_s7  }
  0x5b   : > { %s6677_s10 = scalar_select %p11401_p6, %s6340_s26, %s116_s28  }
  0x5c   : > { %s6328_s3 = sadd.s32 128, %s11402_s0  ;;  %s356_s19 = scalar_lea.vmem [#allocation8], %s5477_s5 }
  0x5d   : > { %s370_s16 = sshll.u32 %s356_s19, 4  ;;  %s11403_s6 = sld [smem:[#allocation151_spill]]  ;;  %s371_s16 = int_to_ptr.vmem [resolvable:$true] %s370_s16 }
  0x5e   : > { %p11404_p7 = pmov %p11398_p10 }
  0x60   : > { %p5690_p10 = pnand %p11404_p7, %p125_p2 }
  0x62   : > { %p6196_p1 = pneg %p5690_p10 }
  0x63   : > { %s367_s24 = scalar_lea.hbm %s11403_s6, %s6328_s3  ;;  %s6199_s11 = scalar_lea.hbm %s11403_s6, 512 }
  0x64   : > { %s368_s17 = sshll.u32 %s367_s24, 4  ;;  %s369_s17 = int_to_ptr.hbm [resolvable:$true] %s368_s17 }
  0x65   : > { %s6192_s18 = sshra.s32 %s369_s17, 4  ;;  %s6193_s18 = int_to_ptr.hbm [resolvable:$true] %s6192_s18 }
  0x66   : > { %s6194_s4 = scalar_lea.hbm %s6193_s18, 128 }
  0x67   : > { %p6195_p12 = scmp.ne.s32.totalorder %s6193_s18, %s6194_s4  ;;  %p6201_p6 = scmp.lt.s32.totalorder %s6199_s11, %s6194_s4 }
  0x69   : > { %p6197_p0 = pnand %p6196_p1, %p6195_p12 }
  0x6b   : > { %p6198_p4 = pneg %p6197_p0 }
  0x6d   : > { %p6203_p11 = pnand %p6201_p6, %p6198_p4 }
  0x6f   : > { %6206 = shalt.err (!%p6203_p11)
}
  0x70   : > { %5692 = dma.hbm_to_vmem [thread:$0]  (!%p5690_p10), %s369_s17, 2048, %s371_s16, %s6593_s29, %s11389_s27, %s11389_s27, %s11388_s7  }
  0x71   : > { %382 = sbr.rel (%p6514_p3) target bundleno = 1796 (0x704), region = 48 }
  0x76   : > { %s6696_s0 = sand.u32 1, %s6360_s8  }
  0x77   : > { %s5483_s3 = sshll.u32 %s6696_s0, 7  ;;  %s385_s19 = scalar_lea.sflag [#allocation4], %s6696_s0 }
  0x78   : > { %s6702_s9 = scalar_lea.vmem [#allocation3], %s5483_s3 }
  0x79   : > { %6307 = dma.done.wait (%p6634_p9), %s385_s19, 2048  }
  0x7a   : > { %6309 = vsyncadd (%p6634_p9), %s385_s19, 4294965248  ;;  %s11406_s29 = sld [smem:[#allocation18_spill]]  ;;  %s394_s7 = sand.u32 1, %s6506_s15  }
  0x7b   : > { %s395_s12 = scalar_lea.sflag [#allocation7], %s394_s7 }
  0x80   : > { %s396_s27 = sand.u32 1, %s11406_s29  }
  0x81   : > { %s5484_s16 = sshll.u32 %s396_s27, 7 }
  0x82   : > { %s6710_s24 = scalar_lea.vmem [#allocation6], %s5484_s16 }
  0x83   : > { %6311 = dma.done.wait (%p6562_p13), %s395_s12, 2048  }
  0x84   : > { %6313 = vsyncadd (%p6562_p13), %s395_s12, 4294965248  ;;  %s406_s17 = sand.u32 1, %s6336_s25  }
  0x85   : > { %s5485_s18 = sshll.u32 %s406_s17, 7 }
  0x86   : > { %s6717_s2 = scalar_lea.vmem [#allocation8], %s5485_s18 }
  0x87   : > { %6315 = dma.done.wait (%p6670_p8), %s395_s12, 2048  }
  0x88   : > { %6317 = vsyncadd (%p6670_p8), %s395_s12, 4294965248  ;;  %p11407_p3 = scmp.eq.s32.totalorder %s6506_s15, 0 }
  0x8a   : > { %6319 = dma.done.wait (%p11407_p3), [#allocation10], 10240   ;;  %p11408_p9 = pmov %p11407_p3 }
  0x8b   : > { %v6390_v0 = vmov -inf   ;;  %v6734_v1 = vld [vmem:[#allocation9 + $0x78] sm:$0xff]  ;;  %v6736_v2 = vld [vmem:[#allocation9 + $0x70] sm:$0xff]  ;;  %v6744_v3 = vld [vmem:[#allocation9 + $0x68] sm:$0xff]  ;;  %s11409_s1 = sld [smem:[#allocation153_spill]]  ;;  %s7179_s4 = scalar_lea.vmem [#allocation12], %s5483_s3 }
  0x8c   : > { %6321 = vsyncadd (%p11408_p9), [#allocation10], 4294957056  ;;  %487 = vst [vmem:[#allocation2 + $0xb8] sm:$0xff] %v6390_v0  ;;  %546 = vmatpush.msra.mxu0 %v6734_v1  ;;  %5516 = vmatpush.msra.mxu1 %v6734_v1  ;;  %v6752_v4 = vld [vmem:[#allocation9 + $0x60] sm:$0xff]  ;;  %v6760_v5 = vld [vmem:[#allocation9 + $0x58] sm:$0xff]  ;;  %s11442_s21 = sld [smem:[#allocation21_spill]] }
  0x8d   : > { %488 = vst [vmem:[#allocation2 + $0x20] sm:$0xff] %v6390_v0  ;;  %5517 = vmatpush.msra.mxu2 %v6734_v1  ;;  %5518 = vmatpush.msra.mxu3 %v6734_v1  ;;  %v6768_v6 = vld [vmem:[#allocation9 + $0x50] sm:$0xff]  ;;  %v6776_v7 = vld [vmem:[#allocation9 + $0x48] sm:$0xff]  ;;  %v6784_v8 = vld [vmem:[#allocation9 + $0x40] sm:$0xff] }
  0x8e   : > { %489 = vst [vmem:[#allocation2 + $0x100] sm:$0xff] %v6390_v0  ;;  %547 = vmatpush.msra.mxu0 %v6736_v2  ;;  %5519 = vmatpush.msra.mxu1 %v6736_v2  ;;  %v6792_v9 = vld [vmem:[#allocation9 + $0x38] sm:$0xff]  ;;  %v6800_v10 = vld [vmem:[#allocation9 + $0x30] sm:$0xff]  ;;  %v6808_v11 = vld [vmem:[#allocation9 + $0x28] sm:$0xff] }
  0x8f   : > { %490 = vst [vmem:[#allocation2 + $0xa0] sm:$0xff] %v6390_v0  ;;  %5520 = vmatpush.msra.mxu2 %v6736_v2  ;;  %5521 = vmatpush.msra.mxu3 %v6736_v2  ;;  %v6816_v12 = vld [vmem:[#allocation9 + $0x20] sm:$0xff]  ;;  %v6824_v13 = vld [vmem:[#allocation9 + $0x18] sm:$0xff]  ;;  %v6832_v14 = vld [vmem:[#allocation9 + $0x10] sm:$0xff] }
  0x90   : > { %491 = vst [vmem:[#allocation2 + $0x138] sm:$0xff] %v6390_v0  ;;  %548 = vmatpush.msra.mxu0 %v6744_v3  ;;  %5522 = vmatpush.msra.mxu1 %v6744_v3  ;;  %v6840_v15 = vld [vmem:[#allocation9 + $0x8] sm:$0xff]  ;;  %v6848_v16 = vld [vmem:[#allocation9] sm:$0xff]  ;;  %v529_v25 = vld [vmem:[%s6702_s9 + $0x10] sm:$0xff] }
  0x91   : > { %492 = vst [vmem:[#allocation2 + $0x158] sm:$0xff] %v6390_v0  ;;  %5523 = vmatpush.msra.mxu2 %v6744_v3  ;;  %5524 = vmatpush.msra.mxu3 %v6744_v3  ;;  %v527_v17 = vld [vmem:[%s6702_s9] sm:$0xff]  ;;  %v528_v21 = vld [vmem:[%s6702_s9 + $0x8] sm:$0xff]  ;;  %v533_v26 = vld [vmem:[%s6702_s9 + $0x30] sm:$0xff] }
  0x92   : > { %493 = vst [vmem:[#allocation2 + $0x1c0] sm:$0xff] %v6390_v0  ;;  %549 = vmatpush.msra.mxu0 %v6752_v4  ;;  %5525 = vmatpush.msra.mxu1 %v6752_v4  ;;  %v531_v18 = vld [vmem:[%s6702_s9 + $0x20] sm:$0xff]  ;;  %v532_v22 = vld [vmem:[%s6702_s9 + $0x28] sm:$0xff]  ;;  %v537_v27 = vld [vmem:[%s6702_s9 + $0x50] sm:$0xff]  ;;  %p5489_p13 = scmp.ne.s32.totalorder %s11442_s21, 0 }
  0x93   : > { %494 = vst [vmem:[#allocation2 + $0x218] sm:$0xff] %v6390_v0  ;;  %5526 = vmatpush.msra.mxu2 %v6752_v4  ;;  %5527 = vmatpush.msra.mxu3 %v6752_v4  ;;  %v535_v19 = vld [vmem:[%s6702_s9 + $0x40] sm:$0xff]  ;;  %v536_v23 = vld [vmem:[%s6702_s9 + $0x48] sm:$0xff]  ;;  %v541_v28 = vld [vmem:[%s6702_s9 + $0x70] sm:$0xff] }
  0x94   : > { %495 = vst [vmem:[#allocation2 + $0xf8] sm:$0xff] %v6390_v0  ;;  %550 = vmatpush.msra.mxu0 %v6760_v5  ;;  %5528 = vmatpush.msra.mxu1 %v6760_v5  ;;  %v539_v20 = vld [vmem:[%s6702_s9 + $0x60] sm:$0xff]  ;;  %v540_v24 = vld [vmem:[%s6702_s9 + $0x68] sm:$0xff]  ;;  %v530_v29 = vld [vmem:[%s6702_s9 + $0x18] sm:$0xff] }
  0x95   : > { %496 = vst [vmem:[#allocation2 + $0xd0] sm:$0xff] %v6390_v0  ;;  %5529 = vmatpush.msra.mxu2 %v6760_v5  ;;  %5530 = vmatpush.msra.mxu3 %v6760_v5  ;;  %v534_v30 = vld [vmem:[%s6702_s9 + $0x38] sm:$0xff]  ;;  %v6882_v33 = vld [vmem:[%s11409_s1] ss:$0 sm:$0xff] }
  0x96   : > { %497 = vst [vmem:[#allocation2 + $0xf0] sm:$0xff] %v6390_v0  ;;  %551 = vmatpush.msra.mxu0 %v6768_v6  ;;  %5531 = vmatpush.msra.mxu1 %v6768_v6  ;;  %v538_v31 = vld [vmem:[%s6702_s9 + $0x58] sm:$0xff] }
  0x97   : > { %498 = vst [vmem:[#allocation2 + $0x1b8] sm:$0xff] %v6390_v0  ;;  %5532 = vmatpush.msra.mxu2 %v6768_v6  ;;  %5533 = vmatpush.msra.mxu3 %v6768_v6  ;;  %v542_v32 = vld [vmem:[%s6702_s9 + $0x78] sm:$0xff] }
  0x98   : > { %499 = vst [vmem:[#allocation2 + $0x1c8] sm:$0xff] %v6390_v0  ;;  %552 = vmatpush.msra.mxu0 %v6776_v7  ;;  %5534 = vmatpush.msra.mxu1 %v6776_v7 }
  0x99   : > { %500 = vst [vmem:[#allocation2 + $0x98] sm:$0xff] %v6390_v0  ;;  %5535 = vmatpush.msra.mxu2 %v6776_v7  ;;  %5536 = vmatpush.msra.mxu3 %v6776_v7 }
  0x9a   : > { %501 = vst [vmem:[#allocation2 + $0xc8] sm:$0xff] %v6390_v0  ;;  %553 = vmatpush.msra.mxu0 %v6784_v8  ;;  %5537 = vmatpush.msra.mxu1 %v6784_v8 }
  0x9b   : > { %502 = vst [vmem:[#allocation2 + $0x88] sm:$0xff] %v6390_v0  ;;  %5538 = vmatpush.msra.mxu2 %v6784_v8  ;;  %5539 = vmatpush.msra.mxu3 %v6784_v8 }
  0x9c   : > { %503 = vst [vmem:[#allocation2 + $0x200] sm:$0xff] %v6390_v0  ;;  %554 = vmatpush.msra.mxu0 %v6792_v9  ;;  %5540 = vmatpush.msra.mxu1 %v6792_v9 }
  0x9d   : > { %504 = vst [vmem:[#allocation2 + $0xc0] sm:$0xff] %v6390_v0  ;;  %5541 = vmatpush.msra.mxu2 %v6792_v9  ;;  %5542 = vmatpush.msra.mxu3 %v6792_v9 }
  0x9e   : > { %505 = vst [vmem:[#allocation2 + $0x40] sm:$0xff] %v6390_v0  ;;  %555 = vmatpush.msra.mxu0 %v6800_v10  ;;  %5543 = vmatpush.msra.mxu1 %v6800_v10 }
  0x9f   : > { %506 = vst [vmem:[#allocation2 + $0x108] sm:$0xff] %v6390_v0  ;;  %5544 = vmatpush.msra.mxu2 %v6800_v10  ;;  %5545 = vmatpush.msra.mxu3 %v6800_v10 }
  0xa0   : > { %507 = vst [vmem:[#allocation2 + $0x30] sm:$0xff] %v6390_v0  ;;  %556 = vmatpush.msra.mxu0 %v6808_v11  ;;  %5546 = vmatpush.msra.mxu1 %v6808_v11 }
  0xa1   : > { %508 = vst [vmem:[#allocation2 + $0x188] sm:$0xff] %v6390_v0  ;;  %5547 = vmatpush.msra.mxu2 %v6808_v11  ;;  %5548 = vmatpush.msra.mxu3 %v6808_v11 }
  0xa2   : > { %509 = vst [vmem:[#allocation2 + $0x210] sm:$0xff] %v6390_v0  ;;  %557 = vmatpush.msra.mxu0 %v6816_v12  ;;  %5549 = vmatpush.msra.mxu1 %v6816_v12 }
  0xa3   : > { %510 = vst [vmem:[#allocation2 + $0xb0] sm:$0xff] %v6390_v0  ;;  %5550 = vmatpush.msra.mxu2 %v6816_v12  ;;  %5551 = vmatpush.msra.mxu3 %v6816_v12 }
  0xa4   : > { %511 = vst [vmem:[#allocation2 + $0x168] sm:$0xff] %v6390_v0  ;;  %558 = vmatpush.msra.mxu0 %v6824_v13  ;;  %5552 = vmatpush.msra.mxu1 %v6824_v13 }
  0xa5   : > { %512 = vst [vmem:[#allocation2 + $0x120] sm:$0xff] %v6390_v0  ;;  %5553 = vmatpush.msra.mxu2 %v6824_v13  ;;  %5554 = vmatpush.msra.mxu3 %v6824_v13 }
  0xa6   : > { %513 = vst [vmem:[#allocation2 + $0x1a0] sm:$0xff] %v6390_v0  ;;  %559 = vmatpush.msra.mxu0 %v6832_v14  ;;  %5555 = vmatpush.msra.mxu1 %v6832_v14 }
  0xa7   : > { %514 = vst [vmem:[#allocation2 + $0x1f0] sm:$0xff] %v6390_v0  ;;  %5556 = vmatpush.msra.mxu2 %v6832_v14  ;;  %5557 = vmatpush.msra.mxu3 %v6832_v14 }
  0xa8   : > { %515 = vst [vmem:[#allocation2 + $0x150] sm:$0xff] %v6390_v0  ;;  %560 = vmatpush.msra.mxu0 %v6840_v15  ;;  %5558 = vmatpush.msra.mxu1 %v6840_v15 }
  0xa9   : > { %516 = vst [vmem:[#allocation2 + $0x228] sm:$0xff] %v6390_v0  ;;  %5559 = vmatpush.msra.mxu2 %v6840_v15  ;;  %5560 = vmatpush.msra.mxu3 %v6840_v15 }
  0xaa   : > { %517 = vst [vmem:[#allocation2 + $0x78] sm:$0xff] %v6390_v0  ;;  %561 = vmatpush.msra.mxu0 %v6848_v16  ;;  %5561 = vmatpush.msra.mxu1 %v6848_v16 }
  0xab   : > { %518 = vst [vmem:[#allocation2 + $0x250] sm:$0xff] %v6390_v0  ;;  %5562 = vmatpush.msra.mxu2 %v6848_v16  ;;  %5563 = vmatpush.msra.mxu3 %v6848_v16 }
  0xac   : > { %519 = vst [vmem:[#allocation2 + $0x178] sm:$0xff] %v6390_v0  ;;  %562 = vmatmul.f32.vlgmr.msra.gmra.mxu0 %v527_v17  ;;  %574 = vmatmul.f32.vlgmr.msra.gmra.mxu1 %v531_v18 }
  0xad   : > { %520 = vst [vmem:[#allocation2 + $0x260] sm:$0xff] %v6390_v0  ;;  %586 = vmatmul.f32.vlgmr.msra.gmra.mxu2 %v535_v19  ;;  %598 = vmatmul.f32.vlgmr.msra.gmra.mxu3 %v539_v20 }
  0xae   : > { %521 = vst [vmem:[#allocation2 + $0x118] sm:$0xff] %v6390_v0 }
  0xaf   : > { %522 = vst [vmem:[#allocation2 + $0x170] sm:$0xff] %v6390_v0 }
  0xb0   : > { %523 = vst [vmem:[#allocation2 + $0x28] sm:$0xff] %v6390_v0 }
  0xb1   : > { %524 = vst [vmem:[#allocation2 + $0x48] sm:$0xff] %v6390_v0 }
  0xb2   : > { %525 = vst [vmem:[#allocation2 + $0x190] sm:$0xff] %v6390_v0 }
  0xb3   : > { %526 = vst [vmem:[#allocation2 + $0x1d0] sm:$0xff] %v6390_v0 }
  0xb4   : > { %565 = vmatmul.f32.gmra.mxu0 %v528_v21  ;;  %577 = vmatmul.f32.gmra.mxu1 %v532_v22 }
  0xb5   : > { %589 = vmatmul.f32.gmra.mxu2 %v536_v23  ;;  %601 = vmatmul.f32.gmra.mxu3 %v540_v24 }
  0xbc   : > { %568 = vmatmul.f32.gmra.mxu0 %v529_v25  ;;  %580 = vmatmul.f32.gmra.mxu1 %v533_v26 }
  0xbd   : > { %592 = vmatmul.f32.gmra.mxu2 %v537_v27  ;;  %604 = vmatmul.f32.gmra.mxu3 %v541_v28 }
  0xc4   : > { %571 = vmatmul.f32.gmra.mxu0 %v530_v29  ;;  %583 = vmatmul.f32.gmra.mxu1 %v534_v30 }
  0xc5   : > { %595 = vmatmul.f32.gmra.mxu2 %v538_v31  ;;  %607 = vmatmul.f32.gmra.mxu3 %v542_v32 }
 0x129   : > { %v563_v34 = vpop.f32.mrf.mxu0  ;;  %v575_v35 = vpop.f32.mrf.mxu1 }
 0x12a   : > { %v6885_v36 = vadd.f32 %v6882_v33, %v563_v34  ;;  %v6888_v37 = vadd.f32 %v6882_v33, %v575_v35 }
 0x12c   : > { %v611_v38 = vsub.f32 0.0, %v6885_v36  ;;  %v615_v39 = vsub.f32 0.0, %v6888_v37 }
 0x12e   : > { %v627_v40 = vmul.f32 1.442695, %v611_v38  ;;  %v635_v41 = vmul.f32 1.442695, %v615_v39 }
 0x130   : > { %5825 = vpow2.f32 %v627_v40  ;;  %v587_v42 = vpop.f32.mrf.mxu2  ;;  %v599_v43 = vpop.f32.mrf.mxu3 }
 0x131   : > { %5827 = vpow2.f32 %v635_v41  ;;  %v6893_v44 = vadd.f32 %v6882_v33, %v587_v42  ;;  %v6896_v45 = vadd.f32 %v6882_v33, %v599_v43  ;;  %v566_v46 = vpop.f32.mrf.mxu0  ;;  %v578_v47 = vpop.f32.mrf.mxu1 }
 0x132   : > { %v6899_v48 = vadd.f32 %v6882_v33, %v566_v46  ;;  %v6902_v49 = vadd.f32 %v6882_v33, %v578_v47 }
 0x133   : > { %v619_v50 = vsub.f32 0.0, %v6893_v44  ;;  %v623_v51 = vsub.f32 0.0, %v6896_v45 }
 0x134   : > { %v612_v52 = vsub.f32 0.0, %v6899_v48  ;;  %v616_v53 = vsub.f32 0.0, %v6902_v49 }
 0x135   : > { %v643_v54 = vmul.f32 1.442695, %v619_v50  ;;  %v651_v55 = vmul.f32 1.442695, %v623_v51 }
 0x136   : > { %v5826_v56 = vpop.eup %5825  ;;  %v629_v59 = vmul.f32 1.442695, %v612_v52  ;;  %v637_v61 = vmul.f32 1.442695, %v616_v53 }
 0x137   : > { %v5828_v57 = vpop.eup %5827  ;;  %v659_v58 = vadd.f32 1.0, %v5826_v56  ;;  %5829 = vpow2.f32 %v643_v54 }
 0x138   : > { %v6908_v60 = vadd.f32 1.0, %v5828_v57  ;;  %5831 = vpow2.f32 %v651_v55  ;;  %v590_v62 = vpop.f32.mrf.mxu2  ;;  %v602_v0 = vpop.f32.mrf.mxu3 }
 0x139   : > { %5833 = vrcp.f32 %v659_v58  ;;  %v6912_v63 = vadd.f32 %v6882_v33, %v590_v62  ;;  %v684_v17 = vand.u32 2147483647, %v659_v58  ;;  %v686_v18 = vand.u32 2147483648, %v659_v58  ;;  %v569_v19 = vpop.f32.mrf.mxu0  ;;  %v581_v27 = vpop.f32.mrf.mxu1 }
 0x13a   : > { %5835 = vrcp.f32 %v6908_v60  ;;  %v744_v21 = vand.u32 2147483647, %v6908_v60  ;;  %v746_v24 = vand.u32 2147483648, %v6908_v60  ;;  %v6920_v26 = vadd.f32 %v6882_v33, %v602_v0 }
 0x13b   : > { %5837 = vpow2.f32 %v629_v59  ;;  %v620_v22 = vsub.f32 0.0, %v6912_v63  ;;  %vm680_vm0 = vweird.f32 %v659_v58  ;;  %vm740_vm1 = vweird.f32 %v6908_v60 }
 0x13c   : > { %5839 = vpow2.f32 %v637_v61  ;;  %v6926_v30 = vadd.f32 %v6882_v33, %v569_v19  ;;  %vm6928_vm2 = vcmp.eq.f32.partialorder %v684_v17, 8.507059e+37  ;;  %v687_v35 = vor.u32 1.1754944e-38, %v686_v18 }
 0x13d   : > { %v5830_v20 = vpop.eup %5829  ;;  %vm6934_vm3 = vcmp.eq.f32.partialorder %v744_v21, 8.507059e+37  ;;  %v645_v41 = vmul.f32 1.442695, %v620_v22  ;;  %v6939_v42 = vadd.f32 %v6882_v33, %v581_v27  ;;  %v747_v47 = vor.u32 1.1754944e-38, %v746_v24 }
 0x13e   : > { %v5832_v23 = vpop.eup %5831  ;;  %v6917_v25 = vadd.f32 1.0, %v5830_v20  ;;  %v624_v50 = vsub.f32 0.0, %v6920_v26  ;;  %v613_v54 = vsub.f32 0.0, %v6926_v30 }
 0x13f   : > { %v5834_v28 = vpop.eup %5833  ;;  %v6923_v29 = vadd.f32 1.0, %v5832_v23  ;;  %v617_v61 = vsub.f32 0.0, %v6939_v42 }
 0x140   : > { %v5836_v31 = vpop.eup %5835  ;;  %v676_v32 = vmul.f32 %v5834_v28, %v659_v58  ;;  %5841 = vrcp.f32 %v6917_v25  ;;  %v804_v52 = vand.u32 2147483647, %v6917_v25  ;;  %v806_v53 = vand.u32 2147483648, %v6917_v25 }
 0x141   : > { %v5838_v38 = vpop.eup %5837  ;;  %v736_v39 = vmul.f32 %v5836_v31, %v6908_v60  ;;  %5843 = vrcp.f32 %v6923_v29  ;;  %vm681_vm4 = vweird.f32 %v5834_v28  ;;  %vm741_vm5 = vweird.f32 %v5836_v31 }
 0x142   : > { %v5840_v43 = vpop.eup %5839  ;;  %v677_v46 = vsub.f32 1.0, %v676_v32  ;;  %v6946_v56 = vadd.f32 1.0, %v5838_v38  ;;  %5845 = vpow2.f32 %v645_v41  ;;  %vm800_vm6 = vweird.f32 %v6917_v25  ;;  %vm682_vm7 = vmor %vm680_vm0, %vm681_vm4 }
 0x143   : > { %v737_v51 = vsub.f32 1.0, %v736_v39  ;;  %v6948_v57 = vadd.f32 1.0, %v5840_v43  ;;  %v864_v17 = vand.u32 2147483647, %v6923_v29  ;;  %vm6956_vm8 = vcmp.eq.f32.partialorder %v804_v52, 8.507059e+37  ;;  %vm742_vm10 = vmor %vm740_vm1, %vm741_vm5 }
 0x144   : > { %v678_v55 = vmul.f32 %v5834_v28, %v677_v46  ;;  %5847 = vrcp.f32 %v6946_v56  ;;  %v807_v21 = vor.u32 1.1754944e-38, %v806_v53  ;;  %vm860_vm9 = vweird.f32 %v6923_v29 }
 0x145   : > { %v738_v59 = vmul.f32 %v5836_v31, %v737_v51  ;;  %v866_v24 = vand.u32 2147483648, %v6923_v29  ;;  %5849 = vrcp.f32 %v6948_v57  ;;  %v653_v58 = vmul.f32 1.442695, %v624_v50 }
 0x146   : > { %v5842_v62 = vpop.eup %5841  ;;  %v679_v0 = vadd.f32 %v5834_v28, %v678_v55  ;;  %vm6974_vm11 = vcmp.eq.f32.partialorder %v864_v17, 8.507059e+37  ;;  %v699_v43 = vand.u32 2147483647, %v6946_v56  ;;  %vm695_vm13 = vweird.f32 %v6946_v56 }
 0x147   : > { %v739_v18 = vadd.f32 %v5836_v31, %v738_v59  ;;  %v796_v19 = vmul.f32 %v5842_v62, %v6917_v25  ;;  %v5844_v22 = vpop.eup %5843  ;;  %vm801_vm12 = vweird.f32 %v5842_v62  ;;  %5851 = vpow2.f32 %v653_v58 }
 0x148   : > { %v683_v23 = vsel %vm682_vm7, %v5834_v28, %v679_v0  ;;  %v856_v39 = vmul.f32 %v5844_v22, %v6923_v29  ;;  %v5846_v46 = vpop.eup %5845  ;;  %vm861_vm14 = vweird.f32 %v5844_v22  ;;  %vm802_vm15 = vmor %vm800_vm6, %vm801_vm12  ;;  %vm6990_vm0 = vcmp.eq.f32.partialorder %v699_v43, 8.507059e+37 }
 0x149   : > { %v688_v27 = vsel %vm6928_vm2, %v687_v35, %v683_v23  ;;  %v743_v32 = vsel %vm742_vm10, %v5836_v31, %v739_v18  ;;  %v797_v38 = vsub.f32 1.0, %v796_v19  ;;  %v6984_v40 = vadd.f32 1.0, %v5846_v46  ;;  %vm862_vm1 = vmor %vm860_vm9, %vm861_vm14 }
 0x14a   : > { %v6970_v41 = vmul.f32 %v688_v27, %v6885_v36  ;;  %v748_v28 = vsel %vm6934_vm3, %v747_v47, %v743_v32  ;;  %v857_v35 = vsub.f32 1.0, %v856_v39  ;;  %v5848_v50 = vpop.eup %5847  ;;  %v867_v36 = vor.u32 1.1754944e-38, %v866_v24  ;;  %v593_v32 = vpop.f32.mrf.mxu2 }
 0x14b   : > { %v6980_v34 = vmul.f32 %v748_v28, %v6888_v37  ;;  %v798_v31 = vmul.f32 %v5842_v62, %v797_v38  ;;  %v691_v37 = vmul.f32 %v5848_v50, %v6946_v56  ;;  %v5850_v52 = vpop.eup %5849  ;;  %v701_v55 = vand.u32 2147483648, %v6946_v56  ;;  %v572_v28 = vpop.f32.mrf.mxu0 }
 0x14c   : > { %11416 = vst [vmem:[#allocation29_spill] sm:$0xff] %v6970_v41  ;;  %v858_v51 = vmul.f32 %v5844_v22, %v857_v35  ;;  %5853 = vrcp.f32 %v6984_v40  ;;  %v631_v59 = vmul.f32 1.442695, %v613_v54  ;;  %v751_v19 = vmul.f32 %v5850_v52, %v6948_v57 }
 0x14d   : > { %11419 = vst [vmem:[#allocation30_spill] sm:$0xff] %v6980_v34  ;;  %v799_v47 = vadd.f32 %v5842_v62, %v798_v31  ;;  %v692_v18 = vsub.f32 1.0, %v691_v37  ;;  %vm696_vm2 = vweird.f32 %v5848_v50  ;;  %v759_v25 = vand.u32 2147483647, %v6948_v57  ;;  %v5852_v38 = vpop.eup %5851 }
 0x14e   : > { %932 = vst [vmem:[#allocation2] sm:$0xff] %v6970_v41  ;;  %v859_v17 = vadd.f32 %v5844_v22, %v858_v51  ;;  %v761_v24 = vand.u32 2147483648, %v6948_v57  ;;  %v752_v27 = vsub.f32 1.0, %v751_v19  ;;  %vm755_vm3 = vweird.f32 %v6948_v57  ;;  %vm697_vm5 = vmor %vm695_vm13, %vm696_vm2 }
 0x14f   : > { %936 = vst [vmem:[#allocation2 + $0x50] sm:$0xff] %v6980_v34  ;;  %v803_v0 = vsel %vm802_vm15, %v5842_v62, %v799_v47  ;;  %v693_v62 = vmul.f32 %v5848_v50, %v692_v18  ;;  %vm756_vm4 = vweird.f32 %v5850_v52  ;;  %5855 = vpow2.f32 %v631_v59 }
 0x150   : > { %v808_v23 = vsel %vm6956_vm8, %v807_v21, %v803_v0  ;;  %v863_v54 = vsel %vm862_vm1, %v5844_v22, %v859_v17  ;;  %v7013_v39 = vadd.f32 1.0, %v5852_v38  ;;  %v605_v22 = vpop.f32.mrf.mxu3  ;;  %v702_v60 = vor.u32 1.1754944e-38, %v701_v55  ;;  %vm757_vm7 = vmor %vm755_vm3, %vm756_vm4  ;;  %v584_v0 = vpop.f32.mrf.mxu1 }
 0x151   : > { %v7004_v58 = vmul.f32 %v808_v23, %v6893_v44  ;;  %v868_v20 = vsel %vm6974_vm11, %v867_v36, %v863_v54  ;;  %v694_v21 = vadd.f32 %v5848_v50, %v693_v62  ;;  %v753_v44 = vmul.f32 %v5850_v52, %v752_v27 }
 0x152   : > { %v7011_v29 = vmul.f32 %v868_v20, %v6896_v45  ;;  %v5854_v43 = vpop.eup %5853  ;;  %vm7018_vm6 = vcmp.eq.f32.partialorder %v759_v25, 8.507059e+37  ;;  %v639_v45 = vmul.f32 1.442695, %v617_v61  ;;  %v7025_v31 = vadd.f32 %v6882_v33, %v593_v32 }
 0x153   : > { %11422 = vst [vmem:[#allocation31_spill] sm:$0xff] %v7004_v58  ;;  %v698_v35 = vsel %vm697_vm5, %v5848_v50, %v694_v21  ;;  %v754_v36 = vadd.f32 %v5850_v52, %v753_v44  ;;  %v762_v47 = vor.u32 1.1754944e-38, %v761_v24  ;;  %v811_v51 = vmul.f32 %v5854_v43, %v6984_v40 }
 0x154   : > { %940 = vst [vmem:[#allocation2 + $0x1e0] sm:$0xff] %v7004_v58  ;;  %v703_v56 = vsel %vm6990_vm0, %v702_v60, %v698_v35  ;;  %5857 = vrcp.f32 %v7013_v39  ;;  %v7036_v61 = vadd.f32 %v6882_v33, %v605_v22  ;;  %v7039_v37 = vadd.f32 %v6882_v33, %v572_v28 }
 0x155   : > { %11423 = vst [vmem:[#allocation32_spill] sm:$0xff] %v7011_v29  ;;  %v7042_v50 = vmul.f32 %v703_v56, %v6899_v48  ;;  %v758_v55 = vsel %vm757_vm7, %v5850_v52, %v754_v36  ;;  %v812_v59 = vsub.f32 1.0, %v811_v51  ;;  %v819_v53 = vand.u32 2147483647, %v6984_v40  ;;  %v5856_v17 = vpop.eup %5855 }
 0x156   : > { %944 = vst [vmem:[#allocation2 + $0x160] sm:$0xff] %v7011_v29  ;;  %v763_v57 = vsel %vm7018_vm6, %v762_v47, %v758_v55  ;;  %v821_v18 = vand.u32 2147483648, %v6984_v40  ;;  %5859 = vpow2.f32 %v639_v45  ;;  %v621_v19 = vsub.f32 0.0, %v7025_v31  ;;  %v596_v45 = vpop.f32.mrf.mxu2 }
 0x157   : > { %11426 = vst [vmem:[#allocation33_spill] sm:$0xff] %v7042_v50  ;;  %v7051_v23 = vmul.f32 %v763_v57, %v6902_v49  ;;  %v813_v48 = vmul.f32 %v5854_v43, %v812_v59  ;;  %vm816_vm8 = vweird.f32 %v5854_v43  ;;  %v7053_v52 = vadd.f32 1.0, %v5856_v17 }
 0x158   : > { %933 = vst [vmem:[#allocation2 + $0x1a8] sm:$0xff] %v7042_v50  ;;  %v647_v25 = vmul.f32 1.442695, %v621_v19  ;;  %v625_v24 = vsub.f32 0.0, %v7036_v61  ;;  %v614_v54 = vsub.f32 0.0, %v7039_v37  ;;  %v7058_v62 = vadd.f32 %v6882_v33, %v584_v0 }
 0x159   : > { %11427 = vst [vmem:[#allocation34_spill] sm:$0xff] %v7051_v23  ;;  %v814_v27 = vadd.f32 %v5854_v43, %v813_v48  ;;  %vm815_vm9 = vweird.f32 %v6984_v40  ;;  %5861 = vrcp.f32 %v7053_v52  ;;  %v822_v32 = vor.u32 1.1754944e-38, %v821_v18 }
 0x15a   : > { %937 = vst [vmem:[#allocation2 + $0xe0] sm:$0xff] %v7051_v23  ;;  %v5858_v49 = vpop.eup %5857  ;;  %vm817_vm10 = vmor %vm815_vm9, %vm816_vm8  ;;  %5863 = vpow2.f32 %v647_v25  ;;  %v655_v38 = vmul.f32 1.442695, %v625_v24  ;;  %v633_v20 = vmul.f32 1.442695, %v614_v54  ;;  %vm820_vm11 = vcmp.eq.f32.partialorder %v819_v53, 8.507059e+37  ;;  %v608_v25 = vpop.f32.mrf.mxu3 }
 0x15b   : > { %v818_v21 = vsel %vm817_vm10, %v5854_v43, %v814_v27  ;;  %v871_v44 = vmul.f32 %v5858_v49, %v7013_v39  ;;  %v879_v22 = vand.u32 2147483647, %v7013_v39  ;;  %v881_v46 = vand.u32 2147483648, %v7013_v39 }
 0x15c   : > { %v5860_v28 = vpop.eup %5859  ;;  %v823_v60 = vsel %vm820_vm11, %v822_v32, %v818_v21  ;;  %5865 = vpow2.f32 %v655_v38  ;;  %v618_v40 = vsub.f32 0.0, %v7058_v62  ;;  %vm876_vm12 = vweird.f32 %v5858_v49 }
 0x15d   : > { %v7068_v35 = vmul.f32 %v823_v60, %v6912_v63  ;;  %v872_v36 = vsub.f32 1.0, %v871_v44  ;;  %v7070_v47 = vadd.f32 1.0, %v5860_v28  ;;  %5867 = vpow2.f32 %v633_v20 }
 0x15e   : > { %v641_v43 = vmul.f32 1.442695, %v618_v40  ;;  %v7075_v55 = vadd.f32 %v6882_v33, %v596_v45  ;;  %vm875_vm13 = vweird.f32 %v7013_v39  ;;  %vm880_vm14 = vcmp.eq.f32.partialorder %v879_v22, 8.507059e+37 }
 0x15f   : > { %11428 = vst [vmem:[#allocation35_spill] sm:$0xff] %v7068_v35  ;;  %v5862_v51 = vpop.eup %5861  ;;  %v873_v56 = vmul.f32 %v5858_v49, %v872_v36  ;;  %5869 = vrcp.f32 %v7070_v47  ;;  %v882_v0 = vor.u32 1.1754944e-38, %v881_v46  ;;  %vm877_vm15 = vmor %vm875_vm13, %vm876_vm12  ;;  %v714_v19 = vand.u32 2147483647, %v7053_v52 }
 0x160   : > { %941 = vst [vmem:[#allocation2 + $0x68] sm:$0xff] %v7068_v35  ;;  %v5864_v59 = vpop.eup %5863  ;;  %v706_v63 = vmul.f32 %v5862_v51, %v7053_v52  ;;  %v716_v48 = vand.u32 2147483648, %v7053_v52  ;;  %5871 = vpow2.f32 %v641_v43  ;;  %vm710_vm0 = vweird.f32 %v7053_v52 }
 0x161   : > { %v874_v53 = vadd.f32 %v5858_v49, %v873_v56  ;;  %v7079_v17 = vadd.f32 1.0, %v5864_v59  ;;  %v622_v39 = vsub.f32 0.0, %v7075_v55  ;;  %vm711_vm1 = vweird.f32 %v5862_v51 }
 0x162   : > { %v5866_v57 = vpop.eup %5865  ;;  %v707_v18 = vsub.f32 1.0, %v706_v63  ;;  %v7094_v22 = vadd.f32 %v6882_v33, %v608_v25  ;;  %vm715_vm2 = vcmp.eq.f32.partialorder %v714_v19, 8.507059e+37  ;;  %v717_v28 = vor.u32 1.1754944e-38, %v716_v48  ;;  %vm712_vm3 = vmor %vm710_vm0, %vm711_vm1 }
 0x163   : > { %v5868_v24 = vpop.eup %5867  ;;  %v878_v54 = vsel %vm877_vm15, %v5858_v49, %v874_v53  ;;  %5873 = vrcp.f32 %v7079_v17  ;;  %v7086_v38 = vadd.f32 1.0, %v5866_v57  ;;  %vm770_vm4 = vweird.f32 %v7070_v47 }
 0x164   : > { %v883_v27 = vsel %vm880_vm14, %v882_v0, %v878_v54  ;;  %v708_v32 = vmul.f32 %v5862_v51, %v707_v18  ;;  %v7091_v44 = vadd.f32 1.0, %v5868_v24  ;;  %v649_v46 = vmul.f32 1.442695, %v622_v39 }
 0x165   : > { %v5870_v20 = vpop.eup %5869  ;;  %v7089_v21 = vmul.f32 %v883_v27, %v6920_v26  ;;  %v774_v26 = vand.u32 2147483647, %v7070_v47  ;;  %5875 = vrcp.f32 %v7086_v38  ;;  %v776_v43 = vand.u32 2147483648, %v7070_v47 }
 0x166   : > { %v709_v49 = vadd.f32 %v5862_v51, %v708_v32  ;;  %v766_v60 = vmul.f32 %v5870_v20, %v7070_v47  ;;  %v5872_v40 = vpop.eup %5871  ;;  %5877 = vrcp.f32 %v7091_v44  ;;  %v834_v63 = vand.u32 2147483647, %v7079_v17 }
 0x167   : > { %11429 = vst [vmem:[#allocation36_spill] sm:$0xff] %v7089_v21  ;;  %v836_v52 = vand.u32 2147483648, %v7079_v17  ;;  %v626_v53 = vsub.f32 0.0, %v7094_v22  ;;  %vm771_vm5 = vweird.f32 %v5870_v20  ;;  %vm7112_vm6 = vcmp.eq.f32.partialorder %v774_v26, 8.507059e+37 }
 0x168   : > { %945 = vst [vmem:[#allocation2 + $0x230] sm:$0xff] %v7089_v21  ;;  %v713_v45 = vsel %vm712_vm3, %v5862_v51, %v709_v49  ;;  %v767_v36 = vsub.f32 1.0, %v766_v60  ;;  %v7116_v19 = vadd.f32 1.0, %v5872_v40  ;;  %5879 = vpow2.f32 %v649_v46  ;;  %vm772_vm8 = vmor %vm770_vm4, %vm771_vm5 }
 0x169   : > { %v5874_v56 = vpop.eup %5873  ;;  %v718_v59 = vsel %vm715_vm2, %v717_v28, %v713_v45  ;;  %v777_v25 = vor.u32 1.1754944e-38, %v776_v43  ;;  %vm830_vm7 = vweird.f32 %v7079_v17  ;;  %vm7122_vm9 = vcmp.eq.f32.partialorder %v834_v63, 8.507059e+37 }
 0x16a   : > { %v7109_v0 = vmul.f32 %v718_v59, %v6926_v30  ;;  %v768_v57 = vmul.f32 %v5870_v20, %v767_v36  ;;  %v826_v51 = vmul.f32 %v5874_v56, %v7079_v17  ;;  %v837_v39 = vor.u32 1.1754944e-38, %v836_v52 }
 0x16b   : > { %v5876_v30 = vpop.eup %5875  ;;  %5881 = vrcp.f32 %v7116_v19  ;;  %v657_v27 = vmul.f32 1.442695, %v626_v53  ;;  %vm831_vm10 = vweird.f32 %v5874_v56  ;;  %vm890_vm11 = vweird.f32 %v7086_v38 }
 0x16c   : > { %11430 = vst [vmem:[#allocation37_spill] sm:$0xff] %v7109_v0  ;;  %v769_v48 = vadd.f32 %v5870_v20, %v768_v57  ;;  %v827_v24 = vsub.f32 1.0, %v826_v51  ;;  %v5878_v32 = vpop.eup %5877  ;;  %v886_v60 = vmul.f32 %v5876_v30, %v7086_v38  ;;  %v894_v47 = vand.u32 2147483647, %v7086_v38  ;;  %vm832_vm12 = vmor %vm830_vm7, %vm831_vm10 }
 0x16d   : > { %934 = vst [vmem:[#allocation2 + $0x240] sm:$0xff] %v7109_v0  ;;  %v721_v46 = vmul.f32 %v5878_v32, %v7091_v44  ;;  %v729_v63 = vand.u32 2147483647, %v7091_v44  ;;  %v731_v52 = vand.u32 2147483648, %v7091_v44  ;;  %5883 = vpow2.f32 %v657_v27 }
 0x16e   : > { %v773_v49 = vsel %vm772_vm8, %v5870_v20, %v769_v48  ;;  %v828_v28 = vmul.f32 %v5874_v56, %v827_v24  ;;  %v887_v36 = vsub.f32 1.0, %v886_v60  ;;  %v896_v20 = vand.u32 2147483648, %v7086_v38  ;;  %v5880_v43 = vpop.eup %5879 }
 0x16f   : > { %v778_v26 = vsel %vm7112_vm6, %v777_v25, %v773_v49  ;;  %v722_v59 = vsub.f32 1.0, %v721_v46  ;;  %vm891_vm13 = vweird.f32 %v5876_v30  ;;  %vm725_vm14 = vweird.f32 %v7091_v44 }
 0x170   : > { %v7134_v40 = vmul.f32 %v778_v26, %v6939_v42  ;;  %v829_v45 = vadd.f32 %v5874_v56, %v828_v28  ;;  %v888_v57 = vmul.f32 %v5876_v30, %v887_v36  ;;  %v670_v42 = vadd.f32 1.0, %v5880_v43  ;;  %vm892_vm1 = vmor %vm890_vm11, %vm891_vm13 }
 0x171   : > { %v5882_v51 = vpop.eup %5881  ;;  %v723_v48 = vmul.f32 %v5878_v32, %v722_v59  ;;  %vm726_vm15 = vweird.f32 %v5878_v32  ;;  %vm895_vm0 = vcmp.eq.f32.partialorder %v894_v47, 8.507059e+37  ;;  %vm730_vm2 = vcmp.eq.f32.partialorder %v729_v63, 8.507059e+37 }
 0x172   : > { %11435 = vst [vmem:[#allocation38_spill] sm:$0xff] %v7134_v40  ;;  %v833_v53 = vsel %vm832_vm12, %v5874_v56, %v829_v45  ;;  %v889_v25 = vadd.f32 %v5876_v30, %v888_v57  ;;  %v781_v24 = vmul.f32 %v5882_v51, %v7116_v19  ;;  %v897_v56 = vor.u32 1.1754944e-38, %v896_v20  ;;  %vm727_vm3 = vmor %vm725_vm14, %vm726_vm15 }
 0x173   : > { %938 = vst [vmem:[#allocation2 + $0x10] sm:$0xff] %v7134_v40  ;;  %v838_v18 = vsel %vm7122_vm9, %v837_v39, %v833_v53  ;;  %v724_v27 = vadd.f32 %v5878_v32, %v723_v48  ;;  %5885 = vrcp.f32 %v670_v42  ;;  %v732_v44 = vor.u32 1.1754944e-38, %v731_v52 }
 0x174   : > { %v7146_v17 = vmul.f32 %v838_v18, %v7025_v31  ;;  %v893_v54 = vsel %vm892_vm1, %v5876_v30, %v889_v25  ;;  %v782_v39 = vsub.f32 1.0, %v781_v24  ;;  %vm785_vm4 = vweird.f32 %v7116_v19  ;;  %v5884_v31 = vpop.eup %5883 }
 0x175   : > { %v898_v49 = vsel %vm895_vm0, %v897_v56, %v893_v54  ;;  %v728_v28 = vsel %vm727_vm3, %v5878_v32, %v724_v27  ;;  %v789_v60 = vand.u32 2147483647, %v7116_v19  ;;  %v791_v38 = vand.u32 2147483648, %v7116_v19 }
 0x176   : > { %11436 = vst [vmem:[#allocation39_spill] sm:$0xff] %v7146_v17  ;;  %v7156_v26 = vmul.f32 %v898_v49, %v7036_v61  ;;  %v733_v47 = vsel %vm730_vm2, %v732_v44, %v728_v28  ;;  %v783_v46 = vmul.f32 %v5882_v51, %v782_v39  ;;  %vm786_vm5 = vweird.f32 %v5882_v51 }
 0x177   : > { %942 = vst [vmem:[#allocation2 + $0x18] sm:$0xff] %v7146_v17  ;;  %v7159_v30 = vmul.f32 %v733_v47, %v7039_v37  ;;  %v674_v45 = vadd.f32 1.0, %v5884_v31  ;;  %vm787_vm6 = vmor %vm785_vm4, %vm786_vm5  ;;  %v792_v32 = vor.u32 1.1754944e-38, %v791_v38  ;;  %vm790_vm7 = vcmp.eq.f32.partialorder %v789_v60, 8.507059e+37 }
 0x178   : > { %11437 = vst [vmem:[#allocation40_spill] sm:$0xff] %v7156_v26  ;;  %v784_v36 = vadd.f32 %v5882_v51, %v783_v46  ;;  %v851_v52 = vand.u32 2147483648, %v670_v42  ;;  %v849_v57 = vand.u32 2147483647, %v670_v42  ;;  %vm845_vm9 = vweird.f32 %v670_v42 }
 0x179   : > { %11438 = vst [vmem:[#allocation41_spill] sm:$0xff] %v7159_v30  ;;  %v5886_v20 = vpop.eup %5885  ;;  %5887 = vrcp.f32 %v674_v45  ;;  %v909_v44 = vand.u32 2147483647, %v674_v45  ;;  %vm905_vm13 = vweird.f32 %v674_v45 }
 0x17a   : > { %946 = vst [vmem:[#allocation2 + $0x248] sm:$0xff] %v7156_v26  ;;  %v788_v61 = vsel %vm787_vm6, %v5882_v51, %v784_v36  ;;  %v841_v43 = vmul.f32 %v5886_v20, %v670_v42  ;;  %vm846_vm8 = vweird.f32 %v5886_v20  ;;  %v852_v25 = vor.u32 1.1754944e-38, %v851_v52 }
 0x17b   : > { %935 = vst [vmem:[#allocation2 + $0x268] sm:$0xff] %v7159_v30  ;;  %v793_v59 = vsel %vm790_vm7, %v792_v32, %v788_v61  ;;  %vm847_vm10 = vmor %vm845_vm9, %vm846_vm8  ;;  %vm850_vm11 = vcmp.eq.f32.partialorder %v849_v57, 8.507059e+37  ;;  %vm910_vm15 = vcmp.eq.f32.partialorder %v909_v44, 8.507059e+37 }
 0x17c   : > { %v7166_v63 = vmul.f32 %v793_v59, %v7058_v62  ;;  %v842_v37 = vsub.f32 1.0, %v841_v43  ;;  %v911_v62 = vand.u32 2147483648, %v674_v45 }
 0x17e   : > { %11439 = vst [vmem:[#allocation42_spill] sm:$0xff] %v7166_v63  ;;  %v843_v53 = vmul.f32 %v5886_v20, %v842_v37  ;;  %v912_v42 = vor.u32 1.1754944e-38, %v911_v62 }
 0x17f   : > { %939 = vst [vmem:[#allocation2 + $0x60] sm:$0xff] %v7166_v63  ;;  %v5888_v18 = vpop.eup %5887 }
 0x180   : > { %v844_v48 = vadd.f32 %v5886_v20, %v843_v53  ;;  %v901_v19 = vmul.f32 %v5888_v18, %v674_v45  ;;  %vm906_vm12 = vweird.f32 %v5888_v18 }
 0x181   : > { %vm907_vm14 = vmor %vm905_vm13, %vm906_vm12 }
 0x182   : > { %v848_v51 = vsel %vm847_vm10, %v5886_v20, %v844_v48  ;;  %v902_v24 = vsub.f32 1.0, %v901_v19 }
 0x183   : > { %v853_v56 = vsel %vm850_vm11, %v852_v25, %v848_v51 }
 0x184   : > { %v7170_v27 = vmul.f32 %v853_v56, %v7075_v55  ;;  %v903_v54 = vmul.f32 %v5888_v18, %v902_v24 }
 0x186   : > { %11440 = vst [vmem:[#allocation43_spill] sm:$0xff] %v7170_v27  ;;  %v904_v39 = vadd.f32 %v5888_v18, %v903_v54 }
 0x187   : > { %943 = vst [vmem:[#allocation2 + $0x70] sm:$0xff] %v7170_v27 }
 0x188   : > { %v908_v31 = vsel %vm907_vm14, %v5888_v18, %v904_v39 }
 0x189   : > { %v913_v49 = vsel %vm910_vm15, %v912_v42, %v908_v31  ;;  %951 = sbr.rel (%p5489_p13) target bundleno = 411 (0x19b), region = 72 }
 0x18a   : > { %v7174_v28 = vmul.f32 %v913_v49, %v7094_v22 }
 0x18c   : > { %11441 = vst [vmem:[#allocation44_spill] sm:$0xff] %v7174_v28 }
 0x18d   : > { %947 = vst [vmem:[#allocation2 + $0x198] sm:$0xff] %v7174_v28 }
 0x18e   : > { %v6391_v55 = vmov -inf  }
 0x18f   : > { %952 = vst [vmem:[#allocation2 + $0x1b0] sm:$0xff] %v6391_v55 }
 0x190   : > { %953 = vst [vmem:[#allocation2 + $0x110] sm:$0xff] %v6391_v55 }
 0x191   : > { %954 = vst [vmem:[#allocation2 + $0xd8] sm:$0xff] %v6391_v55 }
 0x192   : > { %955 = vst [vmem:[#allocation2 + $0x270] sm:$0xff] %v6391_v55 }
 0x193   : > { %956 = vst [vmem:[#allocation2 + $0xa8] sm:$0xff] %v6391_v55 }
 0x194   : > { %957 = vst [vmem:[#allocation2 + $0x148] sm:$0xff] %v6391_v55 }
 0x195   : > { %958 = vst [vmem:[#allocation2 + $0x258] sm:$0xff] %v6391_v55 }
 0x196   : > { %959 = vst [vmem:[#allocation2 + $0x1d8] sm:$0xff] %v6391_v55 }
 0x197   : > { %960 = vst [vmem:[#allocation2 + $0x38] sm:$0xff] %v6391_v55 }
 0x198   : > { %961 = vst [vmem:[#allocation2 + $0x180] sm:$0xff] %v6391_v55 }
 0x199   : > { %962 = vst [vmem:[#allocation2 + $0x278] sm:$0xff] %v6391_v55 }
 0x19a   : > { %963 = vst [vmem:[#allocation2 + $0x90] sm:$0xff] %v6391_v55 }
 0x19b PF: > { %s11443_s28 = sld [smem:[#allocation21_spill]] }
 0x1a1   : > { %p5490_p11 = scmp.le.s32.totalorder %s11443_s28, 0 }
 0x1a3   : > { %967 = sbr.rel (%p5490_p11) target bundleno = 661 (0x295), region = 76 }
 0x1a8   : > { %981 = vmatpush.msra.mxu0 %v6734_v1  ;;  %5564 = vmatpush.msra.mxu1 %v6734_v1  ;;  %v5491_v22 = vld [vmem:[%s6710_s24 + $0x20] sm:$0xff]  ;;  %v5494_v60 = vld [vmem:[%s6710_s24 + $0x38] sm:$0xff]  ;;  %v5497_v38 = vld [vmem:[%s6710_s24 + $0x50] sm:$0xff] }
 0x1a9   : > { %5565 = vmatpush.msra.mxu2 %v6734_v1  ;;  %5566 = vmatpush.msra.mxu3 %v6734_v1  ;;  %v5500_v47 = vld [vmem:[%s6710_s24 + $0x68] sm:$0xff]  ;;  %v5495_v45 = vld [vmem:[%s6710_s24 + $0x40] sm:$0xff]  ;;  %v5498_v36 = vld [vmem:[%s6710_s24 + $0x58] sm:$0xff] }
 0x1aa   : > { %982 = vmatpush.msra.mxu0 %v6736_v2  ;;  %5567 = vmatpush.msra.mxu1 %v6736_v2  ;;  %v5492_v46 = vld [vmem:[%s6710_s24 + $0x28] sm:$0xff]  ;;  %v5501_v20 = vld [vmem:[%s6710_s24 + $0x70] sm:$0xff]  ;;  %v5499_v43 = vld [vmem:[%s6710_s24 + $0x60] sm:$0xff] }
 0x1ab   : > { %5568 = vmatpush.msra.mxu2 %v6736_v2  ;;  %5569 = vmatpush.msra.mxu3 %v6736_v2  ;;  %v5493_v32 = vld [vmem:[%s6710_s24 + $0x30] sm:$0xff]  ;;  %v5496_v61 = vld [vmem:[%s6710_s24 + $0x48] sm:$0xff]  ;;  %v5502_v59 = vld [vmem:[%s6710_s24 + $0x78] sm:$0xff] }
 0x1ac   : > { %983 = vmatpush.msra.mxu0 %v6744_v3  ;;  %5570 = vmatpush.msra.mxu1 %v6744_v3 }
 0x1ad   : > { %5571 = vmatpush.msra.mxu2 %v6744_v3  ;;  %5572 = vmatpush.msra.mxu3 %v6744_v3 }
 0x1ae   : > { %984 = vmatpush.msra.mxu0 %v6752_v4  ;;  %5573 = vmatpush.msra.mxu1 %v6752_v4 }
 0x1af   : > { %5574 = vmatpush.msra.mxu2 %v6752_v4  ;;  %5575 = vmatpush.msra.mxu3 %v6752_v4 }
 0x1b0   : > { %985 = vmatpush.msra.mxu0 %v6760_v5  ;;  %5576 = vmatpush.msra.mxu1 %v6760_v5 }
 0x1b1   : > { %5577 = vmatpush.msra.mxu2 %v6760_v5  ;;  %5578 = vmatpush.msra.mxu3 %v6760_v5 }
 0x1b2   : > { %986 = vmatpush.msra.mxu0 %v6768_v6  ;;  %5579 = vmatpush.msra.mxu1 %v6768_v6 }
 0x1b3   : > { %5580 = vmatpush.msra.mxu2 %v6768_v6  ;;  %5581 = vmatpush.msra.mxu3 %v6768_v6 }
 0x1b4   : > { %987 = vmatpush.msra.mxu0 %v6776_v7  ;;  %5582 = vmatpush.msra.mxu1 %v6776_v7 }
 0x1b5   : > { %5583 = vmatpush.msra.mxu2 %v6776_v7  ;;  %5584 = vmatpush.msra.mxu3 %v6776_v7 }
 0x1b6   : > { %988 = vmatpush.msra.mxu0 %v6784_v8  ;;  %5585 = vmatpush.msra.mxu1 %v6784_v8 }
 0x1b7   : > { %5586 = vmatpush.msra.mxu2 %v6784_v8  ;;  %5587 = vmatpush.msra.mxu3 %v6784_v8 }
 0x1b8   : > { %989 = vmatpush.msra.mxu0 %v6792_v9  ;;  %5588 = vmatpush.msra.mxu1 %v6792_v9 }
 0x1b9   : > { %5589 = vmatpush.msra.mxu2 %v6792_v9  ;;  %5590 = vmatpush.msra.mxu3 %v6792_v9 }
 0x1ba   : > { %990 = vmatpush.msra.mxu0 %v6800_v10  ;;  %5591 = vmatpush.msra.mxu1 %v6800_v10 }
 0x1bb   : > { %5592 = vmatpush.msra.mxu2 %v6800_v10  ;;  %5593 = vmatpush.msra.mxu3 %v6800_v10 }
 0x1bc   : > { %991 = vmatpush.msra.mxu0 %v6808_v11  ;;  %5594 = vmatpush.msra.mxu1 %v6808_v11 }
 0x1bd   : > { %5595 = vmatpush.msra.mxu2 %v6808_v11  ;;  %5596 = vmatpush.msra.mxu3 %v6808_v11 }
 0x1be   : > { %992 = vmatpush.msra.mxu0 %v6816_v12  ;;  %5597 = vmatpush.msra.mxu1 %v6816_v12 }
 0x1bf   : > { %5598 = vmatpush.msra.mxu2 %v6816_v12  ;;  %5599 = vmatpush.msra.mxu3 %v6816_v12 }
 0x1c0   : > { %993 = vmatpush.msra.mxu0 %v6824_v13  ;;  %5600 = vmatpush.msra.mxu1 %v6824_v13 }
 0x1c1   : > { %5601 = vmatpush.msra.mxu2 %v6824_v13  ;;  %5602 = vmatpush.msra.mxu3 %v6824_v13 }
 0x1c2   : > { %994 = vmatpush.msra.mxu0 %v6832_v14  ;;  %5603 = vmatpush.msra.mxu1 %v6832_v14 }
 0x1c3   : > { %5604 = vmatpush.msra.mxu2 %v6832_v14  ;;  %5605 = vmatpush.msra.mxu3 %v6832_v14 }
 0x1c4   : > { %995 = vmatpush.msra.mxu0 %v6840_v15  ;;  %5606 = vmatpush.msra.mxu1 %v6840_v15 }
 0x1c5   : > { %5607 = vmatpush.msra.mxu2 %v6840_v15  ;;  %5608 = vmatpush.msra.mxu3 %v6840_v15 }
 0x1c6   : > { %996 = vmatpush.msra.mxu0 %v6848_v16  ;;  %5609 = vmatpush.msra.mxu1 %v6848_v16 }
 0x1c7   : > { %5610 = vmatpush.msra.mxu2 %v6848_v16  ;;  %5611 = vmatpush.msra.mxu3 %v6848_v16 }
 0x1c8   : > { %997 = vmatmul.f32.vlgmr.msra.gmra.mxu0 %v5491_v22  ;;  %1006 = vmatmul.f32.vlgmr.msra.gmra.mxu1 %v5494_v60 }
 0x1c9   : > { %1015 = vmatmul.f32.vlgmr.msra.gmra.mxu2 %v5497_v38  ;;  %1024 = vmatmul.f32.vlgmr.msra.gmra.mxu3 %v5500_v47 }
 0x1d0   : > { %1000 = vmatmul.f32.gmra.mxu0 %v5492_v46  ;;  %1009 = vmatmul.f32.gmra.mxu1 %v5495_v45 }
 0x1d1   : > { %1018 = vmatmul.f32.gmra.mxu2 %v5498_v36  ;;  %1027 = vmatmul.f32.gmra.mxu3 %v5501_v20 }
 0x1d8   : > { %1003 = vmatmul.f32.gmra.mxu0 %v5493_v32  ;;  %1012 = vmatmul.f32.gmra.mxu1 %v5496_v61 }
 0x1d9   : > { %1021 = vmatmul.f32.gmra.mxu2 %v5499_v43  ;;  %1030 = vmatmul.f32.gmra.mxu3 %v5502_v59 }
 0x245   : > { %v998_v37 = vpop.f32.mrf.mxu0  ;;  %v1007_v52 = vpop.f32.mrf.mxu1 }
 0x246   : > { %v7260_v53 = vadd.f32 %v6882_v33, %v998_v37  ;;  %v7263_v57 = vadd.f32 %v6882_v33, %v1007_v52 }
 0x248   : > { %v1034_v18 = vsub.f32 0.0, %v7260_v53  ;;  %v1037_v48 = vsub.f32 0.0, %v7263_v57 }
 0x24a   : > { %v1046_v19 = vmul.f32 1.442695, %v1034_v18  ;;  %v1052_v25 = vmul.f32 1.442695, %v1037_v48 }
 0x24c   : > { %5889 = vpow2.f32 %v1046_v19  ;;  %v1016_v51 = vpop.f32.mrf.mxu2  ;;  %v1025_v24 = vpop.f32.mrf.mxu3 }
 0x24d   : > { %5891 = vpow2.f32 %v1052_v25  ;;  %v7268_v56 = vadd.f32 %v6882_v33, %v1016_v51  ;;  %v7271_v62 = vadd.f32 %v6882_v33, %v1025_v24  ;;  %v1001_v54 = vpop.f32.mrf.mxu0  ;;  %v1010_v44 = vpop.f32.mrf.mxu1 }
 0x24e   : > { %v7274_v39 = vadd.f32 %v6882_v33, %v1001_v54  ;;  %v7277_v42 = vadd.f32 %v6882_v33, %v1010_v44 }
 0x24f   : > { %v1040_v31 = vsub.f32 0.0, %v7268_v56  ;;  %v1043_v49 = vsub.f32 0.0, %v7271_v62 }
 0x250   : > { %v1035_v55 = vsub.f32 0.0, %v7274_v39  ;;  %v1038_v22 = vsub.f32 0.0, %v7277_v42 }
 0x251   : > { %v1058_v60 = vmul.f32 1.442695, %v1040_v31  ;;  %v1064_v38 = vmul.f32 1.442695, %v1043_v49 }
 0x252   : > { %v5890_v47 = vpop.eup %5889  ;;  %v1048_v36 = vmul.f32 1.442695, %v1035_v55  ;;  %v1054_v32 = vmul.f32 1.442695, %v1038_v22 }
 0x253   : > { %v5892_v46 = vpop.eup %5891  ;;  %v1070_v45 = vadd.f32 1.0, %v5890_v47  ;;  %5893 = vpow2.f32 %v1058_v60 }
 0x254   : > { %v7283_v20 = vadd.f32 1.0, %v5892_v46  ;;  %5895 = vpow2.f32 %v1064_v38  ;;  %v1019_v61 = vpop.f32.mrf.mxu2  ;;  %v1028_v59 = vpop.f32.mrf.mxu3 }
 0x255   : > { %5897 = vrcp.f32 %v1070_v45  ;;  %v7287_v43 = vadd.f32 %v6882_v33, %v1019_v61  ;;  %v1091_v37 = vand.u32 2147483647, %v1070_v45  ;;  %v1004_v52 = vpop.f32.mrf.mxu0  ;;  %v1013_v18 = vpop.f32.mrf.mxu1  ;;  %v1093_v19 = vand.u32 2147483648, %v1070_v45 }
 0x256   : > { %5899 = vrcp.f32 %v7283_v20  ;;  %v1136_v25 = vand.u32 2147483647, %v7283_v20  ;;  %v1138_v54 = vand.u32 2147483648, %v7283_v20  ;;  %v7295_v31 = vadd.f32 %v6882_v33, %v1028_v59 }
 0x257   : > { %5901 = vpow2.f32 %v1048_v36  ;;  %v1041_v51 = vsub.f32 0.0, %v7287_v43  ;;  %vm1087_vm0 = vweird.f32 %v1070_v45  ;;  %v7300_v22 = vadd.f32 %v6882_v33, %v1004_v52 }
 0x258   : > { %5903 = vpow2.f32 %v1054_v32  ;;  %v7303_v60 = vadd.f32 %v6882_v33, %v1013_v18  ;;  %vm7305_vm1 = vcmp.eq.f32.partialorder %v1091_v37, 8.507059e+37  ;;  %vm1132_vm2 = vweird.f32 %v7283_v20 }
 0x259   : > { %v5894_v48 = vpop.eup %5893  ;;  %v1094_v32 = vor.u32 1.1754944e-38, %v1093_v19  ;;  %vm7312_vm3 = vcmp.eq.f32.partialorder %v1136_v25, 8.507059e+37  ;;  %v1060_v52 = vmul.f32 1.442695, %v1041_v51  ;;  %v1044_v37 = vsub.f32 0.0, %v7295_v31 }
 0x25a   : > { %v5896_v24 = vpop.eup %5895  ;;  %v7292_v44 = vadd.f32 1.0, %v5894_v48  ;;  %v1036_v21 = vsub.f32 0.0, %v7300_v22 }
 0x25b   : > { %v5898_v49 = vpop.eup %5897  ;;  %v7297_v55 = vadd.f32 1.0, %v5896_v24  ;;  %v1139_v24 = vor.u32 1.1754944e-38, %v1138_v54 }
 0x25c   : > { %v5900_v38 = vpop.eup %5899  ;;  %v1083_v47 = vmul.f32 %v5898_v49, %v1070_v45  ;;  %5905 = vrcp.f32 %v7292_v44  ;;  %v1181_v26 = vand.u32 2147483647, %v7292_v44  ;;  %vm1088_vm4 = vweird.f32 %v5898_v49 }
 0x25d   : > { %v5902_v36 = vpop.eup %5901  ;;  %v1128_v61 = vmul.f32 %v5900_v38, %v7283_v20  ;;  %5907 = vrcp.f32 %v7297_v55  ;;  %vm1133_vm5 = vweird.f32 %v5900_v38  ;;  %vm1177_vm6 = vweird.f32 %v7292_v44  ;;  %vm1089_vm7 = vmor %vm1087_vm0, %vm1088_vm4 }
 0x25e   : > { %v5904_v18 = vpop.eup %5903  ;;  %v1084_v48 = vsub.f32 1.0, %v1083_v47  ;;  %v7321_v25 = vadd.f32 1.0, %v5902_v36  ;;  %5909 = vpow2.f32 %v1060_v52  ;;  %v1226_v17 = vand.u32 2147483647, %v7297_v55  ;;  %vm1134_vm10 = vmor %vm1132_vm2, %vm1133_vm5 }
 0x25f   : > { %v1129_v28 = vsub.f32 1.0, %v1128_v61  ;;  %v7323_v27 = vadd.f32 1.0, %v5904_v18  ;;  %v1183_v61 = vand.u32 2147483648, %v7292_v44  ;;  %vm7331_vm8 = vcmp.eq.f32.partialorder %v1181_v26, 8.507059e+37 }
 0x260   : > { %v1085_v29 = vmul.f32 %v5898_v49, %v1084_v48  ;;  %5911 = vrcp.f32 %v7321_v25  ;;  %vm1222_vm9 = vweird.f32 %v7297_v55  ;;  %v1066_v45 = vmul.f32 1.442695, %v1044_v37 }
 0x261   : > { %v1130_v51 = vmul.f32 %v5900_v38, %v1129_v28  ;;  %5913 = vrcp.f32 %v7323_v27  ;;  %vm7347_vm11 = vcmp.eq.f32.partialorder %v1226_v17, 8.507059e+37  ;;  %vm1102_vm13 = vweird.f32 %v7321_v25 }
 0x262   : > { %v5906_v54 = vpop.eup %5905  ;;  %v1086_v47 = vadd.f32 %v5898_v49, %v1085_v29  ;;  %v1228_v29 = vand.u32 2147483648, %v7297_v55  ;;  %5915 = vpow2.f32 %v1066_v45  ;;  %vm1147_vm2 = vweird.f32 %v7323_v27  ;;  %v1022_v45 = vpop.f32.mrf.mxu2 }
 0x263   : > { %v1131_v48 = vadd.f32 %v5900_v38, %v1130_v51  ;;  %v1173_v36 = vmul.f32 %v5906_v54, %v7292_v44  ;;  %v5908_v28 = vpop.eup %5907  ;;  %vm1178_vm12 = vweird.f32 %v5906_v54  ;;  %v1151_v44 = vand.u32 2147483647, %v7323_v27 }
 0x264   : > { %v1090_v52 = vsel %vm1089_vm7, %v5898_v49, %v1086_v47  ;;  %v1218_v35 = vmul.f32 %v5908_v28, %v7297_v55  ;;  %v1184_v47 = vor.u32 1.1754944e-38, %v1183_v61  ;;  %v5910_v63 = vpop.eup %5909  ;;  %vm1223_vm14 = vweird.f32 %v5908_v28  ;;  %vm1179_vm15 = vmor %vm1177_vm6, %vm1178_vm12 }
 0x265   : > { %v1095_v51 = vsel %vm7305_vm1, %v1094_v32, %v1090_v52  ;;  %v1135_v26 = vsel %vm1134_vm10, %v5900_v38, %v1131_v48  ;;  %v1174_v19 = vsub.f32 1.0, %v1173_v36  ;;  %v1229_v32 = vor.u32 1.1754944e-38, %v1228_v29  ;;  %vm1224_vm0 = vmor %vm1222_vm9, %vm1223_vm14 }
 0x266   : > { %v1262_v58 = vmul.f32 %v1095_v51, %v7260_v53  ;;  %v1140_v49 = vsel %vm7312_vm3, %v1139_v24, %v1135_v26  ;;  %v1219_v46 = vsub.f32 1.0, %v1218_v35  ;;  %v5912_v38 = vpop.eup %5911  ;;  %v7353_v53 = vadd.f32 1.0, %v5910_v63 }
 0x267   : > { %v1265_v37 = vmul.f32 %v1140_v49, %v7263_v57  ;;  %v1175_v40 = vmul.f32 %v5906_v54, %v1174_v19  ;;  %v1098_v24 = vmul.f32 %v5912_v38, %v7321_v25  ;;  %v5914_v61 = vpop.eup %5913  ;;  %v1106_v35 = vand.u32 2147483647, %v7321_v25 }
 0x268   : > { %1274 = vst [vmem:[#allocation2 + $0x1b0] sm:$0xff] %v1262_v58  ;;  %v1220_v17 = vmul.f32 %v5908_v28, %v1219_v46  ;;  %v1108_v58 = vand.u32 2147483648, %v7321_v25  ;;  %5917 = vrcp.f32 %v7353_v53  ;;  %v1050_v57 = vmul.f32 1.442695, %v1036_v21  ;;  %v5916_v51 = vpop.eup %5915 }
 0x269   : > { %1277 = vst [vmem:[#allocation2 + $0x270] sm:$0xff] %v1265_v37  ;;  %v1176_v59 = vadd.f32 %v5906_v54, %v1175_v40  ;;  %v1099_v48 = vsub.f32 1.0, %v1098_v24  ;;  %v1143_v40 = vmul.f32 %v5914_v61, %v7323_v27  ;;  %vm1103_vm1 = vweird.f32 %v5912_v38 }
 0x26a   : > { %v1221_v19 = vadd.f32 %v5908_v28, %v1220_v17  ;;  %vm1148_vm3 = vweird.f32 %v5914_v61  ;;  %v1153_v18 = vand.u32 2147483648, %v7323_v27  ;;  %5919 = vpow2.f32 %v1050_v57  ;;  %vm1104_vm4 = vmor %vm1102_vm13, %vm1103_vm1 }
 0x26b   : > { %v1180_v63 = vsel %vm1179_vm15, %v5906_v54, %v1176_v59  ;;  %v1100_v21 = vmul.f32 %v5912_v38, %v1099_v48  ;;  %v1144_v54 = vsub.f32 1.0, %v1143_v40  ;;  %v7373_v37 = vadd.f32 1.0, %v5916_v51  ;;  %vm1149_vm7 = vmor %vm1147_vm2, %vm1148_vm3 }
 0x26c   : > { %v1185_v36 = vsel %vm7331_vm8, %v1184_v47, %v1180_v63  ;;  %v1225_v29 = vsel %vm1224_vm0, %v5908_v28, %v1221_v19  ;;  %vm1107_vm5 = vcmp.eq.f32.partialorder %v1106_v35, 8.507059e+37  ;;  %v1109_v20 = vor.u32 1.1754944e-38, %v1108_v58 }
 0x26d   : > { %v1268_v52 = vmul.f32 %v1185_v36, %v7268_v56  ;;  %v1230_v26 = vsel %vm7347_vm11, %v1229_v32, %v1225_v29  ;;  %v1101_v49 = vadd.f32 %v5912_v38, %v1100_v21  ;;  %v1145_v47 = vmul.f32 %v5914_v61, %v1144_v54  ;;  %v1031_v56 = vpop.f32.mrf.mxu3 }
 0x26e   : > { %v1271_v55 = vmul.f32 %v1230_v26, %v7271_v62  ;;  %v5918_v28 = vpop.eup %5917  ;;  %v11452_v46 = vsub.f32 0.0, %v7303_v60  ;;  %v7381_v59 = vadd.f32 %v6882_v33, %v1022_v45  ;;  %vm1152_vm6 = vcmp.eq.f32.partialorder %v1151_v44, 8.507059e+37 }
 0x26f   : > { %1280 = vst [vmem:[#allocation2 + $0x258] sm:$0xff] %v1268_v52  ;;  %v1105_v62 = vsel %vm1104_vm4, %v5912_v38, %v1101_v49  ;;  %v1146_v17 = vadd.f32 %v5914_v61, %v1145_v47  ;;  %v1188_v24 = vmul.f32 %v5918_v28, %v7353_v53  ;;  %v1154_v25 = vor.u32 1.1754944e-38, %v1153_v18 }
 0x270   : > { %v1056_v32 = vmul.f32 1.442695, %v11452_v46  ;;  %1283 = vst [vmem:[#allocation2 + $0x180] sm:$0xff] %v1271_v55  ;;  %v1110_v57 = vsel %vm1107_vm5, %v1109_v20, %v1105_v62  ;;  %5921 = vrcp.f32 %v7373_v37  ;;  %v7389_v35 = vadd.f32 %v6882_v33, %v1031_v56  ;;  %v5920_v48 = vpop.eup %5919 }
 0x271   : > { %v1263_v58 = vmul.f32 %v1110_v57, %v7274_v39  ;;  %v1150_v63 = vsel %vm1149_vm7, %v5914_v61, %v1146_v17  ;;  %v1189_v19 = vsub.f32 1.0, %v1188_v24  ;;  %v1196_v38 = vand.u32 2147483647, %v7353_v53 }
 0x272   : > { %v1155_v40 = vsel %vm1152_vm6, %v1154_v25, %v1150_v63  ;;  %v1198_v36 = vand.u32 2147483648, %v7353_v53  ;;  %5923 = vpow2.f32 %v1056_v32  ;;  %v1042_v27 = vsub.f32 0.0, %v7381_v59 }
 0x273   : > { %1275 = vst [vmem:[#allocation2 + $0x110] sm:$0xff] %v1263_v58  ;;  %v1266_v44 = vmul.f32 %v1155_v40, %v7277_v42  ;;  %v1190_v52 = vmul.f32 %v5918_v28, %v1189_v19  ;;  %vm1193_vm8 = vweird.f32 %v5918_v28  ;;  %v1072_v29 = vadd.f32 1.0, %v5920_v48 }
 0x274   : > { %v1062_v21 = vmul.f32 1.442695, %v1042_v27  ;;  %v1045_v39 = vsub.f32 0.0, %v7389_v35  ;;  %vm1192_vm9 = vweird.f32 %v7353_v53  ;;  %v1199_v45 = vor.u32 1.1754944e-38, %v1198_v36 }
 0x275   : > { %1278 = vst [vmem:[#allocation2 + $0xa8] sm:$0xff] %v1266_v44  ;;  %v1191_v61 = vadd.f32 %v5918_v28, %v1190_v52  ;;  %5925 = vrcp.f32 %v1072_v29  ;;  %vm1194_vm10 = vmor %vm1192_vm9, %vm1193_vm8  ;;  %vm1197_vm11 = vcmp.eq.f32.partialorder %v1196_v38, 8.507059e+37  ;;  %v1241_v20 = vand.u32 2147483647, %v7373_v37 }
 0x276   : > { %v5922_v54 = vpop.eup %5921  ;;  %5927 = vpow2.f32 %v1062_v21  ;;  %v1068_v51 = vmul.f32 1.442695, %v1045_v39  ;;  %v1243_v53 = vand.u32 2147483648, %v7373_v37  ;;  %vm1237_vm13 = vweird.f32 %v7373_v37 }
 0x277   : > { %v1195_v26 = vsel %vm1194_vm10, %v5918_v28, %v1191_v61  ;;  %v1233_v42 = vmul.f32 %v5922_v54, %v7373_v37  ;;  %vm1238_vm12 = vweird.f32 %v5922_v54  ;;  %vm1242_vm15 = vcmp.eq.f32.partialorder %v1241_v20, 8.507059e+37 }
 0x278   : > { %v5924_v18 = vpop.eup %5923  ;;  %v1200_v55 = vsel %vm1197_vm11, %v1199_v45, %v1195_v26  ;;  %5929 = vpow2.f32 %v1068_v51  ;;  %vm1239_vm14 = vmor %vm1237_vm13, %vm1238_vm12  ;;  %vm1117_vm0 = vweird.f32 %v1072_v29  ;;  %v1121_v63 = vand.u32 2147483647, %v1072_v29 }
 0x279   : > { %v1269_v49 = vmul.f32 %v1200_v55, %v7287_v43  ;;  %v1234_v47 = vsub.f32 1.0, %v1233_v42  ;;  %v1075_v56 = vadd.f32 1.0, %v5924_v18  ;;  %v1244_v43 = vor.u32 1.1754944e-38, %v1243_v53 }
 0x27a   : > { %v1123_v19 = vand.u32 2147483648, %v1072_v29  ;;  %vm1122_vm3 = vcmp.eq.f32.partialorder %v1121_v63, 8.507059e+37 }
 0x27b   : > { %v5926_v46 = vpop.eup %5925  ;;  %1281 = vst [vmem:[#allocation2 + $0x1d8] sm:$0xff] %v1269_v49  ;;  %v1235_v32 = vmul.f32 %v5922_v54, %v1234_v47  ;;  %5931 = vrcp.f32 %v1075_v56  ;;  %vm1162_vm4 = vweird.f32 %v1075_v56  ;;  %v1168_v45 = vand.u32 2147483648, %v1075_v56 }
 0x27c   : > { %v5928_v28 = vpop.eup %5927  ;;  %v1113_v62 = vmul.f32 %v5926_v46, %v1072_v29  ;;  %vm1118_vm1 = vweird.f32 %v5926_v46  ;;  %v1124_v52 = vor.u32 1.1754944e-38, %v1123_v19  ;;  %v1166_v29 = vand.u32 2147483647, %v1075_v56 }
 0x27d   : > { %v1236_v17 = vadd.f32 %v5922_v54, %v1235_v32  ;;  %v1078_v24 = vadd.f32 1.0, %v5928_v28  ;;  %vm1119_vm2 = vmor %vm1117_vm0, %vm1118_vm1  ;;  %v1169_v49 = vor.u32 1.1754944e-38, %v1168_v45 }
 0x27e   : > { %v5930_v57 = vpop.eup %5929  ;;  %v1114_v25 = vsub.f32 1.0, %v1113_v62  ;;  %vm1167_vm7 = vcmp.eq.f32.partialorder %v1166_v29, 8.507059e+37 }
 0x27f   : > { %v1240_v58 = vsel %vm1239_vm14, %v5922_v54, %v1236_v17  ;;  %5933 = vrcp.f32 %v1078_v24  ;;  %v1081_v40 = vadd.f32 1.0, %v5930_v57  ;;  %v1211_v47 = vand.u32 2147483647, %v1078_v24 }
 0x280   : > { %v1245_v38 = vsel %vm1242_vm15, %v1244_v43, %v1240_v58  ;;  %v1115_v48 = vmul.f32 %v5926_v46, %v1114_v25  ;;  %v1213_v20 = vand.u32 2147483648, %v1078_v24  ;;  %vm1207_vm9 = vweird.f32 %v1078_v24 }
 0x281   : > { %v5932_v36 = vpop.eup %5931  ;;  %v1272_v27 = vmul.f32 %v1245_v38, %v7295_v31  ;;  %5935 = vrcp.f32 %v1081_v40  ;;  %vm1212_vm11 = vcmp.eq.f32.partialorder %v1211_v47, 8.507059e+37  ;;  %v1258_v57 = vand.u32 2147483648, %v1081_v40 }
 0x282   : > { %v1116_v44 = vadd.f32 %v5926_v46, %v1115_v48  ;;  %v1158_v37 = vmul.f32 %v5932_v36, %v1075_v56  ;;  %vm1163_vm5 = vweird.f32 %v5932_v36  ;;  %v1214_v17 = vor.u32 1.1754944e-38, %v1213_v20 }
 0x283   : > { %1284 = vst [vmem:[#allocation2 + $0x278] sm:$0xff] %v1272_v27  ;;  %vm1164_vm6 = vmor %vm1162_vm4, %vm1163_vm5  ;;  %v1256_v58 = vand.u32 2147483647, %v1081_v40  ;;  %vm1252_vm13 = vweird.f32 %v1081_v40  ;;  %v1259_v48 = vor.u32 1.1754944e-38, %v1258_v57 }
 0x284   : > { %v1120_v21 = vsel %vm1119_vm2, %v5926_v46, %v1116_v44  ;;  %v1159_v39 = vsub.f32 1.0, %v1158_v37 }
 0x285   : > { %v5934_v61 = vpop.eup %5933  ;;  %v1125_v54 = vsel %vm1122_vm3, %v1124_v52, %v1120_v21  ;;  %vm1257_vm15 = vcmp.eq.f32.partialorder %v1256_v58, 8.507059e+37 }
 0x286   : > { %v1264_v51 = vmul.f32 %v1125_v54, %v7300_v22  ;;  %v1160_v26 = vmul.f32 %v5932_v36, %v1159_v39  ;;  %v1203_v42 = vmul.f32 %v5934_v61, %v1078_v24  ;;  %vm1208_vm8 = vweird.f32 %v5934_v61 }
 0x287   : > { %v5936_v55 = vpop.eup %5935  ;;  %vm1209_vm10 = vmor %vm1207_vm9, %vm1208_vm8 }
 0x288   : > { %1276 = vst [vmem:[#allocation2 + $0xd8] sm:$0xff] %v1264_v51  ;;  %v1161_v31 = vadd.f32 %v5932_v36, %v1160_v26  ;;  %v1204_v18 = vsub.f32 1.0, %v1203_v42  ;;  %v1248_v32 = vmul.f32 %v5936_v55, %v1081_v40  ;;  %vm1253_vm12 = vweird.f32 %v5936_v55 }
 0x289   : > { %vm1254_vm14 = vmor %vm1252_vm13, %vm1253_vm12 }
 0x28a   : > { %v1165_v53 = vsel %vm1164_vm6, %v5932_v36, %v1161_v31  ;;  %v1205_v46 = vmul.f32 %v5934_v61, %v1204_v18  ;;  %v1249_v62 = vsub.f32 1.0, %v1248_v32 }
 0x28b   : > { %v1170_v28 = vsel %vm1167_vm7, %v1169_v49, %v1165_v53 }
 0x28c   : > { %v1267_v56 = vmul.f32 %v1170_v28, %v7303_v60  ;;  %v1206_v22 = vadd.f32 %v5934_v61, %v1205_v46  ;;  %v1250_v25 = vmul.f32 %v5936_v55, %v1249_v62 }
 0x28e   : > { %1279 = vst [vmem:[#allocation2 + $0x148] sm:$0xff] %v1267_v56  ;;  %v1210_v43 = vsel %vm1209_vm10, %v5934_v61, %v1206_v22  ;;  %v1251_v38 = vadd.f32 %v5936_v55, %v1250_v25 }
 0x28f   : > { %v1215_v63 = vsel %vm1212_vm11, %v1214_v17, %v1210_v43 }
 0x290   : > { %v1270_v19 = vmul.f32 %v1215_v63, %v7381_v59  ;;  %v1255_v60 = vsel %vm1254_vm14, %v5936_v55, %v1251_v38 }
 0x291   : > { %v1260_v24 = vsel %vm1257_vm15, %v1259_v48, %v1255_v60 }
 0x292   : > { %1282 = vst [vmem:[#allocation2 + $0x38] sm:$0xff] %v1270_v19  ;;  %v1273_v36 = vmul.f32 %v1260_v24, %v7389_v35 }
 0x294   : > { %1285 = vst [vmem:[#allocation2 + $0x90] sm:$0xff] %v1273_v36 }
 0x295 PF: > { %s11453_s11 = sld [smem:[#allocation21_spill]] }
 0x29b   : > { %p5503_p2 = scmp.ne.s32.totalorder %s11453_s11, 1 }
 0x29d   : > { %1289 = sbr.rel (%p5503_p2) target bundleno = 687 (0x2af), region = 80 }
 0x2a2   : > { %v6392_v27 = vmov -inf  }
 0x2a3   : > { %1291 = vst [vmem:[#allocation2 + $0x208] sm:$0xff] %v6392_v27 }
 0x2a4   : > { %1292 = vst [vmem:[#allocation2 + $0x220] sm:$0xff] %v6392_v27 }
 0x2a5   : > { %1293 = vst [vmem:[#allocation2 + $0x1f8] sm:$0xff] %v6392_v27 }
 0x2a6   : > { %1294 = vst [vmem:[#allocation2 + $0x238] sm:$0xff] %v6392_v27 }
 0x2a7   : > { %1295 = vst [vmem:[#allocation2 + $0x8] sm:$0xff] %v6392_v27 }
 0x2a8   : > { %1296 = vst [vmem:[#allocation2 + $0x1e8] sm:$0xff] %v6392_v27 }
 0x2a9   : > { %1297 = vst [vmem:[#allocation2 + $0x128] sm:$0xff] %v6392_v27 }
 0x2aa   : > { %1298 = vst [vmem:[#allocation2 + $0xe8] sm:$0xff] %v6392_v27 }
 0x2ab   : > { %1299 = vst [vmem:[#allocation2 + $0x80] sm:$0xff] %v6392_v27 }
 0x2ac   : > { %1300 = vst [vmem:[#allocation2 + $0x130] sm:$0xff] %v6392_v27 }
 0x2ad   : > { %1301 = vst [vmem:[#allocation2 + $0x140] sm:$0xff] %v6392_v27 }
 0x2ae   : > { %1302 = vst [vmem:[#allocation2 + $0x58] sm:$0xff] %v6392_v27 }
 0x2af PF: > { %s11454_s5 = sld [smem:[#allocation21_spill]] }
 0x2b5   : > { %p5504_p8 = scmp.ge.s32.totalorder %s11454_s5, 1 }
 0x2b7   : > { %1306 = sbr.rel (%p5504_p8) target bundleno = 936 (0x3a8), region = 84 }
 0x2bc   : > { %1319 = vmatpush.msra.mxu0 %v6734_v1  ;;  %5612 = vmatpush.msra.mxu1 %v6734_v1 }
 0x2bd   : > { %5613 = vmatpush.msra.mxu2 %v6734_v1  ;;  %5614 = vmatpush.msra.mxu3 %v6734_v1  ;;  %v1307_v1 = vld [vmem:[%s6717_s2] sm:$0xff] }
 0x2be   : > { %1320 = vmatpush.msra.mxu0 %v6736_v2  ;;  %5615 = vmatpush.msra.mxu1 %v6736_v2 }
 0x2bf   : > { %5616 = vmatpush.msra.mxu2 %v6736_v2  ;;  %5617 = vmatpush.msra.mxu3 %v6736_v2  ;;  %v1310_v2 = vld [vmem:[%s6717_s2 + $0x18] sm:$0xff] }
 0x2c0   : > { %1321 = vmatpush.msra.mxu0 %v6744_v3  ;;  %5618 = vmatpush.msra.mxu1 %v6744_v3 }
 0x2c1   : > { %5619 = vmatpush.msra.mxu2 %v6744_v3  ;;  %5620 = vmatpush.msra.mxu3 %v6744_v3  ;;  %v1313_v3 = vld [vmem:[%s6717_s2 + $0x30] sm:$0xff] }
 0x2c2   : > { %1322 = vmatpush.msra.mxu0 %v6752_v4  ;;  %5621 = vmatpush.msra.mxu1 %v6752_v4 }
 0x2c3   : > { %5622 = vmatpush.msra.mxu2 %v6752_v4  ;;  %5623 = vmatpush.msra.mxu3 %v6752_v4  ;;  %v1316_v4 = vld [vmem:[%s6717_s2 + $0x48] sm:$0xff] }
 0x2c4   : > { %1323 = vmatpush.msra.mxu0 %v6760_v5  ;;  %5624 = vmatpush.msra.mxu1 %v6760_v5 }
 0x2c5   : > { %5625 = vmatpush.msra.mxu2 %v6760_v5  ;;  %5626 = vmatpush.msra.mxu3 %v6760_v5  ;;  %v1308_v5 = vld [vmem:[%s6717_s2 + $0x8] sm:$0xff] }
 0x2c6   : > { %1324 = vmatpush.msra.mxu0 %v6768_v6  ;;  %5627 = vmatpush.msra.mxu1 %v6768_v6 }
 0x2c7   : > { %5628 = vmatpush.msra.mxu2 %v6768_v6  ;;  %5629 = vmatpush.msra.mxu3 %v6768_v6  ;;  %v1311_v6 = vld [vmem:[%s6717_s2 + $0x20] sm:$0xff] }
 0x2c8   : > { %1325 = vmatpush.msra.mxu0 %v6776_v7  ;;  %5630 = vmatpush.msra.mxu1 %v6776_v7 }
 0x2c9   : > { %5631 = vmatpush.msra.mxu2 %v6776_v7  ;;  %5632 = vmatpush.msra.mxu3 %v6776_v7  ;;  %v1314_v7 = vld [vmem:[%s6717_s2 + $0x38] sm:$0xff] }
 0x2ca   : > { %1326 = vmatpush.msra.mxu0 %v6784_v8  ;;  %5633 = vmatpush.msra.mxu1 %v6784_v8 }
 0x2cb   : > { %5634 = vmatpush.msra.mxu2 %v6784_v8  ;;  %5635 = vmatpush.msra.mxu3 %v6784_v8  ;;  %v1317_v8 = vld [vmem:[%s6717_s2 + $0x50] sm:$0xff] }
 0x2cc   : > { %1327 = vmatpush.msra.mxu0 %v6792_v9  ;;  %5636 = vmatpush.msra.mxu1 %v6792_v9 }
 0x2cd   : > { %5637 = vmatpush.msra.mxu2 %v6792_v9  ;;  %5638 = vmatpush.msra.mxu3 %v6792_v9  ;;  %v1309_v9 = vld [vmem:[%s6717_s2 + $0x10] sm:$0xff] }
 0x2ce   : > { %1328 = vmatpush.msra.mxu0 %v6800_v10  ;;  %5639 = vmatpush.msra.mxu1 %v6800_v10 }
 0x2cf   : > { %5640 = vmatpush.msra.mxu2 %v6800_v10  ;;  %5641 = vmatpush.msra.mxu3 %v6800_v10  ;;  %v1312_v10 = vld [vmem:[%s6717_s2 + $0x28] sm:$0xff] }
 0x2d0   : > { %1329 = vmatpush.msra.mxu0 %v6808_v11  ;;  %5642 = vmatpush.msra.mxu1 %v6808_v11 }
 0x2d1   : > { %5643 = vmatpush.msra.mxu2 %v6808_v11  ;;  %5644 = vmatpush.msra.mxu3 %v6808_v11  ;;  %v1315_v11 = vld [vmem:[%s6717_s2 + $0x40] sm:$0xff] }
 0x2d2   : > { %1330 = vmatpush.msra.mxu0 %v6816_v12  ;;  %5645 = vmatpush.msra.mxu1 %v6816_v12 }
 0x2d3   : > { %5646 = vmatpush.msra.mxu2 %v6816_v12  ;;  %5647 = vmatpush.msra.mxu3 %v6816_v12  ;;  %v1318_v12 = vld [vmem:[%s6717_s2 + $0x58] sm:$0xff] }
 0x2d4   : > { %1331 = vmatpush.msra.mxu0 %v6824_v13  ;;  %5648 = vmatpush.msra.mxu1 %v6824_v13 }
 0x2d5   : > { %5649 = vmatpush.msra.mxu2 %v6824_v13  ;;  %5650 = vmatpush.msra.mxu3 %v6824_v13 }
 0x2d6   : > { %1332 = vmatpush.msra.mxu0 %v6832_v14  ;;  %5651 = vmatpush.msra.mxu1 %v6832_v14 }
 0x2d7   : > { %5652 = vmatpush.msra.mxu2 %v6832_v14  ;;  %5653 = vmatpush.msra.mxu3 %v6832_v14 }
 0x2d8   : > { %1333 = vmatpush.msra.mxu0 %v6840_v15  ;;  %5654 = vmatpush.msra.mxu1 %v6840_v15 }
 0x2d9   : > { %5655 = vmatpush.msra.mxu2 %v6840_v15  ;;  %5656 = vmatpush.msra.mxu3 %v6840_v15 }
 0x2da   : > { %1334 = vmatpush.msra.mxu0 %v6848_v16  ;;  %5657 = vmatpush.msra.mxu1 %v6848_v16 }
 0x2db   : > { %5658 = vmatpush.msra.mxu2 %v6848_v16  ;;  %5659 = vmatpush.msra.mxu3 %v6848_v16 }
 0x2dc   : > { %1335 = vmatmul.f32.vlgmr.msra.gmra.mxu0 %v1307_v1  ;;  %1344 = vmatmul.f32.vlgmr.msra.gmra.mxu1 %v1310_v2 }
 0x2dd   : > { %1353 = vmatmul.f32.vlgmr.msra.gmra.mxu2 %v1313_v3  ;;  %1362 = vmatmul.f32.vlgmr.msra.gmra.mxu3 %v1316_v4 }
 0x2e4   : > { %1338 = vmatmul.f32.gmra.mxu0 %v1308_v5  ;;  %1347 = vmatmul.f32.gmra.mxu1 %v1311_v6 }
 0x2e5   : > { %1356 = vmatmul.f32.gmra.mxu2 %v1314_v7  ;;  %1365 = vmatmul.f32.gmra.mxu3 %v1317_v8 }
 0x2ec   : > { %1341 = vmatmul.f32.gmra.mxu0 %v1309_v9  ;;  %1350 = vmatmul.f32.gmra.mxu1 %v1312_v10 }
 0x2ed   : > { %1359 = vmatmul.f32.gmra.mxu2 %v1315_v11  ;;  %1368 = vmatmul.f32.gmra.mxu3 %v1318_v12 }
 0x359   : > { %v1336_v13 = vpop.f32.mrf.mxu0  ;;  %v1345_v14 = vpop.f32.mrf.mxu1 }
 0x35a   : > { %v7487_v15 = vadd.f32 %v6882_v33, %v1336_v13  ;;  %v7490_v16 = vadd.f32 %v6882_v33, %v1345_v14 }
 0x35c   : > { %v1372_v59 = vsub.f32 0.0, %v7487_v15  ;;  %v1375_v35 = vsub.f32 0.0, %v7490_v16 }
 0x35e   : > { %v1384_v40 = vmul.f32 1.442695, %v1372_v59  ;;  %v1390_v44 = vmul.f32 1.442695, %v1375_v35 }
 0x360   : > { %5937 = vpow2.f32 %v1384_v40  ;;  %v1354_v37 = vpop.f32.mrf.mxu2  ;;  %v1363_v52 = vpop.f32.mrf.mxu3 }
 0x361   : > { %5939 = vpow2.f32 %v1390_v44  ;;  %v7495_v21 = vadd.f32 %v6882_v33, %v1354_v37  ;;  %v7498_v39 = vadd.f32 %v6882_v33, %v1363_v52  ;;  %v1339_v61 = vpop.f32.mrf.mxu0  ;;  %v1348_v54 = vpop.f32.mrf.mxu1 }
 0x362   : > { %v7501_v29 = vadd.f32 %v6882_v33, %v1339_v61  ;;  %v7504_v45 = vadd.f32 %v6882_v33, %v1348_v54 }
 0x363   : > { %v1378_v51 = vsub.f32 0.0, %v7495_v21  ;;  %v1381_v26 = vsub.f32 0.0, %v7498_v39 }
 0x364   : > { %v1373_v42 = vsub.f32 0.0, %v7501_v29  ;;  %v1376_v31 = vsub.f32 0.0, %v7504_v45 }
 0x365   : > { %v1396_v18 = vmul.f32 1.442695, %v1378_v51  ;;  %v1402_v55 = vmul.f32 1.442695, %v1381_v26 }
 0x366   : > { %v5938_v49 = vpop.eup %5937  ;;  %v1386_v53 = vmul.f32 1.442695, %v1373_v42  ;;  %v1392_v32 = vmul.f32 1.442695, %v1376_v31 }
 0x367   : > { %v5940_v47 = vpop.eup %5939  ;;  %v1408_v20 = vadd.f32 1.0, %v5938_v49  ;;  %5941 = vpow2.f32 %v1396_v18 }
 0x368   : > { %v7510_v46 = vadd.f32 1.0, %v5940_v47  ;;  %5943 = vpow2.f32 %v1402_v55  ;;  %v1357_v28 = vpop.f32.mrf.mxu2  ;;  %v1366_v22 = vpop.f32.mrf.mxu3 }
 0x369   : > { %5945 = vrcp.f32 %v1408_v20  ;;  %v7514_v56 = vadd.f32 %v6882_v33, %v1357_v28  ;;  %v1429_v62 = vand.u32 2147483647, %v1408_v20  ;;  %v1342_v17 = vpop.f32.mrf.mxu0  ;;  %v1351_v57 = vpop.f32.mrf.mxu1  ;;  %v1431_v25 = vand.u32 2147483648, %v1408_v20 }
 0x36a   : > { %5947 = vrcp.f32 %v7510_v46  ;;  %v1474_v58 = vand.u32 2147483647, %v7510_v46  ;;  %v1476_v38 = vand.u32 2147483648, %v7510_v46  ;;  %v7522_v60 = vadd.f32 %v6882_v33, %v1366_v22 }
 0x36b   : > { %5949 = vpow2.f32 %v1386_v53  ;;  %v1379_v63 = vsub.f32 0.0, %v7514_v56  ;;  %vm1425_vm0 = vweird.f32 %v1408_v20  ;;  %v7527_v27 = vadd.f32 %v6882_v33, %v1342_v17 }
 0x36c   : > { %5951 = vpow2.f32 %v1392_v32  ;;  %v7530_v1 = vadd.f32 %v6882_v33, %v1351_v57  ;;  %vm7532_vm1 = vcmp.eq.f32.partialorder %v1429_v62, 8.507059e+37  ;;  %vm1470_vm2 = vweird.f32 %v7510_v46 }
 0x36d   : > { %v5942_v43 = vpop.eup %5941  ;;  %v1432_v6 = vor.u32 1.1754944e-38, %v1431_v25  ;;  %vm7539_vm3 = vcmp.eq.f32.partialorder %v1474_v58, 8.507059e+37  ;;  %v1398_v9 = vmul.f32 1.442695, %v1379_v63  ;;  %v1477_v12 = vor.u32 1.1754944e-38, %v1476_v38 }
 0x36e   : > { %v5944_v19 = vpop.eup %5943  ;;  %v7519_v48 = vadd.f32 1.0, %v5942_v43  ;;  %v1382_v13 = vsub.f32 0.0, %v7522_v60  ;;  %v1374_v35 = vsub.f32 0.0, %v7527_v27  ;;  %v1377_v40 = vsub.f32 0.0, %v7530_v1 }
 0x36f   : > { %v5946_v24 = vpop.eup %5945  ;;  %v7524_v36 = vadd.f32 1.0, %v5944_v19 }
 0x370   : > { %v5948_v2 = vpop.eup %5947  ;;  %v1421_v3 = vmul.f32 %v5946_v24, %v1408_v20  ;;  %5953 = vrcp.f32 %v7519_v48  ;;  %v1519_v59 = vand.u32 2147483647, %v7519_v48  ;;  %vm1426_vm4 = vweird.f32 %v5946_v24 }
 0x371   : > { %v5950_v5 = vpop.eup %5949  ;;  %v1466_v7 = vmul.f32 %v5948_v2, %v7510_v46  ;;  %5955 = vrcp.f32 %v7524_v36  ;;  %vm1471_vm5 = vweird.f32 %v5948_v2  ;;  %vm1515_vm6 = vweird.f32 %v7519_v48  ;;  %vm1427_vm7 = vmor %vm1425_vm0, %vm1426_vm4 }
 0x372   : > { %v5952_v10 = vpop.eup %5951  ;;  %v1422_v11 = vsub.f32 1.0, %v1421_v3  ;;  %v7548_v37 = vadd.f32 1.0, %v5950_v5  ;;  %5957 = vpow2.f32 %v1398_v9  ;;  %v1521_v26 = vand.u32 2147483648, %v7519_v48  ;;  %vm1472_vm10 = vmor %vm1470_vm2, %vm1471_vm5 }
 0x373   : > { %v1467_v14 = vsub.f32 1.0, %v1466_v7  ;;  %v7550_v52 = vadd.f32 1.0, %v5952_v10  ;;  %v1564_v42 = vand.u32 2147483647, %v7524_v36  ;;  %vm7558_vm8 = vcmp.eq.f32.partialorder %v1519_v59, 8.507059e+37 }
 0x374   : > { %v1423_v44 = vmul.f32 %v5946_v24, %v1422_v11  ;;  %5959 = vrcp.f32 %v7548_v37  ;;  %vm1560_vm9 = vweird.f32 %v7524_v36  ;;  %v1566_v53 = vand.u32 2147483648, %v7524_v36 }
 0x375   : > { %v1468_v61 = vmul.f32 %v5948_v2, %v1467_v14  ;;  %5961 = vrcp.f32 %v7550_v52  ;;  %v1404_v20 = vmul.f32 1.442695, %v1382_v13  ;;  %v1522_v43 = vor.u32 1.1754944e-38, %v1521_v26 }
 0x376   : > { %v5954_v54 = vpop.eup %5953  ;;  %v1424_v51 = vadd.f32 %v5946_v24, %v1423_v44  ;;  %vm7574_vm11 = vcmp.eq.f32.partialorder %v1564_v42, 8.507059e+37  ;;  %vm1440_vm13 = vweird.f32 %v7548_v37  ;;  %v1388_v7 = vmul.f32 1.442695, %v1374_v35  ;;  %v1360_v44 = vpop.f32.mrf.mxu2 }
 0x377   : > { %v1469_v31 = vadd.f32 %v5948_v2, %v1468_v61  ;;  %v1511_v18 = vmul.f32 %v5954_v54, %v7519_v48  ;;  %v5956_v49 = vpop.eup %5955  ;;  %vm1516_vm12 = vweird.f32 %v5954_v54  ;;  %5963 = vpow2.f32 %v1404_v20 }
 0x378   : > { %v1428_v47 = vsel %vm1427_vm7, %v5946_v24, %v1424_v51  ;;  %v1556_v62 = vmul.f32 %v5956_v49, %v7524_v36  ;;  %v5958_v25 = vpop.eup %5957  ;;  %v1567_v24 = vor.u32 1.1754944e-38, %v1566_v53  ;;  %vm1561_vm14 = vweird.f32 %v5956_v49  ;;  %vm1517_vm15 = vmor %vm1515_vm6, %vm1516_vm12 }
 0x379   : > { %v1433_v32 = vsel %vm7532_vm1, %v1432_v6, %v1428_v47  ;;  %v1473_v28 = vsel %vm1472_vm10, %v5948_v2, %v1469_v31  ;;  %v1512_v22 = vsub.f32 1.0, %v1511_v18  ;;  %v1446_v6 = vand.u32 2147483648, %v7548_v37  ;;  %vm1562_vm0 = vmor %vm1560_vm9, %vm1561_vm14 }
 0x37a   : > { %v1600_v17 = vmul.f32 %v1433_v32, %v7487_v15  ;;  %v1478_v57 = vsel %vm7539_vm3, %v1477_v12, %v1473_v28  ;;  %v1557_v19 = vsub.f32 1.0, %v1556_v62  ;;  %v5960_v38 = vpop.eup %5959  ;;  %v7580_v15 = vadd.f32 1.0, %v5958_v25 }
 0x37b   : > { %v1603_v58 = vmul.f32 %v1478_v57, %v7490_v16  ;;  %v1513_v63 = vmul.f32 %v5954_v54, %v1512_v22  ;;  %v1436_v4 = vmul.f32 %v5960_v38, %v7548_v37  ;;  %v5962_v5 = vpop.eup %5961  ;;  %v1444_v16 = vand.u32 2147483647, %v7548_v37 }
 0x37c   : > { %1613 = vst [vmem:[#allocation2 + $0x208] sm:$0xff] %v1600_v17  ;;  %v1558_v3 = vmul.f32 %v5956_v49, %v1557_v19  ;;  %5965 = vrcp.f32 %v7580_v15  ;;  %v1481_v11 = vmul.f32 %v5962_v5, %v7550_v52  ;;  %vm1441_vm1 = vweird.f32 %v5960_v38 }
 0x37d   : > { %1616 = vst [vmem:[#allocation2 + $0x238] sm:$0xff] %v1603_v58  ;;  %v1514_v2 = vadd.f32 %v5954_v54, %v1513_v63  ;;  %v1437_v10 = vsub.f32 1.0, %v1436_v4  ;;  %vm1485_vm2 = vweird.f32 %v7550_v52  ;;  %v1489_v48 = vand.u32 2147483647, %v7550_v52  ;;  %v5964_v61 = vpop.eup %5963  ;;  %vm1442_vm4 = vmor %vm1440_vm13, %vm1441_vm1 }
 0x37e   : > { %v1559_v9 = vadd.f32 %v5956_v49, %v1558_v3  ;;  %v1482_v35 = vsub.f32 1.0, %v1481_v11  ;;  %vm1486_vm3 = vweird.f32 %v5962_v5  ;;  %v1491_v51 = vand.u32 2147483648, %v7550_v52 }
 0x37f   : > { %v1518_v8 = vsel %vm1517_vm15, %v5954_v54, %v1514_v2  ;;  %v1438_v59 = vmul.f32 %v5960_v38, %v1437_v10  ;;  %5967 = vpow2.f32 %v1388_v7  ;;  %v7600_v31 = vadd.f32 1.0, %v5964_v61  ;;  %vm1487_vm7 = vmor %vm1485_vm2, %vm1486_vm3 }
 0x380   : > { %v1523_v12 = vsel %vm7558_vm8, %v1522_v43, %v1518_v8  ;;  %v1563_v14 = vsel %vm1562_vm0, %v5956_v49, %v1559_v9  ;;  %v1483_v42 = vmul.f32 %v5962_v5, %v1482_v35  ;;  %vm1445_vm5 = vcmp.eq.f32.partialorder %v1444_v16, 8.507059e+37 }
 0x381   : > { %v1606_v13 = vmul.f32 %v1523_v12, %v7495_v21  ;;  %v1568_v54 = vsel %vm7574_vm11, %v1567_v24, %v1563_v14  ;;  %v1439_v26 = vadd.f32 %v5960_v38, %v1438_v59  ;;  %v1369_v21 = vpop.f32.mrf.mxu3  ;;  %v1447_v55 = vor.u32 1.1754944e-38, %v1446_v6 }
 0x382   : > { %v1609_v36 = vmul.f32 %v1568_v54, %v7498_v39  ;;  %v5966_v18 = vpop.eup %5965  ;;  %v1394_v49 = vmul.f32 1.442695, %v1377_v40  ;;  %v7608_v47 = vadd.f32 %v6882_v33, %v1360_v44  ;;  %v1484_v53 = vadd.f32 %v5962_v5, %v1483_v42 }
 0x383   : > { %1619 = vst [vmem:[#allocation2 + $0x128] sm:$0xff] %v1606_v13  ;;  %v1443_v39 = vsel %vm1442_vm4, %v5960_v38, %v1439_v26  ;;  %vm1490_vm6 = vcmp.eq.f32.partialorder %v1489_v48, 8.507059e+37  ;;  %v1526_v20 = vmul.f32 %v5966_v18, %v7580_v15  ;;  %v1492_v37 = vor.u32 1.1754944e-38, %v1491_v51 }
 0x384   : > { %1622 = vst [vmem:[#allocation2 + $0x130] sm:$0xff] %v1609_v36  ;;  %v1448_v32 = vsel %vm1445_vm5, %v1447_v55, %v1443_v39  ;;  %5969 = vrcp.f32 %v7600_v31  ;;  %v7616_v28 = vadd.f32 %v6882_v33, %v1369_v21  ;;  %v1488_v22 = vsel %vm1487_vm7, %v5962_v5, %v1484_v53 }
 0x385   : > { %v1601_v40 = vmul.f32 %v1448_v32, %v7501_v29  ;;  %v1527_v62 = vsub.f32 1.0, %v1526_v20  ;;  %v1534_v17 = vand.u32 2147483647, %v7580_v15  ;;  %v5968_v57 = vpop.eup %5967  ;;  %v1493_v43 = vsel %vm1490_vm6, %v1492_v37, %v1488_v22 }
 0x386   : > { %v1536_v46 = vand.u32 2147483648, %v7580_v15  ;;  %5971 = vpow2.f32 %v1394_v49  ;;  %v1380_v52 = vsub.f32 0.0, %v7608_v47  ;;  %v1604_v25 = vmul.f32 %v1493_v43, %v7504_v45 }
 0x387   : > { %1614 = vst [vmem:[#allocation2 + $0x220] sm:$0xff] %v1601_v40  ;;  %v1528_v58 = vmul.f32 %v5966_v18, %v1527_v62  ;;  %vm1531_vm8 = vweird.f32 %v5966_v18  ;;  %v1410_v33 = vadd.f32 1.0, %v5968_v57  ;;  %v1383_v29 = vsub.f32 0.0, %v7616_v28 }
 0x388   : > { %v1400_v63 = vmul.f32 1.442695, %v1380_v52  ;;  %1617 = vst [vmem:[#allocation2 + $0x8] sm:$0xff] %v1604_v25  ;;  %vm1530_vm9 = vweird.f32 %v7580_v15  ;;  %v1537_v24 = vor.u32 1.1754944e-38, %v1536_v46  ;;  %vm1535_vm11 = vcmp.eq.f32.partialorder %v1534_v17, 8.507059e+37 }
 0x389   : > { %v1529_v19 = vadd.f32 %v5966_v18, %v1528_v58  ;;  %5973 = vrcp.f32 %v1410_v33  ;;  %vm1532_vm10 = vmor %vm1530_vm9, %vm1531_vm8  ;;  %v1406_v2 = vmul.f32 1.442695, %v1383_v29  ;;  %v1579_v8 = vand.u32 2147483647, %v7600_v31 }
 0x38a   : > { %v5970_v38 = vpop.eup %5969  ;;  %5975 = vpow2.f32 %v1400_v63  ;;  %v1581_v15 = vand.u32 2147483648, %v7600_v31  ;;  %vm1575_vm13 = vweird.f32 %v7600_v31  ;;  %vm1455_vm0 = vweird.f32 %v1410_v33 }
 0x38b   : > { %v1533_v3 = vsel %vm1532_vm10, %v5966_v18, %v1529_v19  ;;  %v1571_v45 = vmul.f32 %v5970_v38, %v7600_v31  ;;  %5977 = vpow2.f32 %v1406_v2  ;;  %vm1576_vm12 = vweird.f32 %v5970_v38 }
 0x38c   : > { %v5972_v4 = vpop.eup %5971  ;;  %v1538_v5 = vsel %vm1535_vm11, %v1537_v24, %v1533_v3  ;;  %vm1577_vm14 = vmor %vm1575_vm13, %vm1576_vm12  ;;  %vm1580_vm15 = vcmp.eq.f32.partialorder %v1579_v8, 8.507059e+37  ;;  %v1459_v44 = vand.u32 2147483647, %v1410_v33  ;;  %v1461_v61 = vand.u32 2147483648, %v1410_v33 }
 0x38d   : > { %v1607_v16 = vmul.f32 %v1538_v5, %v7514_v56  ;;  %v1572_v6 = vsub.f32 1.0, %v1571_v45  ;;  %v1413_v7 = vadd.f32 1.0, %v5972_v4  ;;  %v1582_v56 = vor.u32 1.1754944e-38, %v1581_v15 }
 0x38e   : > { %v1462_v18 = vor.u32 1.1754944e-38, %v1461_v61  ;;  %vm1460_vm3 = vcmp.eq.f32.partialorder %v1459_v44, 8.507059e+37 }
 0x38f   : > { %v5974_v9 = vpop.eup %5973  ;;  %1620 = vst [vmem:[#allocation2 + $0xe8] sm:$0xff] %v1607_v16  ;;  %v1573_v10 = vmul.f32 %v5970_v38, %v1572_v6  ;;  %5979 = vrcp.f32 %v1413_v7  ;;  %vm1500_vm4 = vweird.f32 %v1413_v7  ;;  %v1504_v20 = vand.u32 2147483647, %v1413_v7 }
 0x390   : > { %v5976_v11 = vpop.eup %5975  ;;  %v1451_v12 = vmul.f32 %v5974_v9, %v1410_v33  ;;  %vm1456_vm1 = vweird.f32 %v5974_v9  ;;  %v1506_v32 = vand.u32 2147483648, %v1413_v7 }
 0x391   : > { %v1574_v48 = vadd.f32 %v5970_v38, %v1573_v10  ;;  %v1416_v13 = vadd.f32 1.0, %v5976_v11  ;;  %v5978_v14 = vpop.eup %5977  ;;  %vm1457_vm2 = vmor %vm1455_vm0, %vm1456_vm1  ;;  %vm1505_vm7 = vcmp.eq.f32.partialorder %v1504_v20, 8.507059e+37 }
 0x392   : > { %v1452_v59 = vsub.f32 1.0, %v1451_v12  ;;  %v1419_v36 = vadd.f32 1.0, %v5978_v14  ;;  %v1507_v57 = vor.u32 1.1754944e-38, %v1506_v32 }
 0x393   : > { %v1578_v35 = vsel %vm1577_vm14, %v5970_v38, %v1574_v48  ;;  %5981 = vrcp.f32 %v1416_v13  ;;  %v1549_v43 = vand.u32 2147483647, %v1416_v13  ;;  %v1551_v46 = vand.u32 2147483648, %v1416_v13 }
 0x394   : > { %v1583_v54 = vsel %vm1580_vm15, %v1582_v56, %v1578_v35  ;;  %v1453_v51 = vmul.f32 %v5974_v9, %v1452_v59  ;;  %5983 = vrcp.f32 %v1419_v36  ;;  %vm1545_vm9 = vweird.f32 %v1416_v13 }
 0x395   : > { %v5980_v26 = vpop.eup %5979  ;;  %v1610_v42 = vmul.f32 %v1583_v54, %v7522_v60  ;;  %vm1550_vm11 = vcmp.eq.f32.partialorder %v1549_v43, 8.507059e+37  ;;  %v1552_v19 = vor.u32 1.1754944e-38, %v1551_v46  ;;  %v1596_v38 = vand.u32 2147483648, %v1419_v36 }
 0x396   : > { %v1454_v21 = vadd.f32 %v5974_v9, %v1453_v51  ;;  %v1496_v31 = vmul.f32 %v5980_v26, %v1413_v7  ;;  %vm1501_vm5 = vweird.f32 %v5980_v26  ;;  %v1594_v3 = vand.u32 2147483647, %v1419_v36 }
 0x397   : > { %1623 = vst [vmem:[#allocation2 + $0x140] sm:$0xff] %v1610_v42  ;;  %vm1502_vm6 = vmor %vm1500_vm4, %vm1501_vm5  ;;  %vm1590_vm13 = vweird.f32 %v1419_v36  ;;  %v1597_v16 = vor.u32 1.1754944e-38, %v1596_v38 }
 0x398   : > { %v1458_v55 = vsel %vm1457_vm2, %v5974_v9, %v1454_v21  ;;  %v1497_v49 = vsub.f32 1.0, %v1496_v31  ;;  %vm1595_vm15 = vcmp.eq.f32.partialorder %v1594_v3, 8.507059e+37 }
 0x399   : > { %v5982_v39 = vpop.eup %5981  ;;  %v1463_v53 = vsel %vm1460_vm3, %v1462_v18, %v1458_v55 }
 0x39a   : > { %v1602_v37 = vmul.f32 %v1463_v53, %v7527_v27  ;;  %v1498_v40 = vmul.f32 %v5980_v26, %v1497_v49  ;;  %v1541_v22 = vmul.f32 %v5982_v39, %v1416_v13  ;;  %v5984_v17 = vpop.eup %5983  ;;  %vm1546_vm8 = vweird.f32 %v5982_v39 }
 0x39b   : > { %v1586_v58 = vmul.f32 %v5984_v17, %v1419_v36  ;;  %vm1547_vm10 = vmor %vm1545_vm9, %vm1546_vm8  ;;  %vm1591_vm12 = vweird.f32 %v5984_v17 }
 0x39c   : > { %1615 = vst [vmem:[#allocation2 + $0x1f8] sm:$0xff] %v1602_v37  ;;  %v1499_v60 = vadd.f32 %v5980_v26, %v1498_v40  ;;  %v1542_v62 = vsub.f32 1.0, %v1541_v22  ;;  %vm1592_vm14 = vmor %vm1590_vm13, %vm1591_vm12 }
 0x39d   : > { %v1587_v29 = vsub.f32 1.0, %v1586_v58 }
 0x39e   : > { %v1503_v52 = vsel %vm1502_vm6, %v5980_v26, %v1499_v60  ;;  %v1543_v25 = vmul.f32 %v5982_v39, %v1542_v62 }
 0x39f   : > { %v1508_v33 = vsel %vm1505_vm7, %v1507_v57, %v1503_v52  ;;  %v1588_v2 = vmul.f32 %v5984_v17, %v1587_v29 }
 0x3a0   : > { %v1605_v63 = vmul.f32 %v1508_v33, %v7530_v1  ;;  %v1544_v27 = vadd.f32 %v5982_v39, %v1543_v25 }
 0x3a1   : > { %v1589_v5 = vadd.f32 %v5984_v17, %v1588_v2 }
 0x3a2   : > { %1618 = vst [vmem:[#allocation2 + $0x1e8] sm:$0xff] %v1605_v63  ;;  %v1548_v24 = vsel %vm1547_vm10, %v5982_v39, %v1544_v27 }
 0x3a3   : > { %v1553_v45 = vsel %vm1550_vm11, %v1552_v19, %v1548_v24  ;;  %v1593_v1 = vsel %vm1592_vm14, %v5984_v17, %v1589_v5 }
 0x3a4   : > { %v1608_v4 = vmul.f32 %v1553_v45, %v7608_v47  ;;  %v1598_v6 = vsel %vm1595_vm15, %v1597_v16, %v1593_v1 }
 0x3a5   : > { %v1611_v7 = vmul.f32 %v1598_v6, %v7616_v28 }
 0x3a6   : > { %1621 = vst [vmem:[#allocation2 + $0x80] sm:$0xff] %v1608_v4 }
 0x3a7   : > { %1624 = vst [vmem:[#allocation2 + $0x58] sm:$0xff] %v1611_v7 }
 0x3a8 PF: > { %v4665_v8 = vld [vmem:[#allocation11 + $0x178] sm:$0xff]  ;;  %v4664_v15 = vld [vmem:[#allocation11 + $0x170] sm:$0xff]  ;;  %v4663_v47 = vld [vmem:[#allocation11 + $0x168] sm:$0xff]  ;;  %vm2025_vm0 = vcmask 1046528   ;;  %vm2266_vm1 = vcmask 1045504   ;;  %vm2507_vm2 = vcmask 1044480  }
 0x3a9   : > { %v4843_v9 = vld [vmem:[#allocation11 + $0x1f8] sm:$0xff]  ;;  %4666 = vmatpush.msra.mxu2 %v4665_v8  ;;  %v4842_v12 = vld [vmem:[#allocation11 + $0x1f0] sm:$0xff]  ;;  %v4841_v14 = vld [vmem:[#allocation11 + $0x1e8] sm:$0xff]  ;;  %vm2748_vm3 = vcmask 1043456   ;;  %vm4365_vm4 = vcmask 1041408   ;;  %s12220_s9 = sld [smem:[#allocation155_spill]] }
 0x3aa   : > { %4844 = vmatpush.msra.mxu3 %v4843_v9  ;;  %v4438_v10 = vld [vmem:[#allocation11 + $0xf8] sm:$0xff]  ;;  %v4437_v48 = vld [vmem:[#allocation11 + $0xf0] sm:$0xff]  ;;  %v4436_v56 = vld [vmem:[#allocation11 + $0xe8] sm:$0xff]  ;;  %s12221_s29 = sld [smem:[#allocation21_spill]]  ;;  %s5297_s20 = sshll.u32 %s7179_s4, 4  ;;  %s5298_s20 = int_to_ptr.vmem [resolvable:$true] %s5297_s20 }
 0x3ab   : > { %v4340_v11 = vld [vmem:[#allocation11 + $0x78] sm:$0xff]  ;;  %4439 = vmatpush.msra.mxu0 %v4438_v10  ;;  %v4339_v13 = vld [vmem:[#allocation11 + $0x70] sm:$0xff]  ;;  %4667 = vmatpush.msra.mxu2 %v4664_v15  ;;  %v4662_v28 = vld [vmem:[#allocation11 + $0x160] sm:$0xff]  ;;  %s12222_s7 = sld [smem:[#allocation22_spill]]  ;;  %s5282_s21 = scalar_lea.sflag [#allocation5], %s6696_s0 }
 0x3ac   : > { %4504 = vmatpush.msra.mxu1 %v4340_v11  ;;  %4845 = vmatpush.msra.mxu3 %v4842_v12  ;;  %v4338_v59 = vld [vmem:[#allocation11 + $0x68] sm:$0xff]  ;;  %v4840_v35 = vld [vmem:[#allocation11 + $0x1e0] sm:$0xff]  ;;  %v4661_v54 = vld [vmem:[#allocation11 + $0x158] sm:$0xff]  ;;  %s12223_s2 = sld [smem:[#allocation156_spill]] }
 0x3ad   : > { %4440 = vmatpush.msra.mxu0 %v4437_v48  ;;  %4668 = vmatpush.msra.mxu2 %v4663_v47  ;;  %v4435_v44 = vld [vmem:[#allocation11 + $0xe0] sm:$0xff]  ;;  %v4839_v51 = vld [vmem:[#allocation11 + $0x1d8] sm:$0xff]  ;;  %v4660_v42 = vld [vmem:[#allocation11 + $0x150] sm:$0xff] }
 0x3ae   : > { %4505 = vmatpush.msra.mxu1 %v4339_v13  ;;  %4846 = vmatpush.msra.mxu3 %v4841_v14  ;;  %v4337_v61 = vld [vmem:[#allocation11 + $0x60] sm:$0xff]  ;;  %v4434_v36 = vld [vmem:[#allocation11 + $0xd8] sm:$0xff]  ;;  %v4838_v21 = vld [vmem:[#allocation11 + $0x1d0] sm:$0xff] }
 0x3af   : > { %4441 = vmatpush.msra.mxu0 %v4436_v56  ;;  %4669 = vmatpush.msra.mxu2 %v4662_v28  ;;  %v4336_v26 = vld [vmem:[#allocation11 + $0x58] sm:$0xff]  ;;  %v4433_v31 = vld [vmem:[#allocation11 + $0xd0] sm:$0xff]  ;;  %v4659_v55 = vld [vmem:[#allocation11 + $0x148] sm:$0xff] }
 0x3b0   : > { %4506 = vmatpush.msra.mxu1 %v4338_v59  ;;  %4847 = vmatpush.msra.mxu3 %v4840_v35  ;;  %v4335_v18 = vld [vmem:[#allocation11 + $0x50] sm:$0xff]  ;;  %v4837_v49 = vld [vmem:[#allocation11 + $0x1c8] sm:$0xff]  ;;  %v4658_v20 = vld [vmem:[#allocation11 + $0x140] sm:$0xff]  ;;  %s5515_s27 = sshll.u32 %s12221_s29, 4 }
 0x3b1   : > { %4442 = vmatpush.msra.mxu0 %v4435_v44  ;;  %4670 = vmatpush.msra.mxu2 %v4661_v54  ;;  %v4432_v39 = vld [vmem:[#allocation11 + $0xc8] sm:$0xff]  ;;  %v4836_v32 = vld [vmem:[#allocation11 + $0x1c0] sm:$0xff]  ;;  %v4657_v22 = vld [vmem:[#allocation11 + $0x138] sm:$0xff]  ;;  %s5508_s16 = sshll.u32 %s12222_s7, 5 }
 0x3b2   : > { %4507 = vmatpush.msra.mxu1 %v4337_v61  ;;  %4848 = vmatpush.msra.mxu3 %v4839_v51  ;;  %v4334_v53 = vld [vmem:[#allocation11 + $0x48] sm:$0xff]  ;;  %v4431_v37 = vld [vmem:[#allocation11 + $0xc0] sm:$0xff]  ;;  %v4835_v60 = vld [vmem:[#allocation11 + $0x1b8] sm:$0xff]  ;;  %s5294_s12 = sadd.s32 %s5515_s27, %s5508_s16  ;;  %s6242_s19 = scalar_lea.hbm %s12223_s2, 512 }
 0x3b3   : > { %4443 = vmatpush.msra.mxu0 %v4434_v36  ;;  %4671 = vmatpush.msra.mxu2 %v4660_v42  ;;  %v4333_v40 = vld [vmem:[#allocation11 + $0x40] sm:$0xff]  ;;  %v4430_v62 = vld [vmem:[#allocation11 + $0xb8] sm:$0xff]  ;;  %v4656_v57 = vld [vmem:[#allocation11 + $0x130] sm:$0xff]  ;;  %s5509_s24 = sshll.u32 %s5294_s12, 3 }
 0x3b4   : > { %4508 = vmatpush.msra.mxu1 %v4336_v26  ;;  %4849 = vmatpush.msra.mxu3 %v4838_v21  ;;  %v4332_v17 = vld [vmem:[#allocation11 + $0x38] sm:$0xff]  ;;  %v4655_v43 = vld [vmem:[#allocation11 + $0x128] sm:$0xff]  ;;  %v4834_v46 = vld [vmem:[#allocation11 + $0x1b0] sm:$0xff]  ;;  %s5296_s15 = scalar_lea.hbm %s12223_s2, %s5509_s24 }
 0x3b5   : > { %4444 = vmatpush.msra.mxu0 %v4433_v31  ;;  %4672 = vmatpush.msra.mxu2 %v4659_v55  ;;  %v4429_v52 = vld [vmem:[#allocation11 + $0xb0] sm:$0xff]  ;;  %v4833_v58 = vld [vmem:[#allocation11 + $0x1a8] sm:$0xff]  ;;  %v4654_v33 = vld [vmem:[#allocation11 + $0x120] sm:$0xff]  ;;  %s5299_s1 = sshll.u32 %s5296_s15, 4  ;;  %s5300_s1 = int_to_ptr.hbm [resolvable:$true] %s5299_s1 }
 0x3b6   : > { %4509 = vmatpush.msra.mxu1 %v4335_v18  ;;  %4850 = vmatpush.msra.mxu3 %v4837_v49  ;;  %v4331_v25 = vld [vmem:[#allocation11 + $0x30] sm:$0xff]  ;;  %v4428_v63 = vld [vmem:[#allocation11 + $0xa8] sm:$0xff]  ;;  %v4832_v29 = vld [vmem:[#allocation11 + $0x1a0] sm:$0xff]  ;;  %s6236_s28 = sshra.s32 %s5300_s1, 4  ;;  %s6237_s28 = int_to_ptr.hbm [resolvable:$true] %s6236_s28 }
 0x3b7   : > { %4445 = vmatpush.msra.mxu0 %v4432_v39  ;;  %4673 = vmatpush.msra.mxu2 %v4658_v20  ;;  %v4330_v27 = vld [vmem:[#allocation11 + $0x28] sm:$0xff]  ;;  %v4427_v19 = vld [vmem:[#allocation11 + $0xa0] sm:$0xff]  ;;  %v7635_v24 = vld [vmem:[#allocation2 + $0xb8] sm:$0xff]  ;;  %s6238_s11 = scalar_lea.hbm %s6237_s28, 128  ;;  %p6243_p1 = scmp.lt.s32.totalorder %s6237_s28, %s12223_s2 }
 0x3b8   : > { %4510 = vmatpush.msra.mxu1 %v4334_v53  ;;  %4851 = vmatpush.msra.mxu3 %v4836_v32  ;;  %v4329_v38 = vld [vmem:[#allocation11 + $0x20] sm:$0xff]  ;;  %v4653_v2 = vld [vmem:[#allocation11 + $0x118] sm:$0xff]  ;;  %v7637_v45 = vld [vmem:[#allocation2 + $0x1b0] sm:$0xff]  ;;  %p6239_p7 = scmp.ne.s32.totalorder %s6237_s28, %s6238_s11  ;;  %p6244_p0 = scmp.lt.s32.totalorder %s6242_s19, %s6238_s11 }
 0x3b9   : > { %4446 = vmatpush.msra.mxu0 %v4431_v37  ;;  %4674 = vmatpush.msra.mxu2 %v4657_v22  ;;  %v4831_v3 = vld [vmem:[#allocation11 + $0x198] sm:$0xff]  ;;  %v7639_v4 = vld [vmem:[#allocation2 + $0x110] sm:$0xff]  ;;  %v7643_v6 = vld [vmem:[#allocation2 + $0x20] sm:$0xff] }
 0x3ba   : > { %4511 = vmatpush.msra.mxu1 %v4333_v40  ;;  %4852 = vmatpush.msra.mxu3 %v4835_v60  ;;  %v7641_v5 = vld [vmem:[#allocation2 + $0x30] sm:$0xff]  ;;  %v4426_v16 = vld [vmem:[#allocation11 + $0x98] sm:$0xff]  ;;  %v7649_v10 = vld [vmem:[#allocation2 + $0x188] sm:$0xff]  ;;  %v1705_v12 = vmax.f32 %v7635_v24, %v7643_v6  ;;  %p6240_p10 = pnand %p6239_p7, %p6638_p5  ;;  %p6245_p4 = por %p6244_p0, %p6243_p1 }
 0x3bb   : > { %4447 = vmatpush.msra.mxu0 %v4430_v62  ;;  %4675 = vmatpush.msra.mxu2 %v4656_v57  ;;  %v4328_v1 = vld [vmem:[#allocation11 + $0x18] sm:$0xff]  ;;  %v7647_v8 = vld [vmem:[#allocation2 + $0x270] sm:$0xff]  ;;  %v7651_v11 = vld [vmem:[#allocation2 + $0x100] sm:$0xff]  ;;  %v1708_v44 = vmax.f32 %v7641_v5, %v7649_v10 }
 0x3bc   : > { %4512 = vmatpush.msra.mxu1 %v4332_v17  ;;  %4853 = vmatpush.msra.mxu3 %v4834_v46  ;;  %v7645_v7 = vld [vmem:[#allocation2 + $0xd8] sm:$0xff]  ;;  %v4652_v15 = vld [vmem:[#allocation11 + $0x110] sm:$0xff]  ;;  %v7653_v47 = vld [vmem:[#allocation2 + $0xa8] sm:$0xff]  ;;  %v1707_v13 = vmax.f32 %v7639_v4, %v7647_v8  ;;  %v11493_v5 = vmax.f32 %v7643_v6, %v7651_v11  ;;  %p6241_p12 = pneg %p6240_p10 }
 0x3bd   : > { %4448 = vmatpush.msra.mxu0 %v4429_v52  ;;  %4676 = vmatpush.msra.mxu2 %v4655_v43  ;;  %v4830_v9 = vld [vmem:[#allocation11 + $0x190] sm:$0xff]  ;;  %v1706_v48 = vmax.f32 %v7637_v45, %v7645_v7  ;;  %v7661_v28 = vld [vmem:[#allocation2 + $0x148] sm:$0xff]  ;;  %v7665_v35 = vld [vmem:[#allocation2 + $0xa0] sm:$0xff]  ;;  %v11498_v6 = vmax.f32 %v7645_v7, %v7653_v47 }
 0x3be   : > { %4513 = vmatpush.msra.mxu1 %v4331_v25  ;;  %4854 = vmatpush.msra.mxu3 %v4833_v58  ;;  %v4425_v14 = vld [vmem:[#allocation11 + $0x90] sm:$0xff]  ;;  %v4651_v51 = vld [vmem:[#allocation11 + $0x108] sm:$0xff]  ;;  %v7673_v26 = vld [vmem:[#allocation2 + $0x258] sm:$0xff]  ;;  %v7797_v45 = vmax.f32 %v1707_v13, %v7661_v28  ;;  %v11503_v7 = vmax.f32 %v7647_v8, %v7661_v28  ;;  %v11506_v8 = vmax.f32 %v7651_v11, %v7665_v35  ;;  %p6246_p6 = pnand %p6245_p4, %p6241_p12 }
 0x3bf   : > { %4449 = vmatpush.msra.mxu0 %v4428_v63  ;;  %4677 = vmatpush.msra.mxu2 %v4654_v33  ;;  %v4327_v56 = vld [vmem:[#allocation11 + $0x10] sm:$0xff]  ;;  %v4829_v36 = vld [vmem:[#allocation11 + $0x188] sm:$0xff]  ;;  %v7675_v42 = vld [vmem:[#allocation2 + $0x1d8] sm:$0xff]  ;;  %v7779_v24 = vmax.f32 %v1706_v48, %v7653_v47 }
 0x3c0   : > { %4514 = vmatpush.msra.mxu1 %v4330_v27  ;;  %4855 = vmatpush.msra.mxu3 %v4832_v29  ;;  %v7663_v59 = vld [vmem:[#allocation2 + $0x210] sm:$0xff]  ;;  %v7685_v49 = vld [vmem:[#allocation2 + $0x138] sm:$0xff]  ;;  %v7689_v53 = vld [vmem:[#allocation2 + $0x180] sm:$0xff]  ;;  %11485 = vst [vmem:[#allocation67_spill] sm:$0xff] %v7797_v45 }
 0x3c1   : > { %4450 = vmatpush.msra.mxu0 %v4427_v19  ;;  %v7677_v21 = vld [vmem:[#allocation2 + $0xb0] sm:$0xff]  ;;  %4678 = vmatpush.msra.mxu2 %v4653_v2  ;;  %v7687_v39 = vld [vmem:[#allocation2 + $0x38] sm:$0xff]  ;;  %11463 = vst [vmem:[#allocation45_spill] sm:$0xff] %v7689_v53  ;;  %v4650_v40 = vld [vmem:[#allocation11 + $0x100] sm:$0xff]  ;;  %v7815_v4 = vmax.f32 %v1708_v44, %v7663_v59  ;;  %v7833_v44 = vmax.f32 %v11493_v5, %v7665_v35 }
 0x3c2   : > { %4515 = vmatpush.msra.mxu1 %v4329_v38  ;;  %4856 = vmatpush.msra.mxu3 %v4831_v3  ;;  %v7697_v22 = vld [vmem:[#allocation2 + $0x168] sm:$0xff]  ;;  %v7699_v60 = vld [vmem:[#allocation2 + $0x158] sm:$0xff]  ;;  %v7709_v46 = vld [vmem:[#allocation2 + $0x90] sm:$0xff]  ;;  %11481 = vst [vmem:[#allocation63_spill] sm:$0xff] %v7779_v24  ;;  %v7851_v5 = vmax.f32 %v11498_v6, %v7673_v26  ;;  %v7869_v6 = vmax.f32 %v11503_v7, %v7675_v42 }
 0x3c3   : > { %4451 = vmatpush.msra.mxu0 %v4426_v16  ;;  %11464 = vst [vmem:[#allocation46_spill] sm:$0xff] %v7697_v22  ;;  %v7701_v62 = vld [vmem:[#allocation2 + $0x278] sm:$0xff]  ;;  %4679 = vmatpush.msra.mxu2 %v4652_v15  ;;  %v7711_v52 = vld [vmem:[#allocation2 + $0x120] sm:$0xff]  ;;  %v7723_v29 = vld [vmem:[#allocation2 + $0x1a8] sm:$0xff]  ;;  %v7887_v7 = vmax.f32 %v11506_v8, %v7685_v49 }
 0x3c4   : > { %4516 = vmatpush.msra.mxu1 %v4328_v1  ;;  %11465 = vst [vmem:[#allocation47_spill] sm:$0xff] %v7699_v60  ;;  %4857 = vmatpush.msra.mxu3 %v4830_v9  ;;  %v7713_v25 = vld [vmem:[#allocation2 + $0x1c0] sm:$0xff]  ;;  %v7733_v16 = vld [vmem:[#allocation2 + $0x218] sm:$0xff]  ;;  %v7737_v15 = vld [vmem:[#allocation2 + $0x268] sm:$0xff] }
 0x3c5   : > { %11466 = vst [vmem:[#allocation48_spill] sm:$0xff] %v7701_v62  ;;  %4452 = vmatpush.msra.mxu0 %v4425_v14  ;;  %v7721_v27 = vld [vmem:[#allocation2] sm:$0xff]  ;;  %4680 = vmatpush.msra.mxu2 %v4651_v51  ;;  %v7745_v2 = vld [vmem:[#allocation2 + $0x1f0] sm:$0xff]  ;;  %v7747_v3 = vld [vmem:[#allocation2 + $0xf8] sm:$0xff] }
 0x3c6   : > { %11467 = vst [vmem:[#allocation49_spill] sm:$0xff] %v7709_v46  ;;  %4517 = vmatpush.msra.mxu1 %v4327_v56  ;;  %v7725_v19 = vld [vmem:[#allocation2 + $0x1a0] sm:$0xff]  ;;  %4858 = vmatpush.msra.mxu3 %v4829_v36  ;;  %v7749_v51 = vld [vmem:[#allocation2 + $0x50] sm:$0xff]  ;;  %v7761_v56 = vmax.f32 %v1705_v12, %v7651_v11  ;;  %v1733_v38 = vmax.f32 %v7733_v16, %v7747_v3  ;;  %v7785_v58 = vld [vmem:[#allocation2 + $0x228] sm:$0xff] }
 0x3c7   : > { %11468 = vst [vmem:[#allocation50_spill] sm:$0xff] %v7711_v52  ;;  %v7735_v1 = vld [vmem:[#allocation2 + $0x240] sm:$0xff]  ;;  %4681 = vmatpush.msra.mxu2 %v4650_v40  ;;  %v7765_v63 = vld [vmem:[#allocation2 + $0x150] sm:$0xff]  ;;  %v1732_v36 = vmax.f32 %v7725_v19, %v7745_v2  ;;  %v7803_v32 = vld [vmem:[#allocation2 + $0x68] sm:$0xff]  ;;  %v11510_v11 = vmax.f32 %v7665_v35, %v7685_v49 }
 0x3c8   : > { %11469 = vst [vmem:[#allocation51_spill] sm:$0xff] %v7713_v25  ;;  %v7763_v14 = vld [vmem:[#allocation2 + $0xe0] sm:$0xff]  ;;  %v7767_v33 = vld [vmem:[#allocation2 + $0xd0] sm:$0xff]  ;;  %v1734_v9 = vmax.f32 %v7735_v1, %v7749_v51  ;;  %v1736_v57 = vmax.f32 %v7745_v2, %v7765_v63  ;;  %v1740_v18 = vmax.f32 %v7765_v63, %v7785_v58  ;;  %v7817_v13 = vld [vmem:[#allocation2 + $0x78] sm:$0xff] }
 0x3c9   : > { %11470 = vst [vmem:[#allocation52_spill] sm:$0xff] %v7721_v27  ;;  %v7781_v12 = vld [vmem:[#allocation2 + $0x10] sm:$0xff]  ;;  %v7783_v40 = vld [vmem:[#allocation2 + $0x60] sm:$0xff]  ;;  %v1735_v43 = vmax.f32 %v7737_v15, %v7763_v14  ;;  %v1737_v17 = vmax.f32 %v7747_v3, %v7767_v33  ;;  %v7819_v31 = vld [vmem:[#allocation2 + $0x1b8] sm:$0xff]  ;;  %v1744_v41 = vmax.f32 %v7785_v58, %v7817_v13  ;;  %v7911_v8 = vmax.f32 %v11510_v11, %v7699_v60 }
 0x3ca   : > { %11471 = vst [vmem:[#allocation53_spill] sm:$0xff] %v7723_v29  ;;  %v7799_v48 = vld [vmem:[#allocation2 + $0xf0] sm:$0xff]  ;;  %v7801_v37 = vld [vmem:[#allocation2 + $0x1e0] sm:$0xff]  ;;  %v1738_v20 = vmax.f32 %v7749_v51, %v7781_v12  ;;  %v1739_v55 = vmax.f32 %v7763_v14, %v7783_v40  ;;  %v7821_v54 = vld [vmem:[#allocation2 + $0x18] sm:$0xff]  ;;  %v1743_v34 = vmax.f32 %v7783_v40, %v7803_v32  ;;  %v11518_v11 = vmax.f32 %v7685_v49, %v7699_v60 }
 0x3cb   : > { %11472 = vst [vmem:[#allocation54_spill] sm:$0xff] %v7725_v19  ;;  %v1741_v61 = vmax.f32 %v7767_v33, %v7799_v48  ;;  %v1742_v23 = vmax.f32 %v7781_v12, %v7801_v37  ;;  %v7835_v30 = vld [vmem:[#allocation2 + $0x70] sm:$0xff]  ;;  %v7839_v50 = vld [vmem:[#allocation2 + $0x1c8] sm:$0xff]  ;;  %v1746_v45 = vmax.f32 %v7801_v37, %v7821_v54 }
 0x3cc   : > { %11473 = vst [vmem:[#allocation55_spill] sm:$0xff] %v7733_v16  ;;  %v7837_v0 = vld [vmem:[#allocation2 + $0x250] sm:$0xff] }
 0x3cd   : > { %11474 = vst [vmem:[#allocation56_spill] sm:$0xff] %v7735_v1  ;;  %v7855_v24 = vld [vmem:[#allocation2 + $0x230] sm:$0xff] }
 0x3ce   : > { %11475 = vst [vmem:[#allocation57_spill] sm:$0xff] %v7737_v15 }
 0x3cf   : > { %11476 = vst [vmem:[#allocation58_spill] sm:$0xff] %v7745_v2 }
 0x3d0   : > { %11477 = vst [vmem:[#allocation59_spill] sm:$0xff] %v7747_v3 }
 0x3d1   : > { %11478 = vst [vmem:[#allocation60_spill] sm:$0xff] %v7749_v51 }
 0x3d2   : > { %11479 = vst [vmem:[#allocation61_spill] sm:$0xff] %v7761_v56  ;;  %v7857_v56 = vld [vmem:[#allocation2 + $0x178] sm:$0xff] }
 0x3d3   : > { %11480 = vst [vmem:[#allocation62_spill] sm:$0xff] %v7767_v33 }
 0x3d4   : > { %11482 = vst [vmem:[#allocation64_spill] sm:$0xff] %v7781_v12 }
 0x3d5   : > { %11483 = vst [vmem:[#allocation65_spill] sm:$0xff] %v7783_v40  ;;  %v1751_v40 = vmax.f32 %v7835_v30, %v7855_v24 }
 0x3d6   : > { %11484 = vst [vmem:[#allocation66_spill] sm:$0xff] %v7785_v58  ;;  %v1747_v58 = vmax.f32 %v7803_v32, %v7835_v30 }
 0x3d7   : > { %11486 = vst [vmem:[#allocation68_spill] sm:$0xff] %v7799_v48 }
 0x3d8   : > { %11487 = vst [vmem:[#allocation69_spill] sm:$0xff] %v7801_v37  ;;  %v1749_v37 = vmax.f32 %v7819_v31, %v7839_v50 }
 0x3d9   : > { %11488 = vst [vmem:[#allocation70_spill] sm:$0xff] %v7803_v32  ;;  %v11508_v32 = vmax.f32 %v7661_v28, %v7675_v42  ;;  %v11514_v28 = vmax.f32 %v7675_v42, %v7689_v53 }
 0x3da   : > { %11489 = vst [vmem:[#allocation71_spill] sm:$0xff] %v7815_v4  ;;  %v1745_v4 = vmax.f32 %v7799_v48, %v7819_v31  ;;  %v1748_v48 = vmax.f32 %v7817_v13, %v7837_v0 }
 0x3db   : > { %11490 = vst [vmem:[#allocation72_spill] sm:$0xff] %v7817_v13  ;;  %v11505_v13 = vmax.f32 %v7649_v10, %v7663_v59  ;;  %v11509_v10 = vmax.f32 %v7663_v59, %v7677_v21  ;;  %v11516_v59 = vmax.f32 %v7677_v21, %v7697_v22 }
 0x3dc   : > { %11491 = vst [vmem:[#allocation73_spill] sm:$0xff] %v7819_v31 }
 0x3dd   : > { %11492 = vst [vmem:[#allocation74_spill] sm:$0xff] %v7821_v54 }
 0x3de   : > { %11494 = vst [vmem:[#allocation75_spill] sm:$0xff] %v7833_v44  ;;  %v7853_v44 = vld [vmem:[#allocation2 + $0x160] sm:$0xff] }
 0x3df   : > { %11495 = vst [vmem:[#allocation76_spill] sm:$0xff] %v7835_v30 }
 0x3e0   : > { %11496 = vst [vmem:[#allocation77_spill] sm:$0xff] %v7837_v0 }
 0x3e1   : > { %11497 = vst [vmem:[#allocation78_spill] sm:$0xff] %v7839_v50  ;;  %v7881_v50 = vmax.f32 %v11505_v13, %v7677_v21  ;;  %v7905_v13 = vmax.f32 %v11509_v10, %v7697_v22  ;;  %v7929_v10 = vmax.f32 %v11516_v59, %v7711_v52  ;;  %v11524_v59 = vmax.f32 %v7697_v22, %v7711_v52 }
 0x3e2   : > { %11499 = vst [vmem:[#allocation79_spill] sm:$0xff] %v7851_v5  ;;  %v1750_v5 = vmax.f32 %v7821_v54, %v7853_v44 }
 0x3e3   : > { %11500 = vst [vmem:[#allocation80_spill] sm:$0xff] %v7853_v44 }
 0x3e4   : > { %11501 = vst [vmem:[#allocation81_spill] sm:$0xff] %v7855_v24 }
 0x3e5   : > { %11502 = vst [vmem:[#allocation82_spill] sm:$0xff] %v7857_v56  ;;  %v7899_v56 = vmax.f32 %v11508_v32, %v7689_v53  ;;  %v7923_v32 = vmax.f32 %v11514_v28, %v7709_v46  ;;  %v11522_v28 = vmax.f32 %v7689_v53, %v7709_v46 }
 0x3e6   : > { %11504 = vst [vmem:[#allocation83_spill] sm:$0xff] %v7869_v6  ;;  %v11507_v6 = vmax.f32 %v7653_v47, %v7673_v26  ;;  %v11512_v47 = vmax.f32 %v7673_v26, %v7687_v39 }
 0x3e7   : > { %11511 = vst [vmem:[#allocation84_spill] sm:$0xff] %v7911_v8  ;;  %v7935_v8 = vmax.f32 %v11518_v11, %v7713_v25  ;;  %v11526_v11 = vmax.f32 %v7699_v60, %v7713_v25 }
 0x3e8   : > { %v7893_v24 = vmax.f32 %v11507_v6, %v7687_v39  ;;  %v7917_v6 = vmax.f32 %v11512_v47, %v7701_v62  ;;  %11515 = vst [vmem:[#allocation86_spill] sm:$0xff] %v7923_v32  ;;  %v11520_v47 = vmax.f32 %v7687_v39, %v7701_v62  ;;  %v7947_v32 = vmax.f32 %v11522_v28, %v7723_v29 }
 0x3e9   : > { %11517 = vst [vmem:[#allocation87_spill] sm:$0xff] %v7929_v10  ;;  %v7953_v10 = vmax.f32 %v11524_v59, %v7725_v19  ;;  %v11530_v28 = vmax.f32 %v7709_v46, %v7723_v29  ;;  %v11532_v59 = vmax.f32 %v7711_v52, %v7725_v19 }
 0x3ea   : > { %11513 = vst [vmem:[#allocation85_spill] sm:$0xff] %v7917_v6  ;;  %v7941_v6 = vmax.f32 %v11520_v47, %v7721_v27  ;;  %v11528_v47 = vmax.f32 %v7701_v62, %v7721_v27 }
 0x3eb   : > { %11519 = vst [vmem:[#allocation88_spill] sm:$0xff] %v7935_v8  ;;  %v7959_v8 = vmax.f32 %v11526_v11, %v7733_v16  ;;  %v11534_v11 = vmax.f32 %v7713_v25, %v7733_v16 }
 0x3ec   : > { %11521 = vst [vmem:[#allocation89_spill] sm:$0xff] %v7941_v6  ;;  %v7965_v6 = vmax.f32 %v11528_v47, %v7735_v1  ;;  %v11536_v47 = vmax.f32 %v7721_v27, %v7735_v1 }
 0x3ed   : > { %11523 = vst [vmem:[#allocation90_spill] sm:$0xff] %v7947_v32  ;;  %v7971_v32 = vmax.f32 %v11530_v28, %v7737_v15  ;;  %v11538_v28 = vmax.f32 %v7723_v29, %v7737_v15 }
 0x3ee   : > { %11525 = vst [vmem:[#allocation91_spill] sm:$0xff] %v7953_v10  ;;  %v7977_v10 = vmax.f32 %v11532_v59, %v7745_v2  ;;  %v7998_v59 = vmax.f32 %v1732_v36, %v7765_v63  ;;  %v11547_v36 = vld [vmem:[#allocation70_spill] sm:$0xff] }
 0x3ef   : > { %11527 = vst [vmem:[#allocation92_spill] sm:$0xff] %v7959_v8  ;;  %v7983_v8 = vmax.f32 %v11534_v11, %v7747_v3  ;;  %v8004_v11 = vmax.f32 %v1734_v9, %v7781_v12  ;;  %v8025_v9 = vmax.f32 %v1741_v61, %v7819_v31  ;;  %v8046_v61 = vmax.f32 %v1746_v45, %v7853_v44  ;;  %v11568_v45 = vld [vmem:[#allocation63_spill] sm:$0xff] }
 0x3f0   : > { %11529 = vst [vmem:[#allocation93_spill] sm:$0xff] %v7965_v6  ;;  %v7989_v6 = vmax.f32 %v11536_v47, %v7749_v51  ;;  %v11543_v47 = vld [vmem:[#allocation66_spill] sm:$0xff]  ;;  %v11544_v51 = vld [vmem:[#allocation68_spill] sm:$0xff] }
 0x3f1   : > { %11531 = vst [vmem:[#allocation94_spill] sm:$0xff] %v7971_v32  ;;  %v7995_v32 = vmax.f32 %v11538_v28, %v7763_v14  ;;  %v8013_v2 = vmax.f32 %v1737_v17, %v11544_v51  ;;  %v11545_v28 = vld [vmem:[#allocation69_spill] sm:$0xff]  ;;  %v8034_v17 = vmax.f32 %v1744_v41, %v7837_v0 }
 0x3f2   : > { %11533 = vst [vmem:[#allocation95_spill] sm:$0xff] %v7977_v10  ;;  %v8001_v10 = vmax.f32 %v1733_v38, %v7767_v33  ;;  %v11548_v38 = vld [vmem:[#allocation72_spill] sm:$0xff] }
 0x3f3   : > { %11535 = vst [vmem:[#allocation96_spill] sm:$0xff] %v7983_v8  ;;  %v11542_v8 = vld [vmem:[#allocation65_spill] sm:$0xff] }
 0x3f4   : > { %11537 = vst [vmem:[#allocation97_spill] sm:$0xff] %v7989_v6  ;;  %v8007_v3 = vmax.f32 %v1735_v43, %v11542_v8  ;;  %v8010_v6 = vmax.f32 %v1736_v57, %v11543_v47  ;;  %v8028_v43 = vmax.f32 %v1742_v23, %v7821_v54  ;;  %v8031_v57 = vmax.f32 %v1743_v34, %v7835_v30  ;;  %v11560_v23 = vld [vmem:[#allocation81_spill] sm:$0xff]  ;;  %v11562_v34 = vld [vmem:[#allocation82_spill] sm:$0xff] }
 0x3f5   : > { %11539 = vst [vmem:[#allocation98_spill] sm:$0xff] %v7995_v32  ;;  %v8016_v32 = vmax.f32 %v1738_v20, %v11545_v28  ;;  %v8036_v20 = vld [vmem:[#allocation2 + $0x98] sm:$0xff] }
 0x3f6   : > { %11540 = vst [vmem:[#allocation99_spill] sm:$0xff] %v7998_v59  ;;  %v8019_v59 = vmax.f32 %v1739_v55, %v11547_v36  ;;  %v8040_v55 = vld [vmem:[#allocation2 + $0x198] sm:$0xff]  ;;  %v8055_v41 = vmax.f32 %v1749_v37, %v8036_v20  ;;  %v11571_v37 = vld [vmem:[#allocation75_spill] sm:$0xff] }
 0x3f7   : > { %11541 = vst [vmem:[#allocation100_spill] sm:$0xff] %v8001_v10  ;;  %v8022_v10 = vmax.f32 %v1740_v18, %v11548_v38  ;;  %v11557_v18 = vld [vmem:[#allocation78_spill] sm:$0xff] }
 0x3f8   : > { %11546 = vst [vmem:[#allocation101_spill] sm:$0xff] %v8016_v32  ;;  %v8038_v32 = vld [vmem:[#allocation2 + $0x248] sm:$0xff] }
 0x3f9   : > { %11549 = vst [vmem:[#allocation102_spill] sm:$0xff] %v8022_v10  ;;  %v8043_v10 = vmax.f32 %v1745_v4, %v11557_v18  ;;  %v11567_v4 = vld [vmem:[#allocation61_spill] sm:$0xff] }
 0x3fa   : > { %11550 = vst [vmem:[#allocation103_spill] sm:$0xff] %v8025_v9  ;;  %v8061_v9 = vmax.f32 %v1751_v40, %v8040_v55  ;;  %v11573_v40 = vld [vmem:[#allocation83_spill] sm:$0xff] }
 0x3fb   : > { %11551 = vst [vmem:[#allocation104_spill] sm:$0xff] %v8028_v43  ;;  %v8049_v43 = vmax.f32 %v1747_v58, %v11560_v23  ;;  %v11569_v58 = vld [vmem:[#allocation67_spill] sm:$0xff] }
 0x3fc   : > { %11552 = vst [vmem:[#allocation105_spill] sm:$0xff] %v8031_v57  ;;  %v8052_v57 = vmax.f32 %v1748_v48, %v11562_v34  ;;  %v11570_v48 = vld [vmem:[#allocation71_spill] sm:$0xff] }
 0x3fd   : > { %11553 = vst [vmem:[#allocation106_spill] sm:$0xff] %v8034_v17  ;;  %v8058_v17 = vmax.f32 %v1750_v5, %v8038_v32  ;;  %v11572_v5 = vld [vmem:[#allocation79_spill] sm:$0xff] }
 0x3fe   : > { %11554 = vst [vmem:[#allocation107_spill] sm:$0xff] %v8036_v20 }
 0x3ff   : > { %11555 = vst [vmem:[#allocation108_spill] sm:$0xff] %v8038_v32 }
 0x400   : > { %11556 = vst [vmem:[#allocation109_spill] sm:$0xff] %v8040_v55 }
 0x401   : > { %11558 = vst [vmem:[#allocation110_spill] sm:$0xff] %v8043_v10  ;;  %v1833_v10 = vmax.f32 %v11567_v4, %v7665_v35  ;;  %v1840_v35 = vmax.f32 %v7881_v50, %v7697_v22  ;;  %v1844_v4 = vmax.f32 %v7905_v13, %v7711_v52  ;;  %v11576_v50 = vld [vmem:[#allocation86_spill] sm:$0xff]  ;;  %v11583_v22 = vld [vmem:[#allocation59_spill] sm:$0xff] }
 0x402   : > { %11559 = vst [vmem:[#allocation111_spill] sm:$0xff] %v8046_v61  ;;  %v1834_v61 = vmax.f32 %v11568_v45, %v7673_v26  ;;  %v1841_v26 = vmax.f32 %v7887_v7, %v7699_v60  ;;  %v11574_v45 = vld [vmem:[#allocation84_spill] sm:$0xff]  ;;  %v11577_v7 = vld [vmem:[#allocation87_spill] sm:$0xff]  ;;  %v11580_v13 = vld [vmem:[#allocation90_spill] sm:$0xff] }
 0x403   : > { %11561 = vst [vmem:[#allocation112_spill] sm:$0xff] %v8049_v43  ;;  %v1835_v43 = vmax.f32 %v11569_v58, %v7675_v42  ;;  %v1842_v42 = vmax.f32 %v7893_v24, %v7701_v62  ;;  %v1845_v58 = vmax.f32 %v11574_v45, %v7713_v25  ;;  %v11578_v24 = vld [vmem:[#allocation88_spill] sm:$0xff]  ;;  %v1851_v52 = vmax.f32 %v11580_v13, %v7737_v15  ;;  %v11581_v60 = vld [vmem:[#allocation58_spill] sm:$0xff]  ;;  %v11582_v45 = vld [vmem:[#allocation91_spill] sm:$0xff] }
 0x404   : > { %11563 = vst [vmem:[#allocation113_spill] sm:$0xff] %v8052_v57  ;;  %v1836_v57 = vmax.f32 %v11570_v48, %v7677_v21  ;;  %v1843_v21 = vmax.f32 %v7899_v56, %v7709_v46  ;;  %v11575_v48 = vld [vmem:[#allocation85_spill] sm:$0xff]  ;;  %v1849_v62 = vmax.f32 %v11578_v24, %v7733_v16  ;;  %v1852_v25 = vmax.f32 %v11582_v45, %v11581_v60  ;;  %v11588_v24 = vld [vmem:[#allocation95_spill] sm:$0xff]  ;;  %v11591_v45 = vld [vmem:[#allocation98_spill] sm:$0xff] }
 0x405   : > { %11564 = vst [vmem:[#allocation114_spill] sm:$0xff] %v8055_v41  ;;  %v1837_v41 = vmax.f32 %v11571_v37, %v7685_v49  ;;  %v1846_v37 = vmax.f32 %v11575_v48, %v7721_v27  ;;  %v11579_v56 = vld [vmem:[#allocation89_spill] sm:$0xff]  ;;  %v11584_v48 = vld [vmem:[#allocation92_spill] sm:$0xff]  ;;  %v1856_v16 = vmax.f32 %v11588_v24, %v7765_v63  ;;  %v1859_v60 = vmax.f32 %v11591_v45, %v11542_v8 }
 0x406   : > { %11565 = vst [vmem:[#allocation115_spill] sm:$0xff] %v8058_v17  ;;  %v1838_v17 = vmax.f32 %v11572_v5, %v7687_v39  ;;  %v1847_v5 = vmax.f32 %v11576_v50, %v7723_v29  ;;  %v1850_v46 = vmax.f32 %v11579_v56, %v7735_v1  ;;  %v1853_v27 = vmax.f32 %v11584_v48, %v11583_v22  ;;  %v11586_v50 = vld [vmem:[#allocation93_spill] sm:$0xff]  ;;  %v11589_v56 = vld [vmem:[#allocation96_spill] sm:$0xff]  ;;  %v11592_v48 = vld [vmem:[#allocation99_spill] sm:$0xff] }
 0x407   : > { %11566 = vst [vmem:[#allocation116_spill] sm:$0xff] %v8061_v9  ;;  %v1839_v9 = vmax.f32 %v11573_v40, %v7689_v53  ;;  %v1848_v40 = vmax.f32 %v11577_v7, %v7725_v19  ;;  %v11585_v53 = vld [vmem:[#allocation60_spill] sm:$0xff]  ;;  %v11587_v7 = vld [vmem:[#allocation94_spill] sm:$0xff]  ;;  %v1857_v1 = vmax.f32 %v11589_v56, %v7767_v33  ;;  %v11590_v13 = vld [vmem:[#allocation97_spill] sm:$0xff]  ;;  %v1860_v22 = vmax.f32 %v11592_v48, %v11543_v47 }
 0x408   : > { %v1854_v29 = vmax.f32 %v11586_v50, %v11585_v53  ;;  %v1855_v19 = vmax.f32 %v11587_v7, %v7763_v14  ;;  %v1858_v15 = vmax.f32 %v11590_v13, %v7781_v12  ;;  %v11593_v50 = vld [vmem:[#allocation100_spill] sm:$0xff]  ;;  %v1862_v7 = vmax.f32 %v8004_v11, %v11545_v28  ;;  %v11594_v45 = vld [vmem:[#allocation101_spill] sm:$0xff]  ;;  %v11596_v11 = vld [vmem:[#allocation103_spill] sm:$0xff] }
 0x409   : > { %v1861_v53 = vmax.f32 %v11593_v50, %v11544_v51  ;;  %v1863_v24 = vmax.f32 %v8007_v3, %v11547_v36  ;;  %v1864_v56 = vmax.f32 %v8010_v6, %v11548_v38  ;;  %v1865_v13 = vmax.f32 %v8013_v2, %v7819_v31  ;;  %v11595_v50 = vld [vmem:[#allocation102_spill] sm:$0xff]  ;;  %v1680_v47 = vld [vmem:[#allocation2 + $0x260] sm:$0xff]  ;;  %v11598_v6 = vld [vmem:[#allocation104_spill] sm:$0xff] }
 0x40a   : > { %v1866_v8 = vmax.f32 %v11594_v45, %v7821_v54  ;;  %v1867_v48 = vmax.f32 %v8019_v59, %v7835_v30  ;;  %v1868_v51 = vmax.f32 %v11595_v50, %v7837_v0  ;;  %v1869_v28 = vmax.f32 %v11596_v11, %v11557_v18  ;;  %v8137_v3 = vld [vmem:[#allocation2 + $0xc8] sm:$0xff]  ;;  %v11599_v2 = vld [vmem:[#allocation105_spill] sm:$0xff]  ;;  %v11603_v50 = vld [vmem:[#allocation111_spill] sm:$0xff] }
 0x40b   : > { %11597 = vst [vmem:[#allocation61_spill] sm:$0xff] %v8137_v3  ;;  %v1870_v38 = vmax.f32 %v11598_v6, %v7853_v44  ;;  %v1871_v31 = vmax.f32 %v11599_v2, %v11560_v23  ;;  %v11600_v45 = vld [vmem:[#allocation106_spill] sm:$0xff]  ;;  %v1874_v11 = vmax.f32 %v11603_v50, %v8038_v32  ;;  %v11604_v18 = vld [vmem:[#allocation112_spill] sm:$0xff]  ;;  %v11605_v12 = vld [vmem:[#allocation113_spill] sm:$0xff] }
 0x40c   : > { %v1872_v54 = vmax.f32 %v11600_v45, %v11562_v34  ;;  %v11601_v59 = vld [vmem:[#allocation110_spill] sm:$0xff]  ;;  %v1875_v0 = vmax.f32 %v11604_v18, %v8040_v55  ;;  %v1876_v33 = vmax.f32 %v11605_v12, %v1680_v47  ;;  %v8159_v45 = vmax.f32 %v1833_v10, %v7685_v49  ;;  %v11614_v18 = vld [vmem:[#allocation47_spill] sm:$0xff]  ;;  %v11616_v55 = vld [vmem:[#allocation48_spill] sm:$0xff] }
 0x40d   : > { %v1873_v30 = vmax.f32 %v11601_v59, %v8036_v20  ;;  %v8147_v36 = vld [vmem:[#allocation2 + $0x208] sm:$0xff]  ;;  %v8162_v59 = vmax.f32 %v1834_v61, %v7687_v39  ;;  %v11610_v20 = vld [vmem:[#allocation45_spill] sm:$0xff]  ;;  %v8171_v12 = vmax.f32 %v1837_v41, %v11614_v18  ;;  %v8174_v44 = vmax.f32 %v1838_v17, %v11616_v55  ;;  %v11621_v39 = vld [vmem:[#allocation51_spill] sm:$0xff] }
 0x40e   : > { %11602 = vst [vmem:[#allocation63_spill] sm:$0xff] %v8147_v36  ;;  %v8165_v34 = vmax.f32 %v1835_v43, %v11610_v20  ;;  %v11612_v50 = vld [vmem:[#allocation46_spill] sm:$0xff]  ;;  %v11618_v6 = vld [vmem:[#allocation49_spill] sm:$0xff]  ;;  %v8183_v61 = vmax.f32 %v1841_v26, %v11621_v39  ;;  %v11623_v43 = vld [vmem:[#allocation52_spill] sm:$0xff] }
 0x40f   : > { %11608 = vst [vmem:[#allocation67_spill] sm:$0xff] %v8159_v45  ;;  %v8168_v32 = vmax.f32 %v1836_v57, %v11612_v50  ;;  %v8177_v23 = vmax.f32 %v1839_v9, %v11618_v6  ;;  %v11620_v49 = vld [vmem:[#allocation50_spill] sm:$0xff]  ;;  %v8186_v20 = vmax.f32 %v1842_v42, %v11623_v43  ;;  %v11625_v57 = vld [vmem:[#allocation53_spill] sm:$0xff]  ;;  %v11629_v17 = vld [vmem:[#allocation55_spill] sm:$0xff] }
 0x410   : > { %11609 = vst [vmem:[#allocation71_spill] sm:$0xff] %v8162_v59  ;;  %v8180_v10 = vmax.f32 %v1840_v35, %v11620_v49  ;;  %v8189_v50 = vmax.f32 %v1843_v21, %v11625_v57  ;;  %v11627_v41 = vld [vmem:[#allocation54_spill] sm:$0xff]  ;;  %v8195_v55 = vmax.f32 %v1845_v58, %v11629_v17  ;;  %v11631_v9 = vld [vmem:[#allocation56_spill] sm:$0xff]  ;;  %v11633_v35 = vld [vmem:[#allocation57_spill] sm:$0xff]  ;;  %v8216_v58 = vmax.f32 %v1852_v25, %v7765_v63 }
 0x411   : > { %11611 = vst [vmem:[#allocation75_spill] sm:$0xff] %v8165_v34  ;;  %v8192_v18 = vmax.f32 %v1844_v4, %v11627_v41  ;;  %v8198_v6 = vmax.f32 %v1846_v37, %v11631_v9  ;;  %v8201_v49 = vmax.f32 %v1847_v5, %v11633_v35  ;;  %v11635_v26 = vld [vmem:[#allocation58_spill] sm:$0xff]  ;;  %v11637_v42 = vld [vmem:[#allocation59_spill] sm:$0xff]  ;;  %v11639_v21 = vld [vmem:[#allocation60_spill] sm:$0xff]  ;;  %v8213_v4 = vmax.f32 %v1851_v52, %v7763_v14 }
 0x412   : > { %11613 = vst [vmem:[#allocation79_spill] sm:$0xff] %v8168_v32  ;;  %v8204_v39 = vmax.f32 %v1848_v40, %v11635_v26  ;;  %v8207_v43 = vmax.f32 %v1849_v62, %v11637_v42  ;;  %v8210_v57 = vmax.f32 %v1850_v46, %v11639_v21  ;;  %v11643_v37 = vld [vmem:[#allocation62_spill] sm:$0xff]  ;;  %v11645_v5 = vld [vmem:[#allocation64_spill] sm:$0xff]  ;;  %v11647_v40 = vld [vmem:[#allocation65_spill] sm:$0xff] }
 0x413   : > { %11615 = vst [vmem:[#allocation83_spill] sm:$0xff] %v8171_v12  ;;  %v8219_v41 = vmax.f32 %v1853_v27, %v11643_v37  ;;  %v8222_v17 = vmax.f32 %v1854_v29, %v11645_v5  ;;  %v8225_v9 = vmax.f32 %v1855_v19, %v11647_v40  ;;  %v11649_v62 = vld [vmem:[#allocation66_spill] sm:$0xff]  ;;  %v11651_v46 = vld [vmem:[#allocation68_spill] sm:$0xff]  ;;  %v11653_v52 = vld [vmem:[#allocation69_spill] sm:$0xff] }
 0x414   : > { %11617 = vst [vmem:[#allocation84_spill] sm:$0xff] %v8174_v44  ;;  %v8228_v35 = vmax.f32 %v1856_v16, %v11649_v62  ;;  %v8231_v26 = vmax.f32 %v1857_v1, %v11651_v46  ;;  %v8234_v14 = vmax.f32 %v1858_v15, %v11653_v52  ;;  %v11655_v25 = vld [vmem:[#allocation70_spill] sm:$0xff]  ;;  %v1683_v27 = vld [vmem:[#allocation2 + $0x220] sm:$0xff]  ;;  %v11657_v42 = vld [vmem:[#allocation72_spill] sm:$0xff] }
 0x415   : > { %11619 = vst [vmem:[#allocation85_spill] sm:$0xff] %v8177_v23  ;;  %v8237_v63 = vmax.f32 %v1859_v60, %v11655_v25  ;;  %v8240_v21 = vmax.f32 %v1860_v22, %v11657_v42  ;;  %v11659_v29 = vld [vmem:[#allocation73_spill] sm:$0xff]  ;;  %v11661_v19 = vld [vmem:[#allocation74_spill] sm:$0xff]  ;;  %v11663_v16 = vld [vmem:[#allocation76_spill] sm:$0xff] }
 0x416   : > { %11622 = vst [vmem:[#allocation86_spill] sm:$0xff] %v8183_v61  ;;  %v8243_v37 = vmax.f32 %v1861_v53, %v11659_v29  ;;  %v8246_v5 = vmax.f32 %v1862_v7, %v11661_v19  ;;  %v8249_v40 = vmax.f32 %v1863_v24, %v11663_v16  ;;  %v1684_v1 = vld [vmem:[#allocation2 + $0x118] sm:$0xff]  ;;  %v11665_v62 = vld [vmem:[#allocation77_spill] sm:$0xff]  ;;  %v11667_v46 = vld [vmem:[#allocation78_spill] sm:$0xff] }
 0x417   : > { %11624 = vst [vmem:[#allocation87_spill] sm:$0xff] %v8186_v20  ;;  %v8252_v15 = vmax.f32 %v1864_v56, %v11665_v62  ;;  %v8255_v60 = vmax.f32 %v1865_v13, %v11667_v46  ;;  %v11669_v52 = vld [vmem:[#allocation80_spill] sm:$0xff]  ;;  %v11671_v22 = vld [vmem:[#allocation81_spill] sm:$0xff]  ;;  %v11673_v53 = vld [vmem:[#allocation82_spill] sm:$0xff]  ;;  %v8275_v13 = vmax.f32 %v1872_v54, %v1680_v47  ;;  %v8283_v46 = vmax.f32 %v1875_v0, %v1683_v27 }
 0x418   : > { %11626 = vst [vmem:[#allocation88_spill] sm:$0xff] %v8189_v50  ;;  %v8258_v25 = vmax.f32 %v1866_v8, %v11669_v52  ;;  %v8261_v42 = vmax.f32 %v1867_v48, %v11671_v22  ;;  %v8264_v29 = vmax.f32 %v1868_v51, %v11673_v53  ;;  %v11675_v7 = vld [vmem:[#allocation107_spill] sm:$0xff]  ;;  %v11677_v24 = vld [vmem:[#allocation108_spill] sm:$0xff]  ;;  %v11679_v56 = vld [vmem:[#allocation109_spill] sm:$0xff]  ;;  %v8278_v8 = vmax.f32 %v1873_v30, %v8137_v3 }
 0x419   : > { %11628 = vst [vmem:[#allocation89_spill] sm:$0xff] %v8192_v18  ;;  %v8267_v19 = vmax.f32 %v1869_v28, %v11675_v7  ;;  %v8270_v16 = vmax.f32 %v1870_v38, %v11677_v24  ;;  %v8273_v2 = vmax.f32 %v1871_v31, %v11679_v56  ;;  %v8281_v48 = vmax.f32 %v1874_v11, %v8147_v36 }
 0x41a   : > { %11630 = vst [vmem:[#allocation90_spill] sm:$0xff] %v8195_v55  ;;  %v8285_v51 = vmax.f32 %v1876_v33, %v1684_v1  ;;  %v2026_v28 = vrot.slane %v8159_v45, 1  ;;  %v2027_v38 = vrot.slane %v8162_v59, 1  ;;  %v2029_v31 = vrot.slane %v8165_v34, 1 }
 0x41b   : > { %11632 = vst [vmem:[#allocation91_spill] sm:$0xff] %v8198_v6  ;;  %v11048_v54 = vrot.slane %v8168_v32, 1  ;;  %v2033_v47 = vrot.slane %v8171_v12, 1  ;;  %v2034_v30 = vrot.slane %v8174_v44, 1  ;;  %v2036_v0 = vrot.slane %v8177_v23, 1 }
 0x41c   : > { %11634 = vst [vmem:[#allocation92_spill] sm:$0xff] %v8201_v49  ;;  %v8294_v11 = vsel %vm2025_vm0, %v2026_v28, %v2027_v38  ;;  %v11050_v33 = vrot.slane %v8180_v10, 1  ;;  %v2040_v27 = vrot.slane %v8183_v61, 1  ;;  %v8300_v1 = vsel %vm2025_vm0, %v2027_v38, %v2029_v31 }
 0x41d   : > { %11636 = vst [vmem:[#allocation93_spill] sm:$0xff] %v8204_v39  ;;  %v8305_v52 = vsel %vm2025_vm0, %v2029_v31, %v11048_v54  ;;  %v8308_v22 = vsel %vm2025_vm0, %v2033_v47, %v2034_v30  ;;  %v2041_v7 = vrot.slane %v8186_v20, 1  ;;  %v8312_v24 = vsel %vm2025_vm0, %v2034_v30, %v2036_v0 }
 0x41e   : > { %11638 = vst [vmem:[#allocation94_spill] sm:$0xff] %v8207_v43  ;;  %v8317_v56 = vsel %vm2025_vm0, %v2036_v0, %v11050_v33  ;;  %v2043_v28 = vrot.slane %v8189_v50, 1  ;;  %v11053_v38 = vrot.slane %v8192_v18, 1  ;;  %v2047_v47 = vrot.slane %v8195_v55, 1 }
 0x41f   : > { %11640 = vst [vmem:[#allocation95_spill] sm:$0xff] %v8210_v57  ;;  %v8322_v31 = vsel %vm2025_vm0, %v2040_v27, %v2041_v7  ;;  %v2048_v54 = vrot.slane %v8198_v6, 1  ;;  %v2050_v36 = vrot.slane %v8201_v49, 1  ;;  %v2052_v33 = vrot.slane %v8204_v39, 1 }
 0x420   : > { %11641 = vst [vmem:[#allocation96_spill] sm:$0xff] %v8213_v4  ;;  %v8328_v30 = vsel %vm2025_vm0, %v2041_v7, %v2043_v28  ;;  %v8333_v0 = vsel %vm2025_vm0, %v2043_v28, %v11053_v38  ;;  %v2054_v3 = vrot.slane %v8207_v43, 1  ;;  %v2055_v62 = vrot.slane %v8210_v57, 1 }
 0x421   : > { %11642 = vst [vmem:[#allocation97_spill] sm:$0xff] %v8216_v58  ;;  %v8338_v27 = vsel %vm2025_vm0, %v2047_v47, %v2048_v54  ;;  %v8341_v53 = vsel %vm2025_vm0, %v2048_v54, %v2050_v36  ;;  %v2057_v7 = vrot.slane %v8213_v4, 1  ;;  %v2059_v28 = vrot.slane %v8216_v58, 1 }
 0x422   : > { %11644 = vst [vmem:[#allocation98_spill] sm:$0xff] %v8219_v41  ;;  %v2061_v38 = vrot.slane %v8219_v41, 1  ;;  %v2064_v54 = vrot.slane %v8225_v9, 1  ;;  %v2068_v41 = vrot.slane %v8231_v26, 1 }
 0x423   : > { %11646 = vst [vmem:[#allocation99_spill] sm:$0xff] %v8222_v17  ;;  %v8355_v47 = vsel %vm2025_vm0, %v2055_v62, %v2057_v7  ;;  %v8360_v32 = vsel %vm2025_vm0, %v2057_v7, %v2059_v28 }
 0x424   : > { %11648 = vst [vmem:[#allocation100_spill] sm:$0xff] %v8225_v9  ;;  %v2071_v9 = vrot.slane %v8237_v63, 1 }
 0x425   : > { %11650 = vst [vmem:[#allocation101_spill] sm:$0xff] %v8228_v35 }
 0x426   : > { %11652 = vst [vmem:[#allocation102_spill] sm:$0xff] %v8231_v26  ;;  %v2078_v26 = vrot.slane %v8249_v40, 1 }
 0x427   : > { %11654 = vst [vmem:[#allocation103_spill] sm:$0xff] %v8234_v14 }
 0x428   : > { %11656 = vst [vmem:[#allocation104_spill] sm:$0xff] %v8237_v63  ;;  %v2082_v63 = vrot.slane %v8255_v60, 1 }
 0x429   : > { %11658 = vst [vmem:[#allocation105_spill] sm:$0xff] %v8240_v21 }
 0x42a   : > { %11660 = vst [vmem:[#allocation106_spill] sm:$0xff] %v8243_v37 }
 0x42b   : > { %11662 = vst [vmem:[#allocation110_spill] sm:$0xff] %v8246_v5 }
 0x42c   : > { %11664 = vst [vmem:[#allocation111_spill] sm:$0xff] %v8249_v40  ;;  %v2085_v40 = vrot.slane %v8261_v42, 1 }
 0x42d   : > { %11666 = vst [vmem:[#allocation112_spill] sm:$0xff] %v8252_v15 }
 0x42e   : > { %11668 = vst [vmem:[#allocation113_spill] sm:$0xff] %v8255_v60 }
 0x42f   : > { %11670 = vst [vmem:[#allocation45_spill] sm:$0xff] %v8258_v25 }
 0x430   : > { %11672 = vst [vmem:[#allocation46_spill] sm:$0xff] %v8261_v42 }
 0x431   : > { %11674 = vst [vmem:[#allocation47_spill] sm:$0xff] %v8264_v29 }
 0x432   : > { %11676 = vst [vmem:[#allocation48_spill] sm:$0xff] %v8267_v19 }
 0x433   : > { %11678 = vst [vmem:[#allocation49_spill] sm:$0xff] %v8270_v16 }
 0x434   : > { %11680 = vst [vmem:[#allocation50_spill] sm:$0xff] %v8273_v2 }
 0x435   : > { %11681 = vst [vmem:[#allocation51_spill] sm:$0xff] %v8278_v8  ;;  %v2066_v8 = vrot.slane %v8228_v35, 1  ;;  %v2073_v35 = vrot.slane %v8240_v21, 1 }
 0x436   : > { %11682 = vst [vmem:[#allocation52_spill] sm:$0xff] %v8281_v48  ;;  %v8352_v48 = vsel %vm2025_vm0, %v2054_v3, %v2055_v62 }
 0x437   : > { %11683 = vst [vmem:[#allocation53_spill] sm:$0xff] %v8283_v46  ;;  %v2062_v46 = vrot.slane %v8222_v17, 1  ;;  %v2069_v17 = vrot.slane %v8234_v14, 1  ;;  %v8371_v62 = vsel %vm2025_vm0, %v2064_v54, %v2066_v8 }
 0x438   : > { %11684 = vst [vmem:[#allocation54_spill] sm:$0xff] %v8285_v51  ;;  %v8346_v51 = vsel %vm2025_vm0, %v2050_v36, %v2052_v33 }
 0x439   : > { %11685 = vst [vmem:[#allocation55_spill] sm:$0xff] %v8322_v31  ;;  %v8363_v36 = vsel %vm2025_vm0, %v2061_v38, %v2062_v46  ;;  %v8368_v3 = vsel %vm2025_vm0, %v2062_v46, %v2064_v54  ;;  %v8376_v7 = vsel %vm2025_vm0, %v2068_v41, %v2069_v17  ;;  %v2075_v38 = vrot.slane %v8243_v37, 1 }
 0x43a   : > { %11686 = vst [vmem:[#allocation56_spill] sm:$0xff] %v8328_v30  ;;  %v8382_v14 = vsel %vm2025_vm0, %v2069_v17, %v2071_v9  ;;  %v8385_v46 = vsel %vm2025_vm0, %v2071_v9, %v2073_v35  ;;  %v2080_v54 = vrot.slane %v8252_v15, 1  ;;  %v11094_v9 = vrot.slane %v8264_v29, 1 }
 0x43b   : > { %11687 = vst [vmem:[#allocation57_spill] sm:$0xff] %v8333_v0  ;;  %v2089_v37 = vrot.slane %v8267_v19, 1  ;;  %v2090_v15 = vrot.slane %v8270_v16, 1  ;;  %v8462_v31 = vmax.f32 %v8204_v39, %v2052_v33  ;;  %v11717_v33 = vld [vmem:[#allocation100_spill] sm:$0xff]  ;;  %v2284_v0 = vrot.slane %v8189_v50, 2 }
 0x43c   : > { %11688 = vst [vmem:[#allocation58_spill] sm:$0xff] %v8338_v27  ;;  %v8398_v17 = vsel %vm2025_vm0, %v2078_v26, %v2080_v54  ;;  %v11728_v27 = vld [vmem:[#allocation112_spill] sm:$0xff]  ;;  %v11132_v30 = vrot.slane %v8192_v18, 2 }
 0x43d   : > { %11689 = vst [vmem:[#allocation59_spill] sm:$0xff] %v8341_v53  ;;  %v8417_v42 = vsel %vm2025_vm0, %v2089_v37, %v2090_v15 }
 0x43e   : > { %11690 = vst [vmem:[#allocation60_spill] sm:$0xff] %v8346_v51  ;;  %v11725_v51 = vld [vmem:[#allocation106_spill] sm:$0xff] }
 0x43f   : > { %11691 = vst [vmem:[#allocation62_spill] sm:$0xff] %v8352_v48  ;;  %v11723_v48 = vld [vmem:[#allocation105_spill] sm:$0xff] }
 0x440   : > { %11692 = vst [vmem:[#allocation64_spill] sm:$0xff] %v8355_v47  ;;  %v8489_v53 = vmax.f32 %v11723_v48, %v2073_v35  ;;  %v8498_v47 = vmax.f32 %v11728_v27, %v2080_v54  ;;  %v11732_v35 = vld [vmem:[#allocation46_spill] sm:$0xff]  ;;  %v2267_v54 = vrot.slane %v8159_v45, 2 }
 0x441   : > { %11693 = vst [vmem:[#allocation65_spill] sm:$0xff] %v8360_v32  ;;  %v11730_v32 = vld [vmem:[#allocation113_spill] sm:$0xff] }
 0x442   : > { %11694 = vst [vmem:[#allocation66_spill] sm:$0xff] %v8363_v36  ;;  %v2076_v36 = vrot.slane %v8246_v5, 1  ;;  %v2083_v5 = vrot.slane %v8258_v25, 1  ;;  %v11095_v25 = vrot.slane %v8275_v13, 1 }
 0x443   : > { %11695 = vst [vmem:[#allocation68_spill] sm:$0xff] %v8368_v3 }
 0x444   : > { %11696 = vst [vmem:[#allocation69_spill] sm:$0xff] %v8371_v62  ;;  %v8390_v21 = vsel %vm2025_vm0, %v2075_v38, %v2076_v36  ;;  %v8393_v41 = vsel %vm2025_vm0, %v2076_v36, %v2078_v26  ;;  %v8404_v60 = vsel %vm2025_vm0, %v2082_v63, %v2083_v5  ;;  %v8407_v38 = vsel %vm2025_vm0, %v2083_v5, %v2085_v40  ;;  %v11733_v62 = vld [vmem:[#allocation49_spill] sm:$0xff] }
 0x445   : > { %11697 = vst [vmem:[#allocation70_spill] sm:$0xff] %v8376_v7  ;;  %v2092_v36 = vrot.slane %v8273_v2, 1  ;;  %v8414_v26 = vsel %vm2025_vm0, %v2085_v40, %v11094_v9  ;;  %v11710_v40 = vrot.slane %v8192_v18, 1  ;;  %v8471_v63 = vmax.f32 %v8216_v58, %v2059_v28  ;;  %v11722_v28 = vld [vmem:[#allocation104_spill] sm:$0xff] }
 0x446   : > { %11698 = vst [vmem:[#allocation72_spill] sm:$0xff] %v8382_v14  ;;  %v2268_v14 = vrot.slane %v8162_v59, 2 }
 0x447   : > { %11699 = vst [vmem:[#allocation73_spill] sm:$0xff] %v8385_v46  ;;  %v8424_v5 = vsel %vm2025_vm0, %v2090_v15, %v2092_v36  ;;  %v8429_v2 = vsel %vm2025_vm0, %v2092_v36, %v11095_v25  ;;  %v11709_v15 = vrot.slane %v8180_v10, 1  ;;  %v8453_v9 = vmax.f32 %v8192_v18, %v11710_v40  ;;  %v11716_v36 = vld [vmem:[#allocation99_spill] sm:$0xff]  ;;  %v11720_v25 = vld [vmem:[#allocation102_spill] sm:$0xff] }
 0x448   : > { %11700 = vst [vmem:[#allocation74_spill] sm:$0xff] %v8390_v21  ;;  %v11721_v40 = vld [vmem:[#allocation103_spill] sm:$0xff]  ;;  %v8519_v3 = vsel %vm2266_vm1, %v2267_v54, %v2268_v14  ;;  %v2282_v21 = vrot.slane %v8186_v20, 2 }
 0x449   : > { %11701 = vst [vmem:[#allocation76_spill] sm:$0xff] %v8393_v41  ;;  %v8442_v16 = vmax.f32 %v8180_v10, %v11709_v15  ;;  %v11715_v15 = vld [vmem:[#allocation98_spill] sm:$0xff]  ;;  %v11735_v46 = vld [vmem:[#allocation79_spill] sm:$0xff]  ;;  %v2277_v41 = vrot.slane %v8177_v23, 2 }
 0x44a   : > { %11702 = vst [vmem:[#allocation78_spill] sm:$0xff] %v8398_v17  ;;  %v11121_v17 = vrot.slane %v8180_v10, 2  ;;  %v2302_v18 = vrot.slane %v11715_v15, 2 }
 0x44b   : > { %11703 = vst [vmem:[#allocation80_spill] sm:$0xff] %v8404_v60  ;;  %v2270_v60 = vrot.slane %v8165_v34, 2 }
 0x44c   : > { %11704 = vst [vmem:[#allocation81_spill] sm:$0xff] %v8407_v38  ;;  %v11120_v38 = vrot.slane %v11735_v46, 2  ;;  %v2280_v54 = vsel %vm2266_vm1, %v2277_v41, %v11121_v17  ;;  %v2288_v46 = vrot.slane %v8195_v55, 2  ;;  %v2295_v17 = vrot.slane %v8207_v43, 2 }
 0x44d   : > { %11705 = vst [vmem:[#allocation107_spill] sm:$0xff] %v8414_v26  ;;  %v2275_v26 = vrot.slane %v8174_v44, 2  ;;  %v2296_v55 = vrot.slane %v8210_v57, 2 }
 0x44e   : > { %11706 = vst [vmem:[#allocation108_spill] sm:$0xff] %v8417_v42  ;;  %v2273_v42 = vsel %vm2266_vm1, %v2270_v60, %v11120_v38  ;;  %v2285_v38 = vsel %vm2266_vm1, %v2282_v21, %v2284_v0 }
 0x44f   : > { %11707 = vst [vmem:[#allocation109_spill] sm:$0xff] %v8424_v5  ;;  %v2271_v5 = vsel %vm2266_vm1, %v2268_v14, %v2270_v60  ;;  %v2278_v7 = vsel %vm2266_vm1, %v2275_v26, %v2277_v41  ;;  %v2289_v60 = vrot.slane %v8198_v6, 2  ;;  %v2293_v41 = vrot.slane %v8204_v39, 2 }
 0x450   : > { %11708 = vst [vmem:[#allocation117_spill] sm:$0xff] %v8429_v2  ;;  %v2281_v2 = vrot.slane %v8183_v61, 2  ;;  %v2298_v6 = vrot.slane %v8213_v4, 2 }
 0x451   : > { %11711 = vst [vmem:[#allocation118_spill] sm:$0xff] %v8453_v9  ;;  %v11718_v9 = vld [vmem:[#allocation101_spill] sm:$0xff]  ;;  %v2290_v50 = vsel %vm2266_vm1, %v2288_v46, %v2289_v60  ;;  %v2305_v46 = vrot.slane %v11717_v33, 2 }
 0x452   : > { %11712 = vst [vmem:[#allocation119_spill] sm:$0xff] %v8462_v31  ;;  %v8480_v37 = vmax.f32 %v11718_v9, %v2066_v8  ;;  %v11726_v31 = vld [vmem:[#allocation110_spill] sm:$0xff]  ;;  %v11727_v8 = vld [vmem:[#allocation111_spill] sm:$0xff]  ;;  %v2283_v14 = vsel %vm2266_vm1, %v2281_v2, %v2282_v21  ;;  %v2300_v21 = vrot.slane %v8216_v58, 2  ;;  %v2299_v39 = vsel %vm2266_vm1, %v2296_v55, %v2298_v6 }
 0x453   : > { %11713 = vst [vmem:[#allocation120_spill] sm:$0xff] %v8471_v63  ;;  %v11731_v63 = vld [vmem:[#allocation45_spill] sm:$0xff]  ;;  %v2310_v58 = vrot.slane %v11721_v40, 2 }
 0x454   : > { %11719 = vst [vmem:[#allocation121_spill] sm:$0xff] %v8480_v37  ;;  %v11734_v37 = vld [vmem:[#allocation50_spill] sm:$0xff]  ;;  %v2301_v57 = vsel %vm2266_vm1, %v2298_v6, %v2300_v21  ;;  %v2317_v6 = vrot.slane %v11726_v31, 2 }
 0x455   : > { %11724 = vst [vmem:[#allocation122_spill] sm:$0xff] %v8489_v53  ;;  %v2274_v53 = vrot.slane %v8171_v12, 2 }
 0x456   : > { %11729 = vst [vmem:[#allocation123_spill] sm:$0xff] %v8498_v47 }
 0x457   : > { %v2276_v47 = vsel %vm2266_vm1, %v2274_v53, %v2275_v26  ;;  %v2291_v53 = vrot.slane %v8201_v49, 2  ;;  %v2287_v26 = vsel %vm2266_vm1, %v2284_v0, %v11132_v30  ;;  %v2303_v0 = vrot.slane %v11716_v36, 2 }
 0x458   : > { %v2297_v30 = vsel %vm2266_vm1, %v2295_v17, %v2296_v55  ;;  %v2312_v17 = vrot.slane %v11722_v28, 2  ;;  %v2314_v55 = vrot.slane %v11723_v48, 2 }
 0x459   : > { %v2292_v2 = vsel %vm2266_vm1, %v2289_v60, %v2291_v53  ;;  %v2294_v49 = vsel %vm2266_vm1, %v2291_v53, %v2293_v41  ;;  %v2307_v60 = vrot.slane %v11718_v9, 2  ;;  %v2304_v4 = vsel %vm2266_vm1, %v2302_v18, %v2303_v0 }
 0x45a   : > { %v2309_v53 = vrot.slane %v11720_v25, 2  ;;  %v2306_v15 = vsel %vm2266_vm1, %v2303_v0, %v2305_v46  ;;  %v2316_v9 = vrot.slane %v11725_v51, 2  ;;  %v2319_v18 = vrot.slane %v11727_v8, 2 }
 0x45b   : > { %v2308_v36 = vsel %vm2266_vm1, %v2305_v46, %v2307_v60  ;;  %v2313_v25 = vsel %vm2266_vm1, %v2310_v58, %v2312_v17  ;;  %v2315_v40 = vsel %vm2266_vm1, %v2312_v17, %v2314_v55  ;;  %v2321_v0 = vrot.slane %v11728_v27, 2 }
 0x45c   : > { %v2311_v33 = vsel %vm2266_vm1, %v2309_v53, %v2310_v58  ;;  %v2323_v46 = vrot.slane %v11730_v32, 2  ;;  %v2318_v28 = vsel %vm2266_vm1, %v2316_v9, %v2317_v6  ;;  %v2320_v48 = vsel %vm2266_vm1, %v2317_v6, %v2319_v18 }
 0x45d   : > { %v2324_v53 = vrot.slane %v11731_v63, 2  ;;  %v2326_v51 = vrot.slane %v11732_v35, 2  ;;  %v2322_v31 = vsel %vm2266_vm1, %v2319_v18, %v2321_v0  ;;  %v11162_v8 = vrot.slane %v8264_v29, 2 }
 0x45e   : > { %v2330_v58 = vrot.slane %v8267_v19, 2  ;;  %v2331_v17 = vrot.slane %v11733_v62, 2  ;;  %v2333_v9 = vrot.slane %v11734_v37, 2  ;;  %v11161_v6 = vrot.slane %v8275_v13, 2 }
 0x45f   : > { %v2325_v27 = vsel %vm2266_vm1, %v2323_v46, %v2324_v53  ;;  %v2327_v32 = vsel %vm2266_vm1, %v2324_v53, %v2326_v51  ;;  %v2329_v35 = vsel %vm2266_vm1, %v2326_v51, %v11162_v8  ;;  %v11736_v19 = vmax.f32 %v8159_v45, %v8294_v11  ;;  %v11758_v8 = vld [vmem:[#allocation58_spill] sm:$0xff] }
 0x460   : > { %v2332_v18 = vsel %vm2266_vm1, %v2330_v58, %v2331_v17  ;;  %v11737_v46 = vmax.f32 %v8162_v59, %v8300_v1  ;;  %v2334_v37 = vsel %vm2266_vm1, %v2331_v17, %v2333_v9  ;;  %v2336_v29 = vsel %vm2266_vm1, %v2333_v9, %v11161_v6  ;;  %v11755_v6 = vld [vmem:[#allocation118_spill] sm:$0xff] }
 0x461   : > { %v8594_v63 = vmax.f32 %v11736_v19, %v8519_v3  ;;  %v11738_v51 = vmax.f32 %v8165_v34, %v8305_v52  ;;  %v11739_v19 = vmax.f32 %v8171_v12, %v8308_v22  ;;  %v11740_v1 = vmax.f32 %v8174_v44, %v8312_v24  ;;  %v11743_v52 = vld [vmem:[#allocation55_spill] sm:$0xff] }
 0x462   : > { %v8599_v53 = vmax.f32 %v11737_v46, %v2271_v5  ;;  %v11741_v5 = vmax.f32 %v8177_v23, %v8317_v56  ;;  %v11742_v9 = vrot.slane %v8180_v10, 2  ;;  %v11744_v22 = vmax.f32 %v8183_v61, %v11743_v52  ;;  %v11746_v46 = vld [vmem:[#allocation56_spill] sm:$0xff] }
 0x463   : > { %v8608_v58 = vmax.f32 %v11738_v51, %v2273_v42  ;;  %v8613_v11 = vmax.f32 %v11739_v19, %v2276_v47  ;;  %v8618_v3 = vmax.f32 %v11740_v1, %v2278_v7  ;;  %v11747_v24 = vmax.f32 %v8186_v20, %v11746_v46  ;;  %v11749_v51 = vld [vmem:[#allocation88_spill] sm:$0xff]  ;;  %v11750_v19 = vld [vmem:[#allocation57_spill] sm:$0xff] }
 0x464   : > { %v8623_v17 = vmax.f32 %v11741_v5, %v2280_v54  ;;  %v8628_v42 = vmax.f32 %v8442_v16, %v11742_v9  ;;  %v8633_v47 = vmax.f32 %v11744_v22, %v2283_v14  ;;  %v11751_v56 = vmax.f32 %v11749_v51, %v11750_v19  ;;  %v11753_v1 = vld [vmem:[#allocation89_spill] sm:$0xff]  ;;  %v11757_v9 = vld [vmem:[#allocation90_spill] sm:$0xff]  ;;  %v11761_v22 = vld [vmem:[#allocation91_spill] sm:$0xff] }
 0x465   : > { %v8638_v7 = vmax.f32 %v11747_v24, %v2285_v38  ;;  %v11754_v5 = vrot.slane %v11753_v1, 2  ;;  %v11759_v52 = vmax.f32 %v11757_v9, %v11758_v8  ;;  %v11765_v24 = vld [vmem:[#allocation92_spill] sm:$0xff] }
 0x466   : > { %11745 = vst [vmem:[#allocation55_spill] sm:$0xff] %v8633_v47  ;;  %v8643_v54 = vmax.f32 %v11751_v56, %v2287_v26  ;;  %v11762_v47 = vld [vmem:[#allocation59_spill] sm:$0xff]  ;;  %v11775_v8 = vld [vmem:[#allocation64_spill] sm:$0xff] }
 0x467   : > { %11748 = vst [vmem:[#allocation56_spill] sm:$0xff] %v8638_v7  ;;  %v8648_v16 = vmax.f32 %v11755_v6, %v11754_v5  ;;  %v8653_v14 = vmax.f32 %v11759_v52, %v2290_v50  ;;  %v11763_v46 = vmax.f32 %v11761_v22, %v11762_v47  ;;  %v11766_v7 = vld [vmem:[#allocation60_spill] sm:$0xff]  ;;  %v11769_v56 = vld [vmem:[#allocation119_spill] sm:$0xff]  ;;  %v11771_v6 = vld [vmem:[#allocation62_spill] sm:$0xff] }
 0x468   : > { %11752 = vst [vmem:[#allocation57_spill] sm:$0xff] %v8643_v54  ;;  %v11767_v19 = vmax.f32 %v11765_v24, %v11766_v7  ;;  %v8666_v54 = vmax.f32 %v11769_v56, %v2293_v41  ;;  %v11772_v5 = vmax.f32 %v8207_v43, %v11771_v6  ;;  %v11774_v50 = vld [vmem:[#allocation95_spill] sm:$0xff]  ;;  %v11779_v47 = vld [vmem:[#allocation65_spill] sm:$0xff]  ;;  %v11784_v41 = vld [vmem:[#allocation98_spill] sm:$0xff] }
 0x469   : > { %11756 = vst [vmem:[#allocation89_spill] sm:$0xff] %v8648_v16  ;;  %v8658_v38 = vmax.f32 %v11763_v46, %v2292_v2  ;;  %v11776_v52 = vmax.f32 %v11774_v50, %v11775_v8  ;;  %v11778_v2 = vld [vmem:[#allocation96_spill] sm:$0xff]  ;;  %v11793_v8 = vld [vmem:[#allocation69_spill] sm:$0xff] }
 0x46a   : > { %11760 = vst [vmem:[#allocation118_spill] sm:$0xff] %v8653_v14  ;;  %v8663_v26 = vmax.f32 %v11767_v19, %v2294_v49  ;;  %v8671_v16 = vmax.f32 %v11772_v5, %v2297_v30  ;;  %v11780_v46 = vmax.f32 %v11778_v2, %v11779_v47  ;;  %v11782_v49 = vld [vmem:[#allocation120_spill] sm:$0xff]  ;;  %v11785_v19 = vld [vmem:[#allocation66_spill] sm:$0xff]  ;;  %v11788_v30 = vld [vmem:[#allocation99_spill] sm:$0xff] }
 0x46b   : > { %11764 = vst [vmem:[#allocation58_spill] sm:$0xff] %v8658_v38  ;;  %v8676_v14 = vmax.f32 %v11776_v52, %v2299_v39  ;;  %v8684_v7 = vmax.f32 %v11782_v49, %v2300_v21  ;;  %v11786_v56 = vmax.f32 %v11784_v41, %v11785_v19  ;;  %v11789_v6 = vld [vmem:[#allocation68_spill] sm:$0xff]  ;;  %v11798_v21 = vld [vmem:[#allocation102_spill] sm:$0xff] }
 0x46c   : > { %11768 = vst [vmem:[#allocation59_spill] sm:$0xff] %v8663_v26  ;;  %v8681_v38 = vmax.f32 %v11780_v46, %v2301_v57  ;;  %v11790_v5 = vmax.f32 %v11788_v30, %v11789_v6  ;;  %v11792_v39 = vld [vmem:[#allocation100_spill] sm:$0xff]  ;;  %v11796_v57 = vld [vmem:[#allocation121_spill] sm:$0xff]  ;;  %v11799_v46 = vld [vmem:[#allocation70_spill] sm:$0xff] }
 0x46d   : > { %11770 = vst [vmem:[#allocation60_spill] sm:$0xff] %v8666_v54  ;;  %v8689_v54 = vmax.f32 %v11786_v56, %v2304_v4  ;;  %v11794_v52 = vmax.f32 %v11792_v39, %v11793_v8  ;;  %v8702_v47 = vmax.f32 %v11796_v57, %v2307_v60  ;;  %v11800_v49 = vmax.f32 %v11798_v21, %v11799_v46  ;;  %v11802_v4 = vld [vmem:[#allocation103_spill] sm:$0xff]  ;;  %v11803_v19 = vld [vmem:[#allocation72_spill] sm:$0xff]  ;;  %v11807_v6 = vld [vmem:[#allocation73_spill] sm:$0xff] }
 0x46e   : > { %11773 = vst [vmem:[#allocation119_spill] sm:$0xff] %v8671_v16  ;;  %v8694_v16 = vmax.f32 %v11790_v5, %v2306_v15  ;;  %v11804_v56 = vmax.f32 %v11802_v4, %v11803_v19  ;;  %v11806_v15 = vld [vmem:[#allocation104_spill] sm:$0xff]  ;;  %v11812_v60 = vld [vmem:[#allocation106_spill] sm:$0xff] }
 0x46f   : > { %11777 = vst [vmem:[#allocation62_spill] sm:$0xff] %v8676_v14  ;;  %v8699_v14 = vmax.f32 %v11794_v52, %v2308_v36  ;;  %v11808_v5 = vmax.f32 %v11806_v15, %v11807_v6  ;;  %v11810_v36 = vld [vmem:[#allocation122_spill] sm:$0xff]  ;;  %v11817_v46 = vld [vmem:[#allocation76_spill] sm:$0xff] }
 0x470   : > { %11781 = vst [vmem:[#allocation64_spill] sm:$0xff] %v8681_v38  ;;  %v8720_v8 = vmax.f32 %v11810_v36, %v2314_v55  ;;  %v11813_v52 = vld [vmem:[#allocation74_spill] sm:$0xff]  ;;  %v11825_v55 = vld [vmem:[#allocation113_spill] sm:$0xff] }
 0x471   : > { %11783 = vst [vmem:[#allocation65_spill] sm:$0xff] %v8684_v7  ;;  %v8707_v7 = vmax.f32 %v11800_v49, %v2311_v33  ;;  %v11814_v57 = vmax.f32 %v11812_v60, %v11813_v52  ;;  %v11816_v33 = vld [vmem:[#allocation110_spill] sm:$0xff]  ;;  %v11830_v52 = vld [vmem:[#allocation81_spill] sm:$0xff] }
 0x472   : > { %11787 = vst [vmem:[#allocation120_spill] sm:$0xff] %v8689_v54  ;;  %v8712_v54 = vmax.f32 %v11804_v56, %v2313_v25  ;;  %v11818_v49 = vmax.f32 %v11816_v33, %v11817_v46  ;;  %v11820_v25 = vld [vmem:[#allocation111_spill] sm:$0xff]  ;;  %v11821_v19 = vld [vmem:[#allocation78_spill] sm:$0xff]  ;;  %v11941_v38 = vld [vmem:[#allocation113_spill] sm:$0xff] }
 0x473   : > { %11791 = vst [vmem:[#allocation66_spill] sm:$0xff] %v8694_v16  ;;  %v8717_v16 = vmax.f32 %v11808_v5, %v2315_v40  ;;  %v11822_v56 = vmax.f32 %v11820_v25, %v11821_v19  ;;  %v11824_v40 = vld [vmem:[#allocation123_spill] sm:$0xff]  ;;  %v11826_v5 = vld [vmem:[#allocation80_spill] sm:$0xff] }
 0x474   : > { %11795 = vst [vmem:[#allocation68_spill] sm:$0xff] %v8699_v14  ;;  %v8738_v6 = vmax.f32 %v11824_v40, %v2321_v0  ;;  %v11827_v36 = vmax.f32 %v11825_v55, %v11826_v5  ;;  %v11834_v46 = vld [vmem:[#allocation107_spill] sm:$0xff]  ;;  %v11838_v19 = vld [vmem:[#allocation108_spill] sm:$0xff]  ;;  %v11841_v40 = vld [vmem:[#allocation109_spill] sm:$0xff] }
 0x475   : > { %11797 = vst [vmem:[#allocation69_spill] sm:$0xff] %v8702_v47  ;;  %v8725_v47 = vmax.f32 %v11814_v57, %v2318_v28  ;;  %v11829_v28 = vld [vmem:[#allocation45_spill] sm:$0xff]  ;;  %v11842_v5 = vmax.f32 %v11733_v62, %v11841_v40  ;;  %v2522_v40 = vrot.slane %v8183_v61, 3 }
 0x476   : > { %11801 = vst [vmem:[#allocation121_spill] sm:$0xff] %v8707_v7  ;;  %v8730_v7 = vmax.f32 %v11818_v49, %v2320_v48  ;;  %v11831_v57 = vmax.f32 %v11829_v28, %v11830_v52  ;;  %v11833_v48 = vld [vmem:[#allocation46_spill] sm:$0xff]  ;;  %v11936_v14 = vld [vmem:[#allocation105_spill] sm:$0xff] }
 0x477   : > { %11805 = vst [vmem:[#allocation70_spill] sm:$0xff] %v8712_v54  ;;  %v8735_v54 = vmax.f32 %v11822_v56, %v2322_v31  ;;  %v11835_v49 = vmax.f32 %v11833_v48, %v11834_v46  ;;  %v11837_v31 = vld [vmem:[#allocation48_spill] sm:$0xff]  ;;  %v2511_v46 = vrot.slane %v8165_v34, 3  ;;  %v11860_v34 = vld [vmem:[#allocation97_spill] sm:$0xff] }
 0x478   : > { %11809 = vst [vmem:[#allocation72_spill] sm:$0xff] %v8717_v16  ;;  %v11839_v56 = vmax.f32 %v11837_v31, %v11838_v19  ;;  %v2515_v19 = vrot.slane %v8171_v12, 3 }
 0x479   : > { %11811 = vst [vmem:[#allocation73_spill] sm:$0xff] %v8720_v8  ;;  %v8743_v8 = vmax.f32 %v11827_v36, %v2325_v27  ;;  %v8763_v27 = vmax.f32 %v11842_v5, %v2334_v37  ;;  %v11844_v36 = vld [vmem:[#allocation50_spill] sm:$0xff] }
 0x47a   : > { %11815 = vst [vmem:[#allocation122_spill] sm:$0xff] %v8725_v47  ;;  %v8748_v47 = vmax.f32 %v11831_v57, %v2327_v32  ;;  %v8758_v0 = vmax.f32 %v11839_v56, %v2332_v18  ;;  %v2508_v57 = vrot.slane %v8159_v45, 3  ;;  %v2516_v56 = vrot.slane %v8174_v44, 3 }
 0x47b   : > { %11819 = vst [vmem:[#allocation74_spill] sm:$0xff] %v8730_v7  ;;  %v8753_v7 = vmax.f32 %v11835_v49, %v2329_v35  ;;  %v2509_v35 = vrot.slane %v8162_v59, 3  ;;  %v11848_v49 = vld [vmem:[#allocation79_spill] sm:$0xff]  ;;  %v2558_v45 = vrot.slane %v11816_v33, 3  ;;  %v2565_v33 = vrot.slane %v11829_v28, 3 }
 0x47c   : > { %11823 = vst [vmem:[#allocation76_spill] sm:$0xff] %v8735_v54  ;;  %v11181_v18 = vrot.slane %v11848_v49, 3  ;;  %v8791_v12 = vsel %vm2507_vm2, %v2515_v19, %v2516_v56  ;;  %v2529_v19 = vrot.slane %v11757_v9, 3  ;;  %v2536_v49 = vrot.slane %v8207_v43, 3  ;;  %v11922_v54 = vld [vmem:[#allocation91_spill] sm:$0xff] }
 0x47d   : > { %11828 = vst [vmem:[#allocation78_spill] sm:$0xff] %v8743_v8  ;;  %v11845_v8 = vld [vmem:[#allocation117_spill] sm:$0xff]  ;;  %v8777_v37 = vsel %vm2507_vm2, %v2508_v57, %v2509_v35  ;;  %v8783_v5 = vsel %vm2507_vm2, %v2509_v35, %v2511_v46  ;;  %v2523_v57 = vrot.slane %v8186_v20, 3  ;;  %v2525_v35 = vrot.slane %v11749_v51, 3 }
 0x47e   : > { %11832 = vst [vmem:[#allocation123_spill] sm:$0xff] %v8748_v47  ;;  %v11846_v52 = vmax.f32 %v11844_v36, %v11845_v8  ;;  %v2518_v8 = vrot.slane %v8177_v23, 3  ;;  %v11190_v23 = vrot.slane %v11753_v1, 3  ;;  %v2532_v20 = vrot.slane %v11765_v24, 3  ;;  %v11915_v47 = vld [vmem:[#allocation83_spill] sm:$0xff] }
 0x47f   : > { %11836 = vst [vmem:[#allocation80_spill] sm:$0xff] %v8753_v7  ;;  %v2537_v24 = vrot.slane %v11774_v50, 3  ;;  %v11863_v50 = vld [vmem:[#allocation101_spill] sm:$0xff]  ;;  %v11213_v28 = vrot.slane %v8275_v13, 3 }
 0x480   : > { %11840 = vst [vmem:[#allocation81_spill] sm:$0xff] %v8758_v0  ;;  %v8768_v32 = vmax.f32 %v11846_v52, %v2336_v29  ;;  %v11183_v29 = vrot.slane %v8180_v10, 3  ;;  %v8788_v52 = vsel %vm2507_vm2, %v2511_v46, %v11181_v18  ;;  %v8795_v44 = vsel %vm2507_vm2, %v2516_v56, %v2518_v8  ;;  %v11921_v0 = vld [vmem:[#allocation90_spill] sm:$0xff] }
 0x481   : > { %11843 = vst [vmem:[#allocation107_spill] sm:$0xff] %v8763_v27  ;;  %v8805_v46 = vsel %vm2507_vm2, %v2522_v40, %v2523_v57  ;;  %v2530_v18 = vrot.slane %v11761_v22, 3  ;;  %v8811_v56 = vsel %vm2507_vm2, %v2523_v57, %v2525_v35  ;;  %v2539_v57 = vrot.slane %v11778_v2, 3 }
 0x482   : > { %11847 = vst [vmem:[#allocation48_spill] sm:$0xff] %v8768_v32  ;;  %v8800_v61 = vsel %vm2507_vm2, %v2518_v8, %v11183_v29  ;;  %v8816_v8 = vsel %vm2507_vm2, %v2525_v35, %v11190_v23  ;;  %v11856_v29 = vld [vmem:[#allocation93_spill] sm:$0xff]  ;;  %v2541_v35 = vrot.slane %v11860_v34, 3  ;;  %v2543_v23 = vrot.slane %v11784_v41, 3 }
 0x483   : > { %11849 = vst [vmem:[#allocation108_spill] sm:$0xff] %v8783_v5  ;;  %v2534_v51 = vrot.slane %v11856_v29, 3  ;;  %v8821_v40 = vsel %vm2507_vm2, %v2529_v19, %v2530_v18  ;;  %v8824_v9 = vsel %vm2507_vm2, %v2530_v18, %v2532_v20  ;;  %v2544_v29 = vrot.slane %v11788_v30, 3  ;;  %v11868_v34 = vld [vmem:[#allocation105_spill] sm:$0xff]  ;;  %v11885_v5 = vld [vmem:[#allocation56_spill] sm:$0xff] }
 0x484   : > { %11850 = vst [vmem:[#allocation109_spill] sm:$0xff] %v8788_v52  ;;  %v8835_v43 = vsel %vm2507_vm2, %v2536_v49, %v2537_v24  ;;  %v8838_v19 = vsel %vm2507_vm2, %v2537_v24, %v2539_v57  ;;  %v2546_v18 = vrot.slane %v11792_v39, 3  ;;  %v2548_v59 = vrot.slane %v11863_v50, 3  ;;  %v11934_v52 = vld [vmem:[#allocation103_spill] sm:$0xff] }
 0x485   : > { %11851 = vst [vmem:[#allocation117_spill] sm:$0xff] %v8791_v12  ;;  %v8829_v22 = vsel %vm2507_vm2, %v2532_v20, %v2534_v51  ;;  %v8843_v2 = vsel %vm2507_vm2, %v2539_v57, %v2541_v35  ;;  %v8846_v20 = vsel %vm2507_vm2, %v2543_v23, %v2544_v29  ;;  %v2550_v41 = vrot.slane %v11798_v21, 3 }
 0x486   : > { %11852 = vst [vmem:[#allocation124_spill] sm:$0xff] %v8795_v44  ;;  %v2551_v30 = vrot.slane %v11802_v4, 3  ;;  %v8851_v49 = vsel %vm2507_vm2, %v2544_v29, %v2546_v18  ;;  %v8854_v24 = vsel %vm2507_vm2, %v2546_v18, %v2548_v59  ;;  %v2553_v39 = vrot.slane %v11806_v15, 3  ;;  %v11872_v18 = vld [vmem:[#allocation112_spill] sm:$0xff] }
 0x487   : > { %11853 = vst [vmem:[#allocation125_spill] sm:$0xff] %v8800_v61  ;;  %v2555_v50 = vrot.slane %v11868_v34, 3  ;;  %v2557_v23 = vrot.slane %v11812_v60, 3  ;;  %v2560_v21 = vrot.slane %v11820_v25, 3  ;;  %v2562_v32 = vrot.slane %v11872_v18, 3  ;;  %v11876_v60 = vld [vmem:[#allocation47_spill] sm:$0xff] }
 0x488   : > { %11854 = vst [vmem:[#allocation126_spill] sm:$0xff] %v8805_v46  ;;  %v8859_v57 = vsel %vm2507_vm2, %v2550_v41, %v2551_v30  ;;  %v8865_v4 = vsel %vm2507_vm2, %v2551_v30, %v2553_v39  ;;  %v2564_v15 = vrot.slane %v11825_v55, 3  ;;  %v2567_v25 = vrot.slane %v11833_v48, 3  ;;  %v11891_v46 = vld [vmem:[#allocation60_spill] sm:$0xff] }
 0x489   : > { %11855 = vst [vmem:[#allocation127_spill] sm:$0xff] %v8816_v8  ;;  %v8868_v29 = vsel %vm2507_vm2, %v2553_v39, %v2555_v50  ;;  %v8873_v34 = vsel %vm2507_vm2, %v2557_v23, %v2558_v45  ;;  %v8876_v41 = vsel %vm2507_vm2, %v2558_v45, %v2560_v21  ;;  %v8881_v30 = vsel %vm2507_vm2, %v2560_v21, %v2562_v32  ;;  %v11942_v8 = vld [vmem:[#allocation45_spill] sm:$0xff] }
 0x48a   : > { %11857 = vst [vmem:[#allocation128_spill] sm:$0xff] %v8821_v40  ;;  %v11212_v39 = vrot.slane %v11876_v60, 3  ;;  %v2571_v27 = vrot.slane %v11837_v31, 3  ;;  %v2572_v18 = vrot.slane %v11733_v62, 3  ;;  %v8887_v55 = vsel %vm2507_vm2, %v2564_v15, %v2565_v33  ;;  %v11889_v15 = vld [vmem:[#allocation118_spill] sm:$0xff] }
 0x48b   : > { %11858 = vst [vmem:[#allocation129_spill] sm:$0xff] %v8824_v9  ;;  %v8890_v23 = vsel %vm2507_vm2, %v2565_v33, %v2567_v25  ;;  %v2574_v45 = vrot.slane %v11844_v36, 3  ;;  %v11887_v12 = vrot.slane %v11753_v1, 3 }
 0x48c   : > { %11859 = vst [vmem:[#allocation130_spill] sm:$0xff] %v8829_v22  ;;  %v8897_v21 = vsel %vm2507_vm2, %v2567_v25, %v11212_v39  ;;  %v8900_v48 = vsel %vm2507_vm2, %v2571_v27, %v2572_v18  ;;  %v11888_v39 = vld [vmem:[#allocation89_spill] sm:$0xff]  ;;  %v11927_v22 = vld [vmem:[#allocation96_spill] sm:$0xff] }
 0x48d   : > { %11861 = vst [vmem:[#allocation131_spill] sm:$0xff] %v8835_v43  ;;  %v8907_v33 = vsel %vm2507_vm2, %v2572_v18, %v2574_v45  ;;  %v8912_v36 = vsel %vm2507_vm2, %v2574_v45, %v11213_v28  ;;  %v11883_v18 = vrot.slane %v8180_v10, 3  ;;  %v8936_v44 = vmax.f32 %v11888_v39, %v11887_v12  ;;  %v11895_v39 = vld [vmem:[#allocation65_spill] sm:$0xff]  ;;  %v11937_v28 = vld [vmem:[#allocation106_spill] sm:$0xff] }
 0x48e   : > { %11862 = vst [vmem:[#allocation132_spill] sm:$0xff] %v8838_v19  ;;  %v8945_v45 = vmax.f32 %v11891_v46, %v2534_v51  ;;  %v8954_v61 = vmax.f32 %v11895_v39, %v2541_v35  ;;  %v11899_v46 = vld [vmem:[#allocation69_spill] sm:$0xff]  ;;  %v11914_v35 = vld [vmem:[#allocation79_spill] sm:$0xff]  ;;  %v11943_v43 = vld [vmem:[#allocation46_spill] sm:$0xff] }
 0x48f   : > { %11864 = vst [vmem:[#allocation133_spill] sm:$0xff] %v8843_v2  ;;  %v8925_v62 = vmax.f32 %v8628_v42, %v11883_v18  ;;  %v8963_v27 = vmax.f32 %v11899_v46, %v2548_v59  ;;  %v11903_v39 = vld [vmem:[#allocation73_spill] sm:$0xff]  ;;  %v8981_v46 = vmax.f32 %v8738_v6, %v2562_v32  ;;  %v11911_v6 = vld [vmem:[#allocation67_spill] sm:$0xff] }
 0x490   : > { %11865 = vst [vmem:[#allocation134_spill] sm:$0xff] %v8846_v20  ;;  %v8972_v9 = vmax.f32 %v11903_v39, %v2555_v50  ;;  %v2749_v32 = vrot.slane %v11911_v6, 4  ;;  %v2756_v50 = vrot.slane %v11915_v47, 4  ;;  %v11919_v47 = vld [vmem:[#allocation87_spill] sm:$0xff]  ;;  %v11932_v12 = vld [vmem:[#allocation101_spill] sm:$0xff]  ;;  %v11938_v20 = vld [vmem:[#allocation110_spill] sm:$0xff] }
 0x491   : > { %11866 = vst [vmem:[#allocation135_spill] sm:$0xff] %v8851_v49  ;;  %v11917_v49 = vld [vmem:[#allocation85_spill] sm:$0xff]  ;;  %v11939_v18 = vld [vmem:[#allocation111_spill] sm:$0xff] }
 0x492   : > { %11867 = vst [vmem:[#allocation136_spill] sm:$0xff] %v8854_v24  ;;  %v2764_v24 = vrot.slane %v11919_v47, 4  ;;  %v11944_v25 = vld [vmem:[#allocation49_spill] sm:$0xff] }
 0x493   : > { %11869 = vst [vmem:[#allocation137_spill] sm:$0xff] %v8859_v57  ;;  %v11933_v57 = vld [vmem:[#allocation102_spill] sm:$0xff] }
 0x494   : > { %11870 = vst [vmem:[#allocation138_spill] sm:$0xff] %v8865_v4  ;;  %v11930_v4 = vld [vmem:[#allocation99_spill] sm:$0xff] }
 0x495   : > { %11871 = vst [vmem:[#allocation139_spill] sm:$0xff] %v8868_v29  ;;  %v11929_v29 = vld [vmem:[#allocation98_spill] sm:$0xff] }
 0x496   : > { %11873 = vst [vmem:[#allocation140_spill] sm:$0xff] %v8873_v34  ;;  %v11926_v34 = vld [vmem:[#allocation95_spill] sm:$0xff]  ;;  %v2784_v16 = vrot.slane %v11929_v29, 4 }
 0x497   : > { %11874 = vst [vmem:[#allocation141_spill] sm:$0xff] %v8876_v41  ;;  %v11924_v41 = vld [vmem:[#allocation93_spill] sm:$0xff] }
 0x498   : > { %11875 = vst [vmem:[#allocation142_spill] sm:$0xff] %v8881_v30  ;;  %v11241_v30 = vrot.slane %v8180_v10, 4 }
 0x499   : > { %11877 = vst [vmem:[#allocation143_spill] sm:$0xff] %v8887_v55  ;;  %v11913_v55 = vld [vmem:[#allocation75_spill] sm:$0xff] }
 0x49a   : > { %11878 = vst [vmem:[#allocation144_spill] sm:$0xff] %v8890_v23  ;;  %v2752_v2 = vrot.slane %v11913_v55, 4  ;;  %v11239_v23 = vrot.slane %v11914_v35, 4  ;;  %v2770_v35 = vrot.slane %v11921_v0, 4  ;;  %v2778_v0 = vrot.slane %v11926_v34, 4 }
 0x49b   : > { %11879 = vst [vmem:[#allocation145_spill] sm:$0xff] %v8897_v21  ;;  %v11916_v21 = vld [vmem:[#allocation84_spill] sm:$0xff] }
 0x49c   : > { %11880 = vst [vmem:[#allocation146_spill] sm:$0xff] %v8900_v48  ;;  %v2757_v7 = vrot.slane %v11916_v21, 4  ;;  %v2755_v55 = vsel %vm2748_vm3, %v2752_v2, %v11239_v23  ;;  %v11923_v23 = vld [vmem:[#allocation92_spill] sm:$0xff] }
 0x49d   : > { %11881 = vst [vmem:[#allocation147_spill] sm:$0xff] %v8907_v33  ;;  %v2759_v33 = vrot.slane %v11917_v49, 4 }
 0x49e   : > { %11882 = vst [vmem:[#allocation148_spill] sm:$0xff] %v8912_v36  ;;  %v11918_v36 = vld [vmem:[#allocation86_spill] sm:$0xff] }
 0x49f   : > { %11892 = vst [vmem:[#allocation56_spill] sm:$0xff] %v8945_v45  ;;  %v2763_v59 = vrot.slane %v11918_v36, 4  ;;  %v2760_v21 = vsel %vm2748_vm3, %v2757_v7, %v2759_v33  ;;  %v2762_v49 = vsel %vm2748_vm3, %v2759_v33, %v11241_v30  ;;  %v11246_v36 = vrot.slane %v11753_v1, 4  ;;  %v11925_v30 = vld [vmem:[#allocation94_spill] sm:$0xff] }
 0x4a0   : > { %11896 = vst [vmem:[#allocation89_spill] sm:$0xff] %v8954_v61  ;;  %v2775_v33 = vrot.slane %v11924_v41, 4  ;;  %v11940_v61 = vld [vmem:[#allocation112_spill] sm:$0xff]  ;;  %v11945_v45 = vld [vmem:[#allocation50_spill] sm:$0xff] }
 0x4a1   : > { %11900 = vst [vmem:[#allocation118_spill] sm:$0xff] %v8963_v27  ;;  %v11935_v27 = vld [vmem:[#allocation104_spill] sm:$0xff] }
 0x4a2   : > { %11904 = vst [vmem:[#allocation60_spill] sm:$0xff] %v8972_v9  ;;  %v11928_v9 = vld [vmem:[#allocation97_spill] sm:$0xff] }
 0x4a3   : > { %11907 = vst [vmem:[#allocation65_spill] sm:$0xff] %v8981_v46  ;;  %v11912_v46 = vld [vmem:[#allocation71_spill] sm:$0xff] }
 0x4a4   : > { %v2750_v19 = vrot.slane %v11912_v46, 4  ;;  %v2758_v46 = vsel %vm2748_vm3, %v2756_v50, %v2757_v7  ;;  %v2773_v50 = vrot.slane %v11923_v23, 4 }
 0x4a6   : > { %v9002_v39 = vsel %vm2748_vm3, %v2749_v32, %v2750_v19  ;;  %v2753_v6 = vsel %vm2748_vm3, %v2750_v19, %v2752_v2  ;;  %v11920_v32 = vld [vmem:[#allocation88_spill] sm:$0xff]  ;;  %v2765_v19 = vsel %vm2748_vm3, %v2763_v59, %v2764_v24  ;;  %v2771_v2 = vrot.slane %v11922_v54, 4 }
 0x4a7   : > { %v2766_v48 = vrot.slane %v11920_v32, 4  ;;  %v2777_v32 = vrot.slane %v11925_v30, 4  ;;  %v2780_v54 = vrot.slane %v11927_v22, 4  ;;  %v2776_v23 = vsel %vm2748_vm3, %v2773_v50, %v2775_v33 }
 0x4a8   : > { %v2772_v51 = vsel %vm2748_vm3, %v2770_v35, %v2771_v2  ;;  %v2774_v59 = vsel %vm2748_vm3, %v2771_v2, %v2773_v50  ;;  %v2789_v2 = vrot.slane %v11932_v12, 4  ;;  %v2791_v50 = vrot.slane %v11933_v57, 4 }
 0x4a9   : > { %v2767_v47 = vsel %vm2748_vm3, %v2764_v24, %v2766_v48  ;;  %v2769_v7 = vsel %vm2748_vm3, %v2766_v48, %v11246_v36  ;;  %v2782_v24 = vrot.slane %v11928_v9, 4  ;;  %v2785_v48 = vrot.slane %v11930_v4, 4  ;;  %v11931_v36 = vld [vmem:[#allocation100_spill] sm:$0xff] }
 0x4aa   : > { %v2779_v41 = vsel %vm2748_vm3, %v2777_v32, %v2778_v0  ;;  %v2781_v30 = vsel %vm2748_vm3, %v2778_v0, %v2780_v54  ;;  %v2787_v35 = vrot.slane %v11931_v36, 4  ;;  %v2792_v9 = vrot.slane %v11934_v52, 4 }
 0x4ab   : > { %v2783_v34 = vsel %vm2748_vm3, %v2780_v54, %v2782_v24  ;;  %v2786_v22 = vsel %vm2748_vm3, %v2784_v16, %v2785_v48  ;;  %v2794_v32 = vrot.slane %v11935_v27, 4  ;;  %v2796_v0 = vrot.slane %v11936_v14, 4 }
 0x4ac   : > { %v2788_v29 = vsel %vm2748_vm3, %v2785_v48, %v2787_v35  ;;  %v2790_v4 = vsel %vm2748_vm3, %v2787_v35, %v2789_v2  ;;  %v2793_v36 = vsel %vm2748_vm3, %v2791_v50, %v2792_v9  ;;  %v2798_v12 = vrot.slane %v11937_v28, 4 }
 0x4ad   : > { %v2799_v54 = vrot.slane %v11938_v20, 4  ;;  %v2801_v16 = vrot.slane %v11939_v18, 4  ;;  %v2795_v57 = vsel %vm2748_vm3, %v2792_v9, %v2794_v32  ;;  %v2797_v52 = vsel %vm2748_vm3, %v2794_v32, %v2796_v0 }
 0x4ae   : > { %v2803_v48 = vrot.slane %v11940_v61, 4  ;;  %v2805_v35 = vrot.slane %v11941_v38, 4  ;;  %v2806_v50 = vrot.slane %v11942_v8, 4  ;;  %v2808_v28 = vrot.slane %v11943_v43, 4 }
 0x4af   : > { %v2800_v27 = vsel %vm2748_vm3, %v2798_v12, %v2799_v54  ;;  %v2802_v14 = vsel %vm2748_vm3, %v2799_v54, %v2801_v16  ;;  %v11254_v18 = vrot.slane %v11876_v60, 4  ;;  %v2812_v9 = vrot.slane %v11837_v31, 4  ;;  %v11949_v60 = vld [vmem:[#allocation109_spill] sm:$0xff] }
 0x4b0   : > { %v2804_v20 = vsel %vm2748_vm3, %v2801_v16, %v2803_v48  ;;  %v2813_v32 = vrot.slane %v11944_v25, 4  ;;  %v2807_v61 = vsel %vm2748_vm3, %v2805_v35, %v2806_v50  ;;  %v2809_v38 = vsel %vm2748_vm3, %v2806_v50, %v2808_v28  ;;  %v11947_v25 = vld [vmem:[#allocation108_spill] sm:$0xff] }
 0x4b1   : > { %v2815_v12 = vrot.slane %v11945_v45, 4  ;;  %v11256_v54 = vrot.slane %v8275_v13, 4  ;;  %v2811_v43 = vsel %vm2748_vm3, %v2808_v28, %v11254_v18  ;;  %v11946_v31 = vmax.f32 %v8594_v63, %v8777_v37  ;;  %v11953_v63 = vld [vmem:[#allocation124_spill] sm:$0xff] }
 0x4b2   : > { %v2814_v8 = vsel %vm2748_vm3, %v2812_v9, %v2813_v32  ;;  %v11948_v35 = vmax.f32 %v8599_v53, %v11947_v25  ;;  %v11950_v28 = vmax.f32 %v8608_v58, %v11949_v60  ;;  %v11951_v9 = vld [vmem:[#allocation117_spill] sm:$0xff]  ;;  %v11954_v37 = vmax.f32 %v8618_v3, %v11953_v63  ;;  %v11958_v25 = vld [vmem:[#allocation55_spill] sm:$0xff]  ;;  %v11959_v58 = vld [vmem:[#allocation126_spill] sm:$0xff] }
 0x4b3   : > { %v2925_v16 = vmax.f32 %v11946_v31, %v9002_v39  ;;  %v2816_v50 = vsel %vm2748_vm3, %v2813_v32, %v2815_v12  ;;  %v2818_v45 = vsel %vm2748_vm3, %v2815_v12, %v11256_v54  ;;  %v11952_v42 = vmax.f32 %v8613_v11, %v11951_v9  ;;  %v11955_v53 = vld [vmem:[#allocation125_spill] sm:$0xff]  ;;  %v11963_v3 = vld [vmem:[#allocation127_spill] sm:$0xff]  ;;  %v11968_v9 = vld [vmem:[#allocation58_spill] sm:$0xff] }
 0x4b4   : > { %v2926_v26 = vmax.f32 %v11948_v35, %v2753_v6  ;;  %v2927_v18 = vmax.f32 %v11950_v28, %v2755_v55  ;;  %v2930_v39 = vmax.f32 %v11954_v37, %v2760_v21  ;;  %v11956_v6 = vmax.f32 %v8623_v17, %v11955_v53 }
 0x4b5   : > { %v2929_v40 = vmax.f32 %v11952_v42, %v2758_v46  ;;  %v11957_v31 = vrot.slane %v8180_v10, 4  ;;  %v11960_v60 = vmax.f32 %v11958_v25, %v11959_v58  ;;  %v11961_v11 = vmax.f32 %v11885_v5, %v8811_v56  ;;  %v11962_v46 = vld [vmem:[#allocation57_spill] sm:$0xff]  ;;  %v11966_v10 = vld [vmem:[#allocation128_spill] sm:$0xff]  ;;  %v11971_v5 = vld [vmem:[#allocation59_spill] sm:$0xff] }
 0x4b6   : > { %v2931_v32 = vmax.f32 %v11956_v6, %v2762_v49  ;;  %v11964_v21 = vmax.f32 %v11962_v46, %v11963_v3  ;;  %v11965_v17 = vrot.slane %v11753_v1, 4  ;;  %v11972_v56 = vld [vmem:[#allocation130_spill] sm:$0xff]  ;;  %v11976_v6 = vld [vmem:[#allocation131_spill] sm:$0xff] }
 0x4b7   : > { %v9099_v12 = vmax.f32 %v8925_v62, %v11957_v31  ;;  %v2933_v55 = vmax.f32 %v11960_v60, %v2765_v19  ;;  %v2934_v42 = vmax.f32 %v11961_v11, %v2767_v47  ;;  %v11967_v62 = vmax.f32 %v11889_v15, %v11966_v10  ;;  %v11969_v19 = vld [vmem:[#allocation129_spill] sm:$0xff]  ;;  %v11979_v15 = vld [vmem:[#allocation62_spill] sm:$0xff] }
 0x4b8   : > { %v2935_v35 = vmax.f32 %v11964_v21, %v2769_v7  ;;  %v9113_v49 = vmax.f32 %v8936_v44, %v11965_v17  ;;  %v11970_v63 = vmax.f32 %v11968_v9, %v11969_v19  ;;  %v11973_v47 = vmax.f32 %v11971_v5, %v11972_v56  ;;  %v11974_v7 = vld [vmem:[#allocation56_spill] sm:$0xff]  ;;  %v11975_v44 = vld [vmem:[#allocation119_spill] sm:$0xff]  ;;  %v11984_v11 = vld [vmem:[#allocation133_spill] sm:$0xff] }
 0x4b9   : > { %v9118_v28 = vmax.f32 %v11967_v62, %v2772_v51  ;;  %v9131_v1 = vmax.f32 %v11974_v7, %v2775_v33  ;;  %v11977_v31 = vmax.f32 %v11975_v44, %v11976_v6  ;;  %v11980_v51 = vld [vmem:[#allocation132_spill] sm:$0xff]  ;;  %v11989_v17 = vld [vmem:[#allocation134_spill] sm:$0xff]  ;;  %v11993_v9 = vld [vmem:[#allocation135_spill] sm:$0xff] }
 0x4ba   : > { %v9123_v37 = vmax.f32 %v11970_v63, %v2774_v59  ;;  %v9128_v53 = vmax.f32 %v11973_v47, %v2776_v23  ;;  %v11981_v58 = vmax.f32 %v11979_v15, %v11980_v51  ;;  %v11983_v59 = vld [vmem:[#allocation64_spill] sm:$0xff]  ;;  %v11987_v23 = vld [vmem:[#allocation89_spill] sm:$0xff]  ;;  %v12006_v15 = vld [vmem:[#allocation138_spill] sm:$0xff] }
 0x4bb   : > { %v9136_v25 = vmax.f32 %v11977_v31, %v2779_v41  ;;  %v11985_v46 = vmax.f32 %v11983_v59, %v11984_v11  ;;  %v9149_v21 = vmax.f32 %v11987_v23, %v2782_v24  ;;  %v11988_v33 = vld [vmem:[#allocation120_spill] sm:$0xff]  ;;  %v11992_v41 = vld [vmem:[#allocation66_spill] sm:$0xff]  ;;  %v12001_v24 = vld [vmem:[#allocation121_spill] sm:$0xff] }
 0x4bc   : > { %v9141_v60 = vmax.f32 %v11981_v58, %v2781_v30  ;;  %v11990_v10 = vmax.f32 %v11988_v33, %v11989_v17  ;;  %v11994_v19 = vmax.f32 %v11992_v41, %v11993_v9  ;;  %v11996_v30 = vld [vmem:[#allocation68_spill] sm:$0xff]  ;;  %v12002_v44 = vld [vmem:[#allocation137_spill] sm:$0xff]  ;;  %v12010_v59 = vld [vmem:[#allocation139_spill] sm:$0xff] }
 0x4bd   : > { %11978 = vst [vmem:[#allocation69_spill] sm:$0xff] %v9136_v25  ;;  %v9146_v3 = vmax.f32 %v11985_v46, %v2783_v34  ;;  %v11997_v5 = vld [vmem:[#allocation136_spill] sm:$0xff]  ;;  %v12000_v34 = vld [vmem:[#allocation118_spill] sm:$0xff]  ;;  %v12003_v6 = vmax.f32 %v12001_v24, %v12002_v44  ;;  %v12019_v41 = vld [vmem:[#allocation141_spill] sm:$0xff] }
 0x4be   : > { %11982 = vst [vmem:[#allocation73_spill] sm:$0xff] %v9141_v60  ;;  %v9154_v62 = vmax.f32 %v11990_v10, %v2786_v22  ;;  %v9159_v63 = vmax.f32 %v11994_v19, %v2788_v29  ;;  %v11998_v56 = vmax.f32 %v11996_v30, %v11997_v5  ;;  %v9167_v7 = vmax.f32 %v12000_v34, %v2789_v2  ;;  %v12005_v22 = vld [vmem:[#allocation70_spill] sm:$0xff]  ;;  %v12009_v29 = vld [vmem:[#allocation72_spill] sm:$0xff]  ;;  %v12029_v24 = vld [vmem:[#allocation143_spill] sm:$0xff] }
 0x4bf   : > { %11986 = vst [vmem:[#allocation67_spill] sm:$0xff] %v9146_v3  ;;  %v9172_v31 = vmax.f32 %v12003_v6, %v2793_v36  ;;  %v12007_v51 = vmax.f32 %v12005_v22, %v12006_v15  ;;  %v12011_v11 = vmax.f32 %v12009_v29, %v12010_v59  ;;  %v12014_v2 = vld [vmem:[#allocation122_spill] sm:$0xff]  ;;  %v12015_v33 = vld [vmem:[#allocation140_spill] sm:$0xff]  ;;  %v12037_v29 = vld [vmem:[#allocation145_spill] sm:$0xff] }
 0x4c0   : > { %11991 = vst [vmem:[#allocation71_spill] sm:$0xff] %v9154_v62  ;;  %v9164_v47 = vmax.f32 %v11998_v56, %v2790_v4  ;;  %v12013_v4 = vld [vmem:[#allocation60_spill] sm:$0xff]  ;;  %v12016_v17 = vmax.f32 %v12014_v2, %v12015_v33  ;;  %v12018_v36 = vld [vmem:[#allocation74_spill] sm:$0xff]  ;;  %v12044_v33 = vld [vmem:[#allocation107_spill] sm:$0xff] }
 0x4c1   : > { %11995 = vst [vmem:[#allocation75_spill] sm:$0xff] %v9159_v63  ;;  %v9177_v58 = vmax.f32 %v12007_v51, %v2795_v57  ;;  %v9182_v46 = vmax.f32 %v12011_v11, %v2797_v52  ;;  %v9185_v23 = vmax.f32 %v12013_v4, %v2796_v0  ;;  %v12020_v9 = vmax.f32 %v12018_v36, %v12019_v41  ;;  %v12022_v57 = vld [vmem:[#allocation76_spill] sm:$0xff]  ;;  %v12023_v30 = vld [vmem:[#allocation142_spill] sm:$0xff]  ;;  %v12026_v52 = vld [vmem:[#allocation65_spill] sm:$0xff] }
 0x4c2   : > { %11999 = vst [vmem:[#allocation83_spill] sm:$0xff] %v9164_v47  ;;  %v9190_v10 = vmax.f32 %v12016_v17, %v2800_v27  ;;  %v12024_v5 = vmax.f32 %v12022_v57, %v12023_v30  ;;  %v9203_v34 = vmax.f32 %v12026_v52, %v2803_v48  ;;  %v12028_v0 = vld [vmem:[#allocation78_spill] sm:$0xff]  ;;  %v12032_v27 = vld [vmem:[#allocation123_spill] sm:$0xff]  ;;  %v12033_v22 = vld [vmem:[#allocation144_spill] sm:$0xff]  ;;  %v2989_v30 = vmax.f32 %v2925_v16, %v2929_v40 }
 0x4c3   : > { %12004 = vst [vmem:[#allocation84_spill] sm:$0xff] %v9172_v31  ;;  %v9195_v19 = vmax.f32 %v12020_v9, %v2802_v14  ;;  %v12030_v44 = vmax.f32 %v12028_v0, %v12029_v24  ;;  %v12034_v15 = vmax.f32 %v12032_v27, %v12033_v22  ;;  %v12036_v14 = vld [vmem:[#allocation80_spill] sm:$0xff]  ;;  %v12041_v4 = vld [vmem:[#allocation146_spill] sm:$0xff]  ;;  %v12045_v17 = vld [vmem:[#allocation147_spill] sm:$0xff]  ;;  %v2991_v52 = vmax.f32 %v2927_v18, %v2931_v32 }
 0x4c4   : > { %12008 = vst [vmem:[#allocation85_spill] sm:$0xff] %v9177_v58  ;;  %v9200_v56 = vmax.f32 %v12024_v5, %v2804_v20  ;;  %v12038_v59 = vmax.f32 %v12036_v14, %v12037_v29  ;;  %v12040_v20 = vld [vmem:[#allocation81_spill] sm:$0xff]  ;;  %v12046_v36 = vmax.f32 %v12044_v33, %v12045_v17  ;;  %v12048_v41 = vld [vmem:[#allocation48_spill] sm:$0xff]  ;;  %v2990_v5 = vmax.f32 %v2926_v26, %v2930_v39 }
 0x4c5   : > { %12012 = vst [vmem:[#allocation86_spill] sm:$0xff] %v9182_v46  ;;  %v9208_v6 = vmax.f32 %v12030_v44, %v2807_v61  ;;  %v9213_v51 = vmax.f32 %v12034_v15, %v2809_v38  ;;  %v12042_v2 = vmax.f32 %v12040_v20, %v12041_v4  ;;  %v12049_v9 = vld [vmem:[#allocation148_spill] sm:$0xff]  ;;  %v2994_v0 = vmax.f32 %v2930_v39, %v2934_v42 }
 0x4c6   : > { %12017 = vst [vmem:[#allocation87_spill] sm:$0xff] %v9190_v10  ;;  %v9218_v11 = vmax.f32 %v12038_v59, %v2811_v43  ;;  %v9228_v61 = vmax.f32 %v12046_v36, %v2816_v50  ;;  %v12050_v57 = vmax.f32 %v12048_v41, %v12049_v9  ;;  %v2993_v43 = vmax.f32 %v2929_v40, %v2933_v55 }
 0x4c7   : > { %12021 = vst [vmem:[#allocation88_spill] sm:$0xff] %v9195_v19  ;;  %v9223_v48 = vmax.f32 %v12042_v2, %v2814_v8  ;;  %v2995_v24 = vmax.f32 %v2931_v32, %v2935_v35  ;;  %v2997_v44 = vmax.f32 %v2933_v55, %v9118_v28  ;;  %v2998_v27 = vmax.f32 %v2934_v42, %v9123_v37 }
 0x4c8   : > { %12025 = vst [vmem:[#allocation90_spill] sm:$0xff] %v9200_v56  ;;  %v9233_v38 = vmax.f32 %v12050_v57, %v2818_v45  ;;  %v2999_v50 = vmax.f32 %v2935_v35, %v9128_v53  ;;  %v3000_v22 = vmax.f32 %v9113_v49, %v9131_v1  ;;  %v3001_v16 = vmax.f32 %v9118_v28, %v9136_v25 }
 0x4c9   : > { %12027 = vst [vmem:[#allocation91_spill] sm:$0xff] %v9203_v34  ;;  %v3002_v26 = vmax.f32 %v9123_v37, %v9141_v60  ;;  %v3003_v40 = vmax.f32 %v9128_v53, %v9146_v3  ;;  %v3005_v18 = vmax.f32 %v9136_v25, %v9154_v62  ;;  %v3006_v45 = vmax.f32 %v9141_v60, %v9159_v63 }
 0x4ca   : > { %12031 = vst [vmem:[#allocation92_spill] sm:$0xff] %v9208_v6  ;;  %v3007_v39 = vmax.f32 %v9146_v3, %v9164_v47  ;;  %v3009_v32 = vmax.f32 %v9154_v62, %v9172_v31  ;;  %v3010_v15 = vmax.f32 %v9159_v63, %v9177_v58  ;;  %v3011_v14 = vmax.f32 %v9164_v47, %v9182_v46 }
 0x4cb   : > { %12035 = vst [vmem:[#allocation93_spill] sm:$0xff] %v9213_v51  ;;  %v3037_v20 = vmax.f32 %v2989_v30, %v2933_v55  ;;  %v3038_v4 = vmax.f32 %v2990_v5, %v2934_v42  ;;  %v3039_v2 = vmax.f32 %v2991_v52, %v2935_v35  ;;  %v3041_v33 = vmax.f32 %v2993_v43, %v9118_v28 }
 0x4cc   : > { %12039 = vst [vmem:[#allocation94_spill] sm:$0xff] %v9218_v11  ;;  %v3042_v17 = vmax.f32 %v2994_v0, %v9123_v37  ;;  %v3043_v36 = vmax.f32 %v2995_v24, %v9128_v53  ;;  %v3045_v41 = vmax.f32 %v2997_v44, %v9136_v25  ;;  %v3046_v9 = vmax.f32 %v2998_v27, %v9141_v60 }
 0x4cd   : > { %12043 = vst [vmem:[#allocation95_spill] sm:$0xff] %v9223_v48  ;;  %v3047_v57 = vmax.f32 %v2999_v50, %v9146_v3  ;;  %v3048_v54 = vmax.f32 %v3000_v22, %v9149_v21  ;;  %v3049_v29 = vmax.f32 %v3001_v16, %v9154_v62  ;;  %v3050_v55 = vmax.f32 %v3002_v26, %v9159_v63 }
 0x4ce   : > { %12047 = vst [vmem:[#allocation96_spill] sm:$0xff] %v9228_v61  ;;  %v3051_v42 = vmax.f32 %v3003_v40, %v9164_v47  ;;  %v3053_v35 = vmax.f32 %v3005_v18, %v9172_v31  ;;  %v3054_v30 = vmax.f32 %v3006_v45, %v9177_v58  ;;  %v3055_v5 = vmax.f32 %v3007_v39, %v9182_v46 }
 0x4cf   : > { %12051 = vst [vmem:[#allocation97_spill] sm:$0xff] %v9233_v38  ;;  %v3057_v52 = vmax.f32 %v3009_v32, %v9190_v10  ;;  %v3058_v43 = vmax.f32 %v3010_v15, %v9195_v19  ;;  %v3059_v0 = vmax.f32 %v3011_v14, %v9200_v56  ;;  %v3085_v24 = vmax.f32 %v3037_v20, %v9118_v28 }
 0x4d0   : > { %v3086_v44 = vmax.f32 %v3038_v4, %v9123_v37  ;;  %v3087_v27 = vmax.f32 %v3039_v2, %v9128_v53  ;;  %v3089_v50 = vmax.f32 %v3041_v33, %v9136_v25  ;;  %v3090_v22 = vmax.f32 %v3042_v17, %v9141_v60 }
 0x4d1   : > { %v3091_v16 = vmax.f32 %v3043_v36, %v9146_v3  ;;  %v3093_v26 = vmax.f32 %v3045_v41, %v9154_v62  ;;  %v3094_v40 = vmax.f32 %v3046_v9, %v9159_v63  ;;  %v3095_v18 = vmax.f32 %v3047_v57, %v9164_v47 }
 0x4d2   : > { %v3096_v45 = vmax.f32 %v3048_v54, %v9167_v7  ;;  %v3097_v28 = vmax.f32 %v3049_v29, %v9172_v31  ;;  %v3098_v37 = vmax.f32 %v3050_v55, %v9177_v58  ;;  %v3099_v53 = vmax.f32 %v3051_v42, %v9182_v46 }
 0x4d3   : > { %v3101_v39 = vmax.f32 %v3053_v35, %v9190_v10  ;;  %v3102_v32 = vmax.f32 %v3054_v30, %v9195_v19  ;;  %v3103_v15 = vmax.f32 %v3055_v5, %v9200_v56  ;;  %v3105_v14 = vmax.f32 %v3057_v52, %v9208_v6 }
 0x4d4   : > { %v3106_v20 = vmax.f32 %v3058_v43, %v9213_v51  ;;  %v3107_v4 = vmax.f32 %v3059_v0, %v9218_v11  ;;  %v9300_v54 = vmax.f32 %v3085_v24, %v9136_v25  ;;  %v9303_v29 = vmax.f32 %v3086_v44, %v9141_v60  ;;  %v4828_v60 = vld [vmem:[#allocation11 + $0x180] sm:$0xff] }
 0x4d5   : > { %v9306_v2 = vmax.f32 %v3087_v27, %v9146_v3  ;;  %v9309_v33 = vmax.f32 %v3089_v50, %v9154_v62  ;;  %v9312_v17 = vmax.f32 %v3090_v22, %v9159_v63  ;;  %v9315_v36 = vmax.f32 %v3091_v16, %v9164_v47  ;;  %v4424_v3 = vld [vmem:[#allocation11 + $0x88] sm:$0xff]  ;;  %4859 = vmatpush.msra.mxu3 %v4828_v60 }
 0x4d6   : > { %v9318_v41 = vmax.f32 %v3093_v26, %v9172_v31  ;;  %v9321_v9 = vmax.f32 %v3094_v40, %v9177_v58  ;;  %v9324_v57 = vmax.f32 %v3095_v18, %v9182_v46  ;;  %v9327_v55 = vmax.f32 %v3096_v45, %v9185_v23  ;;  %4453 = vmatpush.msra.mxu0 %v4424_v3 }
 0x4d7   : > { %v9330_v42 = vmax.f32 %v3097_v28, %v9190_v10  ;;  %v9333_v35 = vmax.f32 %v3098_v37, %v9195_v19  ;;  %v9336_v30 = vmax.f32 %v3099_v53, %v9200_v56  ;;  %v9339_v5 = vmax.f32 %v3101_v39, %v9208_v6 }
 0x4d8   : > { %v9342_v52 = vmax.f32 %v3102_v32, %v9213_v51  ;;  %v9345_v43 = vmax.f32 %v3103_v15, %v9218_v11  ;;  %v9348_v0 = vmax.f32 %v3105_v14, %v9223_v48  ;;  %v9351_v24 = vmax.f32 %v3106_v20, %v9228_v61 }
 0x4d9   : > { %v9354_v44 = vmax.f32 %v3107_v4, %v9233_v38  ;;  %v3229_v27 = vrot.slane %v9300_v54, 1  ;;  %v3230_v50 = vrot.slane %v9303_v29, 1  ;;  %v11257_v22 = vrot.slane %v9306_v2, 1 }
 0x4da   : > { %v3236_v16 = vrot.slane %v9309_v33, 1  ;;  %v3237_v26 = vrot.slane %v9312_v17, 1  ;;  %v11258_v40 = vrot.slane %v9315_v36, 1  ;;  %v3243_v18 = vrot.slane %v9318_v41, 1 }
 0x4db   : > { %v3244_v45 = vrot.slane %v9321_v9, 1  ;;  %v9365_v28 = vsel %vm2025_vm0, %v3229_v27, %v3230_v50  ;;  %v9370_v37 = vsel %vm2025_vm0, %v3230_v50, %v11257_v22  ;;  %v3246_v53 = vrot.slane %v9324_v57, 1 }
 0x4dc   : > { %v3248_v39 = vrot.slane %v9327_v55, 1  ;;  %v9375_v32 = vsel %vm2025_vm0, %v3236_v16, %v3237_v26  ;;  %v9380_v15 = vsel %vm2025_vm0, %v3237_v26, %v11258_v40  ;;  %v3250_v20 = vrot.slane %v9330_v42, 1 }
 0x4dd   : > { %v9383_v14 = vsel %vm2025_vm0, %v3243_v18, %v3244_v45  ;;  %v9387_v4 = vsel %vm2025_vm0, %v3244_v45, %v3246_v53  ;;  %v3251_v50 = vrot.slane %v9333_v35, 1  ;;  %v11263_v16 = vrot.slane %v9336_v30, 1 }
 0x4de   : > { %v9390_v27 = vsel %vm2025_vm0, %v3246_v53, %v3248_v39  ;;  %v3257_v59 = vrot.slane %v9339_v5, 1  ;;  %v3258_v26 = vrot.slane %v9342_v52, 1  ;;  %v11264_v22 = vrot.slane %v9345_v43, 1 }
 0x4df   : > { %v3264_v18 = vrot.slane %v9348_v0, 1  ;;  %v9399_v40 = vsel %vm2025_vm0, %v3250_v20, %v3251_v50  ;;  %v9404_v45 = vsel %vm2025_vm0, %v3251_v50, %v11263_v16  ;;  %v3265_v53 = vrot.slane %v9351_v24, 1 }
 0x4e0   : > { %v11265_v39 = vrot.slane %v9354_v44, 1  ;;  %v9409_v8 = vsel %vm2025_vm0, %v3257_v59, %v3258_v26  ;;  %v9414_v38 = vsel %vm2025_vm0, %v3258_v26, %v11264_v22  ;;  %v3349_v20 = vmax.f32 %v9300_v54, %v9365_v28 }
 0x4e1   : > { %v3350_v61 = vmax.f32 %v9303_v29, %v9370_v37  ;;  %v9421_v50 = vsel %vm2025_vm0, %v3264_v18, %v3265_v53  ;;  %v3352_v59 = vmax.f32 %v9309_v33, %v9375_v32  ;;  %v3353_v26 = vmax.f32 %v9312_v17, %v9380_v15 }
 0x4e2   : > { %v9426_v16 = vsel %vm2025_vm0, %v3265_v53, %v11265_v39  ;;  %v3355_v28 = vmax.f32 %v9318_v41, %v9383_v14  ;;  %v3356_v37 = vmax.f32 %v9321_v9, %v9387_v4  ;;  %v3357_v18 = vmax.f32 %v9324_v57, %v9390_v27 }
 0x4e3   : > { %v3358_v22 = vmax.f32 %v9330_v42, %v9399_v40  ;;  %v3359_v53 = vmax.f32 %v9333_v35, %v9404_v45  ;;  %v3361_v32 = vmax.f32 %v9339_v5, %v9409_v8  ;;  %v3362_v15 = vmax.f32 %v9342_v52, %v9414_v38 }
 0x4e4   : > { %v3364_v14 = vmax.f32 %v9348_v0, %v9421_v50  ;;  %v3365_v4 = vmax.f32 %v9351_v24, %v9426_v16  ;;  %v3385_v27 = vrot.slane %v9300_v54, 2  ;;  %v3386_v39 = vrot.slane %v9303_v29, 2 }
 0x4e5   : > { %v11282_v40 = vrot.slane %v9306_v2, 2  ;;  %v3392_v45 = vrot.slane %v9309_v33, 2  ;;  %v3393_v48 = vrot.slane %v9312_v17, 2  ;;  %v11287_v8 = vrot.slane %v9315_v36, 2 }
 0x4e6   : > { %v3399_v38 = vrot.slane %v9318_v41, 2  ;;  %v3387_v11 = vsel %vm2266_vm1, %v3385_v27, %v3386_v39  ;;  %v3400_v50 = vrot.slane %v9321_v9, 2  ;;  %v3402_v51 = vrot.slane %v9324_v57, 2 }
 0x4e7   : > { %v3389_v16 = vsel %vm2266_vm1, %v3386_v39, %v11282_v40  ;;  %v3394_v6 = vsel %vm2266_vm1, %v3392_v45, %v3393_v48  ;;  %v3396_v46 = vsel %vm2266_vm1, %v3393_v48, %v11287_v8  ;;  %v3404_v56 = vrot.slane %v9327_v55, 2 }
 0x4e8   : > { %v3406_v58 = vrot.slane %v9330_v42, 2  ;;  %v3401_v27 = vsel %vm2266_vm1, %v3399_v38, %v3400_v50  ;;  %v3403_v19 = vsel %vm2266_vm1, %v3400_v50, %v3402_v51  ;;  %v3407_v39 = vrot.slane %v9333_v35, 2 }
 0x4e9   : > { %v11294_v40 = vrot.slane %v9336_v30, 2  ;;  %v3405_v31 = vsel %vm2266_vm1, %v3402_v51, %v3404_v56  ;;  %v3413_v45 = vrot.slane %v9339_v5, 2  ;;  %v3414_v10 = vrot.slane %v9342_v52, 2 }
 0x4ea   : > { %v11297_v48 = vrot.slane %v9345_v43, 2  ;;  %v3408_v8 = vsel %vm2266_vm1, %v3406_v58, %v3407_v39  ;;  %v3420_v50 = vrot.slane %v9348_v0, 2  ;;  %v3421_v47 = vrot.slane %v9351_v24, 2  ;;  %v4326_v58 = vld [vmem:[#allocation11 + $0x8] sm:$0xff] }
 0x4eb   : > { %v3410_v38 = vsel %vm2266_vm1, %v3407_v39, %v11294_v40  ;;  %v3415_v63 = vsel %vm2266_vm1, %v3413_v45, %v3414_v10  ;;  %v11298_v51 = vrot.slane %v9354_v44, 2  ;;  %v9488_v62 = vmax.f32 %v3349_v20, %v3387_v11  ;;  %4518 = vmatpush.msra.mxu1 %v4326_v58 }
 0x4ec   : > { %v3417_v56 = vsel %vm2266_vm1, %v3414_v10, %v11297_v48  ;;  %v3422_v25 = vsel %vm2266_vm1, %v3420_v50, %v3421_v47  ;;  %v9491_v39 = vmax.f32 %v3350_v61, %v3389_v16  ;;  %v9493_v40 = vmax.f32 %v3352_v59, %v3394_v6 }
 0x4ed   : > { %v9495_v34 = vmax.f32 %v3353_v26, %v3396_v46  ;;  %v3424_v10 = vsel %vm2266_vm1, %v3421_v47, %v11298_v51  ;;  %v9500_v45 = vmax.f32 %v3355_v28, %v3401_v27  ;;  %v9502_v11 = vmax.f32 %v3356_v37, %v3403_v19 }
 0x4ee   : > { %v9504_v20 = vmax.f32 %v3357_v18, %v3405_v31  ;;  %v9506_v48 = vmax.f32 %v3358_v22, %v3408_v8  ;;  %v9508_v61 = vmax.f32 %v3359_v53, %v3410_v38  ;;  %v9510_v6 = vmax.f32 %v3361_v32, %v3415_v63 }
 0x4ef   : > { %v9512_v46 = vmax.f32 %v3362_v15, %v3417_v56  ;;  %v9514_v3 = vmax.f32 %v3364_v14, %v3422_v25  ;;  %v9516_v59 = vmax.f32 %v3365_v4, %v3424_v10  ;;  %v3541_v47 = vrot.slane %v9300_v54, 3 }
 0x4f0   : > { %v3542_v19 = vrot.slane %v9303_v29, 3  ;;  %v3544_v31 = vrot.slane %v9306_v2, 3  ;;  %v3548_v22 = vrot.slane %v9309_v33, 3  ;;  %v3549_v26 = vrot.slane %v9312_v17, 3 }
 0x4f1   : > { %v3551_v63 = vrot.slane %v9315_v36, 3  ;;  %v3555_v25 = vrot.slane %v9318_v41, 3  ;;  %v3556_v60 = vrot.slane %v9321_v9, 3  ;;  %v3558_v37 = vrot.slane %v9324_v57, 3 }
 0x4f2   : > { %v9525_v28 = vsel %vm2507_vm2, %v3541_v47, %v3542_v19  ;;  %v9533_v18 = vsel %vm2507_vm2, %v3542_v19, %v3544_v31  ;;  %v9536_v53 = vsel %vm2507_vm2, %v3548_v22, %v3549_v26  ;;  %v3560_v15 = vrot.slane %v9327_v55, 3 }
 0x4f3   : > { %v9541_v32 = vsel %vm2507_vm2, %v3549_v26, %v3551_v63  ;;  %v9545_v14 = vsel %vm2507_vm2, %v3555_v25, %v3556_v60  ;;  %v9548_v4 = vsel %vm2507_vm2, %v3556_v60, %v3558_v37  ;;  %v3562_v8 = vrot.slane %v9330_v42, 3 }
 0x4f4   : > { %v3563_v16 = vrot.slane %v9333_v35, 3  ;;  %v9553_v27 = vsel %vm2507_vm2, %v3558_v37, %v3560_v15  ;;  %v3565_v38 = vrot.slane %v9336_v30, 3  ;;  %v3569_v50 = vrot.slane %v9339_v5, 3 }
 0x4f5   : > { %v3570_v56 = vrot.slane %v9342_v52, 3  ;;  %v3572_v10 = vrot.slane %v9345_v43, 3  ;;  %v3576_v47 = vrot.slane %v9348_v0, 3  ;;  %v3577_v19 = vrot.slane %v9351_v24, 3 }
 0x4f6   : > { %v9559_v58 = vsel %vm2507_vm2, %v3562_v8, %v3563_v16  ;;  %v3566_v22 = vsel %vm2507_vm2, %v3563_v16, %v3565_v38  ;;  %v11301_v25 = vrot.slane %v9354_v44, 3  ;;  %v3661_v60 = vmax.f32 %v9488_v62, %v9525_v28 }
 0x4f7   : > { %v3571_v26 = vsel %vm2507_vm2, %v3569_v50, %v3570_v56  ;;  %v3573_v37 = vsel %vm2507_vm2, %v3570_v56, %v3572_v10  ;;  %v3578_v15 = vsel %vm2507_vm2, %v3576_v47, %v3577_v19  ;;  %v3662_v8 = vmax.f32 %v9491_v39, %v9533_v18 }
 0x4f8   : > { %v3664_v51 = vmax.f32 %v9493_v40, %v9536_v53  ;;  %v3580_v16 = vsel %vm2507_vm2, %v3577_v19, %v11301_v25  ;;  %v3665_v50 = vmax.f32 %v9495_v34, %v9541_v32  ;;  %v3667_v62 = vmax.f32 %v9500_v45, %v9545_v14 }
 0x4f9   : > { %v3668_v28 = vmax.f32 %v9502_v11, %v9548_v4  ;;  %v3669_v56 = vmax.f32 %v9504_v20, %v9553_v27  ;;  %v3670_v39 = vmax.f32 %v9506_v48, %v9559_v58  ;;  %v3671_v40 = vmax.f32 %v9508_v61, %v3566_v22 }
 0x4fa   : > { %v3673_v18 = vmax.f32 %v9510_v6, %v3571_v26  ;;  %v3674_v53 = vmax.f32 %v9512_v46, %v3573_v37  ;;  %v3676_v34 = vmax.f32 %v9514_v3, %v3578_v15  ;;  %v3677_v32 = vmax.f32 %v9516_v59, %v3580_v16 }
 0x4fb   : > { %v3697_v45 = vrot.slane %v9300_v54, 4  ;;  %v3698_v11 = vrot.slane %v9303_v29, 4  ;;  %v3700_v14 = vrot.slane %v9306_v2, 4  ;;  %v3704_v20 = vrot.slane %v9309_v33, 4 }
 0x4fc   : > { %v3705_v48 = vrot.slane %v9312_v17, 4  ;;  %v3707_v61 = vrot.slane %v9315_v36, 4  ;;  %v3711_v6 = vrot.slane %v9318_v41, 4  ;;  %v3712_v46 = vrot.slane %v9321_v9, 4 }
 0x4fd   : > { %v3714_v3 = vrot.slane %v9324_v57, 4  ;;  %v3699_v59 = vsel %vm2748_vm3, %v3697_v45, %v3698_v11  ;;  %v3701_v54 = vsel %vm2748_vm3, %v3698_v11, %v3700_v14  ;;  %v3716_v33 = vrot.slane %v9327_v55, 4 }
 0x4fe   : > { %v3706_v29 = vsel %vm2748_vm3, %v3704_v20, %v3705_v48  ;;  %v3708_v17 = vsel %vm2748_vm3, %v3705_v48, %v3707_v61  ;;  %v3713_v41 = vsel %vm2748_vm3, %v3711_v6, %v3712_v46  ;;  %v3718_v57 = vrot.slane %v9330_v42, 4 }
 0x4ff   : > { %v3715_v9 = vsel %vm2748_vm3, %v3712_v46, %v3714_v3  ;;  %v3717_v4 = vsel %vm2748_vm3, %v3714_v3, %v3716_v33  ;;  %v3719_v27 = vrot.slane %v9333_v35, 4  ;;  %v3721_v58 = vrot.slane %v9336_v30, 4 }
 0x500   : > { %v3725_v47 = vrot.slane %v9339_v5, 4  ;;  %v3726_v55 = vrot.slane %v9342_v52, 4  ;;  %v3728_v19 = vrot.slane %v9345_v43, 4  ;;  %v3732_v22 = vrot.slane %v9348_v0, 4 }
 0x501   : > { %v3733_v26 = vrot.slane %v9351_v24, 4  ;;  %v3720_v37 = vsel %vm2748_vm3, %v3718_v57, %v3719_v27  ;;  %v3722_v42 = vsel %vm2748_vm3, %v3719_v27, %v3721_v58  ;;  %v11300_v35 = vrot.slane %v9354_v44, 4 }
 0x502   : > { %v3817_v15 = vmax.f32 %v3661_v60, %v3699_v59  ;;  %v3727_v16 = vsel %vm2748_vm3, %v3725_v47, %v3726_v55  ;;  %v3729_v5 = vsel %vm2748_vm3, %v3726_v55, %v3728_v19  ;;  %v3818_v0 = vmax.f32 %v3662_v8, %v3701_v54 }
 0x503   : > { %v3734_v52 = vsel %vm2748_vm3, %v3732_v22, %v3733_v26  ;;  %v3736_v24 = vsel %vm2748_vm3, %v3733_v26, %v11300_v35  ;;  %v3820_v45 = vmax.f32 %v3664_v51, %v3706_v29  ;;  %v3821_v11 = vmax.f32 %v3665_v50, %v3708_v17 }
 0x504   : > { %v3823_v20 = vmax.f32 %v3667_v62, %v3713_v41  ;;  %v9639_v48 = vmax.f32 %v3668_v28, %v3715_v9  ;;  %v9641_v6 = vmax.f32 %v3669_v56, %v3717_v4  ;;  %v9643_v60 = vmax.f32 %v3670_v39, %v3720_v37  ;;  %v12052_v9 = vld [vmem:[#allocation79_spill] sm:$0xff] }
 0x505   : > { %v9645_v46 = vmax.f32 %v3671_v40, %v3722_v42  ;;  %v9647_v3 = vmax.f32 %v3673_v18, %v3727_v16  ;;  %v9649_v59 = vmax.f32 %v3674_v53, %v3729_v5  ;;  %v9651_v8 = vmax.f32 %v3676_v34, %v3734_v52  ;;  %v12054_v42 = vld [vmem:[#allocation47_spill] sm:$0xff] }
 0x506   : > { %v9653_v54 = vmax.f32 %v3677_v32, %v3736_v24  ;;  %v3853_v33 = vmax.f32 %v3817_v15, %v3820_v45  ;;  %v3854_v51 = vmax.f32 %v3818_v0, %v3821_v11  ;;  %v3856_v50 = vmax.f32 %v3820_v45, %v3823_v20 }
 0x507   : > { %v3857_v62 = vmax.f32 %v3821_v11, %v9639_v48  ;;  %v3859_v28 = vmax.f32 %v3823_v20, %v9643_v60  ;;  %v3860_v56 = vmax.f32 %v9639_v48, %v9645_v46  ;;  %v4593_v39 = vrot.slane %v3823_v20, 4 }
 0x508   : > { %v4594_v40 = vrot.slane %v9639_v48, 4  ;;  %v3877_v18 = vmax.f32 %v3853_v33, %v3823_v20  ;;  %v3878_v53 = vmax.f32 %v3854_v51, %v9639_v48  ;;  %v9662_v34 = vmax.f32 %v3856_v50, %v9643_v60 }
 0x509   : > { %v9665_v32 = vmax.f32 %v3857_v62, %v9645_v46  ;;  %v9668_v29 = vmax.f32 %v3859_v28, %v9647_v3  ;;  %v9671_v17 = vmax.f32 %v3860_v56, %v9649_v59  ;;  %v12053_v57 = vrot.slane %v12052_v9, 1 }
 0x50a   : > { %v4595_v41 = vsel %vm2748_vm3, %v4593_v39, %v4594_v40  ;;  %v3901_v27 = vmax.f32 %v3877_v18, %v9643_v60  ;;  %v3902_v47 = vmax.f32 %v3878_v53, %v9645_v46  ;;  %v3904_v55 = vmax.f32 %v9662_v34, %v9647_v3 }
 0x50b   : > { %v2205_v4 = vmax.f32 %v12052_v9, %v12053_v57  ;;  %4682 = vmatmul.f32.vlgmr.msra.gmra.mxu2 %v4595_v41  ;;  %v12055_v15 = vrot.slane %v12054_v42, 1  ;;  %v12056_v5 = vrot.slane %v12052_v9, 2  ;;  %v3004_v0 = vmax.f32 %v9131_v1, %v9149_v21 }
 0x50c   : > { %v3008_v24 = vmax.f32 %v9149_v21, %v9167_v7  ;;  %v12057_v45 = vmax.f32 %v9099_v12, %v9113_v49  ;;  %v9703_v20 = vmax.f32 %v3901_v27, %v9647_v3  ;;  %v12058_v33 = vrot.slane %v12054_v42, 2 }
 0x50d   : > { %v2237_v16 = vmax.f32 %v12054_v42, %v12055_v15  ;;  %v2446_v52 = vmax.f32 %v2205_v4, %v12056_v5  ;;  %v12059_v50 = vrot.slane %v12052_v9, 3  ;;  %v9710_v28 = vmax.f32 %v3902_v47, %v9649_v59 }
 0x50e   : > { %v3044_v11 = vmax.f32 %v12057_v45, %v9131_v1  ;;  %v12060_v56 = vrot.slane %v8275_v13, 1  ;;  %v3052_v18 = vmax.f32 %v3004_v0, %v9167_v7  ;;  %v3056_v53 = vmax.f32 %v3008_v24, %v9185_v23  ;;  %v12063_v45 = vld [vmem:[#allocation91_spill] sm:$0xff] }
 0x50f   : > { %v2478_v51 = vmax.f32 %v2237_v16, %v12058_v33  ;;  %v2687_v62 = vmax.f32 %v2446_v52, %v12059_v50  ;;  %v3973_v57 = vrot.slane %v9703_v20, 1  ;;  %v12061_v4 = vrot.slane %v12054_v42, 3 }
 0x510   : > { %v9715_v39 = vmax.f32 %v8275_v13, %v12060_v56  ;;  %v3092_v41 = vmax.f32 %v3044_v11, %v9149_v21  ;;  %v12062_v15 = vrot.slane %v12052_v9, 4  ;;  %v11299_v16 = vrot.slane %v9710_v28, 1 }
 0x511   : > { %v2719_v27 = vmax.f32 %v2478_v51, %v12061_v4  ;;  %v4061_v5 = vrot.slane %v9703_v20, 2  ;;  %v3100_v52 = vmax.f32 %v3052_v18, %v9185_v23  ;;  %v3104_v0 = vmax.f32 %v3056_v53, %v12063_v45 }
 0x512   : > { %v2928_v47 = vmax.f32 %v2687_v62, %v12062_v15  ;;  %v3140_v24 = vmax.f32 %v3092_v41, %v9167_v7  ;;  %v4062_v11 = vrot.slane %v9710_v28, 2  ;;  %v12064_v33 = vrot.slane %v12054_v42, 4 }
 0x513   : > { %v3975_v9 = vsel %vm2025_vm0, %v3973_v57, %v11299_v16  ;;  %v4149_v62 = vrot.slane %v9703_v20, 3  ;;  %v3148_v56 = vmax.f32 %v3100_v52, %v12063_v45  ;;  %v12066_v57 = vrot.slane %v9315_v36, 2 }
 0x514   : > { %v9733_v50 = vmax.f32 %v2719_v27, %v12064_v33  ;;  %v2992_v51 = vmax.f32 %v2928_v47, %v9099_v12  ;;  %v3241_v18 = vrot.slane %v3140_v24, 1  ;;  %v3397_v53 = vrot.slane %v3140_v24, 2 }
 0x515   : > { %v3553_v4 = vrot.slane %v3140_v24, 3  ;;  %v3709_v42 = vrot.slane %v3140_v24, 4  ;;  %v4037_v27 = vmax.f32 %v9703_v20, %v3975_v9  ;;  %v12065_v12 = vrot.slane %v9315_v36, 1 }
 0x516   : > { %v3040_v41 = vmax.f32 %v2992_v51, %v9113_v49  ;;  %v3152_v15 = vmax.f32 %v3104_v0, %v9733_v50  ;;  %v3255_v33 = vrot.slane %v3148_v56, 1  ;;  %v3398_v37 = vsel %vm2266_vm1, %v12066_v57, %v3397_v53 }
 0x517   : > { %v3242_v47 = vsel %vm2025_vm0, %v12065_v12, %v3241_v18  ;;  %v3411_v52 = vrot.slane %v3148_v56, 2  ;;  %v12067_v0 = vrot.slane %v9336_v30, 1  ;;  %v12068_v9 = vrot.slane %v9336_v30, 2 }
 0x518   : > { %v3088_v26 = vmax.f32 %v3040_v41, %v9131_v1  ;;  %v3262_v16 = vrot.slane %v3152_v15, 1  ;;  %v3354_v49 = vmax.f32 %v9315_v36, %v3242_v47  ;;  %v3418_v51 = vrot.slane %v3152_v15, 2 }
 0x519   : > { %v3256_v24 = vsel %vm2025_vm0, %v12067_v0, %v3255_v33  ;;  %v3412_v18 = vsel %vm2266_vm1, %v12068_v9, %v3411_v52  ;;  %v3554_v12 = vsel %vm2507_vm2, %v3551_v63, %v3553_v4  ;;  %v3567_v53 = vrot.slane %v3148_v56, 3 }
 0x51a   : > { %v3136_v57 = vmax.f32 %v3088_v26, %v9149_v21  ;;  %v12069_v1 = vrot.slane %v9345_v43, 1  ;;  %v3360_v47 = vmax.f32 %v9336_v30, %v3256_v24  ;;  %v12070_v35 = vrot.slane %v9345_v43, 2 }
 0x51b   : > { %v3510_v52 = vmax.f32 %v3354_v49, %v3398_v37  ;;  %v3568_v63 = vsel %vm2507_vm2, %v3565_v38, %v3567_v53  ;;  %v3574_v4 = vrot.slane %v3152_v15, 3  ;;  %v12071_v37 = vrot.slane %v9306_v2, 1 }
 0x51c   : > { %v3263_v41 = vsel %vm2025_vm0, %v12069_v1, %v3262_v16  ;;  %v3419_v33 = vsel %vm2266_vm1, %v12070_v35, %v3418_v51  ;;  %v3234_v9 = vrot.slane %v3136_v57, 1  ;;  %v3390_v21 = vrot.slane %v3136_v57, 2  ;;  %v4423_v35 = vld [vmem:[#allocation11 + $0x80] sm:$0xff] }
 0x51d   : > { %v3363_v0 = vmax.f32 %v9345_v43, %v3263_v41  ;;  %v3516_v26 = vmax.f32 %v3360_v47, %v3412_v18  ;;  %v3546_v25 = vrot.slane %v3136_v57, 3  ;;  %v3575_v16 = vsel %vm2507_vm2, %v3572_v10, %v3574_v4  ;;  %v4325_v51 = vld [vmem:[#allocation11] sm:$0xff]  ;;  %4454 = vmatpush.msra.mxu0 %v4423_v35 }
 0x51e   : > { %v3666_v24 = vmax.f32 %v3510_v52, %v3554_v12  ;;  %v3702_v1 = vrot.slane %v3136_v57, 4  ;;  %v3235_v49 = vsel %vm2025_vm0, %v12071_v37, %v3234_v9  ;;  %v12072_v38 = vrot.slane %v9306_v2, 2  ;;  %4519 = vmatpush.msra.mxu1 %v4325_v51  ;;  %v12076_v4 = vld [vmem:[#allocation73_spill] sm:$0xff] }
 0x51f   : > { %v3519_v22 = vmax.f32 %v3363_v0, %v3419_v33  ;;  %v3547_v18 = vsel %vm2507_vm2, %v3544_v31, %v3546_v25  ;;  %v3672_v41 = vmax.f32 %v3516_v26, %v3568_v63  ;;  %v3351_v10 = vmax.f32 %v9306_v2, %v3235_v49  ;;  %v12073_v25 = vld [vmem:[#allocation29_spill] sm:$0xff] }
 0x520   : > { %v3391_v53 = vsel %vm2266_vm1, %v12072_v38, %v3390_v21  ;;  %v3703_v57 = vsel %vm2748_vm3, %v3700_v14, %v3702_v1  ;;  %v3710_v47 = vsel %vm2748_vm3, %v3707_v61, %v3709_v42  ;;  %v3723_v33 = vrot.slane %v3148_v56, 4  ;;  %4520 = vmatmul.f32.vlgmr.msra.gmra.mxu1 %v12073_v25 }
 0x521   : > { %v3675_v12 = vmax.f32 %v3519_v22, %v3575_v16  ;;  %v3730_v0 = vrot.slane %v3152_v15, 4  ;;  %v3822_v52 = vmax.f32 %v3666_v24, %v3710_v47  ;;  %v4063_v31 = vsel %vm2266_vm1, %v4061_v5, %v4062_v11  ;;  %v12077_v16 = vld [vmem:[#allocation67_spill] sm:$0xff] }
 0x522   : > { %v3507_v63 = vmax.f32 %v3351_v10, %v3391_v53  ;;  %v4125_v22 = vmax.f32 %v4037_v27, %v4063_v31  ;;  %v4150_v2 = vrot.slane %v9710_v28, 3  ;;  %v4237_v14 = vrot.slane %v9703_v20, 4 }
 0x523   : > { %v3724_v36 = vsel %vm2748_vm3, %v3721_v58, %v3723_v33  ;;  %v3731_v61 = vsel %vm2748_vm3, %v3728_v19, %v3730_v0  ;;  %v4238_v56 = vrot.slane %v9710_v28, 4  ;;  %v12075_v58 = vld [vmem:[#allocation69_spill] sm:$0xff]  ;;  %v4367_v9 = vrot.slane %v12076_v4, 6 }
 0x524   : > { %v3663_v5 = vmax.f32 %v3507_v63, %v3547_v18  ;;  %v9805_v15 = vmax.f32 %v3672_v41, %v3724_v36  ;;  %v9807_v42 = vmax.f32 %v3675_v12, %v3731_v61  ;;  %v4151_v30 = vsel %vm2507_vm2, %v4149_v62, %v4150_v2  ;;  %v12080_v12 = vld [vmem:[#allocation33_spill] sm:$0xff]  ;;  %v12085_v36 = vld [vmem:[#allocation52_spill] sm:$0xff] }
 0x525   : > { %v4213_v27 = vmax.f32 %v4125_v22, %v4151_v30  ;;  %v4239_v43 = vsel %vm2748_vm3, %v4237_v14, %v4238_v56  ;;  %v4366_v19 = vrot.slane %v12075_v58, 6  ;;  %v4596_v26 = vrot.slane %v9641_v6, 4  ;;  %v12084_v22 = vld [vmem:[#allocation51_spill] sm:$0xff] }
 0x526   : > { %12074 = vst [vmem:[#allocation98_spill] sm:$0xff] %v9807_v42  ;;  %v3819_v21 = vmax.f32 %v3663_v5, %v3703_v57  ;;  %v4369_v24 = vrot.slane %v12077_v16, 6  ;;  %v4598_v1 = vrot.slane %v9643_v60, 4  ;;  %v4599_v62 = vrot.slane %v9645_v46, 4 }
 0x527   : > { %v9822_v35 = vmax.f32 %v4213_v27, %v4239_v43  ;;  %v4368_v20 = vsel %vm4365_vm4, %v4366_v19, %v4367_v9  ;;  %v12078_v51 = vrot.slane %v8275_v13, 2  ;;  %v4597_v38 = vsel %vm2748_vm3, %v4594_v40, %v4596_v26 }
 0x528   : > { %v3855_v49 = vmax.f32 %v3819_v21, %v3822_v52  ;;  %4455 = vmatmul.f32.vlgmr.msra.gmra.mxu0 %v4368_v20  ;;  %v4370_v53 = vsel %vm4365_vm4, %v4367_v9, %v4369_v24  ;;  %v12079_v18 = vmax.f32 %v9167_v7, %v9185_v23  ;;  %4685 = vmatmul.f32.gmra.mxu2 %v4597_v38  ;;  %v12081_v48 = vrot.slane %v8275_v13, 3 }
 0x529   : > { %v2482_v37 = vmax.f32 %v9715_v39, %v12078_v51  ;;  %v4771_v10 = vrot.slane %v9822_v35, 2  ;;  %4523 = vmatmul.f32.gmra.mxu1 %v12080_v12  ;;  %v4600_v39 = vsel %vm2748_vm3, %v4598_v1, %v4599_v62  ;;  %v3858_v40 = vmax.f32 %v3822_v52, %v9641_v6 }
 0x52a   : > { %v3060_v41 = vmax.f32 %v12079_v18, %v12063_v45  ;;  %v3879_v47 = vmax.f32 %v3855_v49, %v9641_v6  ;;  %v3928_v7 = vmax.f32 %v3904_v55, %v9651_v8  ;;  %v12082_v0 = vmax.f32 %v9665_v32, %v9649_v59 }
 0x52b   : > { %v2723_v57 = vmax.f32 %v2482_v37, %v12081_v48  ;;  %v12083_v25 = vrot.slane %v8275_v13, 4  ;;  %v9862_v52 = vmax.f32 %v3858_v40, %v9805_v15  ;;  %v2096_v14 = vrot.slane %v12084_v22, 1 }
 0x52c   : > { %v3108_v33 = vmax.f32 %v3060_v41, %v9733_v50  ;;  %v9855_v31 = vmax.f32 %v12082_v0, %v9653_v54  ;;  %v2097_v61 = vrot.slane %v12085_v36, 1  ;;  %v3903_v34 = vmax.f32 %v3879_v47, %v9805_v15 }
 0x52d   : > { %v9859_v63 = vmax.f32 %v2723_v57, %v12083_v25  ;;  %v3978_v55 = vrot.slane %v3928_v7, 1  ;;  %v4066_v30 = vrot.slane %v3928_v7, 2  ;;  %v3906_v13 = vmax.f32 %v9862_v52, %v9807_v42  ;;  %v12091_v25 = vld [vmem:[#allocation37_spill] sm:$0xff] }
 0x52e   : > { %v3979_v5 = vrot.slane %v9855_v31, 1  ;;  %v4067_v27 = vrot.slane %v9855_v31, 2  ;;  %v4154_v43 = vrot.slane %v3928_v7, 3  ;;  %v3927_v58 = vmax.f32 %v3903_v34, %v9807_v42 }
 0x52f   : > { %v3156_v32 = vmax.f32 %v3108_v33, %v9859_v63  ;;  %v4155_v4 = vrot.slane %v9855_v31, 3  ;;  %v4242_v9 = vrot.slane %v3928_v7, 4  ;;  %v12086_v49 = vrot.slane %v9354_v44, 1 }
 0x530   : > { %v3980_v19 = vsel %vm2025_vm0, %v3978_v55, %v3979_v5  ;;  %v3976_v1 = vrot.slane %v3927_v58, 1  ;;  %v4064_v20 = vrot.slane %v3927_v58, 2  ;;  %v4152_v51 = vrot.slane %v3927_v58, 3  ;;  %4458 = vmatmul.f32.gmra.mxu0 %v4370_v53  ;;  %4688 = vmatmul.f32.gmra.mxu2 %v4600_v39 }
 0x531   : > { %v3269_v21 = vrot.slane %v3156_v32, 1  ;;  %v3425_v26 = vrot.slane %v3156_v32, 2  ;;  %v3581_v16 = vrot.slane %v3156_v32, 3  ;;  %v3737_v24 = vrot.slane %v3156_v32, 4  ;;  %4526 = vmatmul.f32.gmra.mxu1 %v12091_v25 }
 0x532   : > { %v4240_v37 = vrot.slane %v3927_v58, 4  ;;  %v12087_v18 = vrot.slane %v9354_v44, 2  ;;  %v12088_v12 = vrot.slane %v9354_v44, 3  ;;  %v12089_v57 = vrot.slane %v9354_v44, 4 }
 0x533   : > { %v3270_v38 = vsel %vm2025_vm0, %v12086_v49, %v3269_v21  ;;  %v12090_v47 = vrot.slane %v9710_v28, 1  ;;  %v4065_v39 = vsel %vm2266_vm1, %v4062_v11, %v4064_v20  ;;  %v4153_v33 = vsel %vm2507_vm2, %v4150_v2, %v4152_v51 }
 0x534   : > { %v3426_v41 = vsel %vm2266_vm1, %v12087_v18, %v3425_v26  ;;  %v3582_v48 = vsel %vm2507_vm2, %v12088_v12, %v3581_v16  ;;  %v3738_v40 = vsel %vm2748_vm3, %v12089_v57, %v3737_v24  ;;  %v4241_v0 = vsel %vm2748_vm3, %v4238_v56, %v4240_v37  ;;  %v12092_v16 = vld [vmem:[#allocation71_spill] sm:$0xff] }
 0x535   : > { %v3977_v53 = vsel %vm2025_vm0, %v12090_v47, %v3976_v1  ;;  %v4039_v55 = vmax.f32 %v3927_v58, %v3976_v1  ;;  %v3366_v32 = vmax.f32 %v9354_v44, %v3270_v38  ;;  %v4040_v21 = vmax.f32 %v3928_v7, %v3980_v19  ;;  %v12093_v44 = vld [vmem:[#allocation75_spill] sm:$0xff] }
 0x536   : > { %v4038_v34 = vmax.f32 %v9710_v28, %v3977_v53  ;;  %v4068_v11 = vsel %vm2266_vm1, %v4066_v30, %v4067_v27  ;;  %v4156_v2 = vsel %vm2507_vm2, %v4154_v43, %v4155_v4  ;;  %v4243_v26 = vrot.slane %v9855_v31, 4  ;;  %v12094_v1 = vld [vmem:[#allocation83_spill] sm:$0xff] }
 0x537   : > { %v4371_v56 = vrot.slane %v12092_v16, 6  ;;  %v4127_v49 = vmax.f32 %v4039_v55, %v4064_v20  ;;  %v3522_v18 = vmax.f32 %v3366_v32, %v3426_v41  ;;  %v4128_v28 = vmax.f32 %v4040_v21, %v4068_v11 }
 0x538   : > { %v4126_v24 = vmax.f32 %v4038_v34, %v4065_v39  ;;  %v4244_v58 = vsel %vm2748_vm3, %v4242_v9, %v4243_v26  ;;  %v4372_v7 = vrot.slane %v12093_v44, 6  ;;  %v4601_v19 = vrot.slane %v9805_v15, 4 }
 0x539   : > { %v4374_v30 = vrot.slane %v12094_v1, 6  ;;  %v4215_v12 = vmax.f32 %v4127_v49, %v4152_v51  ;;  %v3678_v57 = vmax.f32 %v3522_v18, %v3582_v48  ;;  %v4216_v43 = vmax.f32 %v4128_v28, %v4156_v2  ;;  %v12096_v51 = vld [vmem:[#allocation41_spill] sm:$0xff] }
 0x53a   : > { %v4214_v38 = vmax.f32 %v4126_v24, %v4153_v33  ;;  %v4373_v47 = vsel %vm4365_vm4, %v4371_v56, %v4372_v7  ;;  %v4602_v20 = vsel %vm2748_vm3, %v4599_v62, %v4601_v19  ;;  %v4603_v9 = vrot.slane %v9647_v3, 4  ;;  %4529 = vmatmul.f32.gmra.mxu1 %v12096_v51  ;;  %v12097_v33 = vld [vmem:[#allocation53_spill] sm:$0xff] }
 0x53b   : > { %v4375_v41 = vsel %vm4365_vm4, %v4372_v7, %v4374_v30  ;;  %v4303_v39 = vmax.f32 %v4215_v12, %v4240_v37  ;;  %v9922_v25 = vmax.f32 %v3678_v57, %v3738_v40  ;;  %v9924_v34 = vmax.f32 %v4216_v43, %v4244_v58  ;;  %4461 = vmatmul.f32.gmra.mxu0 %v4373_v47 }
 0x53c   : > { %v4302_v53 = vmax.f32 %v4214_v38, %v4241_v0  ;;  %4691 = vmatmul.f32.gmra.mxu2 %v4602_v20  ;;  %v4604_v48 = vrot.slane %v9649_v59, 4  ;;  %v2098_v62 = vsel %vm2025_vm0, %v2096_v14, %v2097_v61  ;;  %v2099_v55 = vrot.slane %v12097_v33, 1  ;;  %v12098_v0 = vld [vmem:[#allocation54_spill] sm:$0xff] }
 0x53d   : > { %12095 = vst [vmem:[#allocation99_spill] sm:$0xff] %v9922_v25  ;;  %v2101_v37 = vrot.slane %v12098_v0, 1  ;;  %v4774_v32 = vrot.slane %v4303_v39, 2  ;;  %v3930_v21 = vmax.f32 %v3906_v13, %v9922_v25  ;;  %v4776_v11 = vrot.slane %v9924_v34, 2  ;;  %v12099_v20 = vld [vmem:[#allocation30_spill] sm:$0xff]  ;;  %v12107_v34 = vld [vmem:[#allocation85_spill] sm:$0xff] }
 0x53e   : > { %v4772_v40 = vrot.slane %v4302_v53, 2  ;;  %v4605_v2 = vsel %vm2748_vm3, %v4603_v9, %v4604_v48  ;;  %v2100_v14 = vsel %vm2025_vm0, %v2097_v61, %v2099_v55  ;;  %v2242_v56 = vmax.f32 %v12084_v22, %v2098_v62 }
 0x53f   : > { %v2102_v16 = vsel %vm2025_vm0, %v2099_v55, %v2101_v37  ;;  %v3981_v13 = vrot.slane %v3930_v21, 1  ;;  %v4069_v49 = vrot.slane %v3930_v21, 2  ;;  %v4157_v18 = vrot.slane %v3930_v21, 3 }
 0x540   : > { %v4773_v24 = vsel %vm2266_vm1, %v4771_v10, %v4772_v40  ;;  %v4775_v52 = vsel %vm2266_vm1, %v4772_v40, %v4774_v32  ;;  %v4245_v28 = vrot.slane %v3930_v21, 4  ;;  %v2243_v58 = vmax.f32 %v12085_v36, %v2100_v14 }
 0x541   : > { %4860 = vmatmul.f32.vlgmr.msra.gmra.mxu3 %v4773_v24  ;;  %v2244_v44 = vmax.f32 %v12097_v33, %v2102_v16  ;;  %v3982_v61 = vsel %vm2025_vm0, %v3979_v5, %v3981_v13  ;;  %v4070_v35 = vsel %vm2266_vm1, %v4067_v27, %v4069_v49  ;;  %v4042_v10 = vmax.f32 %v3930_v21, %v3981_v13 }
 0x542   : > { %v2245_v7 = vmax.f32 %v12098_v0, %v2101_v37  ;;  %v4041_v19 = vmax.f32 %v9855_v31, %v3982_v61  ;;  %v4158_v1 = vsel %vm2507_vm2, %v4155_v4, %v4157_v18  ;;  %v4246_v30 = vsel %vm2748_vm3, %v4243_v26, %v4245_v28  ;;  %4532 = vmatmul.f32.gmra.mxu1 %v12099_v20 }
 0x543   : > { %v2337_v38 = vrot.slane %v12084_v22, 2  ;;  %v4130_v12 = vmax.f32 %v4042_v10, %v4069_v49  ;;  %4464 = vmatmul.f32.gmra.mxu0 %v4375_v41  ;;  %v2338_v5 = vrot.slane %v12085_v36, 2  ;;  %v2340_v57 = vrot.slane %v12097_v33, 2 }
 0x544   : > { %v2342_v27 = vrot.slane %v12098_v0, 2  ;;  %v4129_v43 = vmax.f32 %v4041_v19, %v4070_v35  ;;  %4694 = vmatmul.f32.gmra.mxu2 %v4605_v2  ;;  %v2578_v47 = vrot.slane %v12084_v22, 3  ;;  %v2579_v31 = vrot.slane %v12085_v36, 3  ;;  %v12101_v19 = vld [vmem:[#allocation84_spill] sm:$0xff] }
 0x545   : > { %v2581_v4 = vrot.slane %v12097_v33, 3  ;;  %v4218_v26 = vmax.f32 %v4130_v12, %v4157_v18  ;;  %v2339_v9 = vsel %vm2266_vm1, %v2337_v38, %v2338_v5  ;;  %v2341_v41 = vsel %vm2266_vm1, %v2338_v5, %v2340_v57  ;;  %v12102_v38 = vld [vmem:[#allocation34_spill] sm:$0xff] }
 0x546   : > { %v2343_v53 = vsel %vm2266_vm1, %v2340_v57, %v2342_v27  ;;  %v4217_v39 = vmax.f32 %v4129_v43, %v4158_v1  ;;  %v2483_v51 = vmax.f32 %v2242_v56, %v2339_v9  ;;  %v2484_v62 = vmax.f32 %v2243_v58, %v2341_v41 }
 0x547   : > { %v2485_v55 = vmax.f32 %v2244_v44, %v2343_v53  ;;  %v4306_v37 = vmax.f32 %v4218_v26, %v4245_v28  ;;  %v2486_v40 = vmax.f32 %v2245_v7, %v2342_v27  ;;  %v2580_v32 = vsel %vm2507_vm2, %v2578_v47, %v2579_v31  ;;  %v12100_v7 = vld [vmem:[#allocation87_spill] sm:$0xff]  ;;  %v12106_v27 = vld [vmem:[#allocation88_spill] sm:$0xff]  ;;  %v12109_v47 = vld [vmem:[#allocation86_spill] sm:$0xff] }
 0x548   : > { %v2582_v21 = vsel %vm2507_vm2, %v2579_v31, %v2581_v4  ;;  %v4305_v2 = vmax.f32 %v4217_v39, %v4246_v30  ;;  %v2583_v14 = vrot.slane %v12098_v0, 3  ;;  %v2724_v16 = vmax.f32 %v2483_v51, %v2580_v32  ;;  %v12112_v53 = vld [vmem:[#allocation93_spill] sm:$0xff] }
 0x549   : > { %4863 = vmatmul.f32.gmra.mxu3 %v4775_v52  ;;  %v2725_v24 = vmax.f32 %v2484_v62, %v2582_v21  ;;  %v4779_v13 = vrot.slane %v4306_v37, 2  ;;  %v2819_v49 = vrot.slane %v12084_v22, 4  ;;  %v2820_v18 = vrot.slane %v12085_v36, 4  ;;  %v10017_v51 = vld [vmem:[#allocation2 + $0x260] sm:$0xff]  ;;  %v12117_v21 = vld [vmem:[#allocation116_spill] sm:$0xff] }
 0x54a   : > { %v2822_v56 = vrot.slane %v12097_v33, 4  ;;  %v4777_v58 = vrot.slane %v4305_v2, 2  ;;  %v2584_v28 = vsel %vm2507_vm2, %v2581_v4, %v2583_v14  ;;  %v2727_v44 = vmax.f32 %v2486_v40, %v2583_v14  ;;  %4535 = vmatmul.f32.gmra.mxu1 %v12102_v38  ;;  %v12110_v4 = vld [vmem:[#allocation92_spill] sm:$0xff]  ;;  %12113 = vst [vmem:[#allocation103_spill] sm:$0xff] %v10017_v51  ;;  %v12114_v62 = vld [vmem:[#allocation77_spill] sm:$0xff] }
 0x54b   : > { %v2824_v61 = vrot.slane %v12098_v0, 4  ;;  %v2726_v35 = vmax.f32 %v2485_v55, %v2584_v28  ;;  %v2821_v52 = vsel %vm2748_vm3, %v2819_v49, %v2820_v18  ;;  %v3013_v1 = vmax.f32 %v12101_v19, %v12100_v7  ;;  %v9997_v0 = vld [vmem:[#allocation2 + $0x88] sm:$0xff]  ;;  %v10025_v32 = vld [vmem:[#allocation2 + $0x220] sm:$0xff]  ;;  %v12122_v49 = vld [vmem:[#allocation95_spill] sm:$0xff] }
 0x54c   : > { %v2823_v10 = vsel %vm2748_vm3, %v2820_v18, %v2822_v56  ;;  %v4778_v22 = vsel %vm2266_vm1, %v4776_v11, %v4777_v58  ;;  %v4780_v36 = vsel %vm2266_vm1, %v4777_v58, %v4779_v13  ;;  %v9994_v30 = vmax.f32 %v2724_v16, %v2821_v52  ;;  %12103 = vst [vmem:[#allocation100_spill] sm:$0xff] %v9997_v0  ;;  %v12108_v11 = vld [vmem:[#allocation90_spill] sm:$0xff]  ;;  %v12119_v14 = vld [vmem:[#allocation61_spill] sm:$0xff]  ;;  %v12123_v28 = vld [vmem:[#allocation96_spill] sm:$0xff] }
 0x54d   : > { %v2825_v33 = vsel %vm2748_vm3, %v2822_v56, %v2824_v61  ;;  %v9999_v12 = vmax.f32 %v2725_v24, %v2823_v10  ;;  %v10003_v57 = vmax.f32 %v2727_v44, %v2824_v61  ;;  %v3014_v43 = vmax.f32 %v12107_v34, %v12106_v27  ;;  %v12115_v55 = vld [vmem:[#allocation82_spill] sm:$0xff]  ;;  %v12124_v10 = vld [vmem:[#allocation97_spill] sm:$0xff] }
 0x54e   : > { %v10001_v5 = vmax.f32 %v2726_v35, %v2825_v33  ;;  %v3015_v31 = vmax.f32 %v12109_v47, %v12108_v11  ;;  %v3061_v20 = vmax.f32 %v3013_v1, %v12110_v4  ;;  %v12111_v26 = vmax.f32 %v9185_v23, %v12063_v45  ;;  %v12118_v23 = vld [vmem:[#allocation114_spill] sm:$0xff] }
 0x54f   : > { %12105 = vst [vmem:[#allocation102_spill] sm:$0xff] %v10003_v57  ;;  %v3861_v41 = vmax.f32 %v9641_v6, %v9805_v15  ;;  %v3062_v39 = vmax.f32 %v3014_v43, %v12112_v53  ;;  %v12116_v37 = vmax.f32 %v12114_v62, %v12115_v55  ;;  %v12120_v16 = vmax.f32 %v12118_v23, %v12119_v14  ;;  %v12121_v24 = vld [vmem:[#allocation94_spill] sm:$0xff] }
 0x550   : > { %12104 = vst [vmem:[#allocation101_spill] sm:$0xff] %v10001_v5  ;;  %v3064_v9 = vmax.f32 %v12111_v26, %v9733_v50  ;;  %v3063_v13 = vmax.f32 %v3015_v31, %v12121_v24  ;;  %v3109_v18 = vmax.f32 %v3061_v20, %v12122_v49  ;;  %v4376_v61 = vrot.slane %v12101_v19, 6  ;;  %v12126_v14 = vld [vmem:[#allocation38_spill] sm:$0xff] }
 0x551   : > { %v10023_v40 = vmax.f32 %v12116_v37, %v10017_v51  ;;  %v10033_v6 = vmax.f32 %v12120_v16, %v9997_v0  ;;  %4866 = vmatmul.f32.gmra.mxu3 %v4778_v22  ;;  %v10039_v58 = vmax.f32 %v3861_v41, %v9807_v42  ;;  %v3110_v44 = vmax.f32 %v3062_v39, %v12123_v28 }
 0x552   : > { %v3112_v56 = vmax.f32 %v3064_v9, %v9859_v63  ;;  %v4377_v35 = vrot.slane %v12107_v34, 6  ;;  %v4606_v52 = vrot.slane %v9807_v42, 4  ;;  %v3111_v1 = vmax.f32 %v3063_v13, %v12124_v10  ;;  %v10055_v34 = vld [vmem:[#allocation2 + $0x118] sm:$0xff]  ;;  %4538 = vmatmul.f32.gmra.mxu1 %v12126_v14 }
 0x553   : > { %v3157_v22 = vmax.f32 %v3109_v18, %v9994_v30  ;;  %v3158_v43 = vmax.f32 %v3110_v44, %v9999_v12  ;;  %12125 = vst [vmem:[#allocation104_spill] sm:$0xff] %v10055_v34  ;;  %v1880_v20 = vmax.f32 %v10023_v40, %v10055_v34 }
 0x554   : > { %v3160_v33 = vmax.f32 %v3112_v56, %v10003_v57  ;;  %v4378_v31 = vsel %vm4365_vm4, %v4376_v61, %v4377_v35  ;;  %v4607_v19 = vsel %vm2748_vm3, %v4604_v48, %v4606_v52  ;;  %v3159_v26 = vmax.f32 %v3111_v1, %v10001_v5 }
 0x555   : > { %v3271_v9 = vrot.slane %v3157_v22, 1  ;;  %v3427_v39 = vrot.slane %v3157_v22, 2  ;;  %4467 = vmatmul.f32.gmra.mxu0 %v4378_v31  ;;  %4697 = vmatmul.f32.gmra.mxu2 %v4607_v19  ;;  %v3272_v62 = vrot.slane %v3158_v43, 1  ;;  %v3428_v55 = vrot.slane %v3158_v43, 2 }
 0x556   : > { %v3276_v41 = vrot.slane %v3160_v33, 1  ;;  %v3432_v37 = vrot.slane %v3160_v33, 2  ;;  %v3583_v23 = vrot.slane %v3157_v22, 3  ;;  %v3274_v16 = vrot.slane %v3159_v26, 1 }
 0x557   : > { %v3430_v48 = vrot.slane %v3159_v26, 2  ;;  %v3584_v13 = vrot.slane %v3158_v43, 3  ;;  %v3586_v18 = vrot.slane %v3159_v26, 3  ;;  %v3273_v56 = vsel %vm2025_vm0, %v3271_v9, %v3272_v62 }
 0x558   : > { %v3429_v40 = vsel %vm2266_vm1, %v3427_v39, %v3428_v55  ;;  %v3588_v44 = vrot.slane %v3160_v33, 3  ;;  %v3739_v61 = vrot.slane %v3157_v22, 4  ;;  %v3275_v52 = vsel %vm2025_vm0, %v3272_v62, %v3274_v16 }
 0x559   : > { %4869 = vmatmul.f32.gmra.mxu3 %v4780_v36  ;;  %v3277_v1 = vsel %vm2025_vm0, %v3274_v16, %v3276_v41  ;;  %v3367_v31 = vmax.f32 %v3157_v22, %v3273_v56  ;;  %v3431_v19 = vsel %vm2266_vm1, %v3428_v55, %v3430_v48  ;;  %v3368_v38 = vmax.f32 %v3158_v43, %v3275_v52  ;;  %v10070_v41 = vld [vmem:[#allocation2 + $0x1f8] sm:$0xff] }
 0x55a   : > { %v3369_v14 = vmax.f32 %v3159_v26, %v3277_v1  ;;  %v3433_v2 = vsel %vm2266_vm1, %v3430_v48, %v3432_v37  ;;  %v3585_v0 = vsel %vm2507_vm2, %v3583_v23, %v3584_v13  ;;  %v3587_v9 = vsel %vm2507_vm2, %v3584_v13, %v3586_v18  ;;  %12127 = vst [vmem:[#allocation105_spill] sm:$0xff] %v10070_v41  ;;  %v10075_v23 = vld [vmem:[#allocation2 + $0x238] sm:$0xff]  ;;  %v10077_v48 = vld [vmem:[#allocation2 + $0x170] sm:$0xff] }
 0x55b   : > { %v3523_v34 = vmax.f32 %v3367_v31, %v3429_v40  ;;  %v3589_v39 = vsel %vm2507_vm2, %v3586_v18, %v3588_v44  ;;  %v3740_v51 = vrot.slane %v3158_v43, 4  ;;  %v3524_v36 = vmax.f32 %v3368_v38, %v3431_v19  ;;  %12128 = vst [vmem:[#allocation106_spill] sm:$0xff] %v10075_v23 }
 0x55c   : > { %v3525_v57 = vmax.f32 %v3369_v14, %v3433_v2  ;;  %v3742_v62 = vrot.slane %v3159_v26, 4  ;;  %v3744_v5 = vrot.slane %v3160_v33, 4  ;;  %v4379_v16 = vrot.slane %v12109_v47, 6  ;;  %12129 = vst [vmem:[#allocation110_spill] sm:$0xff] %v10077_v48  ;;  %v12130_v33 = vld [vmem:[#allocation42_spill] sm:$0xff]  ;;  %v12132_v26 = vld [vmem:[#allocation63_spill] sm:$0xff] }
 0x55d   : > { %v3679_v22 = vmax.f32 %v3523_v34, %v3585_v0  ;;  %v3741_v55 = vsel %vm2748_vm3, %v3739_v61, %v3740_v51  ;;  %v4608_v37 = vrot.slane %v9651_v8, 4  ;;  %v3680_v13 = vmax.f32 %v3524_v36, %v3587_v9  ;;  %4541 = vmatmul.f32.gmra.mxu1 %v12130_v33  ;;  %v12131_v34 = vld [vmem:[#allocation115_spill] sm:$0xff] }
 0x55e   : > { %v3681_v18 = vmax.f32 %v3525_v57, %v3589_v39  ;;  %v3743_v38 = vsel %vm2748_vm3, %v3740_v51, %v3742_v62  ;;  %v3745_v2 = vsel %vm2748_vm3, %v3742_v62, %v3744_v5  ;;  %v4380_v0 = vsel %vm4365_vm4, %v4377_v35, %v4379_v16 }
 0x55f   : > { %v10082_v43 = vmax.f32 %v3679_v22, %v3741_v55  ;;  %v11312_v47 = vrot.slane %v9653_v54, 4  ;;  %v12133_v56 = vmax.f32 %v12131_v34, %v12132_v26  ;;  %v10092_v44 = vmax.f32 %v3680_v13, %v3743_v38  ;;  %4470 = vmatmul.f32.gmra.mxu0 %v4380_v0 }
 0x560   : > { %v10094_v57 = vmax.f32 %v3681_v18, %v3745_v2  ;;  %v12136_v5 = vmax.f32 %v12117_v21, %v10025_v32  ;;  %v10103_v35 = vmax.f32 %v1880_v20, %v10077_v48  ;;  %v12137_v61 = vmax.f32 %v9668_v29, %v9651_v8 }
 0x561   : > { %v10090_v40 = vmax.f32 %v12133_v56, %v10070_v41  ;;  %12134 = vst [vmem:[#allocation111_spill] sm:$0xff] %v10092_v44  ;;  %v4610_v1 = vsel %vm2748_vm3, %v4608_v37, %v11312_v47  ;;  %v2103_v31 = vrot.slane %v10033_v6, 1  ;;  %v12138_v21 = vmax.f32 %v9671_v17, %v9653_v54  ;;  %v12140_v56 = vld [vmem:[#allocation31_spill] sm:$0xff] }
 0x562   : > { %12135 = vst [vmem:[#allocation112_spill] sm:$0xff] %v10094_v57  ;;  %v10100_v51 = vmax.f32 %v12136_v5, %v10075_v23  ;;  %v3931_v52 = vmax.f32 %v12137_v61, %v10082_v43  ;;  %v12139_v20 = vmax.f32 %v10039_v58, %v9922_v25  ;;  %4700 = vmatmul.f32.gmra.mxu2 %v4610_v1  ;;  %v2108_v39 = vrot.slane %v10103_v35, 1 }
 0x563   : > { %v2104_v19 = vrot.slane %v10090_v40, 1  ;;  %v3932_v14 = vmax.f32 %v12138_v21, %v10092_v44 }
 0x564   : > { %v3933_v9 = vmax.f32 %v12139_v20, %v10094_v57  ;;  %v2106_v29 = vrot.slane %v10100_v51, 1  ;;  %v3983_v36 = vrot.slane %v3931_v52, 1  ;;  %v4071_v62 = vrot.slane %v3931_v52, 2 }
 0x565   : > { %v4159_v22 = vrot.slane %v3931_v52, 3  ;;  %v4247_v55 = vrot.slane %v3931_v52, 4  ;;  %v3984_v16 = vrot.slane %v3932_v14, 1  ;;  %v4072_v13 = vrot.slane %v3932_v14, 2  ;;  %4544 = vmatmul.f32.gmra.mxu1 %v12140_v56 }
 0x566   : > { %v3986_v37 = vrot.slane %v3933_v9, 1  ;;  %v4074_v18 = vrot.slane %v3933_v9, 2  ;;  %v4160_v17 = vrot.slane %v3932_v14, 3  ;;  %v4162_v38 = vrot.slane %v3933_v9, 3 }
 0x567   : > { %v4248_v2 = vrot.slane %v3932_v14, 4  ;;  %v4250_v33 = vrot.slane %v3933_v9, 4  ;;  %v3985_v58 = vsel %vm2025_vm0, %v3983_v36, %v3984_v16  ;;  %v4073_v34 = vsel %vm2266_vm1, %v4071_v62, %v4072_v13 }
 0x568   : > { %v3987_v0 = vsel %vm2025_vm0, %v3984_v16, %v3986_v37  ;;  %v4075_v26 = vsel %vm2266_vm1, %v4072_v13, %v4074_v18  ;;  %v4043_v5 = vmax.f32 %v3931_v52, %v3985_v58  ;;  %v4161_v1 = vsel %vm2507_vm2, %v4159_v22, %v4160_v17 }
 0x569   : > { %v4044_v61 = vmax.f32 %v3932_v14, %v3987_v0  ;;  %v4163_v21 = vsel %vm2507_vm2, %v4160_v17, %v4162_v38  ;;  %v4249_v20 = vsel %vm2748_vm3, %v4247_v55, %v4248_v2  ;;  %v4251_v47 = vsel %vm2748_vm3, %v4248_v2, %v4250_v33 }
 0x56a   : > { %v4045_v48 = vmax.f32 %v3933_v9, %v3986_v37  ;;  %v2105_v36 = vsel %vm2025_vm0, %v2103_v31, %v2104_v19  ;;  %v4131_v16 = vmax.f32 %v4043_v5, %v4073_v34  ;;  %v2107_v62 = vsel %vm2025_vm0, %v2104_v19, %v2106_v29 }
 0x56b   : > { %v4132_v23 = vmax.f32 %v4044_v61, %v4075_v26  ;;  %v2109_v13 = vsel %vm2025_vm0, %v2106_v29, %v2108_v39  ;;  %v2246_v52 = vmax.f32 %v10033_v6, %v2105_v36  ;;  %v2247_v14 = vmax.f32 %v10090_v40, %v2107_v62 }
 0x56c   : > { %v4133_v56 = vmax.f32 %v4045_v48, %v4074_v18  ;;  %v2248_v22 = vmax.f32 %v10100_v51, %v2109_v13  ;;  %v4219_v17 = vmax.f32 %v4131_v16, %v4161_v1  ;;  %v2249_v2 = vmax.f32 %v10103_v35, %v2108_v39 }
 0x56d   : > { %v4220_v55 = vmax.f32 %v4132_v23, %v4163_v21  ;;  %v2344_v9 = vrot.slane %v10033_v6, 2  ;;  %v2345_v37 = vrot.slane %v10090_v40, 2  ;;  %v2347_v19 = vrot.slane %v10100_v51, 2 }
 0x56e   : > { %v4221_v31 = vmax.f32 %v4133_v56, %v4162_v38  ;;  %v2349_v29 = vrot.slane %v10103_v35, 2  ;;  %v4307_v48 = vmax.f32 %v4219_v17, %v4249_v20  ;;  %v2585_v58 = vrot.slane %v10033_v6, 3  ;;  %v12141_v38 = vld [vmem:[#allocation35_spill] sm:$0xff] }
 0x56f   : > { %v4308_v18 = vmax.f32 %v4220_v55, %v4251_v47  ;;  %v2586_v0 = vrot.slane %v10090_v40, 3  ;;  %v2346_v23 = vsel %vm2266_vm1, %v2344_v9, %v2345_v37  ;;  %v2348_v39 = vsel %vm2266_vm1, %v2345_v37, %v2347_v19  ;;  %4547 = vmatmul.f32.gmra.mxu1 %v12141_v38 }
 0x570   : > { %v4309_v34 = vmax.f32 %v4221_v31, %v4250_v33  ;;  %v2350_v26 = vsel %vm2266_vm1, %v2347_v19, %v2349_v29  ;;  %v4781_v5 = vrot.slane %v4307_v48, 2  ;;  %v2487_v1 = vmax.f32 %v2246_v52, %v2346_v23  ;;  %v12144_v23 = vld [vmem:[#allocation39_spill] sm:$0xff] }
 0x571   : > { %v4782_v61 = vrot.slane %v4308_v18, 2  ;;  %v2488_v21 = vmax.f32 %v2247_v14, %v2348_v39  ;;  %v2489_v20 = vmax.f32 %v2248_v22, %v2350_v26  ;;  %v2490_v47 = vmax.f32 %v2249_v2, %v2349_v29 }
 0x572   : > { %v4784_v36 = vrot.slane %v4309_v34, 2  ;;  %v2587_v16 = vsel %vm2507_vm2, %v2585_v58, %v2586_v0  ;;  %v2588_v33 = vrot.slane %v10100_v51, 3  ;;  %v2590_v13 = vrot.slane %v10103_v35, 3 }
 0x573   : > { %v4783_v62 = vsel %vm2266_vm1, %v4781_v5, %v4782_v61  ;;  %v2728_v56 = vmax.f32 %v2487_v1, %v2587_v16  ;;  %v2826_v55 = vrot.slane %v10033_v6, 4  ;;  %v2827_v52 = vrot.slane %v10090_v40, 4 }
 0x574   : > { %4872 = vmatmul.f32.gmra.mxu3 %v4783_v62  ;;  %v4785_v17 = vsel %vm2266_vm1, %v4782_v61, %v4784_v36  ;;  %v2829_v14 = vrot.slane %v10100_v51, 4  ;;  %v2589_v22 = vsel %vm2507_vm2, %v2586_v0, %v2588_v33  ;;  %v2591_v2 = vsel %vm2507_vm2, %v2588_v33, %v2590_v13  ;;  %v10190_v36 = vld [vmem:[#allocation2 + $0x1c8] sm:$0xff]  ;;  %v12145_v62 = vld [vmem:[#allocation101_spill] sm:$0xff] }
 0x575   : > { %v2731_v9 = vmax.f32 %v2490_v47, %v2590_v13  ;;  %v2831_v31 = vrot.slane %v10103_v35, 4  ;;  %v2729_v37 = vmax.f32 %v2488_v21, %v2589_v22  ;;  %v2730_v19 = vmax.f32 %v2489_v20, %v2591_v2  ;;  %v10192_v20 = vld [vmem:[#allocation2 + $0x98] sm:$0xff] }
 0x576   : > { %v2828_v29 = vsel %vm2748_vm3, %v2826_v55, %v2827_v52  ;;  %v2830_v48 = vsel %vm2748_vm3, %v2827_v52, %v2829_v14  ;;  %v3017_v51 = vmax.f32 %v12100_v7, %v12110_v4  ;;  %v3018_v35 = vmax.f32 %v12106_v27, %v12112_v53  ;;  %v12146_v55 = vld [vmem:[#allocation102_spill] sm:$0xff] }
 0x577   : > { %v2832_v18 = vsel %vm2748_vm3, %v2829_v14, %v2831_v31  ;;  %v10164_v6 = vmax.f32 %v2728_v56, %v2828_v29  ;;  %v10166_v40 = vmax.f32 %v2731_v9, %v2831_v31  ;;  %v10170_v58 = vmax.f32 %v2729_v37, %v2830_v48  ;;  %4550 = vmatmul.f32.gmra.mxu1 %v12144_v23  ;;  %v12147_v23 = vld [vmem:[#allocation43_spill] sm:$0xff] }
 0x578   : > { %v10172_v0 = vmax.f32 %v2730_v19, %v2832_v18  ;;  %v3019_v34 = vmax.f32 %v12108_v11, %v12121_v24  ;;  %v3020_v39 = vmax.f32 %v12063_v45, %v9733_v50  ;;  %v3065_v26 = vmax.f32 %v3017_v51, %v12122_v49 }
 0x579   : > { %12142 = vst [vmem:[#allocation113_spill] sm:$0xff] %v10170_v58  ;;  %v3862_v38 = vmax.f32 %v9643_v60, %v9647_v3  ;;  %v3863_v5 = vmax.f32 %v9645_v46, %v9649_v59  ;;  %v3066_v61 = vmax.f32 %v3018_v35, %v12123_v28  ;;  %v3864_v21 = vmax.f32 %v9805_v15, %v9807_v42 }
 0x57a   : > { %12143 = vst [vmem:[#allocation45_spill] sm:$0xff] %v10172_v0  ;;  %v3067_v1 = vmax.f32 %v3019_v34, %v12124_v10  ;;  %v3068_v47 = vmax.f32 %v3020_v39, %v9859_v63  ;;  %v3113_v60 = vmax.f32 %v3065_v26, %v9994_v30  ;;  %v4381_v56 = vrot.slane %v12100_v7, 6 }
 0x57b   : > { %v10199_v46 = vmax.f32 %v3862_v38, %v9651_v8  ;;  %v10202_v16 = vmax.f32 %v3863_v5, %v9653_v54  ;;  %v3114_v15 = vmax.f32 %v3066_v61, %v9999_v12  ;;  %v10207_v13 = vmax.f32 %v3864_v21, %v9922_v25 }
 0x57c   : > { %4875 = vmatmul.f32.gmra.mxu3 %v4785_v17  ;;  %v3115_v33 = vmax.f32 %v3067_v1, %v12145_v62  ;;  %v3116_v52 = vmax.f32 %v3068_v47, %v12146_v55  ;;  %v3161_v14 = vmax.f32 %v3113_v60, %v10164_v6  ;;  %v4382_v37 = vrot.slane %v12106_v27, 6 }
 0x57d   : > { %v3910_v22 = vmax.f32 %v10199_v46, %v10082_v43  ;;  %v3911_v2 = vmax.f32 %v10202_v16, %v10092_v44  ;;  %v3162_v17 = vmax.f32 %v3114_v15, %v10170_v58  ;;  %v3912_v31 = vmax.f32 %v10207_v13, %v10094_v57 }
 0x57e   : > { %v3163_v9 = vmax.f32 %v3115_v33, %v10172_v0  ;;  %v3164_v7 = vmax.f32 %v3116_v52, %v10166_v40  ;;  %v3278_v19 = vrot.slane %v3161_v14, 1  ;;  %v3434_v29 = vrot.slane %v3161_v14, 2 }
 0x57f   : > { %v3590_v48 = vrot.slane %v3161_v14, 3  ;;  %v3279_v18 = vrot.slane %v3162_v17, 1  ;;  %v3435_v35 = vrot.slane %v3162_v17, 2  ;;  %4553 = vmatmul.f32.gmra.mxu1 %v12147_v23  ;;  %v3591_v38 = vrot.slane %v3162_v17, 3 }
 0x580   : > { %v3281_v51 = vrot.slane %v3163_v9, 1  ;;  %v3437_v34 = vrot.slane %v3163_v9, 2  ;;  %v3283_v39 = vrot.slane %v3164_v7, 1  ;;  %v3439_v26 = vrot.slane %v3164_v7, 2 }
 0x581   : > { %v3593_v5 = vrot.slane %v3163_v9, 3  ;;  %v3280_v61 = vsel %vm2025_vm0, %v3278_v19, %v3279_v18  ;;  %v3436_v27 = vsel %vm2266_vm1, %v3434_v29, %v3435_v35  ;;  %v3592_v33 = vsel %vm2507_vm2, %v3590_v48, %v3591_v38 }
 0x582   : > { %v3282_v1 = vsel %vm2025_vm0, %v3279_v18, %v3281_v51  ;;  %v3438_v21 = vsel %vm2266_vm1, %v3435_v35, %v3437_v34  ;;  %v3284_v47 = vsel %vm2025_vm0, %v3281_v51, %v3283_v39  ;;  %v3370_v60 = vmax.f32 %v3161_v14, %v3280_v61 }
 0x583   : > { %v3371_v46 = vmax.f32 %v3162_v17, %v3282_v1  ;;  %v3440_v16 = vsel %vm2266_vm1, %v3437_v34, %v3439_v26  ;;  %v3372_v15 = vmax.f32 %v3163_v9, %v3284_v47  ;;  %v3594_v13 = vsel %vm2507_vm2, %v3591_v38, %v3593_v5 }
 0x584   : > { %v3595_v52 = vrot.slane %v3164_v7, 3  ;;  %v3526_v23 = vmax.f32 %v3370_v60, %v3436_v27  ;;  %v3746_v45 = vrot.slane %v3161_v14, 4  ;;  %v3747_v18 = vrot.slane %v3162_v17, 4  ;;  %v12148_v17 = vld [vmem:[#allocation32_spill] sm:$0xff]  ;;  %v6055_v27 = vld [vmem:[#allocation2 + $0x160] sm:$0xff] }
 0x585   : > { %v3527_v19 = vmax.f32 %v3371_v46, %v3438_v21  ;;  %v3528_v57 = vmax.f32 %v3372_v15, %v3440_v16  ;;  %v3749_v35 = vrot.slane %v3163_v9, 4  ;;  %v3751_v42 = vrot.slane %v3164_v7, 4  ;;  %v10250_v21 = vld [vmem:[#allocation2 + $0x248] sm:$0xff]  ;;  %v6057_v16 = vld [vmem:[#allocation2 + $0x230] sm:$0xff]  ;;  %v10256_v15 = vld [vmem:[#allocation2 + $0x198] sm:$0xff] }
 0x586   : > { %v3596_v29 = vsel %vm2507_vm2, %v3593_v5, %v3595_v52  ;;  %v3682_v51 = vmax.f32 %v3526_v23, %v3592_v33  ;;  %v3748_v61 = vsel %vm2748_vm3, %v3746_v45, %v3747_v18  ;;  %v4383_v34 = vsel %vm4365_vm4, %v4381_v56, %v4382_v37  ;;  %12151 = vst [vmem:[#allocation49_spill] sm:$0xff] %v10256_v15  ;;  %v6059_v23 = vld [vmem:[#allocation2 + $0x178] sm:$0xff] }
 0x587   : > { %v3683_v39 = vmax.f32 %v3527_v19, %v3594_v13  ;;  %v3684_v26 = vmax.f32 %v3528_v57, %v3596_v29  ;;  %v3750_v48 = vsel %vm2748_vm3, %v3747_v18, %v3749_v35  ;;  %v3752_v38 = vsel %vm2748_vm3, %v3749_v35, %v3751_v42  ;;  %4473 = vmatmul.f32.gmra.mxu0 %v4383_v34  ;;  %v12152_v19 = vld [vmem:[#allocation103_spill] sm:$0xff] }
 0x588   : > { %v4611_v14 = vrot.slane %v9922_v25, 4  ;;  %4556 = vmatmul.f32.gmra.mxu1 %v12148_v17  ;;  %v10238_v1 = vmax.f32 %v3682_v51, %v3748_v61  ;;  %v4384_v7 = vrot.slane %v12108_v11, 6  ;;  %v4613_v45 = vrot.slane %v10082_v43, 4 }
 0x589   : > { %v10240_v9 = vmax.f32 %v3683_v39, %v3750_v48  ;;  %v10244_v5 = vmax.f32 %v3684_v26, %v3752_v38  ;;  %v12150_v57 = vrot.slane %v9653_v54, 4  ;;  %v11320_v42 = vrot.slane %v10092_v44, 4 }
 0x58a   : > { %v1754_v47 = vmax.f32 %v6055_v27, %v10250_v21  ;;  %v3934_v60 = vmax.f32 %v3910_v22, %v10238_v1  ;;  %v4385_v11 = vsel %vm4365_vm4, %v4382_v37, %v4384_v7  ;;  %v1755_v33 = vmax.f32 %v6057_v16, %v10256_v15  ;;  %v10264_v22 = vld [vmem:[#allocation2 + $0xc8] sm:$0xff] }
 0x58b   : > { %12149 = vst [vmem:[#allocation46_spill] sm:$0xff] %v10244_v5  ;;  %v4612_v56 = vsel %vm2748_vm3, %v12150_v57, %v4611_v14  ;;  %v3935_v46 = vmax.f32 %v3911_v2, %v10240_v9  ;;  %v3936_v13 = vmax.f32 %v3912_v31, %v10244_v5  ;;  %v4615_v52 = vsel %vm2748_vm3, %v4613_v45, %v11320_v42 }
 0x58c   : > { %4703 = vmatmul.f32.gmra.mxu2 %v4612_v56  ;;  %v1756_v18 = vmax.f32 %v6059_v23, %v12152_v19  ;;  %v12153_v2 = vmax.f32 %v10190_v36, %v10192_v20  ;;  %v3988_v29 = vrot.slane %v3934_v60, 1  ;;  %v4076_v51 = vrot.slane %v3934_v60, 2 }
 0x58d   : > { %v3989_v35 = vrot.slane %v3935_v46, 1  ;;  %v4077_v39 = vrot.slane %v3935_v46, 2  ;;  %v3991_v61 = vrot.slane %v3936_v13, 1  ;;  %v4079_v31 = vrot.slane %v3936_v13, 2 }
 0x58e   : > { %v1817_v37 = vmax.f32 %v12153_v2, %v10264_v22  ;;  %v4164_v34 = vrot.slane %v3934_v60, 3  ;;  %v4165_v26 = vrot.slane %v3935_v46, 3  ;;  %v4167_v14 = vrot.slane %v3936_v13, 3  ;;  %v12154_v2 = vld [vmem:[#allocation36_spill] sm:$0xff] }
 0x58f   : > { %v3990_v48 = vsel %vm2025_vm0, %v3988_v29, %v3989_v35  ;;  %v4078_v38 = vsel %vm2266_vm1, %v4076_v51, %v4077_v39  ;;  %v4252_v17 = vrot.slane %v3934_v60, 4  ;;  %v3992_v7 = vsel %vm2025_vm0, %v3989_v35, %v3991_v61  ;;  %4476 = vmatmul.f32.gmra.mxu0 %v4385_v11  ;;  %v10277_v51 = vld [vmem:[#allocation2 + $0x208] sm:$0xff] }
 0x590   : > { %v4046_v45 = vmax.f32 %v3934_v60, %v3990_v48  ;;  %v4080_v36 = vsel %vm2266_vm1, %v4077_v39, %v4079_v31  ;;  %v4166_v57 = vsel %vm2507_vm2, %v4164_v34, %v4165_v26  ;;  %v4047_v56 = vmax.f32 %v3935_v46, %v3992_v7  ;;  %4559 = vmatmul.f32.gmra.mxu1 %v12154_v2  ;;  %v10283_v34 = vld [vmem:[#allocation2 + $0x200] sm:$0xff]  ;;  %v10290_v7 = vld [vmem:[#allocation2 + $0x28] sm:$0xff] }
 0x591   : > { %v4168_v27 = vsel %vm2507_vm2, %v4165_v26, %v4167_v14  ;;  %v4253_v16 = vrot.slane %v3935_v46, 4  ;;  %v4255_v23 = vrot.slane %v3936_v13, 4  ;;  %v4048_v42 = vmax.f32 %v3936_v13, %v3991_v61  ;;  %12155 = vst [vmem:[#allocation50_spill] sm:$0xff] %v10283_v34  ;;  %v10285_v46 = vld [vmem:[#allocation2 + $0x8] sm:$0xff]  ;;  %v12157_v26 = vld [vmem:[#allocation104_spill] sm:$0xff] }
 0x592   : > { %v4134_v29 = vmax.f32 %v4046_v45, %v4078_v38  ;;  %v1818_v19 = vmax.f32 %v1754_v47, %v10277_v51  ;;  %v1819_v60 = vmax.f32 %v1755_v33, %v10025_v32  ;;  %v4135_v35 = vmax.f32 %v4047_v56, %v4080_v36  ;;  %12156 = vst [vmem:[#allocation108_spill] sm:$0xff] %v10285_v46  ;;  %v10288_v61 = vld [vmem:[#allocation2 + $0x1e8] sm:$0xff]  ;;  %v12160_v47 = vld [vmem:[#allocation100_spill] sm:$0xff] }
 0x593   : > { %v4254_v39 = vsel %vm2748_vm3, %v4252_v17, %v4253_v16  ;;  %v4256_v11 = vsel %vm2748_vm3, %v4253_v16, %v4255_v23  ;;  %v1820_v48 = vmax.f32 %v1756_v18, %v12157_v26  ;;  %v4136_v13 = vmax.f32 %v4048_v42, %v4079_v31  ;;  %12158 = vst [vmem:[#allocation109_spill] sm:$0xff] %v10288_v61  ;;  %v12161_v36 = vld [vmem:[#allocation106_spill] sm:$0xff] }
 0x594   : > { %4706 = vmatmul.f32.gmra.mxu2 %v4615_v52  ;;  %v4222_v38 = vmax.f32 %v4134_v29, %v4166_v57  ;;  %12159 = vst [vmem:[#allocation117_spill] sm:$0xff] %v10290_v7  ;;  %v1881_v33 = vmax.f32 %v1817_v37, %v12160_v47  ;;  %v1882_v45 = vmax.f32 %v1818_v19, %v10070_v41  ;;  %v12162_v52 = vld [vmem:[#allocation110_spill] sm:$0xff] }
 0x595   : > { %v4223_v17 = vmax.f32 %v4135_v35, %v4168_v27  ;;  %v1883_v56 = vmax.f32 %v1819_v60, %v12161_v36  ;;  %v1884_v16 = vmax.f32 %v1820_v48, %v12162_v52  ;;  %v3021_v2 = vmax.f32 %v12110_v4, %v12122_v49 }
 0x596   : > { %v4310_v15 = vmax.f32 %v4222_v38, %v4254_v39  ;;  %v4224_v18 = vmax.f32 %v4136_v13, %v4167_v14  ;;  %v1945_v42 = vmax.f32 %v1881_v33, %v10283_v34  ;;  %v1946_v31 = vmax.f32 %v1882_v45, %v10285_v46  ;;  %v12163_v38 = vld [vmem:[#allocation40_spill] sm:$0xff] }
 0x597   : > { %v4311_v57 = vmax.f32 %v4223_v17, %v4256_v11  ;;  %v1947_v29 = vmax.f32 %v1883_v56, %v10288_v61  ;;  %v1948_v37 = vmax.f32 %v1884_v16, %v10290_v7  ;;  %v3022_v19 = vmax.f32 %v12112_v53, %v12123_v28 }
 0x598   : > { %v4786_v27 = vrot.slane %v4310_v15, 2  ;;  %v4312_v60 = vmax.f32 %v4224_v18, %v4255_v23  ;;  %v2110_v35 = vrot.slane %v1945_v42, 1  ;;  %v2111_v48 = vrot.slane %v1946_v31, 1  ;;  %4562 = vmatmul.f32.gmra.mxu1 %v12163_v38 }
 0x599   : > { %v4787_v52 = vrot.slane %v4311_v57, 2  ;;  %v2113_v36 = vrot.slane %v1947_v29, 1  ;;  %v2115_v39 = vrot.slane %v1948_v37, 1  ;;  %v2351_v14 = vrot.slane %v1945_v42, 2 }
 0x59a   : > { %v4789_v13 = vrot.slane %v4312_v60, 2  ;;  %v2112_v11 = vsel %vm2025_vm0, %v2110_v35, %v2111_v48  ;;  %v2352_v33 = vrot.slane %v1946_v31, 2  ;;  %v2354_v45 = vrot.slane %v1947_v29, 2 }
 0x59b   : > { %v4788_v17 = vsel %vm2266_vm1, %v4786_v27, %v4787_v52  ;;  %v2114_v56 = vsel %vm2025_vm0, %v2111_v48, %v2113_v36  ;;  %v2116_v15 = vsel %vm2025_vm0, %v2113_v36, %v2115_v39  ;;  %v2250_v23 = vmax.f32 %v1945_v42, %v2112_v11 }
 0x59c   : > { %4878 = vmatmul.f32.gmra.mxu3 %v4788_v17  ;;  %v4790_v16 = vsel %vm2266_vm1, %v4787_v52, %v4789_v13  ;;  %v2251_v18 = vmax.f32 %v1946_v31, %v2114_v56  ;;  %v2252_v57 = vmax.f32 %v1947_v29, %v2116_v15  ;;  %v2253_v7 = vmax.f32 %v1948_v37, %v2115_v39 }
 0x59d   : > { %v2353_v38 = vsel %vm2266_vm1, %v2351_v14, %v2352_v33  ;;  %v2355_v60 = vsel %vm2266_vm1, %v2352_v33, %v2354_v45  ;;  %v2356_v35 = vrot.slane %v1948_v37, 2  ;;  %v2592_v61 = vrot.slane %v1945_v42, 3 }
 0x59e   : > { %v2491_v46 = vmax.f32 %v2250_v23, %v2353_v38  ;;  %v2492_v28 = vmax.f32 %v2251_v18, %v2355_v60  ;;  %v2593_v27 = vrot.slane %v1946_v31, 3  ;;  %v2595_v34 = vrot.slane %v1947_v29, 3  ;;  %v12164_v23 = vld [vmem:[#allocation44_spill] sm:$0xff] }
 0x59f   : > { %v2357_v48 = vsel %vm2266_vm1, %v2354_v45, %v2356_v35  ;;  %v2494_v36 = vmax.f32 %v2253_v7, %v2356_v35  ;;  %v2597_v11 = vrot.slane %v1948_v37, 3  ;;  %v2833_v17 = vrot.slane %v1945_v42, 4 }
 0x5a0   : > { %v2493_v41 = vmax.f32 %v2252_v57, %v2357_v48  ;;  %v2594_v52 = vsel %vm2507_vm2, %v2592_v61, %v2593_v27  ;;  %v2596_v39 = vsel %vm2507_vm2, %v2593_v27, %v2595_v34  ;;  %v2834_v13 = vrot.slane %v1946_v31, 4  ;;  %4565 = vmatmul.f32.gmra.mxu1 %v12164_v23 }
 0x5a1   : > { %v2598_v14 = vsel %vm2507_vm2, %v2595_v34, %v2597_v11  ;;  %v2732_v33 = vmax.f32 %v2491_v46, %v2594_v52  ;;  %v2733_v56 = vmax.f32 %v2492_v28, %v2596_v39  ;;  %v2735_v15 = vmax.f32 %v2494_v36, %v2597_v11  ;;  %v12167_v36 = vld [vmem:[#allocation98_spill] sm:$0xff] }
 0x5a2   : > { %v2734_v18 = vmax.f32 %v2493_v41, %v2598_v14  ;;  %v2835_v38 = vsel %vm2748_vm3, %v2833_v17, %v2834_v13  ;;  %v2836_v45 = vrot.slane %v1947_v29, 4  ;;  %v2838_v7 = vrot.slane %v1948_v37, 4 }
 0x5a3   : > { %v10318_v60 = vmax.f32 %v2732_v33, %v2835_v38  ;;  %v3023_v61 = vmax.f32 %v12121_v24, %v12124_v10  ;;  %v3024_v42 = vmax.f32 %v9733_v50, %v9859_v63  ;;  %v3069_v34 = vmax.f32 %v3021_v2, %v9994_v30  ;;  %v12168_v33 = vld [vmem:[#allocation112_spill] sm:$0xff] }
 0x5a4   : > { %4881 = vmatmul.f32.gmra.mxu3 %v4790_v16  ;;  %v2837_v28 = vsel %vm2748_vm3, %v2834_v13, %v2836_v45  ;;  %v2839_v46 = vsel %vm2748_vm3, %v2836_v45, %v2838_v7  ;;  %v10327_v41 = vmax.f32 %v2735_v15, %v2838_v7  ;;  %v3070_v31 = vmax.f32 %v3022_v19, %v9999_v12 }
 0x5a5   : > { %v10330_v29 = vmax.f32 %v2733_v56, %v2837_v28  ;;  %v10332_v37 = vmax.f32 %v2734_v18, %v2839_v46  ;;  %v3071_v57 = vmax.f32 %v3023_v61, %v12145_v62  ;;  %v3072_v35 = vmax.f32 %v3024_v42, %v12146_v55 }
 0x5a6   : > { %12165 = vst [vmem:[#allocation124_spill] sm:$0xff] %v10327_v41  ;;  %v3117_v50 = vmax.f32 %v3069_v34, %v10164_v6  ;;  %v3118_v2 = vmax.f32 %v3070_v31, %v10170_v58  ;;  %v3865_v16 = vmax.f32 %v9647_v3, %v9651_v8  ;;  %v3866_v27 = vmax.f32 %v9649_v59, %v9653_v54 }
 0x5a7   : > { %12166 = vst [vmem:[#allocation125_spill] sm:$0xff] %v10332_v37  ;;  %v3119_v19 = vmax.f32 %v3071_v57, %v10172_v0  ;;  %v3120_v48 = vmax.f32 %v3072_v35, %v10166_v40  ;;  %v3867_v11 = vmax.f32 %v12167_v36, %v9922_v25  ;;  %v4386_v17 = vrot.slane %v12110_v4, 6 }
 0x5a8   : > { %v3165_v52 = vmax.f32 %v3117_v50, %v10318_v60  ;;  %v3166_v39 = vmax.f32 %v3118_v2, %v10330_v29  ;;  %v3889_v13 = vmax.f32 %v3865_v16, %v10082_v43  ;;  %v3890_v3 = vmax.f32 %v3866_v27, %v10092_v44 }
 0x5a9   : > { %v3167_v14 = vmax.f32 %v3119_v19, %v10332_v37  ;;  %v3168_v59 = vmax.f32 %v3120_v48, %v10327_v41  ;;  %v3891_v56 = vmax.f32 %v3867_v11, %v12168_v33 }
 0x5aa   : > { %v3285_v23 = vrot.slane %v3165_v52, 1  ;;  %v3286_v18 = vrot.slane %v3166_v39, 1  ;;  %v3441_v38 = vrot.slane %v3165_v52, 2  ;;  %v3442_v4 = vrot.slane %v3166_v39, 2 }
 0x5ab   : > { %v3288_v45 = vrot.slane %v3167_v14, 1  ;;  %v3290_v7 = vrot.slane %v3168_v59, 1  ;;  %v3444_v61 = vrot.slane %v3167_v14, 2  ;;  %v3446_v42 = vrot.slane %v3168_v59, 2 }
 0x5ac   : > { %v3287_v34 = vsel %vm2025_vm0, %v3285_v23, %v3286_v18  ;;  %v3443_v28 = vsel %vm2266_vm1, %v3441_v38, %v3442_v4  ;;  %v3597_v46 = vrot.slane %v3165_v52, 3  ;;  %v3598_v31 = vrot.slane %v3166_v39, 3 }
 0x5ad   : > { %v3289_v57 = vsel %vm2025_vm0, %v3286_v18, %v3288_v45  ;;  %v3291_v35 = vsel %vm2025_vm0, %v3288_v45, %v3290_v7  ;;  %v3373_v50 = vmax.f32 %v3165_v52, %v3287_v34  ;;  %v3445_v2 = vsel %vm2266_vm1, %v3442_v4, %v3444_v61 }
 0x5ae   : > { %v3374_v16 = vmax.f32 %v3166_v39, %v3289_v57  ;;  %v3375_v27 = vmax.f32 %v3167_v14, %v3291_v35  ;;  %v3447_v19 = vsel %vm2266_vm1, %v3444_v61, %v3446_v42  ;;  %v3599_v48 = vsel %vm2507_vm2, %v3597_v46, %v3598_v31 }
 0x5af   : > { %v3529_v36 = vmax.f32 %v3373_v50, %v3443_v28  ;;  %v3600_v11 = vrot.slane %v3167_v14, 3  ;;  %v3602_v23 = vrot.slane %v3168_v59, 3  ;;  %v3753_v15 = vrot.slane %v3165_v52, 4 }
 0x5b0   : > { %v3530_v38 = vmax.f32 %v3374_v16, %v3445_v2  ;;  %v3531_v41 = vmax.f32 %v3375_v27, %v3447_v19  ;;  %v3754_v37 = vrot.slane %v3166_v39, 4  ;;  %v3756_v25 = vrot.slane %v3167_v14, 4 }
 0x5b1   : > { %v3601_v18 = vsel %vm2507_vm2, %v3598_v31, %v3600_v11  ;;  %v3603_v45 = vsel %vm2507_vm2, %v3600_v11, %v3602_v23  ;;  %v3685_v7 = vmax.f32 %v3529_v36, %v3599_v48  ;;  %v3758_v4 = vrot.slane %v3168_v59, 4 }
 0x5b2   : > { %v3686_v34 = vmax.f32 %v3530_v38, %v3601_v18  ;;  %v3687_v57 = vmax.f32 %v3531_v41, %v3603_v45  ;;  %v3755_v61 = vsel %vm2748_vm3, %v3753_v15, %v3754_v37  ;;  %v3757_v42 = vsel %vm2748_vm3, %v3754_v37, %v3756_v25 }
 0x5b3   : > { %v3759_v28 = vsel %vm2748_vm3, %v3756_v25, %v3758_v4  ;;  %v10367_v46 = vmax.f32 %v3685_v7, %v3755_v61  ;;  %v3913_v52 = vmax.f32 %v3889_v13, %v10238_v1  ;;  %v3914_v39 = vmax.f32 %v3890_v3, %v10240_v9 }
 0x5b4   : > { %v10371_v14 = vmax.f32 %v3686_v34, %v3757_v42  ;;  %v10373_v31 = vmax.f32 %v3687_v57, %v3759_v28  ;;  %v3915_v59 = vmax.f32 %v3891_v56, %v10244_v5  ;;  %v12169_v41 = vrot.slane %v12112_v53, 6 }
 0x5b5   : > { %v3937_v37 = vmax.f32 %v3913_v52, %v10367_v46  ;;  %v4616_v25 = vrot.slane %v12168_v33, 4  ;;  %v4389_v35 = vrot.slane %v12121_v24, 6  ;;  %v4618_v13 = vrot.slane %v10238_v1, 4 }
 0x5b6   : > { %v4388_v15 = vsel %vm4365_vm4, %v4386_v17, %v12169_v41  ;;  %v3938_v3 = vmax.f32 %v3914_v39, %v10371_v14  ;;  %v3939_v50 = vmax.f32 %v3915_v59, %v10373_v31  ;;  %v11337_v2 = vrot.slane %v10240_v9, 4 }
 0x5b7   : > { %4479 = vmatmul.f32.gmra.mxu0 %v4388_v15  ;;  %v1757_v56 = vmax.f32 %v10192_v20, %v10264_v22  ;;  %v3993_v16 = vrot.slane %v3937_v37, 1  ;;  %v4081_v17 = vrot.slane %v3937_v37, 2  ;;  %v4169_v27 = vrot.slane %v3937_v37, 3 }
 0x5b8   : > { %v4257_v19 = vrot.slane %v3937_v37, 4  ;;  %v3994_v48 = vrot.slane %v3938_v3, 1  ;;  %v3996_v36 = vrot.slane %v3939_v50, 1  ;;  %v4082_v11 = vrot.slane %v3938_v3, 2 }
 0x5b9   : > { %v4084_v23 = vrot.slane %v3939_v50, 2  ;;  %v4170_v24 = vrot.slane %v3938_v3, 3  ;;  %v4172_v38 = vrot.slane %v3939_v50, 3  ;;  %v4258_v18 = vrot.slane %v3938_v3, 4 }
 0x5ba   : > { %v4260_v45 = vrot.slane %v3939_v50, 4  ;;  %v3995_v7 = vsel %vm2025_vm0, %v3993_v16, %v3994_v48  ;;  %v3997_v4 = vsel %vm2025_vm0, %v3994_v48, %v3996_v36  ;;  %v4083_v34 = vsel %vm2266_vm1, %v4081_v17, %v4082_v11 }
 0x5bb   : > { %v4085_v20 = vsel %vm2266_vm1, %v4082_v11, %v4084_v23  ;;  %v4049_v57 = vmax.f32 %v3937_v37, %v3995_v7  ;;  %v4050_v61 = vmax.f32 %v3938_v3, %v3997_v4  ;;  %v4171_v42 = vsel %vm2507_vm2, %v4169_v27, %v4170_v24  ;;  %v12172_v11 = vld [vmem:[#allocation49_spill] sm:$0xff] }
 0x5bc   : > { %v4173_v28 = vsel %vm2507_vm2, %v4170_v24, %v4172_v38  ;;  %v4259_v52 = vsel %vm2748_vm3, %v4257_v19, %v4258_v18  ;;  %v4261_v39 = vsel %vm2748_vm3, %v4258_v18, %v4260_v45  ;;  %v12170_v59 = vrot.slane %v10092_v44, 4 }
 0x5bd   : > { %v4051_v15 = vmax.f32 %v3939_v50, %v3996_v36  ;;  %v4137_v16 = vmax.f32 %v4049_v57, %v4083_v34  ;;  %v4138_v48 = vmax.f32 %v4050_v61, %v4085_v20  ;;  %v12171_v17 = vrot.slane %v12112_v53, 6  ;;  %v12173_v50 = vld [vmem:[#allocation103_spill] sm:$0xff]  ;;  %v12175_v34 = vld [vmem:[#allocation106_spill] sm:$0xff] }
 0x5be   : > { %v4617_v41 = vsel %vm2748_vm3, %v12170_v59, %v4616_v25  ;;  %v4620_v3 = vsel %vm2748_vm3, %v4618_v13, %v11337_v2  ;;  %v1758_v19 = vmax.f32 %v10250_v21, %v10277_v51  ;;  %v1759_v25 = vmax.f32 %v12172_v11, %v10025_v32  ;;  %v10414_v13 = vld [vmem:[#allocation2 + $0xc0] sm:$0xff]  ;;  %v12176_v20 = vld [vmem:[#allocation110_spill] sm:$0xff] }
 0x5bf   : > { %4709 = vmatmul.f32.gmra.mxu2 %v4617_v41  ;;  %v4390_v37 = vsel %vm4365_vm4, %v12171_v17, %v4389_v35  ;;  %v4139_v27 = vmax.f32 %v4051_v15, %v4084_v23  ;;  %v1760_v36 = vmax.f32 %v12173_v50, %v12157_v26  ;;  %v4225_v24 = vmax.f32 %v4137_v16, %v4171_v42  ;;  %v12174_v23 = vld [vmem:[#allocation105_spill] sm:$0xff]  ;;  %v10419_v59 = vld [vmem:[#allocation2 + $0x128] sm:$0xff]  ;;  %v12181_v15 = vld [vmem:[#allocation108_spill] sm:$0xff] }
 0x5c0   : > { %4482 = vmatmul.f32.gmra.mxu0 %v4390_v37  ;;  %v4226_v18 = vmax.f32 %v4138_v48, %v4173_v28  ;;  %v1821_v53 = vmax.f32 %v1757_v56, %v12160_v47  ;;  %v1822_v4 = vmax.f32 %v1758_v19, %v12174_v23  ;;  %v1823_v21 = vmax.f32 %v1759_v25, %v12175_v34  ;;  %v10421_v26 = vld [vmem:[#allocation2 + $0xe8] sm:$0xff]  ;;  %v12182_v48 = vld [vmem:[#allocation109_spill] sm:$0xff] }
 0x5c1   : > { %v4227_v7 = vmax.f32 %v4139_v27, %v4172_v38  ;;  %v1824_v57 = vmax.f32 %v1760_v36, %v12176_v20  ;;  %v4313_v32 = vmax.f32 %v4225_v24, %v4259_v52  ;;  %12177 = vst [vmem:[#allocation55_spill] sm:$0xff] %v10421_v26  ;;  %v10423_v42 = vld [vmem:[#allocation2 + $0x48] sm:$0xff]  ;;  %v12180_v38 = vld [vmem:[#allocation96_spill] sm:$0xff]  ;;  %v12183_v37 = vld [vmem:[#allocation117_spill] sm:$0xff]  ;;  %v3027_v11 = vmax.f32 %v12124_v10, %v12145_v62 }
 0x5c2   : > { %v4314_v61 = vmax.f32 %v4226_v18, %v4261_v39  ;;  %12178 = vst [vmem:[#allocation126_spill] sm:$0xff] %v10423_v42  ;;  %v12179_v47 = vld [vmem:[#allocation50_spill] sm:$0xff]  ;;  %v1886_v16 = vmax.f32 %v1822_v4, %v12181_v15  ;;  %v1887_v17 = vmax.f32 %v1823_v21, %v12182_v48 }
 0x5c3   : > { %v1885_v56 = vmax.f32 %v1821_v53, %v12179_v47  ;;  %v4315_v41 = vmax.f32 %v4227_v7, %v4260_v45  ;;  %v1888_v27 = vmax.f32 %v1824_v57, %v12183_v37  ;;  %v4791_v52 = vrot.slane %v4313_v32, 2 }
 0x5c4   : > { %v4792_v39 = vrot.slane %v4314_v61, 2  ;;  %v1950_v50 = vmax.f32 %v1886_v16, %v10419_v59  ;;  %v1951_v36 = vmax.f32 %v1887_v17, %v10421_v26 }
 0x5c5   : > { %v1949_v19 = vmax.f32 %v1885_v56, %v10414_v13  ;;  %v4794_v25 = vrot.slane %v4315_v41, 2  ;;  %v1952_v45 = vmax.f32 %v1888_v27, %v10423_v42 }
 0x5c6   : > { %v4793_v24 = vsel %vm2266_vm1, %v4791_v52, %v4792_v39  ;;  %v2118_v4 = vrot.slane %v1950_v50, 1  ;;  %v2120_v34 = vrot.slane %v1951_v36, 1  ;;  %v2359_v20 = vrot.slane %v1950_v50, 2 }
 0x5c7   : > { %4712 = vmatmul.f32.gmra.mxu2 %v4620_v3  ;;  %v2117_v18 = vrot.slane %v1949_v19, 1  ;;  %v2358_v53 = vrot.slane %v1949_v19, 2  ;;  %v2599_v7 = vrot.slane %v1949_v19, 3  ;;  %4884 = vmatmul.f32.gmra.mxu3 %v4793_v24  ;;  %v4795_v23 = vsel %vm2266_vm1, %v4792_v39, %v4794_v25 }
 0x5c8   : > { %v2122_v21 = vrot.slane %v1952_v45, 1  ;;  %v2361_v57 = vrot.slane %v1951_v36, 2  ;;  %v2363_v32 = vrot.slane %v1952_v45, 2  ;;  %v2600_v61 = vrot.slane %v1950_v50, 3 }
 0x5c9   : > { %v2119_v56 = vsel %vm2025_vm0, %v2117_v18, %v2118_v4  ;;  %v2121_v41 = vsel %vm2025_vm0, %v2118_v4, %v2120_v34  ;;  %v2360_v24 = vsel %vm2266_vm1, %v2358_v53, %v2359_v20  ;;  %v2602_v42 = vrot.slane %v1951_v36, 3 }
 0x5ca   : > { %v2123_v16 = vsel %vm2025_vm0, %v2120_v34, %v2122_v21  ;;  %v2257_v3 = vmax.f32 %v1952_v45, %v2122_v21  ;;  %v2254_v17 = vmax.f32 %v1949_v19, %v2119_v56  ;;  %v2255_v27 = vmax.f32 %v1950_v50, %v2121_v41 }
 0x5cb   : > { %v2256_v52 = vmax.f32 %v1951_v36, %v2123_v16  ;;  %v2362_v39 = vsel %vm2266_vm1, %v2359_v20, %v2361_v57  ;;  %v2364_v25 = vsel %vm2266_vm1, %v2361_v57, %v2363_v32  ;;  %v2601_v28 = vsel %vm2507_vm2, %v2599_v7, %v2600_v61 }
 0x5cc   : > { %v2498_v2 = vmax.f32 %v2257_v3, %v2363_v32  ;;  %v2495_v35 = vmax.f32 %v2254_v17, %v2360_v24  ;;  %v2496_v62 = vmax.f32 %v2255_v27, %v2362_v39  ;;  %v2604_v4 = vrot.slane %v1952_v45, 3  ;;  %v12188_v24 = vld [vmem:[#allocation99_spill] sm:$0xff] }
 0x5cd   : > { %v2497_v18 = vmax.f32 %v2256_v52, %v2364_v25  ;;  %v2840_v26 = vrot.slane %v1949_v19, 4  ;;  %v2841_v34 = vrot.slane %v1950_v50, 4  ;;  %v2843_v21 = vrot.slane %v1951_v36, 4  ;;  %v12189_v25 = vld [vmem:[#allocation125_spill] sm:$0xff] }
 0x5ce   : > { %v2603_v56 = vsel %vm2507_vm2, %v2600_v61, %v2602_v42  ;;  %v2736_v41 = vmax.f32 %v2495_v35, %v2601_v28  ;;  %v2845_v16 = vrot.slane %v1952_v45, 4  ;;  %v3028_v53 = vmax.f32 %v9859_v63, %v12146_v55 }
 0x5cf   : > { %4887 = vmatmul.f32.gmra.mxu3 %v4795_v23  ;;  %v2605_v20 = vsel %vm2507_vm2, %v2602_v42, %v2604_v4  ;;  %v2737_v57 = vmax.f32 %v2496_v62, %v2603_v56  ;;  %v2739_v7 = vmax.f32 %v2498_v2, %v2604_v4  ;;  %v2842_v32 = vsel %vm2748_vm3, %v2840_v26, %v2841_v34  ;;  %v12190_v4 = vld [vmem:[#allocation124_spill] sm:$0xff] }
 0x5d0   : > { %v2738_v3 = vmax.f32 %v2497_v18, %v2605_v20  ;;  %v2844_v17 = vsel %vm2748_vm3, %v2841_v34, %v2843_v21  ;;  %v2846_v19 = vsel %vm2748_vm3, %v2843_v21, %v2845_v16  ;;  %v10453_v50 = vmax.f32 %v2736_v41, %v2842_v32 }
 0x5d1   : > { %v10455_v36 = vmax.f32 %v2737_v57, %v2844_v17  ;;  %v10457_v35 = vmax.f32 %v2739_v7, %v2845_v16  ;;  %v12185_v63 = vmax.f32 %v12122_v49, %v9994_v30  ;;  %v12186_v62 = vmax.f32 %v12180_v38, %v9999_v12 }
 0x5d2   : > { %v10467_v26 = vmax.f32 %v2738_v3, %v2846_v19  ;;  %v3075_v28 = vmax.f32 %v3027_v11, %v10172_v0  ;;  %v3076_v45 = vmax.f32 %v3028_v53, %v10166_v40  ;;  %v3868_v23 = vmax.f32 %v9651_v8, %v10082_v43 }
 0x5d3   : > { %12184 = vst [vmem:[#allocation57_spill] sm:$0xff] %v10457_v35  ;;  %v3073_v42 = vmax.f32 %v12185_v63, %v10164_v6  ;;  %v3074_v2 = vmax.f32 %v12186_v62, %v10170_v58  ;;  %v3869_v52 = vmax.f32 %v9653_v54, %v10092_v44  ;;  %v3870_v39 = vmax.f32 %v12188_v24, %v12168_v33 }
 0x5d4   : > { %12187 = vst [vmem:[#allocation127_spill] sm:$0xff] %v10467_v26  ;;  %v3123_v18 = vmax.f32 %v3075_v28, %v12189_v25  ;;  %v3124_v34 = vmax.f32 %v3076_v45, %v12190_v4  ;;  %v3892_v11 = vmax.f32 %v3868_v23, %v10238_v1  ;;  %v4391_v21 = vrot.slane %v12122_v49, 6 }
 0x5d5   : > { %v3121_v61 = vmax.f32 %v3073_v42, %v10318_v60  ;;  %v3122_v27 = vmax.f32 %v3074_v2, %v10330_v29  ;;  %v3893_v41 = vmax.f32 %v3869_v52, %v10240_v9  ;;  %v3894_v16 = vmax.f32 %v3870_v39, %v10244_v5 }
 0x5d6   : > { %v3171_v54 = vmax.f32 %v3123_v18, %v10467_v26  ;;  %v3172_v53 = vmax.f32 %v3124_v34, %v10457_v35  ;;  %v3916_v20 = vmax.f32 %v3892_v11, %v10367_v46 }
 0x5d7   : > { %v3169_v8 = vmax.f32 %v3121_v61, %v10453_v50  ;;  %v3170_v56 = vmax.f32 %v3122_v27, %v10455_v36 }
 0x5d8   : > { %v3295_v17 = vrot.slane %v3171_v54, 1  ;;  %v3297_v19 = vrot.slane %v3172_v53, 1  ;;  %v3451_v63 = vrot.slane %v3171_v54, 2  ;;  %v3453_v42 = vrot.slane %v3172_v53, 2 }
 0x5d9   : > { %v3292_v7 = vrot.slane %v3169_v8, 1  ;;  %v3293_v32 = vrot.slane %v3170_v56, 1  ;;  %v3448_v3 = vrot.slane %v3169_v8, 2  ;;  %v3449_v49 = vrot.slane %v3170_v56, 2 }
 0x5da   : > { %v3604_v28 = vrot.slane %v3169_v8, 3  ;;  %v3605_v45 = vrot.slane %v3170_v56, 3  ;;  %v3298_v61 = vsel %vm2025_vm0, %v3295_v17, %v3297_v19  ;;  %v3454_v18 = vsel %vm2266_vm1, %v3451_v63, %v3453_v42 }
 0x5db   : > { %v3294_v62 = vsel %vm2025_vm0, %v3292_v7, %v3293_v32  ;;  %v3450_v2 = vsel %vm2266_vm1, %v3448_v3, %v3449_v49  ;;  %v3296_v23 = vsel %vm2025_vm0, %v3293_v32, %v3295_v17  ;;  %v3452_v52 = vsel %vm2266_vm1, %v3449_v49, %v3451_v63 }
 0x5dc   : > { %v3376_v27 = vmax.f32 %v3169_v8, %v3294_v62  ;;  %v3377_v24 = vmax.f32 %v3170_v56, %v3296_v23  ;;  %v3378_v39 = vmax.f32 %v3171_v54, %v3298_v61  ;;  %v3606_v34 = vsel %vm2507_vm2, %v3604_v28, %v3605_v45 }
 0x5dd   : > { %v3607_v57 = vrot.slane %v3171_v54, 3  ;;  %v3609_v7 = vrot.slane %v3172_v53, 3  ;;  %v3760_v35 = vrot.slane %v3169_v8, 4  ;;  %v3761_v44 = vrot.slane %v3170_v56, 4 }
 0x5de   : > { %v3532_v11 = vmax.f32 %v3376_v27, %v3450_v2  ;;  %v3533_v3 = vmax.f32 %v3377_v24, %v3452_v52  ;;  %v3534_v33 = vmax.f32 %v3378_v39, %v3454_v18  ;;  %v3763_v26 = vrot.slane %v3171_v54, 4 }
 0x5df   : > { %v3608_v32 = vsel %vm2507_vm2, %v3605_v45, %v3607_v57  ;;  %v3610_v17 = vsel %vm2507_vm2, %v3607_v57, %v3609_v7  ;;  %v3765_v49 = vrot.slane %v3172_v53, 4  ;;  %v3762_v63 = vsel %vm2748_vm3, %v3760_v35, %v3761_v44 }
 0x5e0   : > { %v3688_v19 = vmax.f32 %v3532_v11, %v3606_v34  ;;  %v3689_v62 = vmax.f32 %v3533_v3, %v3608_v32  ;;  %v3690_v23 = vmax.f32 %v3534_v33, %v3610_v17  ;;  %v3764_v42 = vsel %vm2748_vm3, %v3761_v44, %v3763_v26 }
 0x5e1   : > { %v3766_v2 = vsel %vm2748_vm3, %v3763_v26, %v3765_v49  ;;  %v3917_v8 = vmax.f32 %v3893_v41, %v10371_v14  ;;  %v3918_v56 = vmax.f32 %v3894_v16, %v10373_v31  ;;  %v12191_v53 = vrot.slane %v12180_v38, 6 }
 0x5e2   : > { %v10503_v28 = vmax.f32 %v3688_v19, %v3762_v63  ;;  %v10507_v54 = vmax.f32 %v3689_v62, %v3764_v42  ;;  %v10509_v45 = vmax.f32 %v3690_v23, %v3766_v2  ;;  %v4621_v35 = vrot.slane %v10244_v5, 4 }
 0x5e3   : > { %v4393_v33 = vsel %vm4365_vm4, %v4391_v21, %v12191_v53  ;;  %v4394_v26 = vrot.slane %v12124_v10, 6  ;;  %v4623_v57 = vrot.slane %v10367_v46, 4  ;;  %v11349_v41 = vrot.slane %v10371_v14, 4  ;;  %v10524_v21 = vld [vmem:[#allocation2 + $0x88] sm:$0xff] }
 0x5e4   : > { %v3940_v44 = vmax.f32 %v3916_v20, %v10503_v28  ;;  %4485 = vmatmul.f32.gmra.mxu0 %v4393_v33  ;;  %v3941_v16 = vmax.f32 %v3917_v8, %v10507_v54  ;;  %v3942_v61 = vmax.f32 %v3918_v56, %v10509_v45  ;;  %v12192_v27 = vrot.slane %v10240_v9, 4 }
 0x5e5   : > { %v1761_v20 = vmax.f32 %v10264_v22, %v10524_v21 }
 0x5e6   : > { %v4622_v52 = vsel %vm2748_vm3, %v12192_v27, %v4621_v35  ;;  %v3998_v24 = vrot.slane %v3940_v44, 1  ;;  %v4086_v39 = vrot.slane %v3940_v44, 2  ;;  %v4174_v10 = vrot.slane %v3940_v44, 3 }
 0x5e7   : > { %v4262_v18 = vrot.slane %v3940_v44, 4  ;;  %4715 = vmatmul.f32.gmra.mxu2 %v4622_v52  ;;  %v3999_v34 = vrot.slane %v3941_v16, 1  ;;  %v4001_v11 = vrot.slane %v3942_v61, 1  ;;  %v4087_v7 = vrot.slane %v3941_v16, 2 }
 0x5e8   : > { %v4089_v3 = vrot.slane %v3942_v61, 2  ;;  %v4175_v32 = vrot.slane %v3941_v16, 3  ;;  %v4177_v17 = vrot.slane %v3942_v61, 3  ;;  %v4263_v19 = vrot.slane %v3941_v16, 4 }
 0x5e9   : > { %v4265_v49 = vrot.slane %v3942_v61, 4  ;;  %v4000_v62 = vsel %vm2025_vm0, %v3998_v24, %v3999_v34  ;;  %v4002_v23 = vsel %vm2025_vm0, %v3999_v34, %v4001_v11  ;;  %v4088_v63 = vsel %vm2266_vm1, %v4086_v39, %v4087_v7 }
 0x5ea   : > { %v4090_v22 = vsel %vm2266_vm1, %v4087_v7, %v4089_v3  ;;  %v4052_v42 = vmax.f32 %v3940_v44, %v4000_v62  ;;  %v4053_v2 = vmax.f32 %v3941_v16, %v4002_v23  ;;  %v4176_v8 = vsel %vm2507_vm2, %v4174_v10, %v4175_v32  ;;  %v10542_v16 = vld [vmem:[#allocation2 + $0x1f8] sm:$0xff]  ;;  %v10553_v62 = vld [vmem:[#allocation2 + $0x40] sm:$0xff] }
 0x5eb   : > { %v4178_v56 = vsel %vm2507_vm2, %v4175_v32, %v4177_v17  ;;  %v4264_v53 = vsel %vm2748_vm3, %v4262_v18, %v4263_v19  ;;  %v4266_v33 = vsel %vm2748_vm3, %v4263_v19, %v4265_v49  ;;  %v4054_v35 = vmax.f32 %v3942_v61, %v4001_v11  ;;  %v6064_v18 = vld [vmem:[#allocation2 + $0x220] sm:$0xff]  ;;  %v10546_v7 = vld [vmem:[#allocation2 + $0x238] sm:$0xff] }
 0x5ec   : > { %v12193_v27 = vrot.slane %v12180_v38, 6  ;;  %v4140_v24 = vmax.f32 %v4052_v42, %v4088_v63  ;;  %v4141_v34 = vmax.f32 %v4053_v2, %v4090_v22  ;;  %v4625_v44 = vsel %vm2748_vm3, %v4623_v57, %v11349_v41  ;;  %v6066_v61 = vld [vmem:[#allocation2 + $0x118] sm:$0xff]  ;;  %v10558_v63 = vld [vmem:[#allocation2 + $0x80] sm:$0xff] }
 0x5ed   : > { %v1762_v39 = vmax.f32 %v10277_v51, %v10542_v16  ;;  %v4142_v10 = vmax.f32 %v4054_v35, %v4089_v3  ;;  %v1763_v38 = vmax.f32 %v6064_v18, %v10546_v7  ;;  %v1825_v32 = vmax.f32 %v1761_v20, %v12179_v47  ;;  %12194 = vst [vmem:[#allocation128_spill] sm:$0xff] %v10558_v63 }
 0x5ee   : > { %v4395_v52 = vsel %vm4365_vm4, %v12193_v27, %v4394_v26  ;;  %v10549_v26 = vld [vmem:[#allocation2 + $0x170] sm:$0xff]  ;;  %v4228_v19 = vmax.f32 %v4140_v24, %v4176_v8  ;;  %v4229_v57 = vmax.f32 %v4141_v34, %v4178_v56  ;;  %v3030_v35 = vmax.f32 %v9999_v12, %v10170_v58  ;;  %v12198_v24 = vld [vmem:[#allocation126_spill] sm:$0xff] }
 0x5ef   : > { %4488 = vmatmul.f32.gmra.mxu0 %v4395_v52  ;;  %v1764_v11 = vmax.f32 %v6066_v61, %v10549_v26  ;;  %4718 = vmatmul.f32.gmra.mxu2 %v4625_v44  ;;  %v1826_v51 = vmax.f32 %v1762_v39, %v12181_v15  ;;  %v4230_v23 = vmax.f32 %v4142_v10, %v4177_v17  ;;  %v10563_v8 = vld [vmem:[#allocation2 + $0x130] sm:$0xff] }
 0x5f0   : > { %v1827_v22 = vmax.f32 %v1763_v38, %v12182_v48  ;;  %v1889_v2 = vmax.f32 %v1825_v32, %v10414_v13  ;;  %v4316_v47 = vmax.f32 %v4228_v19, %v4264_v53  ;;  %v4317_v20 = vmax.f32 %v4229_v57, %v4266_v33  ;;  %12195 = vst [vmem:[#allocation58_spill] sm:$0xff] %v10563_v8  ;;  %v10565_v56 = vld [vmem:[#allocation2 + $0x190] sm:$0xff]  ;;  %v12199_v33 = vld [vmem:[#allocation101_spill] sm:$0xff] }
 0x5f1   : > { %v1828_v42 = vmax.f32 %v1764_v11, %v12183_v37  ;;  %12196 = vst [vmem:[#allocation129_spill] sm:$0xff] %v10565_v56  ;;  %v1890_v15 = vmax.f32 %v1826_v51, %v10419_v59  ;;  %v4318_v17 = vmax.f32 %v4230_v23, %v4265_v49  ;;  %v12197_v27 = vld [vmem:[#allocation55_spill] sm:$0xff]  ;;  %v3031_v39 = vmax.f32 %v12199_v33, %v10172_v0 }
 0x5f2   : > { %v1891_v52 = vmax.f32 %v1827_v22, %v12197_v27  ;;  %v1953_v37 = vmax.f32 %v1889_v2, %v10553_v62  ;;  %v4796_v34 = vrot.slane %v4316_v47, 2  ;;  %v4797_v44 = vrot.slane %v4317_v20, 2 }
 0x5f3   : > { %v1892_v48 = vmax.f32 %v1828_v42, %v12198_v24  ;;  %v1954_v53 = vmax.f32 %v1890_v15, %v10558_v63  ;;  %v4799_v10 = vrot.slane %v4318_v17, 2 }
 0x5f4   : > { %v1955_v18 = vmax.f32 %v1891_v52, %v10563_v8  ;;  %v2124_v61 = vrot.slane %v1953_v37, 1  ;;  %v4798_v49 = vsel %vm2266_vm1, %v4796_v34, %v4797_v44  ;;  %v2365_v32 = vrot.slane %v1953_v37, 2 }
 0x5f5   : > { %v1956_v38 = vmax.f32 %v1892_v48, %v10565_v56  ;;  %v2125_v11 = vrot.slane %v1954_v53, 1  ;;  %v2366_v19 = vrot.slane %v1954_v53, 2  ;;  %4890 = vmatmul.f32.gmra.mxu3 %v4798_v49  ;;  %v4800_v57 = vsel %vm2266_vm1, %v4797_v44, %v4799_v10 }
 0x5f6   : > { %v2127_v51 = vrot.slane %v1955_v18, 1  ;;  %v2368_v22 = vrot.slane %v1955_v18, 2  ;;  %v2606_v20 = vrot.slane %v1953_v37, 3  ;;  %v2607_v0 = vrot.slane %v1954_v53, 3 }
 0x5f7   : > { %v2129_v23 = vrot.slane %v1956_v38, 1  ;;  %v2126_v42 = vsel %vm2025_vm0, %v2124_v61, %v2125_v11  ;;  %v2367_v2 = vsel %vm2266_vm1, %v2365_v32, %v2366_v19  ;;  %v2370_v47 = vrot.slane %v1956_v38, 2 }
 0x5f8   : > { %v2128_v15 = vsel %vm2025_vm0, %v2125_v11, %v2127_v51  ;;  %v2258_v52 = vmax.f32 %v1953_v37, %v2126_v42  ;;  %v2369_v49 = vsel %vm2266_vm1, %v2366_v19, %v2368_v22  ;;  %v2609_v61 = vrot.slane %v1955_v18, 3 }
 0x5f9   : > { %v2130_v17 = vsel %vm2025_vm0, %v2127_v51, %v2129_v23  ;;  %v2261_v48 = vmax.f32 %v1956_v38, %v2129_v23  ;;  %v2259_v34 = vmax.f32 %v1954_v53, %v2128_v15  ;;  %v2371_v44 = vsel %vm2266_vm1, %v2368_v22, %v2370_v47 }
 0x5fa   : > { %v2260_v41 = vmax.f32 %v1955_v18, %v2130_v17  ;;  %v2499_v10 = vmax.f32 %v2258_v52, %v2367_v2  ;;  %v2611_v58 = vrot.slane %v1956_v38, 3  ;;  %v2847_v8 = vrot.slane %v1953_v37, 4 }
 0x5fb   : > { %v2502_v3 = vmax.f32 %v2261_v48, %v2370_v47  ;;  %v2500_v56 = vmax.f32 %v2259_v34, %v2369_v49  ;;  %v2608_v11 = vsel %vm2507_vm2, %v2606_v20, %v2607_v0  ;;  %v2610_v51 = vsel %vm2507_vm2, %v2607_v0, %v2609_v61  ;;  %v12205_v34 = vld [vmem:[#allocation127_spill] sm:$0xff] }
 0x5fc   : > { %v2501_v32 = vmax.f32 %v2260_v41, %v2371_v44  ;;  %v2848_v42 = vrot.slane %v1954_v53, 4  ;;  %v2850_v23 = vrot.slane %v1955_v18, 4  ;;  %v2612_v15 = vsel %vm2507_vm2, %v2609_v61, %v2611_v58 }
 0x5fd   : > { %v2740_v17 = vmax.f32 %v2499_v10, %v2608_v11  ;;  %v2741_v19 = vmax.f32 %v2500_v56, %v2610_v51  ;;  %v2743_v63 = vmax.f32 %v2502_v3, %v2611_v58  ;;  %4893 = vmatmul.f32.gmra.mxu3 %v4800_v57  ;;  %v2852_v41 = vrot.slane %v1956_v38, 4 }
 0x5fe   : > { %v2742_v22 = vmax.f32 %v2501_v32, %v2612_v15  ;;  %v2849_v2 = vsel %vm2748_vm3, %v2847_v8, %v2848_v42  ;;  %v2851_v47 = vsel %vm2748_vm3, %v2848_v42, %v2850_v23  ;;  %v3032_v0 = vmax.f32 %v12146_v55, %v10166_v40 }
 0x5ff   : > { %v10591_v52 = vmax.f32 %v2740_v17, %v2849_v2  ;;  %v10593_v37 = vmax.f32 %v2741_v19, %v2851_v47  ;;  %v12202_v53 = vmax.f32 %v9994_v30, %v10164_v6  ;;  %v2853_v58 = vsel %vm2748_vm3, %v2850_v23, %v2852_v41 }
 0x600   : > { %v10602_v3 = vmax.f32 %v2743_v63, %v2852_v41  ;;  %v3078_v8 = vmax.f32 %v3030_v35, %v10330_v29  ;;  %v3079_v18 = vmax.f32 %v3031_v39, %v12189_v25  ;;  %v10606_v38 = vmax.f32 %v2742_v22, %v2853_v58  ;;  %v12206_v63 = vld [vmem:[#allocation111_spill] sm:$0xff]  ;;  %v12207_v35 = vld [vmem:[#allocation112_spill] sm:$0xff]  ;;  %v12208_v39 = vld [vmem:[#allocation57_spill] sm:$0xff] }
 0x601   : > { %12200 = vst [vmem:[#allocation59_spill] sm:$0xff] %v10591_v52  ;;  %v3077_v56 = vmax.f32 %v12202_v53, %v10318_v60  ;;  %v3080_v57 = vmax.f32 %v3032_v0, %v12190_v4  ;;  %v3871_v55 = vmax.f32 %v10082_v43, %v10238_v1  ;;  %v3872_v44 = vmax.f32 %v12206_v63, %v10240_v9 }
 0x602   : > { %12201 = vst [vmem:[#allocation130_spill] sm:$0xff] %v10593_v37  ;;  %v3126_v48 = vmax.f32 %v3078_v8, %v10455_v36  ;;  %v3127_v49 = vmax.f32 %v3079_v18, %v12205_v34  ;;  %v3873_v10 = vmax.f32 %v12207_v35, %v10244_v5  ;;  %v4396_v51 = vrot.slane %v9994_v30, 6 }
 0x603   : > { %12203 = vst [vmem:[#allocation56_spill] sm:$0xff] %v10602_v3  ;;  %v3125_v20 = vmax.f32 %v3077_v56, %v10453_v50  ;;  %v3128_v61 = vmax.f32 %v3080_v57, %v12208_v39  ;;  %v3895_v11 = vmax.f32 %v3871_v55, %v10367_v46  ;;  %v3896_v23 = vmax.f32 %v3872_v44, %v10371_v14 }
 0x604   : > { %12204 = vst [vmem:[#allocation119_spill] sm:$0xff] %v10606_v38  ;;  %v3174_v43 = vmax.f32 %v3126_v48, %v10593_v37  ;;  %v3175_v42 = vmax.f32 %v3127_v49, %v10606_v38  ;;  %v3897_v15 = vmax.f32 %v3873_v10, %v10373_v31 }
 0x605   : > { %v3173_v32 = vmax.f32 %v3125_v20, %v10591_v52  ;;  %v3176_v17 = vmax.f32 %v3128_v61, %v10602_v3 }
 0x606   : > { %v3300_v47 = vrot.slane %v3174_v43, 1  ;;  %v3302_v41 = vrot.slane %v3175_v42, 1  ;;  %v3456_v0 = vrot.slane %v3174_v43, 2  ;;  %v3458_v53 = vrot.slane %v3175_v42, 2 }
 0x607   : > { %v3299_v19 = vrot.slane %v3173_v32, 1  ;;  %v3455_v22 = vrot.slane %v3173_v32, 2  ;;  %v3611_v2 = vrot.slane %v3173_v32, 3  ;;  %v3304_v56 = vrot.slane %v3176_v17, 1 }
 0x608   : > { %v3460_v58 = vrot.slane %v3176_v17, 2  ;;  %v3612_v30 = vrot.slane %v3174_v43, 3  ;;  %v3614_v8 = vrot.slane %v3175_v42, 3  ;;  %v3303_v57 = vsel %vm2025_vm0, %v3300_v47, %v3302_v41 }
 0x609   : > { %v3301_v18 = vsel %vm2025_vm0, %v3299_v19, %v3300_v47  ;;  %v3457_v20 = vsel %vm2266_vm1, %v3455_v22, %v3456_v0  ;;  %v3459_v55 = vsel %vm2266_vm1, %v3456_v0, %v3458_v53  ;;  %v3305_v48 = vsel %vm2025_vm0, %v3302_v41, %v3304_v56 }
 0x60a   : > { %v3379_v49 = vmax.f32 %v3173_v32, %v3301_v18  ;;  %v3380_v63 = vmax.f32 %v3174_v43, %v3303_v57  ;;  %v3461_v44 = vsel %vm2266_vm1, %v3458_v53, %v3460_v58  ;;  %v3381_v35 = vmax.f32 %v3175_v42, %v3305_v48 }
 0x60b   : > { %v3613_v10 = vsel %vm2507_vm2, %v3611_v2, %v3612_v30  ;;  %v3615_v61 = vsel %vm2507_vm2, %v3612_v30, %v3614_v8  ;;  %v3616_v3 = vrot.slane %v3176_v17, 3  ;;  %v3767_v37 = vrot.slane %v3173_v32, 4 }
 0x60c   : > { %v3535_v38 = vmax.f32 %v3379_v49, %v3457_v20  ;;  %v3536_v19 = vmax.f32 %v3380_v63, %v3459_v55  ;;  %v3768_v47 = vrot.slane %v3174_v43, 4  ;;  %v3537_v52 = vmax.f32 %v3381_v35, %v3461_v44 }
 0x60d   : > { %v3617_v22 = vsel %vm2507_vm2, %v3614_v8, %v3616_v3  ;;  %v3770_v0 = vrot.slane %v3175_v42, 4  ;;  %v3772_v5 = vrot.slane %v3176_v17, 4  ;;  %v3919_v53 = vmax.f32 %v3895_v11, %v10503_v28 }
 0x60e   : > { %v3691_v41 = vmax.f32 %v3535_v38, %v3613_v10  ;;  %v3692_v56 = vmax.f32 %v3536_v19, %v3615_v61  ;;  %v3769_v18 = vsel %vm2748_vm3, %v3767_v37, %v3768_v47  ;;  %v3693_v58 = vmax.f32 %v3537_v52, %v3617_v22 }
 0x60f   : > { %v3771_v2 = vsel %vm2748_vm3, %v3768_v47, %v3770_v0  ;;  %v3773_v30 = vsel %vm2748_vm3, %v3770_v0, %v3772_v5  ;;  %v3920_v57 = vmax.f32 %v3896_v23, %v10507_v54  ;;  %v3921_v3 = vmax.f32 %v3897_v15, %v10509_v45 }
 0x610   : > { %v10641_v32 = vmax.f32 %v3691_v41, %v3769_v18  ;;  %v10643_v43 = vmax.f32 %v3692_v56, %v3771_v2  ;;  %v4397_v38 = vrot.slane %v9999_v12, 6  ;;  %v10647_v42 = vmax.f32 %v3693_v58, %v3773_v30 }
 0x611   : > { %v4626_v37 = vrot.slane %v10373_v31, 4  ;;  %v4399_v52 = vrot.slane %v12199_v33, 6  ;;  %v4628_v11 = vrot.slane %v10503_v28, 4  ;;  %v4629_v8 = vrot.slane %v10507_v54, 4  ;;  %v6068_v33 = vld [vmem:[#allocation2 + $0x200] sm:$0xff] }
 0x612   : > { %v3943_v5 = vmax.f32 %v3919_v53, %v10641_v32  ;;  %v3944_v23 = vmax.f32 %v3920_v57, %v10643_v43  ;;  %v4398_v17 = vsel %vm4365_vm4, %v4396_v51, %v4397_v38  ;;  %v3945_v15 = vmax.f32 %v3921_v3, %v10647_v42 }
 0x613   : > { %4491 = vmatmul.f32.gmra.mxu0 %v4398_v17  ;;  %v12209_v12 = vrot.slane %v10371_v14, 4  ;;  %v4400_v55 = vsel %vm4365_vm4, %v4397_v38, %v4399_v52  ;;  %v1765_v48 = vmax.f32 %v10524_v21, %v6068_v33  ;;  %v6069_v52 = vld [vmem:[#allocation2 + $0x8] sm:$0xff] }
 0x614   : > { %v4003_v49 = vrot.slane %v3943_v5, 1  ;;  %v4004_v63 = vrot.slane %v3944_v23, 1  ;;  %v4091_v44 = vrot.slane %v3943_v5, 2  ;;  %v4092_v35 = vrot.slane %v3944_v23, 2  ;;  %v6070_v33 = vld [vmem:[#allocation2 + $0x1e8] sm:$0xff] }
 0x615   : > { %v4627_v20 = vsel %vm2748_vm3, %v12209_v12, %v4626_v37  ;;  %v4006_v51 = vrot.slane %v3945_v15, 1  ;;  %v4094_v10 = vrot.slane %v3945_v15, 2  ;;  %v4179_v61 = vrot.slane %v3943_v5, 3 }
 0x616   : > { %4721 = vmatmul.f32.gmra.mxu2 %v4627_v20  ;;  %v4180_v19 = vrot.slane %v3944_v23, 3  ;;  %v4005_v47 = vsel %vm2025_vm0, %v4003_v49, %v4004_v63  ;;  %v4093_v22 = vsel %vm2266_vm1, %v4091_v44, %v4092_v35  ;;  %v4182_v0 = vrot.slane %v3945_v15, 3  ;;  %v6071_v44 = vld [vmem:[#allocation2 + $0x28] sm:$0xff] }
 0x617   : > { %v4267_v41 = vrot.slane %v3943_v5, 4  ;;  %v4007_v56 = vsel %vm2025_vm0, %v4004_v63, %v4006_v51  ;;  %v4055_v18 = vmax.f32 %v3943_v5, %v4005_v47  ;;  %v4095_v21 = vsel %vm2266_vm1, %v4092_v35, %v4094_v10 }
 0x618   : > { %v4181_v53 = vsel %vm2507_vm2, %v4179_v61, %v4180_v19  ;;  %v4056_v58 = vmax.f32 %v3944_v23, %v4007_v56  ;;  %v4183_v2 = vsel %vm2507_vm2, %v4180_v19, %v4182_v0  ;;  %v4268_v30 = vrot.slane %v3944_v23, 4 }
 0x619   : > { %v4270_v57 = vrot.slane %v3945_v15, 4  ;;  %v4143_v3 = vmax.f32 %v4055_v18, %v4093_v22  ;;  %v4057_v38 = vmax.f32 %v3945_v15, %v4006_v51  ;;  %v4630_v37 = vsel %vm2748_vm3, %v4628_v11, %v4629_v8  ;;  %v1701_v51 = vld [vmem:[#allocation2 + $0x108] sm:$0xff]  ;;  %v1702_v22 = vld [vmem:[#allocation2 + $0x140] sm:$0xff] }
 0x61a   : > { %v1766_v17 = vmax.f32 %v10542_v16, %v6069_v52  ;;  %v4144_v12 = vmax.f32 %v4056_v58, %v4095_v21  ;;  %v4269_v5 = vsel %vm2748_vm3, %v4267_v41, %v4268_v30  ;;  %v1767_v49 = vmax.f32 %v10546_v7, %v6070_v33  ;;  %v12211_v18 = vld [vmem:[#allocation58_spill] sm:$0xff] }
 0x61b   : > { %v4271_v20 = vsel %vm2748_vm3, %v4268_v30, %v4270_v57  ;;  %v4231_v63 = vmax.f32 %v4143_v3, %v4181_v53  ;;  %v4145_v23 = vmax.f32 %v4057_v38, %v4094_v10  ;;  %4494 = vmatmul.f32.gmra.mxu0 %v4400_v55  ;;  %v1768_v15 = vmax.f32 %v10549_v26, %v6071_v44  ;;  %v1703_v10 = vld [vmem:[#allocation2 + $0x58] sm:$0xff] }
 0x61c   : > { %v1829_v35 = vmax.f32 %v1765_v48, %v10414_v13  ;;  %v4232_v11 = vmax.f32 %v4144_v12, %v4183_v2  ;;  %v1830_v16 = vmax.f32 %v1766_v17, %v10419_v59  ;;  %v1831_v61 = vmax.f32 %v1767_v49, %v12197_v27  ;;  %v1704_v13 = vld [vmem:[#allocation2 + $0x1d0] sm:$0xff]  ;;  %v12210_v48 = vld [vmem:[#allocation128_spill] sm:$0xff]  ;;  %v12212_v59 = vld [vmem:[#allocation113_spill] sm:$0xff] }
 0x61d   : > { %v3033_v19 = vmax.f32 %v10164_v6, %v10318_v60  ;;  %v4319_v47 = vmax.f32 %v4231_v63, %v4269_v5  ;;  %v4233_v7 = vmax.f32 %v4145_v23, %v4182_v0  ;;  %v1832_v55 = vmax.f32 %v1768_v15, %v12198_v24  ;;  %v12213_v2 = vld [vmem:[#allocation129_spill] sm:$0xff] }
 0x61e   : > { %4724 = vmatmul.f32.gmra.mxu2 %v4630_v37  ;;  %v1893_v26 = vmax.f32 %v1829_v35, %v10553_v62  ;;  %v4320_v41 = vmax.f32 %v4232_v11, %v4271_v20  ;;  %v1894_v56 = vmax.f32 %v1830_v16, %v12210_v48  ;;  %v1895_v21 = vmax.f32 %v1831_v61, %v12211_v18  ;;  %v12214_v24 = vld [vmem:[#allocation45_spill] sm:$0xff] }
 0x61f   : > { %v3034_v27 = vmax.f32 %v12212_v59, %v10330_v29  ;;  %v4801_v53 = vrot.slane %v4319_v47, 2  ;;  %v4321_v58 = vmax.f32 %v4233_v7, %v4270_v57  ;;  %v1896_v30 = vmax.f32 %v1832_v55, %v12213_v2 }
 0x620   : > { %v1957_v0 = vmax.f32 %v1893_v26, %v1701_v51  ;;  %v4802_v3 = vrot.slane %v4320_v41, 2  ;;  %v1958_v38 = vmax.f32 %v1894_v56, %v1702_v22  ;;  %v1959_v37 = vmax.f32 %v1895_v21, %v1703_v10 }
 0x621   : > { %v3035_v62 = vmax.f32 %v12214_v24, %v12189_v25  ;;  %v4804_v52 = vrot.slane %v4321_v58, 2  ;;  %v1960_v17 = vmax.f32 %v1896_v30, %v1704_v13 }
 0x622   : > { %v2131_v12 = vrot.slane %v1957_v0, 1  ;;  %v2372_v5 = vrot.slane %v1957_v0, 2  ;;  %v4803_v20 = vsel %vm2266_vm1, %v4801_v53, %v4802_v3  ;;  %v2132_v33 = vrot.slane %v1958_v38, 1 }
 0x623   : > { %v2134_v49 = vrot.slane %v1959_v37, 1  ;;  %v2373_v29 = vrot.slane %v1958_v38, 2  ;;  %4896 = vmatmul.f32.gmra.mxu3 %v4803_v20  ;;  %v4805_v57 = vsel %vm2266_vm1, %v4802_v3, %v4804_v52  ;;  %v2136_v63 = vrot.slane %v1960_v17, 1 }
 0x624   : > { %v2375_v23 = vrot.slane %v1959_v37, 2  ;;  %v2377_v44 = vrot.slane %v1960_v17, 2  ;;  %v2133_v15 = vsel %vm2025_vm0, %v2131_v12, %v2132_v33  ;;  %v2613_v11 = vrot.slane %v1957_v0, 3 }
 0x625   : > { %v2135_v35 = vsel %vm2025_vm0, %v2132_v33, %v2134_v49  ;;  %v2374_v25 = vsel %vm2266_vm1, %v2372_v5, %v2373_v29  ;;  %v2137_v51 = vsel %vm2025_vm0, %v2134_v49, %v2136_v63  ;;  %v2262_v16 = vmax.f32 %v1957_v0, %v2133_v15 }
 0x626   : > { %v2263_v61 = vmax.f32 %v1958_v38, %v2135_v35  ;;  %v2265_v47 = vmax.f32 %v1960_v17, %v2136_v63  ;;  %v2264_v7 = vmax.f32 %v1959_v37, %v2137_v51  ;;  %v2376_v22 = vsel %vm2266_vm1, %v2373_v29, %v2375_v23  ;;  %v12216_v51 = vld [vmem:[#allocation59_spill] sm:$0xff] }
 0x627   : > { %v2378_v10 = vsel %vm2266_vm1, %v2375_v23, %v2377_v44  ;;  %v2614_v55 = vrot.slane %v1958_v38, 3  ;;  %v2503_v26 = vmax.f32 %v2262_v16, %v2374_v25  ;;  %v2616_v48 = vrot.slane %v1959_v37, 3  ;;  %v12215_v25 = vld [vmem:[#allocation46_spill] sm:$0xff] }
 0x628   : > { %v2504_v41 = vmax.f32 %v2263_v61, %v2376_v22  ;;  %v2506_v13 = vmax.f32 %v2265_v47, %v2377_v44  ;;  %v2505_v56 = vmax.f32 %v2264_v7, %v2378_v10  ;;  %v2618_v21 = vrot.slane %v1960_v17, 3  ;;  %v12217_v61 = vld [vmem:[#allocation130_spill] sm:$0xff] }
 0x629   : > { %v2615_v18 = vsel %vm2507_vm2, %v2613_v11, %v2614_v55  ;;  %v2854_v53 = vrot.slane %v1957_v0, 4  ;;  %v2617_v58 = vsel %vm2507_vm2, %v2614_v55, %v2616_v48  ;;  %v2855_v30 = vrot.slane %v1958_v38, 4 }
 0x62a   : > { %v2744_v2 = vmax.f32 %v2503_v26, %v2615_v18  ;;  %v2857_v3 = vrot.slane %v1959_v37, 4  ;;  %v2619_v52 = vsel %vm2507_vm2, %v2616_v48, %v2618_v21  ;;  %v2745_v12 = vmax.f32 %v2504_v41, %v2617_v58 }
 0x62b   : > { %v2747_v5 = vmax.f32 %v2506_v13, %v2618_v21  ;;  %v2859_v20 = vrot.slane %v1960_v17, 4  ;;  %4899 = vmatmul.f32.gmra.mxu3 %v4805_v57  ;;  %v2746_v33 = vmax.f32 %v2505_v56, %v2619_v52  ;;  %v2856_v49 = vsel %vm2748_vm3, %v2854_v53, %v2855_v30 }
 0x62c   : > { %v2858_v29 = vsel %vm2748_vm3, %v2855_v30, %v2857_v3  ;;  %v3036_v63 = vmax.f32 %v10166_v40, %v12190_v4  ;;  %v2985_v23 = vmax.f32 %v2744_v2, %v2856_v49  ;;  %v3081_v17 = vmax.f32 %v3033_v19, %v10453_v50  ;;  %v12218_v50 = vld [vmem:[#allocation119_spill] sm:$0xff] }
 0x62d   : > { %v2860_v0 = vsel %vm2748_vm3, %v2857_v3, %v2859_v20  ;;  %v2986_v44 = vmax.f32 %v2745_v12, %v2858_v29  ;;  %v2988_v38 = vmax.f32 %v2747_v5, %v2859_v20  ;;  %v3082_v57 = vmax.f32 %v3034_v27, %v10455_v36 }
 0x62e   : > { %v2987_v37 = vmax.f32 %v2746_v33, %v2860_v0  ;;  %v3083_v15 = vmax.f32 %v3035_v62, %v12205_v34  ;;  %v3084_v35 = vmax.f32 %v3036_v63, %v12208_v39  ;;  %v3874_v40 = vmax.f32 %v10238_v1, %v10367_v46  ;;  %v12219_v34 = vld [vmem:[#allocation56_spill] sm:$0xff] }
 0x62f   : > { %v3875_v4 = vmax.f32 %v10240_v9, %v10371_v14  ;;  %v3876_v11 = vmax.f32 %v12215_v25, %v10373_v31  ;;  %v3129_v16 = vmax.f32 %v3081_v17, %v12216_v51  ;;  %v3130_v60 = vmax.f32 %v3082_v57, %v12217_v61  ;;  %v4456_v17 = vpop.f32.mrf.mxu0  ;;  %v4521_v57 = vpop.f32.mrf.mxu1 }
 0x630   : > { %v3131_v19 = vmax.f32 %v3083_v15, %v12218_v50  ;;  %v4401_v36 = vrot.slane %v10164_v6, 6  ;;  %v3132_v27 = vmax.f32 %v3084_v35, %v12219_v34  ;;  %v3898_v39 = vmax.f32 %v3874_v40, %v10503_v28  ;;  %v4683_v61 = vpop.f32.mrf.mxu2 }
 0x631   : > { %v3899_v1 = vmax.f32 %v3875_v4, %v10507_v54  ;;  %v3900_v46 = vmax.f32 %v3876_v11, %v10509_v45  ;;  %v3177_v9 = vmax.f32 %v3129_v16, %v2985_v23  ;;  %v3178_v14 = vmax.f32 %v3130_v60, %v2986_v44 }
 0x632   : > { %v3179_v62 = vmax.f32 %v3131_v19, %v2987_v37  ;;  %v4402_v31 = vrot.slane %v12212_v59, 6  ;;  %v3180_v47 = vmax.f32 %v3132_v27, %v2988_v38  ;;  %v3922_v7 = vmax.f32 %v3898_v39, %v10641_v32 }
 0x633   : > { %v3923_v22 = vmax.f32 %v3899_v1, %v10643_v43  ;;  %v3924_v6 = vmax.f32 %v3900_v46, %v10647_v42  ;;  %v3306_v10 = vrot.slane %v3177_v9, 1  ;;  %v3307_v55 = vrot.slane %v3178_v14, 1 }
 0x634   : > { %v3309_v26 = vrot.slane %v3179_v62, 1  ;;  %v3462_v28 = vrot.slane %v3177_v9, 2  ;;  %v3311_v41 = vrot.slane %v3180_v47, 1  ;;  %v3463_v13 = vrot.slane %v3178_v14, 2 }
 0x635   : > { %v3465_v48 = vrot.slane %v3179_v62, 2  ;;  %v3467_v56 = vrot.slane %v3180_v47, 2  ;;  %v3308_v18 = vsel %vm2025_vm0, %v3306_v10, %v3307_v55  ;;  %v3618_v59 = vrot.slane %v3177_v9, 3 }
 0x636   : > { %v3310_v21 = vsel %vm2025_vm0, %v3307_v55, %v3309_v26  ;;  %v3619_v53 = vrot.slane %v3178_v14, 3  ;;  %v3312_v32 = vsel %vm2025_vm0, %v3309_v26, %v3311_v41  ;;  %v3382_v58 = vmax.f32 %v3177_v9, %v3308_v18 }
 0x637   : > { %v3383_v43 = vmax.f32 %v3178_v14, %v3310_v21  ;;  %v3464_v42 = vsel %vm2266_vm1, %v3462_v28, %v3463_v13  ;;  %v3384_v2 = vmax.f32 %v3179_v62, %v3312_v32  ;;  %v3466_v30 = vsel %vm2266_vm1, %v3463_v13, %v3465_v48 }
 0x638   : > { %v3468_v3 = vsel %vm2266_vm1, %v3465_v48, %v3467_v56  ;;  %v3620_v52 = vsel %vm2507_vm2, %v3618_v59, %v3619_v53  ;;  %v3538_v12 = vmax.f32 %v3382_v58, %v3464_v42  ;;  %v3621_v20 = vrot.slane %v3179_v62, 3  ;;  %v10757_v48 = vld [vmem:[%s12220_s9] ss:$0 sm:$0xff] }
 0x639   : > { %v3539_v5 = vmax.f32 %v3383_v43, %v3466_v30  ;;  %v3623_v33 = vrot.slane %v3180_v47, 3  ;;  %v3540_v49 = vmax.f32 %v3384_v2, %v3468_v3  ;;  %v3774_v29 = vrot.slane %v3177_v9, 4  ;;  %v4459_v2 = vpop.f32.mrf.mxu0  ;;  %v4524_v30 = vpop.f32.mrf.mxu1 }
 0x63a   : > { %v3775_v63 = vrot.slane %v3178_v14, 4  ;;  %v3777_v0 = vrot.slane %v3179_v62, 4  ;;  %v3622_v23 = vsel %vm2507_vm2, %v3619_v53, %v3621_v20  ;;  %v3694_v38 = vmax.f32 %v3538_v12, %v3620_v52  ;;  %v4861_v14 = vpop.f32.mrf.mxu3 }
 0x63b   : > { %v3624_v44 = vsel %vm2507_vm2, %v3621_v20, %v3623_v33  ;;  %v3779_v37 = vrot.slane %v3180_v47, 4  ;;  %v3695_v15 = vmax.f32 %v3539_v5, %v3622_v23  ;;  %v4403_v51 = vsel %vm4365_vm4, %v4401_v36, %v4402_v31 }
 0x63c   : > { %v3696_v35 = vmax.f32 %v3540_v49, %v3624_v44  ;;  %v3776_v40 = vsel %vm2748_vm3, %v3774_v29, %v3775_v63  ;;  %v3778_v4 = vsel %vm2748_vm3, %v3775_v63, %v3777_v0  ;;  %v4631_v16 = vrot.slane %v10509_v45, 4  ;;  %4497 = vmatmul.f32.gmra.mxu0 %v4403_v51  ;;  %v4686_v49 = vpop.f32.mrf.mxu2 }
 0x63d   : > { %v3780_v25 = vsel %vm2748_vm3, %v3777_v0, %v3779_v37  ;;  %v3850_v11 = vmax.f32 %v3694_v38, %v3776_v40  ;;  %v3851_v60 = vmax.f32 %v3695_v15, %v3778_v4  ;;  %v4404_v19 = vrot.slane %v12214_v24, 6 }
 0x63e   : > { %v3852_v50 = vmax.f32 %v3696_v35, %v3780_v25  ;;  %v4522_v34 = vadd.f32 %v4521_v57, %v4456_v17  ;;  %v4632_v39 = vsel %vm2748_vm3, %v4629_v8, %v4631_v16  ;;  %v4525_v5 = vadd.f32 %v4524_v30, %v4459_v2 }
 0x63f   : > { %v3946_v27 = vmax.f32 %v3922_v7, %v3850_v11  ;;  %v3947_v1 = vmax.f32 %v3923_v22, %v3851_v60  ;;  %4727 = vmatmul.f32.gmra.mxu2 %v4632_v39  ;;  %v4405_v9 = vsel %vm4365_vm4, %v4402_v31, %v4404_v19 }
 0x640   : > { %v3948_v46 = vmax.f32 %v3924_v6, %v3852_v50  ;;  %v4731_v36 = vadd.f32 %v4683_v61, %v4522_v34  ;;  %v4732_v0 = vadd.f32 %v4686_v49, %v4525_v5 }
 0x641   : > { %v4008_v45 = vrot.slane %v3946_v27, 1  ;;  %v4096_v62 = vrot.slane %v3946_v27, 2  ;;  %v4184_v47 = vrot.slane %v3946_v27, 3  ;;  %v4272_v10 = vrot.slane %v3946_v27, 4  ;;  %v4462_v25 = vpop.f32.mrf.mxu0  ;;  %v4527_v11 = vpop.f32.mrf.mxu1 }
 0x642   : > { %v4009_v55 = vrot.slane %v3947_v1, 1  ;;  %v4011_v26 = vrot.slane %v3948_v46, 1  ;;  %v4097_v24 = vrot.slane %v3947_v1, 2  ;;  %v4099_v28 = vrot.slane %v3948_v46, 2  ;;  %v4864_v23 = vpop.f32.mrf.mxu3 }
 0x643   : > { %v4185_v7 = vrot.slane %v3947_v1, 3  ;;  %v4187_v41 = vrot.slane %v3948_v46, 3  ;;  %v4273_v54 = vrot.slane %v3947_v1, 4  ;;  %v4275_v13 = vrot.slane %v3948_v46, 4 }
 0x644   : > { %v4010_v8 = vsel %vm2025_vm0, %v4008_v45, %v4009_v55  ;;  %v4012_v22 = vsel %vm2025_vm0, %v4009_v55, %v4011_v26  ;;  %v4098_v31 = vsel %vm2266_vm1, %v4096_v62, %v4097_v24  ;;  %v4100_v6 = vsel %vm2266_vm1, %v4097_v24, %v4099_v28  ;;  %4500 = vmatmul.f32.gmra.mxu0 %v4405_v9  ;;  %v4689_v60 = vpop.f32.mrf.mxu2 }
 0x645   : > { %v4058_v56 = vmax.f32 %v3946_v27, %v4010_v8  ;;  %v4059_v18 = vmax.f32 %v3947_v1, %v4012_v22  ;;  %v4186_v21 = vsel %vm2507_vm2, %v4184_v47, %v4185_v7  ;;  %v4188_v59 = vsel %vm2507_vm2, %v4185_v7, %v4187_v41 }
 0x646   : > { %v4060_v53 = vmax.f32 %v3948_v46, %v4011_v26  ;;  %v4909_v32 = vadd.f32 %v4861_v14, %v4731_v36  ;;  %v4274_v42 = vsel %vm2748_vm3, %v4272_v10, %v4273_v54  ;;  %v4276_v3 = vsel %vm2748_vm3, %v4273_v54, %v4275_v13 }
 0x647   : > { %v4146_v58 = vmax.f32 %v4058_v56, %v4098_v31  ;;  %v4147_v43 = vmax.f32 %v4059_v18, %v4100_v6  ;;  %v4910_v17 = vadd.f32 %v4864_v23, %v4732_v0  ;;  %v4528_v16 = vadd.f32 %v4527_v11, %v4462_v25 }
 0x648   : > { %v4148_v52 = vmax.f32 %v4060_v53, %v4099_v28  ;;  %v10764_v12 = vadd.f32 %v10757_v48, %v4909_v32 }
 0x649   : > { %v4234_v20 = vmax.f32 %v4146_v58, %v4186_v21  ;;  %v4235_v33 = vmax.f32 %v4147_v43, %v4188_v59  ;;  %v10768_v40 = vadd.f32 %v10757_v48, %v4910_v17  ;;  %v4733_v19 = vadd.f32 %v4689_v60, %v4528_v16  ;;  %v4465_v36 = vpop.f32.mrf.mxu0  ;;  %v4530_v14 = vpop.f32.mrf.mxu1 }
 0x64a   : > { %v4236_v29 = vmax.f32 %v4148_v52, %v4187_v41  ;;  %v4945_v63 = vsub.f32 0.0, %v10764_v12  ;;  %v4867_v34 = vpop.f32.mrf.mxu3  ;;  %v4531_v62 = vadd.f32 %v4530_v14, %v4465_v36 }
 0x64b   : > { %v4322_v44 = vmax.f32 %v4234_v20, %v4274_v42  ;;  %v4323_v38 = vmax.f32 %v4235_v33, %v4276_v3  ;;  %v4946_v51 = vsub.f32 0.0, %v10768_v40  ;;  %v4911_v39 = vadd.f32 %v4867_v34, %v4733_v19 }
 0x64c   : > { %v4961_v37 = vmul.f32 1.442695, %v4945_v63  ;;  %v4324_v35 = vmax.f32 %v4236_v29, %v4275_v13  ;;  %v4692_v47 = vpop.f32.mrf.mxu2 }
 0x64d   : > { %v4806_v57 = vrot.slane %v4322_v44, 2  ;;  %v4807_v15 = vrot.slane %v4323_v38, 2  ;;  %v4963_v50 = vmul.f32 1.442695, %v4946_v51  ;;  %v10774_v9 = vadd.f32 %v10757_v48, %v4911_v39 }
 0x64e   : > { %5986 = vpow2.f32 %v4961_v37  ;;  %v4809_v61 = vrot.slane %v4324_v35, 2  ;;  %v4734_v26 = vadd.f32 %v4692_v47, %v4531_v62 }
 0x64f   : > { %v4808_v4 = vsel %vm2266_vm1, %v4806_v57, %v4807_v15  ;;  %5988 = vpow2.f32 %v4963_v50  ;;  %v4947_v45 = vsub.f32 0.0, %v10774_v9 }
 0x650   : > { %4902 = vmatmul.f32.gmra.mxu3 %v4808_v4  ;;  %v4810_v1 = vsel %vm2266_vm1, %v4807_v15, %v4809_v61 }
 0x651   : > { %v4965_v55 = vmul.f32 1.442695, %v4947_v45  ;;  %v4468_v8 = vpop.f32.mrf.mxu0  ;;  %v4533_v22 = vpop.f32.mrf.mxu1 }
 0x652   : > { %v4870_v24 = vpop.f32.mrf.mxu3  ;;  %v4534_v56 = vadd.f32 %v4533_v22, %v4468_v8 }
 0x653   : > { %v4912_v7 = vadd.f32 %v4870_v24, %v4734_v26 }
 0x654   : > { %v5987_v27 = vpop.eup %5986  ;;  %v4695_v59 = vpop.f32.mrf.mxu2 }
 0x655   : > { %v4993_v46 = vadd.f32 1.0, %v5987_v27  ;;  %v5989_v10 = vpop.eup %5988  ;;  %v10778_v13 = vadd.f32 %v10757_v48, %v4912_v7  ;;  %v4735_v43 = vadd.f32 %v4695_v59, %v4534_v56 }
 0x656   : > { %v4994_v28 = vadd.f32 1.0, %v5989_v10 }
 0x657   : > { %5990 = vrcp.f32 %v4993_v46  ;;  %v4948_v6 = vsub.f32 0.0, %v10778_v13  ;;  %v5018_v18 = vand.u32 2147483647, %v4993_v46  ;;  %v5020_v21 = vand.u32 2147483648, %v4993_v46 }
 0x658   : > { %4905 = vmatmul.f32.gmra.mxu3 %v4810_v1  ;;  %5992 = vpow2.f32 %v4965_v55  ;;  %vm5014_vm6 = vweird.f32 %v4993_v46  ;;  %v5033_v63 = vand.u32 2147483647, %v4994_v28  ;;  %v5035_v0 = vand.u32 2147483648, %v4994_v28 }
 0x659   : > { %5994 = vrcp.f32 %v4994_v28  ;;  %v4967_v58 = vmul.f32 1.442695, %v4948_v6  ;;  %v5021_v5 = vor.u32 1.1754944e-38, %v5020_v21  ;;  %vm5019_vm8 = vcmp.eq.f32.partialorder %v5018_v18, 8.507059e+37  ;;  %v4471_v23 = vpop.f32.mrf.mxu0  ;;  %v4536_v44 = vpop.f32.mrf.mxu1 }
 0x65a   : > { %v4873_v42 = vpop.f32.mrf.mxu3  ;;  %v4537_v57 = vadd.f32 %v4536_v44, %v4471_v23  ;;  %vm5029_vm10 = vweird.f32 %v4994_v28  ;;  %v5036_v16 = vor.u32 1.1754944e-38, %v5035_v0  ;;  %vm5034_vm12 = vcmp.eq.f32.partialorder %v5033_v63, 8.507059e+37 }
 0x65b   : > { %5996 = vpow2.f32 %v4967_v58  ;;  %v4913_v49 = vadd.f32 %v4873_v42, %v4735_v43 }
 0x65c   : > { %v4698_v15 = vpop.f32.mrf.mxu2 }
 0x65d   : > { %v5991_v41 = vpop.eup %5990  ;;  %v10786_v17 = vadd.f32 %v10757_v48, %v4913_v49 }
 0x65e   : > { %v5010_v54 = vmul.f32 %v5991_v41, %v4993_v46  ;;  %v5993_v53 = vpop.eup %5992  ;;  %vm5015_vm5 = vweird.f32 %v5991_v41 }
 0x65f   : > { %v5995_v2 = vpop.eup %5994  ;;  %v10781_v30 = vadd.f32 1.0, %v5993_v53  ;;  %vm5016_vm7 = vmor %vm5014_vm6, %vm5015_vm5  ;;  %v4949_v25 = vsub.f32 0.0, %v10786_v17 }
 0x660   : > { %v5011_v31 = vsub.f32 1.0, %v5010_v54  ;;  %v5025_v52 = vmul.f32 %v5995_v2, %v4994_v28  ;;  %vm5030_vm9 = vweird.f32 %v5995_v2 }
 0x661   : > { %5998 = vrcp.f32 %v10781_v30  ;;  %v5997_v35 = vpop.eup %5996  ;;  %vm5031_vm11 = vmor %vm5029_vm10, %vm5030_vm9  ;;  %v4969_v19 = vmul.f32 1.442695, %v4949_v25  ;;  %v5050_v1 = vand.u32 2147483648, %v10781_v30  ;;  %v4474_v36 = vpop.f32.mrf.mxu0  ;;  %v5048_v62 = vand.u32 2147483647, %v10781_v30 }
 0x662   : > { %v5012_v32 = vmul.f32 %v5991_v41, %v5011_v31  ;;  %v5026_v33 = vsub.f32 1.0, %v5025_v52  ;;  %v4876_v11 = vpop.f32.mrf.mxu3  ;;  %v4996_v61 = vadd.f32 1.0, %v5997_v35  ;;  %v4539_v14 = vpop.f32.mrf.mxu1  ;;  %vm5044_vm14 = vweird.f32 %v10781_v30 }
 0x663   : > { %v4540_v47 = vadd.f32 %v4539_v14, %v4474_v36  ;;  %v5051_v28 = vor.u32 1.1754944e-38, %v5050_v1  ;;  %vm5049_vm0 = vcmp.eq.f32.partialorder %v5048_v62, 8.507059e+37 }
 0x664   : > { %v5013_v3 = vadd.f32 %v5991_v41, %v5012_v32  ;;  %v5027_v37 = vmul.f32 %v5995_v2, %v5026_v33  ;;  %6000 = vrcp.f32 %v4996_v61  ;;  %v4701_v55 = vpop.f32.mrf.mxu2  ;;  %v5063_v32 = vand.u32 2147483647, %v4996_v61 }
 0x665   : > { %6002 = vpow2.f32 %v4969_v19  ;;  %v5065_v58 = vand.u32 2147483648, %v4996_v61  ;;  %vm5059_vm2 = vweird.f32 %v4996_v61 }
 0x666   : > { %v5017_v20 = vsel %vm5016_vm7, %v5991_v41, %v5013_v3  ;;  %v5028_v4 = vadd.f32 %v5995_v2, %v5027_v37  ;;  %vm5064_vm4 = vcmp.eq.f32.partialorder %v5063_v32, 8.507059e+37 }
 0x667   : > { %v5022_v29 = vsel %vm5019_vm8, %v5021_v5, %v5017_v20  ;;  %v5999_v51 = vpop.eup %5998  ;;  %v5066_v33 = vor.u32 1.1754944e-38, %v5065_v58 }
 0x668   : > { %v5249_v38 = vmul.f32 %v5022_v29, %v10764_v12  ;;  %v4736_v12 = vadd.f32 %v4698_v15, %v4537_v57  ;;  %v5032_v60 = vsel %vm5031_vm11, %v5995_v2, %v5028_v4  ;;  %v5040_v50 = vmul.f32 %v5999_v51, %v10781_v30 }
 0x669   : > { %v5037_v34 = vsel %vm5034_vm12, %v5036_v16, %v5032_v60  ;;  %vm5045_vm13 = vweird.f32 %v5999_v51  ;;  %v4477_v43 = vpop.f32.mrf.mxu0 }
 0x66a   : > { %5265 = vst [vmem:[%s7179_s4] sm:$0xff] %v5249_v38  ;;  %v5250_v27 = vmul.f32 %v5037_v34, %v10768_v40  ;;  %v5041_v39 = vsub.f32 1.0, %v5040_v50  ;;  %v4914_v46 = vadd.f32 %v4876_v11, %v4736_v12  ;;  %v4737_v40 = vadd.f32 %v4701_v55, %v4540_v47  ;;  %v6001_v24 = vpop.eup %6000  ;;  %vm5046_vm15 = vmor %vm5044_vm14, %vm5045_vm13  ;;  %v4879_v41 = vpop.f32.mrf.mxu3 }
 0x66b   : > { %v6003_v54 = vpop.eup %6002  ;;  %v5055_v22 = vmul.f32 %v6001_v24, %v4996_v61  ;;  %vm5060_vm1 = vweird.f32 %v6001_v24  ;;  %v4542_v42 = vpop.f32.mrf.mxu1 }
 0x66c   : > { %5266 = vst [vmem:[%s7179_s4 + $0x8] sm:$0xff] %v5250_v27  ;;  %v5042_v45 = vmul.f32 %v5999_v51, %v5041_v39  ;;  %v10797_v10 = vadd.f32 %v10757_v48, %v4914_v46  ;;  %v4915_v31 = vadd.f32 %v4879_v41, %v4737_v40  ;;  %v4997_v56 = vadd.f32 1.0, %v6003_v54  ;;  %v4704_v52 = vpop.f32.mrf.mxu2  ;;  %vm5061_vm3 = vmor %vm5059_vm2, %vm5060_vm1 }
 0x66d   : > { %v5056_v59 = vsub.f32 1.0, %v5055_v22  ;;  %v4543_v3 = vadd.f32 %v4542_v42, %v4477_v43 }
 0x66e   : > { %v5043_v26 = vadd.f32 %v5999_v51, %v5042_v45  ;;  %v4950_v7 = vsub.f32 0.0, %v10797_v10  ;;  %v10803_v53 = vadd.f32 %v10757_v48, %v4915_v31  ;;  %6004 = vrcp.f32 %v4997_v56 }
 0x66f   : > { %v5057_v2 = vmul.f32 %v6001_v24, %v5056_v59  ;;  %v4738_v20 = vadd.f32 %v4704_v52, %v4543_v3  ;;  %v5078_v16 = vand.u32 2147483647, %v4997_v56  ;;  %v5080_v61 = vand.u32 2147483648, %v4997_v56 }
 0x670   : > { %v5047_v8 = vsel %vm5046_vm15, %v5999_v51, %v5043_v26  ;;  %v4971_v18 = vmul.f32 1.442695, %v4950_v7  ;;  %v4951_v30 = vsub.f32 0.0, %v10803_v53  ;;  %vm5074_vm6 = vweird.f32 %v4997_v56 }
 0x671   : > { %v5052_v6 = vsel %vm5049_vm0, %v5051_v28, %v5047_v8  ;;  %v5058_v5 = vadd.f32 %v6001_v24, %v5057_v2  ;;  %v4480_v35 = vpop.f32.mrf.mxu0  ;;  %v5081_v46 = vor.u32 1.1754944e-38, %v5080_v61  ;;  %vm5079_vm8 = vcmp.eq.f32.partialorder %v5078_v16, 8.507059e+37 }
 0x672   : > { %v5251_v21 = vmul.f32 %v5052_v6, %v10774_v9  ;;  %6006 = vpow2.f32 %v4971_v18  ;;  %v4973_v9 = vmul.f32 1.442695, %v4951_v30  ;;  %v4882_v49 = vpop.f32.mrf.mxu3 }
 0x673   : > { %v5062_v29 = vsel %vm5061_vm3, %v6001_v24, %v5058_v5  ;;  %v4916_v63 = vadd.f32 %v4882_v49, %v4738_v20  ;;  %v4545_v4 = vpop.f32.mrf.mxu1 }
 0x674   : > { %5267 = vst [vmem:[%s7179_s4 + $0x10] sm:$0xff] %v5251_v21  ;;  %6008 = vpow2.f32 %v4973_v9  ;;  %v6005_v0 = vpop.eup %6004  ;;  %v5067_v23 = vsel %vm5064_vm4, %v5066_v33, %v5062_v29  ;;  %v4546_v51 = vadd.f32 %v4545_v4, %v4480_v35  ;;  %v4707_v12 = vpop.f32.mrf.mxu2 }
 0x675   : > { %v5252_v38 = vmul.f32 %v5067_v23, %v10778_v13  ;;  %v5070_v37 = vmul.f32 %v6005_v0, %v4997_v56  ;;  %v10810_v57 = vadd.f32 %v10757_v48, %v4916_v63  ;;  %vm5075_vm5 = vweird.f32 %v6005_v0 }
 0x676   : > { %v4739_v19 = vadd.f32 %v4707_v12, %v4546_v51  ;;  %vm5076_vm7 = vmor %vm5074_vm6, %vm5075_vm5 }
 0x677   : > { %5268 = vst [vmem:[%s7179_s4 + $0x18] sm:$0xff] %v5252_v38  ;;  %v5071_v25 = vsub.f32 1.0, %v5070_v37  ;;  %v4952_v11 = vsub.f32 0.0, %v10810_v57 }
 0x678   : > { %v6007_v44 = vpop.eup %6006 }
 0x679   : > { %v4998_v15 = vadd.f32 1.0, %v6007_v44  ;;  %v5072_v50 = vmul.f32 %v6005_v0, %v5071_v25  ;;  %v4975_v13 = vmul.f32 1.442695, %v4952_v11  ;;  %v4483_v47 = vpop.f32.mrf.mxu0 }
 0x67a   : > { %v6009_v60 = vpop.eup %6008  ;;  %v4885_v27 = vpop.f32.mrf.mxu3 }
 0x67b   : > { %6010 = vrcp.f32 %v4998_v15  ;;  %v10814_v34 = vadd.f32 1.0, %v6009_v60  ;;  %v5073_v39 = vadd.f32 %v6005_v0, %v5072_v50  ;;  %v4917_v1 = vadd.f32 %v4885_v27, %v4739_v19  ;;  %v4548_v55 = vpop.f32.mrf.mxu1 }
 0x67c   : > { %6012 = vpow2.f32 %v4975_v13  ;;  %v4549_v28 = vadd.f32 %v4548_v55, %v4483_v47  ;;  %v4710_v7 = vpop.f32.mrf.mxu2  ;;  %v5093_v8 = vand.u32 2147483647, %v4998_v15  ;;  %v5095_v6 = vand.u32 2147483648, %v4998_v15 }
 0x67d   : > { %6014 = vrcp.f32 %v10814_v34  ;;  %v5077_v36 = vsel %vm5076_vm7, %v6005_v0, %v5073_v39  ;;  %v10818_v14 = vadd.f32 %v10757_v48, %v4917_v1  ;;  %vm5089_vm10 = vweird.f32 %v4998_v15 }
 0x67e   : > { %v5082_v62 = vsel %vm5079_vm8, %v5081_v46, %v5077_v36  ;;  %v4740_v18 = vadd.f32 %v4710_v7, %v4549_v28  ;;  %vm5094_vm11 = vcmp.eq.f32.partialorder %v5093_v8, 8.507059e+37  ;;  %v5096_v42 = vor.u32 1.1754944e-38, %v5095_v6 }
 0x67f   : > { %v5253_v26 = vmul.f32 %v5082_v62, %v10786_v17  ;;  %v4953_v24 = vsub.f32 0.0, %v10818_v14  ;;  %v5108_v2 = vand.u32 2147483647, %v10814_v34  ;;  %v5110_v30 = vand.u32 2147483648, %v10814_v34 }
 0x680   : > { %vm5104_vm14 = vweird.f32 %v10814_v34 }
 0x681   : > { %v6011_v45 = vpop.eup %6010  ;;  %5269 = vst [vmem:[%s7179_s4 + $0x20] sm:$0xff] %v5253_v26  ;;  %v4977_v22 = vmul.f32 1.442695, %v4953_v24  ;;  %v4486_v3 = vpop.f32.mrf.mxu0  ;;  %v5111_v37 = vor.u32 1.1754944e-38, %v5110_v30  ;;  %vm5109_vm0 = vcmp.eq.f32.partialorder %v5108_v2, 8.507059e+37 }
 0x682   : > { %v5085_v40 = vmul.f32 %v6011_v45, %v4998_v15  ;;  %v6013_v41 = vpop.eup %6012  ;;  %v4888_v21 = vpop.f32.mrf.mxu3  ;;  %vm5090_vm9 = vweird.f32 %v6011_v45 }
 0x683   : > { %v6015_v31 = vpop.eup %6014  ;;  %v10823_v56 = vadd.f32 1.0, %v6013_v41  ;;  %6016 = vpow2.f32 %v4977_v22  ;;  %v4918_v43 = vadd.f32 %v4888_v21, %v4740_v18  ;;  %vm5091_vm12 = vmor %vm5089_vm10, %vm5090_vm9  ;;  %v4551_v52 = vpop.f32.mrf.mxu1 }
 0x684   : > { %v5086_v54 = vsub.f32 1.0, %v5085_v40  ;;  %v5100_v17 = vmul.f32 %v6015_v31, %v10814_v34  ;;  %vm5105_vm13 = vweird.f32 %v6015_v31  ;;  %v4552_v33 = vadd.f32 %v4551_v52, %v4486_v3  ;;  %v4713_v29 = vpop.f32.mrf.mxu2 }
 0x685   : > { %6018 = vrcp.f32 %v10823_v56  ;;  %v10830_v20 = vadd.f32 %v10757_v48, %v4918_v43  ;;  %vm5106_vm15 = vmor %vm5104_vm14, %vm5105_vm13  ;;  %v5125_v12 = vand.u32 2147483648, %v10823_v56  ;;  %v5123_v34 = vand.u32 2147483647, %v10823_v56 }
 0x686   : > { %v5087_v59 = vmul.f32 %v6011_v45, %v5086_v54  ;;  %v5101_v58 = vsub.f32 1.0, %v5100_v17  ;;  %v4741_v35 = vadd.f32 %v4713_v29, %v4552_v33  ;;  %vm5119_vm2 = vweird.f32 %v10823_v56 }
 0x687   : > { %v4954_v44 = vsub.f32 0.0, %v10830_v20  ;;  %vm5124_vm4 = vcmp.eq.f32.partialorder %v5123_v34, 8.507059e+37 }
 0x688   : > { %v5088_v32 = vadd.f32 %v6011_v45, %v5087_v59  ;;  %v5102_v9 = vmul.f32 %v6015_v31, %v5101_v58 }
 0x689   : > { %v6017_v63 = vpop.eup %6016  ;;  %v4979_v51 = vmul.f32 1.442695, %v4954_v44  ;;  %v4489_v50 = vpop.f32.mrf.mxu0 }
 0x68a   : > { %v5092_v5 = vsel %vm5091_vm12, %v6011_v45, %v5088_v32  ;;  %v5103_v23 = vadd.f32 %v6015_v31, %v5102_v9  ;;  %v5001_v15 = vadd.f32 1.0, %v6017_v63  ;;  %v4891_v4 = vpop.f32.mrf.mxu3  ;;  %v5126_v45 = vor.u32 1.1754944e-38, %v5125_v12 }
 0x68b   : > { %v5097_v49 = vsel %vm5094_vm11, %v5096_v42, %v5092_v5  ;;  %v6019_v38 = vpop.eup %6018  ;;  %v4919_v60 = vadd.f32 %v4891_v4, %v4741_v35  ;;  %v4554_v13 = vpop.f32.mrf.mxu1 }
 0x68c   : > { %v5254_v0 = vmul.f32 %v5097_v49, %v10797_v10  ;;  %v5107_v25 = vsel %vm5106_vm15, %v6015_v31, %v5103_v23  ;;  %v5115_v11 = vmul.f32 %v6019_v38, %v10823_v56  ;;  %6020 = vrcp.f32 %v5001_v15  ;;  %v4716_v1 = vpop.f32.mrf.mxu2 }
 0x68d   : > { %v5112_v10 = vsel %vm5109_vm0, %v5111_v37, %v5107_v25  ;;  %6022 = vpow2.f32 %v4979_v51  ;;  %vm5120_vm1 = vweird.f32 %v6019_v38  ;;  %v4555_v27 = vadd.f32 %v4554_v13, %v4489_v50 }
 0x68e   : > { %5270 = vst [vmem:[%s7179_s4 + $0x28] sm:$0xff] %v5254_v0  ;;  %v5255_v16 = vmul.f32 %v5112_v10, %v10803_v53  ;;  %v5116_v61 = vsub.f32 1.0, %v5115_v11  ;;  %v10843_v39 = vadd.f32 %v10757_v48, %v4919_v60  ;;  %vm5121_vm3 = vmor %vm5119_vm2, %vm5120_vm1  ;;  %v5138_v31 = vand.u32 2147483647, %v5001_v15 }
 0x68f   : > { %v4742_v53 = vadd.f32 %v4716_v1, %v4555_v27  ;;  %v5140_v6 = vand.u32 2147483648, %v5001_v15  ;;  %vm5134_vm6 = vweird.f32 %v5001_v15 }
 0x690   : > { %5271 = vst [vmem:[%s7179_s4 + $0x30] sm:$0xff] %v5255_v16  ;;  %v5117_v19 = vmul.f32 %v6019_v38, %v5116_v61  ;;  %v4955_v62 = vsub.f32 0.0, %v10843_v39  ;;  %vm5139_vm8 = vcmp.eq.f32.partialorder %v5138_v31, 8.507059e+37 }
 0x691   : > { %v4492_v56 = vpop.f32.mrf.mxu0  ;;  %v5141_v43 = vor.u32 1.1754944e-38, %v5140_v6 }
 0x692   : > { %v5118_v46 = vadd.f32 %v6019_v38, %v5117_v19  ;;  %v6021_v36 = vpop.eup %6020  ;;  %v4894_v47 = vpop.f32.mrf.mxu3  ;;  %v4981_v41 = vmul.f32 1.442695, %v4955_v62 }
 0x693   : > { %v6023_v55 = vpop.eup %6022  ;;  %v5130_v40 = vmul.f32 %v6021_v36, %v5001_v15  ;;  %v4920_v24 = vadd.f32 %v4894_v47, %v4742_v53  ;;  %vm5135_vm5 = vweird.f32 %v6021_v36  ;;  %v4557_v18 = vpop.f32.mrf.mxu1 }
 0x694   : > { %v5122_v26 = vsel %vm5121_vm3, %v6019_v38, %v5118_v46  ;;  %v5002_v7 = vadd.f32 1.0, %v6023_v55  ;;  %v4558_v17 = vadd.f32 %v4557_v18, %v4492_v56  ;;  %v4719_v32 = vpop.f32.mrf.mxu2  ;;  %vm5136_vm7 = vmor %vm5134_vm6, %vm5135_vm5 }
 0x695   : > { %v5127_v28 = vsel %vm5124_vm4, %v5126_v45, %v5122_v26  ;;  %v5131_v8 = vsub.f32 1.0, %v5130_v40  ;;  %v10849_v22 = vadd.f32 %v10757_v48, %v4920_v24 }
 0x696   : > { %v5256_v54 = vmul.f32 %v5127_v28, %v10810_v57  ;;  %6024 = vrcp.f32 %v5002_v7  ;;  %v4743_v2 = vadd.f32 %v4719_v32, %v4558_v17  ;;  %v5153_v44 = vand.u32 2147483647, %v5002_v7 }
 0x697   : > { %v5132_v21 = vmul.f32 %v6021_v36, %v5131_v8  ;;  %6026 = vpow2.f32 %v4981_v41  ;;  %v4956_v59 = vsub.f32 0.0, %v10849_v22  ;;  %v5155_v38 = vand.u32 2147483648, %v5002_v7 }
 0x698   : > { %5272 = vst [vmem:[%s7179_s4 + $0x38] sm:$0xff] %v5256_v54  ;;  %vm5149_vm10 = vweird.f32 %v5002_v7  ;;  %vm5154_vm12 = vcmp.eq.f32.partialorder %v5153_v44, 8.507059e+37 }
 0x699   : > { %v5133_v58 = vadd.f32 %v6021_v36, %v5132_v21  ;;  %v4983_v57 = vmul.f32 1.442695, %v4956_v59  ;;  %v4495_v29 = vpop.f32.mrf.mxu0  ;;  %v5156_v10 = vor.u32 1.1754944e-38, %v5155_v38 }
 0x69b   : > { %v5137_v42 = vsel %vm5136_vm7, %v6021_v36, %v5133_v58  ;;  %6028 = vpow2.f32 %v4983_v57  ;;  %v4560_v23 = vpop.f32.mrf.mxu1 }
 0x69c   : > { %v6025_v30 = vpop.eup %6024  ;;  %v5142_v3 = vsel %vm5139_vm8, %v5141_v43, %v5137_v42  ;;  %v4561_v4 = vadd.f32 %v4560_v23, %v4495_v29  ;;  %v4722_v25 = vpop.f32.mrf.mxu2 }
 0x69d   : > { %v6027_v52 = vpop.eup %6026  ;;  %v5257_v5 = vmul.f32 %v5142_v3, %v10818_v14  ;;  %v5145_v9 = vmul.f32 %v6025_v30, %v5002_v7  ;;  %vm5150_vm9 = vweird.f32 %v6025_v30 }
 0x69e   : > { %v5003_v33 = vadd.f32 1.0, %v6027_v52  ;;  %vm5151_vm11 = vmor %vm5149_vm10, %vm5150_vm9  ;;  %v4744_v16 = vadd.f32 %v4722_v25, %v4561_v4 }
 0x69f   : > { %5273 = vst [vmem:[%s7179_s4 + $0x40] sm:$0xff] %v5257_v5  ;;  %v5146_v63 = vsub.f32 1.0, %v5145_v9 }
 0x6a0   : > { %6030 = vrcp.f32 %v5003_v33  ;;  %v5168_v46 = vand.u32 2147483647, %v5003_v33  ;;  %v5170_v36 = vand.u32 2147483648, %v5003_v33  ;;  %vm5164_vm14 = vweird.f32 %v5003_v33 }
 0x6a1   : > { %v6029_v37 = vpop.eup %6028  ;;  %v5147_v15 = vmul.f32 %v6025_v30, %v5146_v63 }
 0x6a2   : > { %v5004_v14 = vadd.f32 1.0, %v6029_v37  ;;  %vm5169_vm15 = vcmp.eq.f32.partialorder %v5168_v46, 8.507059e+37  ;;  %v5171_v24 = vor.u32 1.1754944e-38, %v5170_v36 }
 0x6a3   : > { %v5148_v11 = vadd.f32 %v6025_v30, %v5147_v15 }
 0x6a4   : > { %6032 = vrcp.f32 %v5004_v14  ;;  %v5185_v28 = vand.u32 2147483648, %v5004_v14  ;;  %v5183_v31 = vand.u32 2147483647, %v5004_v14  ;;  %vm5179_vm2 = vweird.f32 %v5004_v14  ;;  %v4725_v23 = vpop.f32.mrf.mxu2 }
 0x6a5   : > { %v5152_v61 = vsel %vm5151_vm11, %v6025_v30, %v5148_v11 }
 0x6a6   : > { %v4897_v49 = vpop.f32.mrf.mxu3  ;;  %v6031_v60 = vpop.eup %6030  ;;  %v5157_v50 = vsel %vm5154_vm12, %v5156_v10, %v5152_v61  ;;  %v5186_v21 = vor.u32 1.1754944e-38, %v5185_v28  ;;  %vm5184_vm4 = vcmp.eq.f32.partialorder %v5183_v31, 8.507059e+37 }
 0x6a7   : > { %v4921_v0 = vadd.f32 %v4897_v49, %v4743_v2  ;;  %v5258_v19 = vmul.f32 %v5157_v50, %v10830_v20  ;;  %v5160_v34 = vmul.f32 %v6031_v60, %v5003_v33  ;;  %vm5165_vm13 = vweird.f32 %v6031_v60  ;;  %v4563_v33 = vpop.f32.mrf.mxu1 }
 0x6a8   : > { %vm5166_vm0 = vmor %vm5164_vm14, %vm5165_vm13 }
 0x6a9   : > { %v10857_v35 = vadd.f32 %v10757_v48, %v4921_v0  ;;  %5274 = vst [vmem:[%s7179_s4 + $0x48] sm:$0xff] %v5258_v19  ;;  %v5161_v1 = vsub.f32 1.0, %v5160_v34 }
 0x6aa   : > { %v6033_v53 = vpop.eup %6032 }
 0x6ab   : > { %v4957_v51 = vsub.f32 0.0, %v10857_v35  ;;  %v5162_v62 = vmul.f32 %v6031_v60, %v5161_v1  ;;  %v5175_v47 = vmul.f32 %v6033_v53, %v5004_v14  ;;  %vm5180_vm1 = vweird.f32 %v6033_v53 }
 0x6ac   : > { %vm5181_vm3 = vmor %vm5179_vm2, %vm5180_vm1 }
 0x6ad   : > { %v4985_v12 = vmul.f32 1.442695, %v4957_v51  ;;  %v5163_v40 = vadd.f32 %v6031_v60, %v5162_v62  ;;  %v5176_v20 = vsub.f32 1.0, %v5175_v47 }
 0x6ae   : > { %v4900_v13 = vpop.f32.mrf.mxu3 }
 0x6af   : > { %6034 = vpow2.f32 %v4985_v12  ;;  %v4922_v27 = vadd.f32 %v4900_v13, %v4744_v16  ;;  %v5167_v54 = vsel %vm5166_vm0, %v6031_v60, %v5163_v40  ;;  %v5177_v8 = vmul.f32 %v6033_v53, %v5176_v20  ;;  %v4566_v10 = vpop.f32.mrf.mxu1 }
 0x6b0   : > { %v5172_v6 = vsel %vm5169_vm15, %v5171_v24, %v5167_v54 }
 0x6b1   : > { %v10863_v45 = vadd.f32 %v10757_v48, %v4922_v27  ;;  %v5259_v56 = vmul.f32 %v5172_v6, %v10843_v39  ;;  %v5178_v18 = vadd.f32 %v6033_v53, %v5177_v8 }
 0x6b3   : > { %v4958_v55 = vsub.f32 0.0, %v10863_v45  ;;  %5275 = vst [vmem:[%s7179_s4 + $0x50] sm:$0xff] %v5259_v56  ;;  %v5182_v59 = vsel %vm5181_vm3, %v6033_v53, %v5178_v18 }
 0x6b4   : > { %v5187_v17 = vsel %vm5184_vm4, %v5186_v21, %v5182_v59 }
 0x6b5   : > { %v6035_v26 = vpop.eup %6034  ;;  %v4987_v41 = vmul.f32 1.442695, %v4958_v55  ;;  %v5260_v32 = vmul.f32 %v5187_v17, %v10849_v22 }
 0x6b6   : > { %v5005_v7 = vadd.f32 1.0, %v6035_v26 }
 0x6b7   : > { %5276 = vst [vmem:[%s7179_s4 + $0x58] sm:$0xff] %v5260_v32 }
 0x6b8   : > { %6036 = vrcp.f32 %v5005_v7  ;;  %v5200_v30 = vand.u32 2147483648, %v5005_v7  ;;  %v5198_v3 = vand.u32 2147483647, %v5005_v7  ;;  %vm5194_vm6 = vweird.f32 %v5005_v7 }
 0x6b9   : > { %6038 = vpow2.f32 %v4987_v41  ;;  %v4498_v9 = vpop.f32.mrf.mxu0 }
 0x6ba   : > { %v5201_v5 = vor.u32 1.1754944e-38, %v5200_v30  ;;  %vm5199_vm8 = vcmp.eq.f32.partialorder %v5198_v3, 8.507059e+37  ;;  %v4564_v38 = vadd.f32 %v4563_v33, %v4498_v9 }
 0x6bc   : > { %v4745_v14 = vadd.f32 %v4725_v23, %v4564_v38 }
 0x6be   : > { %v6037_v58 = vpop.eup %6036 }
 0x6bf   : > { %v6039_v57 = vpop.eup %6038  ;;  %v5190_v43 = vmul.f32 %v6037_v58, %v5005_v7  ;;  %vm5195_vm5 = vweird.f32 %v6037_v58 }
 0x6c0   : > { %v5006_v42 = vadd.f32 1.0, %v6039_v57  ;;  %vm5196_vm7 = vmor %vm5194_vm6, %vm5195_vm5 }
 0x6c1   : > { %v5191_v2 = vsub.f32 1.0, %v5190_v43  ;;  %v4501_v51 = vpop.f32.mrf.mxu0 }
 0x6c2   : > { %6040 = vrcp.f32 %v5006_v42  ;;  %v5215_v37 = vand.u32 2147483648, %v5006_v42  ;;  %v5213_v4 = vand.u32 2147483647, %v5006_v42  ;;  %vm5209_vm10 = vweird.f32 %v5006_v42  ;;  %v4728_v13 = vpop.f32.mrf.mxu2 }
 0x6c3   : > { %v5192_v39 = vmul.f32 %v6037_v58, %v5191_v2  ;;  %v4567_v50 = vadd.f32 %v4566_v10, %v4501_v51 }
 0x6c4   : > { %v5216_v11 = vor.u32 1.1754944e-38, %v5215_v37  ;;  %vm5214_vm12 = vcmp.eq.f32.partialorder %v5213_v4, 8.507059e+37 }
 0x6c5   : > { %v5193_v52 = vadd.f32 %v6037_v58, %v5192_v39  ;;  %v4746_v27 = vadd.f32 %v4728_v13, %v4567_v50 }
 0x6c7   : > { %v5197_v49 = vsel %vm5196_vm7, %v6037_v58, %v5193_v52 }
 0x6c8   : > { %v6041_v22 = vpop.eup %6040  ;;  %v5202_v29 = vsel %vm5199_vm8, %v5201_v5, %v5197_v49 }
 0x6c9   : > { %v5261_v63 = vmul.f32 %v5202_v29, %v10857_v35  ;;  %v5205_v0 = vmul.f32 %v6041_v22, %v5006_v42  ;;  %vm5210_vm9 = vweird.f32 %v6041_v22 }
 0x6ca   : > { %vm5211_vm11 = vmor %vm5209_vm10, %vm5210_vm9 }
 0x6cb   : > { %5277 = vst [vmem:[%s7179_s4 + $0x60] sm:$0xff] %v5261_v63  ;;  %v5206_v44 = vsub.f32 1.0, %v5205_v0 }
 0x6cd   : > { %v5207_v15 = vmul.f32 %v6041_v22, %v5206_v44 }
 0x6cf   : > { %v5208_v25 = vadd.f32 %v6041_v22, %v5207_v15 }
 0x6d1   : > { %v5212_v16 = vsel %vm5211_vm11, %v6041_v22, %v5208_v25 }
 0x6d2   : > { %v5217_v35 = vsel %vm5214_vm12, %v5216_v11, %v5212_v16 }
 0x6d3   : > { %v4903_v61 = vpop.f32.mrf.mxu3  ;;  %v5262_v12 = vmul.f32 %v5217_v35, %v10863_v45 }
 0x6d4   : > { %v4923_v60 = vadd.f32 %v4903_v61, %v4745_v14 }
 0x6d5   : > { %5278 = vst [vmem:[%s7179_s4 + $0x68] sm:$0xff] %v5262_v12 }
 0x6d6   : > { %v4943_v19 = vadd.f32 %v10757_v48, %v4923_v60 }
 0x6d8   : > { %v4959_v34 = vsub.f32 0.0, %v4943_v19 }
 0x6da   : > { %v4989_v1 = vmul.f32 1.442695, %v4959_v34 }
 0x6db   : > { %v4906_v46 = vpop.f32.mrf.mxu3 }
 0x6dc   : > { %6042 = vpow2.f32 %v4989_v1  ;;  %v4924_v53 = vadd.f32 %v4906_v46, %v4746_v27 }
 0x6de   : > { %v4944_v36 = vadd.f32 %v10757_v48, %v4924_v53 }
 0x6e0   : > { %v4960_v62 = vsub.f32 0.0, %v4944_v36 }
 0x6e2   : > { %v6043_v47 = vpop.eup %6042  ;;  %v4991_v55 = vmul.f32 1.442695, %v4960_v62 }
 0x6e3   : > { %v5007_v45 = vadd.f32 1.0, %v6043_v47 }
 0x6e4   : > { %6044 = vpow2.f32 %v4991_v55 }
 0x6e5   : > { %6046 = vrcp.f32 %v5007_v45  ;;  %v5230_v7 = vand.u32 2147483648, %v5007_v45  ;;  %v5228_v54 = vand.u32 2147483647, %v5007_v45  ;;  %vm5224_vm14 = vweird.f32 %v5007_v45 }
 0x6e7   : > { %v5231_v31 = vor.u32 1.1754944e-38, %v5230_v7  ;;  %vm5229_vm0 = vcmp.eq.f32.partialorder %v5228_v54, 8.507059e+37 }
 0x6ea   : > { %v6045_v26 = vpop.eup %6044 }
 0x6eb   : > { %v6047_v40 = vpop.eup %6046  ;;  %v5008_v20 = vadd.f32 1.0, %v6045_v26 }
 0x6ec   : > { %v5220_v24 = vmul.f32 %v6047_v40, %v5007_v45  ;;  %vm5225_vm13 = vweird.f32 %v6047_v40 }
 0x6ed   : > { %6048 = vrcp.f32 %v5008_v20  ;;  %vm5226_vm15 = vmor %vm5224_vm14, %vm5225_vm13  ;;  %v5245_v17 = vand.u32 2147483648, %v5008_v20  ;;  %v5243_v58 = vand.u32 2147483647, %v5008_v20  ;;  %vm5239_vm2 = vweird.f32 %v5008_v20 }
 0x6ee   : > { %v5221_v28 = vsub.f32 1.0, %v5220_v24 }
 0x6ef   : > { %v5246_v43 = vor.u32 1.1754944e-38, %v5245_v17  ;;  %vm5244_vm4 = vcmp.eq.f32.partialorder %v5243_v58, 8.507059e+37 }
 0x6f0   : > { %v5222_v41 = vmul.f32 %v6047_v40, %v5221_v28 }
 0x6f2   : > { %v5223_v48 = vadd.f32 %v6047_v40, %v5222_v41 }
 0x6f3   : > { %v6049_v8 = vpop.eup %6048 }
 0x6f4   : > { %v5227_v6 = vsel %vm5226_vm15, %v6047_v40, %v5223_v48  ;;  %v5235_v56 = vmul.f32 %v6049_v8, %v5008_v20  ;;  %vm5240_vm1 = vweird.f32 %v6049_v8 }
 0x6f5   : > { %v5232_v18 = vsel %vm5229_vm0, %v5231_v31, %v5227_v6  ;;  %vm5241_vm3 = vmor %vm5239_vm2, %vm5240_vm1 }
 0x6f6   : > { %v5263_v21 = vmul.f32 %v5232_v18, %v4943_v19  ;;  %v5236_v59 = vsub.f32 1.0, %v5235_v56 }
 0x6f8   : > { %5279 = vst [vmem:[%s7179_s4 + $0x70] sm:$0xff] %v5263_v21  ;;  %v5237_v32 = vmul.f32 %v6049_v8, %v5236_v59 }
 0x6fa   : > { %v5238_v57 = vadd.f32 %v6049_v8, %v5237_v32 }
 0x6fc   : > { %v5242_v42 = vsel %vm5241_vm3, %v6049_v8, %v5238_v57 }
 0x6fd   : > { %v5247_v2 = vsel %vm5244_vm4, %v5246_v43, %v5242_v42 }
 0x6fe   : > { %v5264_v30 = vmul.f32 %v5247_v2, %v4944_v36 }
 0x700   : > { %5280 = vst [vmem:[%s7179_s4 + $0x78] sm:$0xff] %v5264_v30 }
 0x701   : > { %6249 = shalt.err (!%p6246_p6)
}
 0x702   : > { %s6393_s0 = smov 128   ;;  %s6394_s4 = smov 8  }
 0x703   : > { %5674 = dma.vmem_to_hbm [thread:$0]  (%p6638_p5), %s5298_s20, 2048, %s5300_s1, %s5282_s21, %s6393_s0, %s6393_s0, %s6394_s4  }
 0x704 PF: > { %p5702_p3 = scmp.ge.s32.totalorder %s6384_s14, 2  ;;  %s5314_s7 = sand.u32 1, %s6356_s30  }
 0x705   : > { %p12224_p9 = scmp.ne.s32.totalorder %s11395_s23, 0  ;;  %s5315_s27 = scalar_lea.sflag [#allocation5], %s5314_s7 }
 0x707   : > { %p5694_p13 = pnand %p5702_p3, %p12224_p9 }
 0x709   : > { %p5695_p11 = pneg %p5694_p13 }
 0x70b   : > { %6323 = dma.done.wait (%p5695_p11), %s5315_s27, 2048  }
 0x70c   : > { %6325 = vsyncadd (%p5695_p11), %s5315_s27, 4294965248  ;;  %s27_s14 = sadd.s32 1, %s6384_s14   ;;  %s12226_s27 = sld [smem:[#allocation18_spill]] }
 0x70d   : > { %p10900_p2 = scmp.ge.s32.totalorder %s27_s14, 6   ;;  %s12227_s28 = sld [smem:[#allocation19_spill]] }
 0x70e   : > { %s12228_s29 = sld [smem:[#allocation27_spill]]  ;;  %s12234_s24 = smov %s6336_s25 }
 0x70f   : > { %s12229_s22 = sld [smem:[#allocation20_spill]]  ;;  %s12235_s25 = smov %s6340_s26 }
 0x710   : > { %s12230_s9 = sld [smem:[#allocation28_spill]]  ;;  %s12236_s26 = smov %s6677_s10 }
 0x711   : > { %s12231_s23 = sld [smem:[#allocation23_spill]]  ;;  %s12237_s30 = smov %s6360_s8 }
 0x712   : > { %s12232_s12 = sld [smem:[#allocation25_spill]]  ;;  %s12240_s11 = smov %s6380_s13 }
 0x713   : > { %s12233_s17 = sld [smem:[#allocation26_spill]] }
 0x715   : > { %s12238_s8 = smov %s12229_s22  ;;  %26 = sbr.rel (!%p10900_p2) target bundleno = 22 (0x16), region = 148 }
 0x717   : > { %s12239_s10 = smov %s12231_s23 }
 0x719   : > { %s12241_s13 = smov %s12233_s17 }
 0x71a   :  { %5321 = vsyncpa [#allocation4], 1 }
 0x71b   :  { %5323 = vsyncpa [#allocation4 + $0x1], 1 }
 0x71c   :  { %5324 = vsyncpa [#allocation7], 1 }
 0x71d   :  { %5326 = vsyncpa [#allocation7 + $0x1], 1 }
 0x71e   :  { %5327 = vsyncpa [#allocation10], 1 }
 0x71f   :  { %5328 = vsyncpa [#allocation5], 1 }
 0x720   :  { %5330 = vsyncpa [#allocation5 + $0x1], 1 }

</bundles_post_ra>
